<compile_context>
chip_gen: v7x
topology: tpu7x:2x2x1
jax: 0.10.0
libtpu: 0.0.40
codegen_flags: <defaults>
</compile_context>

<pallas_src>
import jax
import jax.numpy as jnp
from jax.experimental import pallas as pl
from jax.experimental.pallas import tpu as pltpu


# ------------------------------ Pallas kernels ------------------------------ #
def _mm_kernel(a_ref, b_ref, o_ref):
    o_ref[...] = jnp.dot(a_ref[...], b_ref[...],
                         preferred_element_type=jnp.float32)


def _mm_bn_relu_kernel(a_ref, b_ref, g_ref, be_ref, o_ref):
    # Full M (real rows only) and full K live in this block, so per-block
    # batch statistics over axis 0 are the exact BatchNorm statistics.
    y = jnp.dot(a_ref[...], b_ref[...], preferred_element_type=jnp.float32)
    mean = jnp.mean(y, axis=0, keepdims=True)
    xc = y - mean
    var = jnp.mean(xc * xc, axis=0, keepdims=True)       # biased variance
    z = xc * jax.lax.rsqrt(var + 1e-5) * g_ref[...] + be_ref[...]
    o_ref[...] = jnp.maximum(z, 0.0).astype(o_ref.dtype)


def _mm_sigmoid_kernel(a_ref, b_ref, o_ref):
    y = jnp.dot(a_ref[...], b_ref[...], preferred_element_type=jnp.float32)
    o_ref[...] = 1.0 / (1.0 + jnp.exp(-y))                # exact sigmoid


def _bn_relu_kernel(x_ref, g_ref, b_ref, o_ref):
    x = x_ref[...]                                        # (rows, C) f32
    mean = jnp.mean(x, axis=0, keepdims=True)             # stats over N*H*W
    xc = x - mean
    var = jnp.mean(xc * xc, axis=0, keepdims=True)        # biased variance
    y = xc * jax.lax.rsqrt(var + 1e-5) * g_ref[...] + b_ref[...]
    o_ref[...] = jnp.maximum(y, 0.0).astype(o_ref.dtype)


# ------------------------------ kernel wrappers ------------------------------ #
def _grid_spec(M, K, N, tn, extra_in_specs=()):
    return pltpu.PrefetchScalarGridSpec(
        num_scalar_prefetch=0,
        grid=(N // tn,),
        in_specs=[pl.BlockSpec((M, K), lambda j: (0, 0)),   # resident LHS
                  pl.BlockSpec((K, tn), lambda j: (0, j))]
                 + list(extra_in_specs),
        out_specs=pl.BlockSpec((M, tn), lambda j: (0, j)))


_PARALLEL = pltpu.CompilerParams(dimension_semantics=("parallel",))


def matmul(a, b, *, tn):
    """A(M,K) @ B(K,N) -> f32 (M,N).  Full M/K per block, grid over N blocks."""
    M, K = a.shape
    K2, N = b.shape
    assert K == K2 and N % tn == 0
    return pl.pallas_call(
        _mm_kernel,
        out_shape=jax.ShapeDtypeStruct((M, N), jnp.float32),
        grid_spec=_grid_spec(M, K, N, tn),
        compiler_params=_PARALLEL,
    )(a, b)


def matmul_bn_relu(a, b, gamma, beta, *, tn):
    """Fused matmul + BatchNorm(train) + ReLU epilogue.  Output bf16."""
    M, K = a.shape
    _, N = b.shape
    assert N % tn == 0
    extra = (pl.BlockSpec((1, tn), lambda j: (0, j)),
             pl.BlockSpec((1, tn), lambda j: (0, j)))
    return pl.pallas_call(
        _mm_bn_relu_kernel,
        out_shape=jax.ShapeDtypeStruct((M, N), jnp.bfloat16),
        grid_spec=_grid_spec(M, K, N, tn, extra),
        compiler_params=_PARALLEL,
    )(a, b, gamma, beta)


def matmul_sigmoid(a, b):
    """Fused matmul + sigmoid epilogue (single block; output is tiny)."""
    M, K = a.shape
    _, N = b.shape
    return pl.pallas_call(
        _mm_sigmoid_kernel,
        out_shape=jax.ShapeDtypeStruct((M, N), jnp.float32),
        grid_spec=_grid_spec(M, K, N, N),
        compiler_params=_PARALLEL,
    )(a, b)


def bn_relu(x2d, gamma, beta):
    """BatchNorm(train)+ReLU on (pixels, channels); single block -> exact stats."""
    R, C = x2d.shape
    return pl.pallas_call(
        _bn_relu_kernel,
        out_shape=jax.ShapeDtypeStruct((R, C), jnp.bfloat16),
    )(x2d, gamma.reshape(1, C), beta.reshape(1, C))


# ---------------- stride-2 ConvTranspose: sub-pixel decomposition ---------------- #
# ConvT(k=4, s=2, p=1): output pixel (2m+a, 2q+b) only uses 2x2 of the 4x4 taps.
# (phase a, window row r) -> kernel tap kh  (same table for columns).
_PHASE_TAP = {(0, 0): 3, (0, 1): 1, (1, 1): 2, (1, 2): 0}


def prep_convT_s2_weight(w):
    """(Cin, Cout, 4, 4) ConvTranspose2d weight -> (9*Cin, 4*Cout) matrix.

    Rows ordered (r, s, ic); columns ordered (phase_a, phase_b, oc)."""
    cin, cout = w.shape[0], w.shape[1]
    wc = jnp.zeros((3, 3, cin, 2, 2, cout), w.dtype)
    for (a, r), kh in _PHASE_TAP.items():
        for (b, s), kw in _PHASE_TAP.items():
            wc = wc.at[r, s, :, a, b, :].set(w[:, :, kh, kw])
    return wc.reshape(9 * cin, 4 * cout)


def extract_patches_3x3(x_nhwc):
    """3x3 stride-1 im2col of an NHWC map (pad 1). -> (N*H*W, 9*C), (r,s,c) cols."""
    n, h, w, c = x_nhwc.shape
    xp = jnp.pad(x_nhwc, ((0, 0), (1, 1), (1, 1), (0, 0)))
    cols = [xp[:, r:r + h, s:s + w, :] for r in range(3) for s in range(3)]
    p = jnp.stack(cols, axis=3)                     # (N, H, W, 9, C)
    return p.reshape(n * h * w, 9 * c)


def interleave_phases(y, n, h, c):
    """(N*h*h, 4*c) phase-major output -> NHWC (N, 2h, 2h, c)."""
    y = y.reshape(n, h, h, 2, 2, c)
    y = y.transpose(0, 1, 3, 2, 4, 5)
    return y.reshape(n, 2 * h, 2 * h, c)


# ------------------------------ parameter prep ------------------------------ #
def prepare_params(raw):
    """One-time weight reshaping / padding / bf16 cast (reused every forward)."""
    bf = lambda a: a.astype(jnp.bfloat16)
    # L1: ConvT(74->1024, k=1) on 1x1 == matmul; pad K 74->128 once.
    w1 = jnp.pad(raw["w1"].reshape(74, 1024), ((0, 54), (0, 0)))
    # L2: ConvT(1024->128, k=7) on 1x1: columns ordered (spatial, channel) so the
    # matmul output reshapes directly to (N*49, 128) for BN, no transpose.
    w2 = raw["w2"].transpose(0, 2, 3, 1).reshape(1024, 49 * 128)
    # L3/L4: stride-2 ConvT -> phase-decomposed weight matrices.
    w3 = prep_convT_s2_weight(raw["w3"])            # (1152, 256)
    w4 = prep_convT_s2_weight(raw["w4"])            # (576, 4)
    return {
        "w1": bf(w1), "w2": bf(w2), "w3": bf(w3), "w4": bf(w4),
        "g1": raw["g1"].reshape(1, 1024), "b1": raw["b1"].reshape(1, 1024),
        "g2": raw["g2"], "b2": raw["b2"],
        "g3": raw["g3"], "b3": raw["b3"],
    }


# -------------------------------- full forward -------------------------------- #
def generator_forward(x, p):
    n = x.shape[0]

    # L1: ConvT(74->1024, k=1) + BN + ReLU, fused into one kernel.
    h = jnp.pad(x.reshape(n, 74), ((0, 0), (0, 54))).astype(jnp.bfloat16)
    h1 = matmul_bn_relu(h, p["w1"], p["g1"], p["b1"], tn=512)      # (n,1024) bf16

    # L2: ConvT(1024->128, k=7) on 1x1 input, then BN+ReLU on (n*49, 128).
    y2 = matmul(h1, p["w2"], tn=896)                               # (n, 6272) f32
    h2 = bn_relu(y2.reshape(n * 49, 128), p["g2"], p["b2"])        # bf16
    h2 = h2.reshape(n, 7, 7, 128)                                  # NHWC

    # L3: ConvT(128->64, k=4, s=2, p=1) via phase decomposition, then BN+ReLU.
    a3 = extract_patches_3x3(h2)                                   # (n*49, 1152) bf16
    y3 = matmul(a3, p["w3"], tn=128)                               # (n*49, 256) f32
    y3 = interleave_phases(y3, n, 7, 64)                           # (n,14,14,64)
    h3 = bn_relu(y3.reshape(n * 196, 64), p["g3"], p["b3"])        # bf16
    h3 = h3.reshape(n, 14, 14, 64)

    # L4: ConvT(64->1, k=4, s=2, p=1) + Sigmoid fused.
    a4 = extract_patches_3x3(h3)                                   # (n*196, 576) bf16
    y4 = matmul_sigmoid(a4, p["w4"])                               # (n*196, 4) f32
    out = interleave_phases(y4, n, 14, 1)                          # (n,28,28,1)
    return out.transpose(0, 3, 1, 2)                               # NCHW (n,1,28,28)


def init_params(key):
    ks = jax.random.split(key, 10)
    f32 = jnp.float32
    return {
        # ConvTranspose2d weights: (C_in, C_out, kH, kW), no bias.
        "w1": 0.05 * jax.random.normal(ks[0], (74, 1024, 1, 1), f32),
        "w2": 0.05 * jax.random.normal(ks[1], (1024, 128, 7, 7), f32),
        "w3": 0.05 * jax.random.normal(ks[2], (128, 64, 4, 4), f32),
        "w4": 0.05 * jax.random.normal(ks[3], (64, 1, 4, 4), f32),
        # BatchNorm affine params.
        "g1": 1.0 + 0.1 * jax.random.normal(ks[4], (1024,), f32),
        "b1": 0.1 * jax.random.normal(ks[5], (1024,), f32),
        "g2": 1.0 + 0.1 * jax.random.normal(ks[6], (128,), f32),
        "b2": 0.1 * jax.random.normal(ks[7], (128,), f32),
        "g3": 1.0 + 0.1 * jax.random.normal(ks[8], (64,), f32),
        "b3": 0.1 * jax.random.normal(ks[9], (64,), f32),
    }


if __name__ == "__main__":
    key = jax.random.PRNGKey(0)
    k_param, k_x = jax.random.split(key)
    params = prepare_params(init_params(k_param))   # one-time weight prep

    # InfoGAN latent: 62 noise + 10 categorical + 2 continuous = 74 channels.
    batch = 2
    x = jax.random.normal(k_x, (batch, 74, 1, 1), jnp.float32)

    fwd = jax.jit(generator_forward)
    out = jax.block_until_ready(fwd(x, params))

    assert out.shape == (batch, 1, 28, 28), out.shape
    assert bool(jnp.all(jnp.isfinite(out)))
    assert bool(jnp.all((out >= 0.0) & (out <= 1.0)))
    print("KERNEL_OK")
</pallas_src>

<mosaic_0001>
module attributes {stable_mosaic.version = 11 : i64} {
  func.func @_mm_kernel(%arg0: i32, %arg1: memref<2x1024xbf16, #tpu.memory_space<vmem>>, %arg2: memref<1024x896xbf16, #tpu.memory_space<vmem>>, %arg3: memref<2x896xf32, #tpu.memory_space<vmem>>) attributes {dimension_semantics = [#tpu.dimension_semantics<parallel>], iteration_bounds = array<i64: 7>, scalar_prefetch = 0 : i64, scratch_operands = 0 : i64, tpu.core_type = #tpu.core_type<tc>, window_params = [{pipeline_mode = #tpu.pipeline_mode<synchronous>, transform_indices = @transform_0, window_bounds = array<i64: 2, 1024>}, {transform_indices = @transform_1, window_bounds = array<i64: 1024, 896>}, {transform_indices = @transform_2, window_bounds = array<i64: 2, 896>}]} {
    %c0 = arith.constant 0 : index
    %c0_0 = arith.constant 0 : index
    %0 = vector.load %arg1[%c0, %c0_0] : memref<2x1024xbf16, #tpu.memory_space<vmem>>, vector<2x1024xbf16>
    %c0_1 = arith.constant 0 : index
    %c0_2 = arith.constant 0 : index
    %1 = vector.load %arg2[%c0_1, %c0_2] : memref<1024x896xbf16, #tpu.memory_space<vmem>>, vector<1024x896xbf16>
    %cst = arith.constant dense<0.000000e+00> : vector<2x896xf32>
    %2 = tpu.matmul %0, %1, %cst {dimension_numbers = #tpu.dot_dimension_numbers<[1], [0], [0], [1], [0, 0, 1, 1], [], []>} : vector<2x1024xbf16>, vector<1024x896xbf16>, vector<2x896xf32> -> vector<2x896xf32>
    %c0_3 = arith.constant 0 : index
    %c0_4 = arith.constant 0 : index
    %3 = vector.load %arg3[%c0_3, %c0_4] : memref<2x896xf32, #tpu.memory_space<vmem>>, vector<2x896xf32>
    tpu.vector_store %arg3[%c0_3, %c0_4], %2 {strides = array<i32>} : memref<2x896xf32, #tpu.memory_space<vmem>>, vector<2x896xf32>,
    return
  }
  func.func @transform_0(%arg0: i32) -> (i32, i32) {
    %c0_i32 = arith.constant 0 : i32
    %c0_i32_0 = arith.constant 0 : i32
    %c0_i32_1 = arith.constant 0 : i32
    return %c0_i32, %c0_i32_0 : i32, i32
  }
  func.func @transform_1(%arg0: i32) -> (i32, i32) {
    %c0_i32 = arith.constant 0 : i32
    %c0_i32_0 = arith.constant 0 : i32
    return %c0_i32, %arg0 : i32, i32
  }
  func.func @transform_2(%arg0: i32) -> (i32, i32) {
    %c0_i32 = arith.constant 0 : i32
    %c0_i32_0 = arith.constant 0 : i32
    return %c0_i32, %arg0 : i32, i32
  }
}

module attributes {stable_mosaic.version = 11 : i64} {
  func.func @_mm_bn_relu_kernel(%arg0: i32, %arg1: memref<2x128xbf16, #tpu.memory_space<vmem>>, %arg2: memref<128x512xbf16, #tpu.memory_space<vmem>>, %arg3: memref<1x512xf32, #tpu.memory_space<vmem>>, %arg4: memref<1x512xf32, #tpu.memory_space<vmem>>, %arg5: memref<2x512xbf16, #tpu.memory_space<vmem>>) attributes {dimension_semantics = [#tpu.dimension_semantics<parallel>], iteration_bounds = array<i64: 2>, scalar_prefetch = 0 : i64, scratch_operands = 0 : i64, tpu.core_type = #tpu.core_type<tc>, window_params = [{pipeline_mode = #tpu.pipeline_mode<synchronous>, transform_indices = @transform_0, window_bounds = array<i64: 2, 128>}, {transform_indices = @transform_1, window_bounds = array<i64: 128, 512>}, {transform_indices = @transform_2, window_bounds = array<i64: 1, 512>}, {transform_indices = @transform_3, window_bounds = array<i64: 1, 512>}, {transform_indices = @transform_4, window_bounds = array<i64: 2, 512>}]} {
    %c0 = arith.constant 0 : index
    %c0_0 = arith.constant 0 : index
    %0 = vector.load %arg1[%c0, %c0_0] : memref<2x128xbf16, #tpu.memory_space<vmem>>, vector<2x128xbf16>
    %c0_1 = arith.constant 0 : index
    %c0_2 = arith.constant 0 : index
    %1 = vector.load %arg2[%c0_1, %c0_2] : memref<128x512xbf16, #tpu.memory_space<vmem>>, vector<128x512xbf16>
    %cst = arith.constant dense<0.000000e+00> : vector<2x512xf32>
    %2 = tpu.matmul %0, %1, %cst {dimension_numbers = #tpu.dot_dimension_numbers<[1], [0], [0], [1], [0, 0, 1, 1], [], []>} : vector<2x128xbf16>, vector<128x512xbf16>, vector<2x512xf32> -> vector<2x512xf32>
    %cst_3 = arith.constant dense<0.000000e+00> : vector<512xf32>
    %3 = vector.multi_reduction <add>, %2, %cst_3 [0] : vector<2x512xf32> to vector<512xf32>
    %4 = vector.shape_cast %3 : vector<512xf32> to vector<1x512xf32>
    %cst_4 = arith.constant 2.000000e+00 : f32
    %5 = vector.broadcast %cst_4 : f32 to vector<1x512xf32>
    %6 = arith.divf %4, %5 : vector<1x512xf32>
    %7 = vector.broadcast %6 : vector<1x512xf32> to vector<2x512xf32>
    %8 = arith.subf %2, %7 : vector<2x512xf32>
    %9 = arith.mulf %8, %8 : vector<2x512xf32>
    %cst_5 = arith.constant dense<0.000000e+00> : vector<512xf32>
    %10 = vector.multi_reduction <add>, %9, %cst_5 [0] : vector<2x512xf32> to vector<512xf32>
    %11 = vector.shape_cast %10 : vector<512xf32> to vector<1x512xf32>
    %cst_6 = arith.constant 2.000000e+00 : f32
    %12 = vector.broadcast %cst_6 : f32 to vector<1x512xf32>
    %13 = arith.divf %11, %12 : vector<1x512xf32>
    %cst_7 = arith.constant 9.99999974E-6 : f32
    %14 = vector.broadcast %cst_7 : f32 to vector<1x512xf32>
    %15 = arith.addf %13, %14 : vector<1x512xf32>
    %16 = math.rsqrt %15 : vector<1x512xf32>
    %17 = vector.broadcast %16 : vector<1x512xf32> to vector<2x512xf32>
    %18 = arith.mulf %8, %17 : vector<2x512xf32>
    %c0_8 = arith.constant 0 : index
    %c0_9 = arith.constant 0 : index
    %19 = vector.load %arg3[%c0_8, %c0_9] : memref<1x512xf32, #tpu.memory_space<vmem>>, vector<1x512xf32>
    %20 = vector.broadcast %19 : vector<1x512xf32> to vector<2x512xf32>
    %21 = arith.mulf %18, %20 : vector<2x512xf32>
    %c0_10 = arith.constant 0 : index
    %c0_11 = arith.constant 0 : index
    %22 = vector.load %arg4[%c0_10, %c0_11] : memref<1x512xf32, #tpu.memory_space<vmem>>, vector<1x512xf32>
    %23 = vector.broadcast %22 : vector<1x512xf32> to vector<2x512xf32>
    %24 = arith.addf %21, %23 : vector<2x512xf32>
    %cst_12 = arith.constant 0.000000e+00 : f32
    %25 = vector.broadcast %cst_12 : f32 to vector<2x512xf32>
    %26 = arith.maximumf %24, %25 : vector<2x512xf32>
    %27 = arith.truncf %26 : vector<2x512xf32> to vector<2x512xbf16>
    %c0_13 = arith.constant 0 : index
    %c0_14 = arith.constant 0 : index
    %28 = vector.load %arg5[%c0_13, %c0_14] : memref<2x512xbf16, #tpu.memory_space<vmem>>, vector<2x512xbf16>
    tpu.vector_store %arg5[%c0_13, %c0_14], %27 {strides = array<i32>} : memref<2x512xbf16, #tpu.memory_space<vmem>>, vector<2x512xbf16>,
    return
  }
  func.func @transform_0(%arg0: i32) -> (i32, i32) {
    %c0_i32 = arith.constant 0 : i32
    %c0_i32_0 = arith.constant 0 : i32
    %c0_i32_1 = arith.constant 0 : i32
    return %c0_i32, %c0_i32_0 : i32, i32
  }
  func.func @transform_1(%arg0: i32) -> (i32, i32) {
    %c0_i32 = arith.constant 0 : i32
    %c0_i32_0 = arith.constant 0 : i32
    return %c0_i32, %arg0 : i32, i32
  }
  func.func @transform_2(%arg0: i32) -> (i32, i32) {
    %c0_i32 = arith.constant 0 : i32
    %c0_i32_0 = arith.constant 0 : i32
    return %c0_i32, %arg0 : i32, i32
  }
  func.func @transform_3(%arg0: i32) -> (i32, i32) {
    %c0_i32 = arith.constant 0 : i32
    %c0_i32_0 = arith.constant 0 : i32
    return %c0_i32, %arg0 : i32, i32
  }
  func.func @transform_4(%arg0: i32) -> (i32, i32) {
    %c0_i32 = arith.constant 0 : i32
    %c0_i32_0 = arith.constant 0 : i32
    return %c0_i32, %arg0 : i32, i32
  }
}

module attributes {stable_mosaic.version = 11 : i64} {
  func.func @_bn_relu_kernel(%arg0: memref<98x128xf32, #tpu.memory_space<vmem>>, %arg1: memref<1x128xf32, #tpu.memory_space<vmem>>, %arg2: memref<1x128xf32, #tpu.memory_space<vmem>>, %arg3: memref<98x128xbf16, #tpu.memory_space<vmem>>) attributes {dimension_semantics = [], scalar_prefetch = 0 : i64, scratch_operands = 0 : i64, tpu.core_type = #tpu.core_type<tc>} {
    %c0 = arith.constant 0 : index
    %c0_0 = arith.constant 0 : index
    %0 = vector.load %arg0[%c0, %c0_0] : memref<98x128xf32, #tpu.memory_space<vmem>>, vector<98x128xf32>
    %cst = arith.constant dense<0.000000e+00> : vector<128xf32>
    %1 = vector.multi_reduction <add>, %0, %cst [0] : vector<98x128xf32> to vector<128xf32>
    %2 = vector.shape_cast %1 : vector<128xf32> to vector<1x128xf32>
    %cst_1 = arith.constant 9.800000e+01 : f32
    %3 = vector.broadcast %cst_1 : f32 to vector<1x128xf32>
    %4 = arith.divf %2, %3 : vector<1x128xf32>
    %5 = vector.broadcast %4 : vector<1x128xf32> to vector<98x128xf32>
    %6 = arith.subf %0, %5 : vector<98x128xf32>
    %7 = arith.mulf %6, %6 : vector<98x128xf32>
    %cst_2 = arith.constant dense<0.000000e+00> : vector<128xf32>
    %8 = vector.multi_reduction <add>, %7, %cst_2 [0] : vector<98x128xf32> to vector<128xf32>
    %9 = vector.shape_cast %8 : vector<128xf32> to vector<1x128xf32>
    %cst_3 = arith.constant 9.800000e+01 : f32
    %10 = vector.broadcast %cst_3 : f32 to vector<1x128xf32>
    %11 = arith.divf %9, %10 : vector<1x128xf32>
    %cst_4 = arith.constant 9.99999974E-6 : f32
    %12 = vector.broadcast %cst_4 : f32 to vector<1x128xf32>
    %13 = arith.addf %11, %12 : vector<1x128xf32>
    %14 = math.rsqrt %13 : vector<1x128xf32>
    %15 = vector.broadcast %14 : vector<1x128xf32> to vector<98x128xf32>
    %16 = arith.mulf %6, %15 : vector<98x128xf32>
    %c0_5 = arith.constant 0 : index
    %c0_6 = arith.constant 0 : index
    %17 = vector.load %arg1[%c0_5, %c0_6] : memref<1x128xf32, #tpu.memory_space<vmem>>, vector<1x128xf32>
    %18 = vector.broadcast %17 : vector<1x128xf32> to vector<98x128xf32>
    %19 = arith.mulf %16, %18 : vector<98x128xf32>
    %c0_7 = arith.constant 0 : index
    %c0_8 = arith.constant 0 : index
    %20 = vector.load %arg2[%c0_7, %c0_8] : memref<1x128xf32, #tpu.memory_space<vmem>>, vector<1x128xf32>
    %21 = vector.broadcast %20 : vector<1x128xf32> to vector<98x128xf32>
    %22 = arith.addf %19, %21 : vector<98x128xf32>
    %cst_9 = arith.constant 0.000000e+00 : f32
    %23 = vector.broadcast %cst_9 : f32 to vector<98x128xf32>
    %24 = arith.maximumf %22, %23 : vector<98x128xf32>
    %25 = arith.truncf %24 : vector<98x128xf32> to vector<98x128xbf16>
    %c0_10 = arith.constant 0 : index
    %c0_11 = arith.constant 0 : index
    %26 = vector.load %arg3[%c0_10, %c0_11] : memref<98x128xbf16, #tpu.memory_space<vmem>>, vector<98x128xbf16>
    tpu.vector_store %arg3[%c0_10, %c0_11], %25 {strides = array<i32>} : memref<98x128xbf16, #tpu.memory_space<vmem>>, vector<98x128xbf16>,
    return
  }
}

module attributes {stable_mosaic.version = 11 : i64} {
  func.func @_mm_kernel(%arg0: i32, %arg1: memref<98x1152xbf16, #tpu.memory_space<vmem>>, %arg2: memref<1152x128xbf16, #tpu.memory_space<vmem>>, %arg3: memref<98x128xf32, #tpu.memory_space<vmem>>) attributes {dimension_semantics = [#tpu.dimension_semantics<parallel>], iteration_bounds = array<i64: 2>, scalar_prefetch = 0 : i64, scratch_operands = 0 : i64, tpu.core_type = #tpu.core_type<tc>, window_params = [{pipeline_mode = #tpu.pipeline_mode<synchronous>, transform_indices = @transform_0, window_bounds = array<i64: 98, 1152>}, {transform_indices = @transform_1, window_bounds = array<i64: 1152, 128>}, {transform_indices = @transform_2, window_bounds = array<i64: 98, 128>}]} {
    %c0 = arith.constant 0 : index
    %c0_0 = arith.constant 0 : index
    %0 = vector.load %arg1[%c0, %c0_0] : memref<98x1152xbf16, #tpu.memory_space<vmem>>, vector<98x1152xbf16>
    %c0_1 = arith.constant 0 : index
    %c0_2 = arith.constant 0 : index
    %1 = vector.load %arg2[%c0_1, %c0_2] : memref<1152x128xbf16, #tpu.memory_space<vmem>>, vector<1152x128xbf16>
    %cst = arith.constant dense<0.000000e+00> : vector<98x128xf32>
    %2 = tpu.matmul %0, %1, %cst {dimension_numbers = #tpu.dot_dimension_numbers<[1], [0], [0], [1], [0, 0, 1, 1], [], []>} : vector<98x1152xbf16>, vector<1152x128xbf16>, vector<98x128xf32> -> vector<98x128xf32>
    %c0_3 = arith.constant 0 : index
    %c0_4 = arith.constant 0 : index
    %3 = vector.load %arg3[%c0_3, %c0_4] : memref<98x128xf32, #tpu.memory_space<vmem>>, vector<98x128xf32>
    tpu.vector_store %arg3[%c0_3, %c0_4], %2 {strides = array<i32>} : memref<98x128xf32, #tpu.memory_space<vmem>>, vector<98x128xf32>,
    return
  }
  func.func @transform_0(%arg0: i32) -> (i32, i32) {
    %c0_i32 = arith.constant 0 : i32
    %c0_i32_0 = arith.constant 0 : i32
    %c0_i32_1 = arith.constant 0 : i32
    return %c0_i32, %c0_i32_0 : i32, i32
  }
  func.func @transform_1(%arg0: i32) -> (i32, i32) {
    %c0_i32 = arith.constant 0 : i32
    %c0_i32_0 = arith.constant 0 : i32
    return %c0_i32, %arg0 : i32, i32
  }
  func.func @transform_2(%arg0: i32) -> (i32, i32) {
    %c0_i32 = arith.constant 0 : i32
    %c0_i32_0 = arith.constant 0 : i32
    return %c0_i32, %arg0 : i32, i32
  }
}

module attributes {stable_mosaic.version = 11 : i64} {
  func.func @_bn_relu_kernel(%arg0: memref<392x64xf32, #tpu.memory_space<vmem>>, %arg1: memref<1x64xf32, #tpu.memory_space<vmem>>, %arg2: memref<1x64xf32, #tpu.memory_space<vmem>>, %arg3: memref<392x64xbf16, #tpu.memory_space<vmem>>) attributes {dimension_semantics = [], scalar_prefetch = 0 : i64, scratch_operands = 0 : i64, tpu.core_type = #tpu.core_type<tc>} {
    %c0 = arith.constant 0 : index
    %c0_0 = arith.constant 0 : index
    %0 = vector.load %arg0[%c0, %c0_0] : memref<392x64xf32, #tpu.memory_space<vmem>>, vector<392x64xf32>
    %cst = arith.constant dense<0.000000e+00> : vector<64xf32>
    %1 = vector.multi_reduction <add>, %0, %cst [0] : vector<392x64xf32> to vector<64xf32>
    %2 = vector.shape_cast %1 : vector<64xf32> to vector<1x64xf32>
    %cst_1 = arith.constant 3.920000e+02 : f32
    %3 = vector.broadcast %cst_1 : f32 to vector<1x64xf32>
    %4 = arith.divf %2, %3 : vector<1x64xf32>
    %5 = vector.broadcast %4 : vector<1x64xf32> to vector<392x64xf32>
    %6 = arith.subf %0, %5 : vector<392x64xf32>
    %7 = arith.mulf %6, %6 : vector<392x64xf32>
    %cst_2 = arith.constant dense<0.000000e+00> : vector<64xf32>
    %8 = vector.multi_reduction <add>, %7, %cst_2 [0] : vector<392x64xf32> to vector<64xf32>
    %9 = vector.shape_cast %8 : vector<64xf32> to vector<1x64xf32>
    %cst_3 = arith.constant 3.920000e+02 : f32
    %10 = vector.broadcast %cst_3 : f32 to vector<1x64xf32>
    %11 = arith.divf %9, %10 : vector<1x64xf32>
    %cst_4 = arith.constant 9.99999974E-6 : f32
    %12 = vector.broadcast %cst_4 : f32 to vector<1x64xf32>
    %13 = arith.addf %11, %12 : vector<1x64xf32>
    %14 = math.rsqrt %13 : vector<1x64xf32>
    %15 = vector.broadcast %14 : vector<1x64xf32> to vector<392x64xf32>
    %16 = arith.mulf %6, %15 : vector<392x64xf32>
    %c0_5 = arith.constant 0 : index
    %c0_6 = arith.constant 0 : index
    %17 = vector.load %arg1[%c0_5, %c0_6] : memref<1x64xf32, #tpu.memory_space<vmem>>, vector<1x64xf32>
    %18 = vector.broadcast %17 : vector<1x64xf32> to vector<392x64xf32>
    %19 = arith.mulf %16, %18 : vector<392x64xf32>
    %c0_7 = arith.constant 0 : index
    %c0_8 = arith.constant 0 : index
    %20 = vector.load %arg2[%c0_7, %c0_8] : memref<1x64xf32, #tpu.memory_space<vmem>>, vector<1x64xf32>
    %21 = vector.broadcast %20 : vector<1x64xf32> to vector<392x64xf32>
    %22 = arith.addf %19, %21 : vector<392x64xf32>
    %cst_9 = arith.constant 0.000000e+00 : f32
    %23 = vector.broadcast %cst_9 : f32 to vector<392x64xf32>
    %24 = arith.maximumf %22, %23 : vector<392x64xf32>
    %25 = arith.truncf %24 : vector<392x64xf32> to vector<392x64xbf16>
    %c0_10 = arith.constant 0 : index
    %c0_11 = arith.constant 0 : index
    %26 = vector.load %arg3[%c0_10, %c0_11] : memref<392x64xbf16, #tpu.memory_space<vmem>>, vector<392x64xbf16>
    tpu.vector_store %arg3[%c0_10, %c0_11], %25 {strides = array<i32>} : memref<392x64xbf16, #tpu.memory_space<vmem>>, vector<392x64xbf16>,
    return
  }
}

module attributes {stable_mosaic.version = 11 : i64} {
  func.func @_mm_sigmoid_kernel(%arg0: i32, %arg1: memref<392x576xbf16, #tpu.memory_space<vmem>>, %arg2: memref<576x4xbf16, #tpu.memory_space<vmem>>, %arg3: memref<392x4xf32, #tpu.memory_space<vmem>>) attributes {dimension_semantics = [#tpu.dimension_semantics<parallel>], iteration_bounds = array<i64: 1>, scalar_prefetch = 0 : i64, scratch_operands = 0 : i64, tpu.core_type = #tpu.core_type<tc>, window_params = [{pipeline_mode = #tpu.pipeline_mode<synchronous>, transform_indices = @transform_0, window_bounds = array<i64: 392, 576>}, {transform_indices = @transform_1, window_bounds = array<i64: 576, 4>}, {transform_indices = @transform_2, window_bounds = array<i64: 392, 4>}]} {
    %c0 = arith.constant 0 : index
    %c0_0 = arith.constant 0 : index
    %0 = vector.load %arg1[%c0, %c0_0] : memref<392x576xbf16, #tpu.memory_space<vmem>>, vector<392x576xbf16>
    %c0_1 = arith.constant 0 : index
    %c0_2 = arith.constant 0 : index
    %1 = vector.load %arg2[%c0_1, %c0_2] : memref<576x4xbf16, #tpu.memory_space<vmem>>, vector<576x4xbf16>
    %cst = arith.constant dense<0.000000e+00> : vector<392x4xf32>
    %2 = tpu.matmul %0, %1, %cst {dimension_numbers = #tpu.dot_dimension_numbers<[1], [0], [0], [1], [0, 0, 1, 1], [], []>} : vector<392x576xbf16>, vector<576x4xbf16>, vector<392x4xf32> -> vector<392x4xf32>
    %cst_3 = arith.constant 0.000000e+00 : f32
    %3 = vector.broadcast %cst_3 : f32 to vector<392x4xf32>
    %4 = arith.subf %3, %2 : vector<392x4xf32>
    %5 = math.exp %4 : vector<392x4xf32>
    %cst_4 = arith.constant 1.000000e+00 : f32
    %6 = vector.broadcast %cst_4 : f32 to vector<392x4xf32>
    %7 = arith.addf %6, %5 : vector<392x4xf32>
    %cst_5 = arith.constant 1.000000e+00 : f32
    %8 = vector.broadcast %cst_5 : f32 to vector<392x4xf32>
    %9 = arith.divf %8, %7 : vector<392x4xf32>
    %c0_6 = arith.constant 0 : index
    %c0_7 = arith.constant 0 : index
    %10 = vector.load %arg3[%c0_6, %c0_7] : memref<392x4xf32, #tpu.memory_space<vmem>>, vector<392x4xf32>
    tpu.vector_store %arg3[%c0_6, %c0_7], %9 {strides = array<i32>} : memref<392x4xf32, #tpu.memory_space<vmem>>, vector<392x4xf32>,
    return
  }
  func.func @transform_0(%arg0: i32) -> (i32, i32) {
    %c0_i32 = arith.constant 0 : i32
    %c0_i32_0 = arith.constant 0 : i32
    %c0_i32_1 = arith.constant 0 : i32
    return %c0_i32, %c0_i32_0 : i32, i32
  }
  func.func @transform_1(%arg0: i32) -> (i32, i32) {
    %c0_i32 = arith.constant 0 : i32
    %c0_i32_0 = arith.constant 0 : i32
    return %c0_i32, %arg0 : i32, i32
  }
  func.func @transform_2(%arg0: i32) -> (i32, i32) {
    %c0_i32 = arith.constant 0 : i32
    %c0_i32_0 = arith.constant 0 : i32
    return %c0_i32, %arg0 : i32, i32
  }
}

</mosaic_0001>

<bundles_post_ra>
// kernel: generator_forward.6
= control target key start
LH: loop header
LB: loop body
LE: loop exit
PB: predicated region body
PF: predicated region fallthrough
CT: control target
= control target key end

     0   :  { %9 = vsyncpa [#allocation3], 0  ;;  %s1443_s0 = inlined_call_operand.vmem [shape: bf16[2,128], index: 0, kind: input, shape index: {}]   ;;  %s1444_s1 = inlined_call_operand.hbm [shape: bf16[128,1024], index: 1, kind: input, shape index: {}]   ;;  %s1445_s2 = inlined_call_operand.hbm [shape: f32[1,1024], index: 2, kind: input, shape index: {}]   ;;  %s1446_s3 = inlined_call_operand.hbm [shape: f32[1,1024], index: 3, kind: input, shape index: {}]   ;;  %s1447_s4 = inlined_call_operand.vmem [shape: bf16[2,1024], index: 4, kind: output, shape index: {}]  }
   0x1   :  { %11 = vsyncpa [#allocation3 + $0x1], 0 }
   0x2   :  { %12 = vsyncpa [#allocation5], 0 }
   0x3   :  { %14 = vsyncpa [#allocation5 + $0x1], 0  ;;  %s1180_s15 = smov 0   ;;  %s1182_s16 = smov 0  }
   0x4   :  { %s1184_s17 = smov 0   ;;  %s1186_s18 = smov 0  }
   0x5 LB: > { %s1199_s19 = sadd.s32 4294967295, %s1145_s18   ;;  %s1202_s20 = sadd.s32 1, %s1145_s18   ;;  %s1145_s18 = sphi %s1186_s18, %s1460_s18   ;;  %s1141_s17 = sphi %s1184_s17, %s1459_s17   ;;  %s1137_s16 = sphi %s1182_s16, %s1458_s16   ;;  %s1133_s15 = sphi %s1180_s15, %s1457_s15  }
   0x6   : > { %s45_s21 = ssub.s32 %s1145_s18, %s1202_s20  ;;  %s48_s22 = sadd.s32 1, %s1141_s17 }
   0x7   : > { %p46_p0 = scmp.eq.s32.totalorder %s45_s21, 0  ;;  %p55_p1 = scmp.ne.s32.totalorder %s1141_s17, %s1137_s16 }
   0x8   : > { %p56_p2 = scmp.eq.s32.totalorder %s1145_s18, 0  ;;  %p61_p3 = scmp.ne.s32.totalorder %s1137_s16, %s1133_s15 }
   0x9   : > { %s1212_s23 = scalar_select %p46_p0, %s1141_s17, %s48_s22  }
   0xa   : > { %p57_p4 = por %p56_p2, %p55_p1  ;;  %p62_p5 = scmp.eq.s32.totalorder %s1199_s19, 0 }
   0xb   : > { %p923_p6 = scmp.lt.s32.totalorder %s1145_s18, 2  ;;  %s1221_s25 = sand.u32 1, %s1141_s17  }
   0xc   : > { %p1216_p7 = por %p62_p5, %p61_p3  ;;  %s853_s26 = sshll.u32 %s1221_s25, 8 }
   0xd   : > { %p1224_p8 = pnand %p923_p6, %p57_p4  ;;  %s170_s28 = scalar_lea.vmem [#allocation2], %s853_s26 }
   0xe   : > { %s1450_s24 = scalar_select %p1216_p7, 1, 0 }
   0xf   : > { %s1451_s27 = scalar_select %p1224_p8, 1, 0 }
  0x10   : > { %s177_s29 = sshll.u32 %s170_s28, 4  ;;  %s187_s30 = sand.u32 1, %s1145_s18   ;;  %s1229_s29 = int_to_ptr.vmem [resolvable:$true] %s177_s29 }
  0x11   : > { %s856_s5 = sshll.u32 %s1221_s25, 2  ;;  %s905_s6 = sshll.u32 %s1145_s18, 6 }
  0x12   : > { %s1238_s9 = scalar_lea.hbm %s1445_s2, %s905_s6  ;;  %s191_s10 = scalar_lea.vmem [#allocation4], %s856_s5 }
  0x13   : > { %s199_s11 = sshll.u32 %s191_s10, 4  ;;  %s1244_s12 = scalar_lea.sflag [#allocation5], %s187_s30  ;;  %s1242_s11 = int_to_ptr.vmem [resolvable:$true] %s199_s11 }
  0x14   : > { %s1017_s13 = scalar_lea.hbm %s1238_s9, 64  ;;  %p1250_p10 = pneg %p1224_p8 }
  0x15   : > { %p1018_p9 = scmp.ne.s32.totalorder %s1238_s9, %s1017_s13  ;;  %s1022_s22 = scalar_lea.hbm %s1445_s2, 128 }
  0x16   : > { %p1023_p13 = scmp.lt.u32.totalorder %s1238_s9, %s1445_s2  ;;  %p1024_p0 = scmp.lt.u32.totalorder %s1022_s22, %s1017_s13 }
  0x17   : > { %p1020_p11 = pnand %p1250_p10, %p1018_p9  ;;  %p1026_p2 = scmp.lt.u32.totalorder %s1017_s13, %s1238_s9 }
  0x18   : > { %p1025_p1 = por %p1024_p0, %p1023_p13 }
  0x19   : > { %p1021_p12 = pneg %p1020_p11 }
  0x1a   : > { %p1027_p3 = por %p1026_p2, %p1025_p1 }
  0x1c   : > { %p1028_p4 = pnand %p1027_p3, %p1021_p12 }
  0x1e   : > { %1031 = shalt.err (!%p1028_p4)
}
  0x1f   : > { %s1032_s30 = scalar_lea.vmem %s1242_s11, 64  ;;  %s1147_s7 = smov [#allocation4]  }
  0x20   : > { %p1033_p5 = scmp.ne.s32.totalorder %s1242_s11, %s1032_s30  ;;  %s1037_s8 = sshll.u32 %s1147_s7, 4  ;;  %s1038_s8 = int_to_ptr.vmem [resolvable:$false] %s1037_s8 }
  0x21   : > { %s1039_s10 = scalar_lea.vmem %s1038_s8, 128  ;;  %p1040_p11 = scmp.lt.s32.totalorder %s1242_s11, %s1038_s8 }
  0x22   : > { %p1035_p6 = pnand %p1033_p5, %p1250_p10  ;;  %p1041_p7 = scmp.lt.s32.totalorder %s1039_s10, %s1032_s30 }
  0x24   : > { %p1036_p9 = pneg %p1035_p6  ;;  %p1042_p13 = por %p1041_p7, %p1040_p11 }
  0x26   : > { %p1043_p0 = pnand %p1042_p13, %p1036_p9 }
  0x28   : > { %1046 = shalt.err (!%p1043_p0)
}
  0x29   : > { %919 = dma.hbm_to_vmem [thread:$0]  (!%p1224_p8), %s1238_s9, 64, %s1242_s11, %s1244_s12  }
  0x2a   : > { %s1279_s21 = scalar_lea.hbm %s1446_s3, %s905_s6  ;;  %p862_p7 = scmp.ge.s32.totalorder %s1145_s18, 1 }
  0x2b   : > { %p223_p12 = scmp.lt.s32.totalorder %s1145_s18, 3  ;;  %s904_s22 = sshll.u32 %s1145_s18, 8 }
  0x2c   : > { %s1287_s30 = scalar_lea.hbm %s1444_s1, %s904_s22  ;;  %s1295_s11 = scalar_lea.vmem [#allocation6], %s856_s5 }
  0x2d   : > { %p1289_p1 = pnand %p862_p7, %p223_p12  ;;  %s218_s6 = sshll.u32 %s1295_s11, 4  ;;  %s219_s6 = int_to_ptr.vmem [resolvable:$true] %s218_s6 }
  0x2e   : > { %s167_s7 = scalar_lea.sflag [#allocation3], %s1221_s25  ;;  %s1047_s18 = scalar_lea.hbm %s1287_s30, 4096 }
  0x2f   : > { %s1453_s9 = scalar_select %p1289_p1, 1, 0 }
  0x30   : > { %p1048_p2 = scmp.ne.s32.totalorder %s1287_s30, %s1047_s18  ;;  %s1052_s13 = scalar_lea.hbm %s1444_s1, 8192 }
  0x31   : > { %p1053_p5 = scmp.lt.u32.totalorder %s1287_s30, %s1444_s1  ;;  %p1054_p6 = scmp.lt.u32.totalorder %s1052_s13, %s1047_s18 }
  0x32   : > { %p1050_p3 = pnand %p1048_p2, %p1250_p10  ;;  %p1056_p11 = scmp.lt.u32.totalorder %s1047_s18, %s1287_s30 }
  0x33   : > { %p1055_p9 = por %p1054_p6, %p1053_p5 }
  0x34   : > { %p1051_p4 = pneg %p1050_p3 }
  0x35   : > { %p1057_p13 = por %p1056_p11, %p1055_p9 }
  0x37   : > { %p1058_p0 = pnand %p1057_p13, %p1051_p4 }
  0x39   : > { %1061 = shalt.err (!%p1058_p0)
}
  0x3a   : > { %s1062_s5 = scalar_lea.vmem %s1229_s29, 4096  ;;  %s1148_s26 = smov [#allocation2]  }
  0x3b   : > { %p1063_p7 = scmp.ne.s32.totalorder %s1229_s29, %s1062_s5  ;;  %s1067_s28 = sshll.u32 %s1148_s26, 4  ;;  %s1068_s28 = int_to_ptr.vmem [resolvable:$false] %s1067_s28 }
  0x3c   : > { %s1069_s8 = scalar_lea.vmem %s1068_s28, 8192  ;;  %p1070_p3 = scmp.lt.s32.totalorder %s1229_s29, %s1068_s28 }
  0x3d   : > { %p1065_p12 = pnand %p1063_p7, %p1250_p10  ;;  %p1071_p1 = scmp.lt.s32.totalorder %s1069_s8, %s1062_s5 }
  0x3f   : > { %p1066_p2 = pneg %p1065_p12  ;;  %p1072_p5 = por %p1071_p1, %p1070_p3 }
  0x41   : > { %p1073_p6 = pnand %p1072_p5, %p1066_p2 }
  0x43   : > { %1076 = shalt.err (!%p1073_p6)
}
  0x44   : > { %s1149_s18 = smov 512   ;;  %s1150_s10 = smov 256  }
  0x45   : > { %s1151_s13 = smov 16   ;;  %s1077_s15 = scalar_lea.hbm %s1279_s21, 64 }
  0x46   : > { %916 = dma.hbm_to_vmem [thread:$0]  (!%p1224_p8), %s1287_s30, 4096, %s1229_s29, %s167_s7, %s1149_s18, %s1150_s10, %s1151_s13  }
  0x47   : > { %p1078_p1 = scmp.ne.s32.totalorder %s1279_s21, %s1077_s15  ;;  %s1082_s26 = scalar_lea.hbm %s1446_s3, 128 }
  0x48   : > { %p1083_p11 = scmp.lt.u32.totalorder %s1279_s21, %s1446_s3  ;;  %p1084_p13 = scmp.lt.u32.totalorder %s1082_s26, %s1077_s15 }
  0x49   : > { %p1080_p4 = pnand %p1078_p1, %p1250_p10  ;;  %p1086_p7 = scmp.lt.u32.totalorder %s1077_s15, %s1279_s21 }
  0x4a   : > { %p1085_p0 = por %p1084_p13, %p1083_p11 }
  0x4b   : > { %p1081_p9 = pneg %p1080_p4 }
  0x4c   : > { %p1087_p12 = por %p1086_p7, %p1085_p0 }
  0x4e   : > { %p1088_p2 = pnand %p1087_p12, %p1081_p9 }
  0x50   : > { %1091 = shalt.err (!%p1088_p2)
}
  0x51   : > { %s1092_s25 = scalar_lea.vmem %s219_s6, 64  ;;  %s1152_s29 = smov [#allocation6]  }
  0x52   : > { %p1093_p3 = scmp.ne.s32.totalorder %s219_s6, %s1092_s25  ;;  %s1097_s30 = sshll.u32 %s1152_s29, 4  ;;  %s1098_s30 = int_to_ptr.vmem [resolvable:$false] %s1097_s30 }
  0x53   : > { %s1099_s11 = scalar_lea.vmem %s1098_s30, 128  ;;  %p1100_p1 = scmp.lt.s32.totalorder %s219_s6, %s1098_s30 }
  0x54   : > { %p1095_p5 = pnand %p1093_p3, %p1250_p10  ;;  %p1101_p4 = scmp.lt.s32.totalorder %s1099_s11, %s1092_s25 }
  0x56   : > { %p1096_p6 = pneg %p1095_p5  ;;  %p1102_p8 = por %p1101_p4, %p1100_p1 }
  0x58   : > { %p1103_p11 = pnand %p1102_p8, %p1096_p6 }
  0x5a   : > { %1106 = shalt.err (!%p1103_p11)
}
  0x5b   : > { %p1454_p13 = scmp.ne.s32.totalorder %s1451_s27, 0  ;;  %p1455_p9 = scmp.ne.s32.totalorder %s1453_s9, 0 }
  0x5c   : > { %s1345_s14 = sand.u32 (!%p1455_p9), 1, %s1137_s16   ;;  %p1456_p8 = scmp.ne.s32.totalorder (!%p1455_p9), %s1450_s24, 0 }
  0x5d   : > { %922 = dma.hbm_to_vmem [thread:$0]  (!%p1454_p13), %s1279_s21, 64, %s219_s6, %s1244_s12  }
  0x5e   : > { %227 = sbr.rel (%p1455_p9) target bundleno = 416 (0x1a0), region = 36  ;;  %s863_s7 = sshll.u32 (!%p1455_p9), %s1345_s14, 8 }
  0x5f   : > { %s230_s18 = scalar_lea.sflag (!%p1455_p9), [#allocation3], %s1345_s14  ;;  %s1349_s10 = scalar_lea.vmem (!%p1455_p9), [#allocation2], %s863_s7 }
  0x65   : > { %1124 = dma.done.wait (%p1456_p8), %s230_s18, 4096  }
  0x66   : > { %1126 = vsyncadd (%p1456_p8), %s230_s18, 4294963200  ;;  %s238_s27 = sand.u32 1, %s1199_s19   ;;  %s864_s12 = sshll.u32 %s1345_s14, 2 }
  0x67   : > { %s239_s21 = scalar_lea.sflag [#allocation5], %s238_s27  ;;  %s1359_s9 = scalar_lea.vmem [#allocation4], %s864_s12 }
  0x68   : > { %1128 = dma.done.wait (%p1456_p8), %s239_s21, 128  }
  0x69   : > { %1130 = vsyncadd (%p1456_p8), %s239_s21, 4294967168  ;;  %v1153_v0 = vmov 0   ;;  %v961_v1 = vld [vmem:[%s1349_s10 + $0x4] ss:$16 sps:$4 sm:$0xff]   ;;  %v963_v2 = vld [vmem:[%s1349_s10 + $0xc] ss:$16 sps:$4 sm:$0xff]  }
  0x6a   : > { %519 = vmatprep.mubr.bf16.mxu0 %v1153_v0  ;;  %560 = vmatprep.mubr.bf16.mxu1 %v1153_v0  ;;  %v965_v3 = vld [vmem:[%s1349_s10] ss:$16 sps:$4 sm:$0xff]   ;;  %v966_v4 = vld [vmem:[%s1349_s10 + $0x8] ss:$16 sps:$4 sm:$0xff]   ;;  %v967_v5 = vld [vmem:[%s1349_s10 + $0x24] ss:$16 sps:$4 sm:$0xff]  }
  0x6b   : > { %487 = vmatprep.subr.bf16.mxu0 %v961_v1  ;;  %528 = vmatprep.subr.bf16.mxu1 %v963_v2  ;;  %v969_v6 = vld [vmem:[%s1349_s10 + $0x2c] ss:$16 sps:$4 sm:$0xff]   ;;  %v971_v7 = vld [vmem:[%s1349_s10 + $0x20] ss:$16 sps:$4 sm:$0xff]   ;;  %v972_v8 = vld [vmem:[%s1349_s10 + $0x28] ss:$16 sps:$4 sm:$0xff]  }
  0x6c   : > { %488 = vmatpush1.bf16.msra.mxu0 %v965_v3  ;;  %529 = vmatpush1.bf16.msra.mxu1 %v966_v4  ;;  %v973_v9 = vld [vmem:[%s1349_s10 + $0x44] ss:$16 sps:$4 sm:$0xff]   ;;  %v975_v10 = vld [vmem:[%s1349_s10 + $0x4c] ss:$16 sps:$4 sm:$0xff]   ;;  %v977_v11 = vld [vmem:[%s1349_s10 + $0x40] ss:$16 sps:$4 sm:$0xff]  }
  0x6d   : > { %489 = vmatprep.subr.bf16.mxu0 %v967_v5  ;;  %530 = vmatprep.subr.bf16.mxu1 %v969_v6  ;;  %v978_v12 = vld [vmem:[%s1349_s10 + $0x48] ss:$16 sps:$4 sm:$0xff]   ;;  %v979_v13 = vld [vmem:[%s1349_s10 + $0x64] ss:$16 sps:$4 sm:$0xff]   ;;  %v981_v14 = vld [vmem:[%s1349_s10 + $0x6c] ss:$16 sps:$4 sm:$0xff]  }
  0x6e   : > { %v983_v15 = vld [vmem:[%s1349_s10 + $0x60] ss:$16 sps:$4 sm:$0xff]   ;;  %v984_v16 = vld [vmem:[%s1349_s10 + $0x68] ss:$16 sps:$4 sm:$0xff]   ;;  %v985_v17 = vld [vmem:[%s1349_s10 + $0x84] ss:$16 sps:$4 sm:$0xff]  }
  0x6f   : > { %v987_v18 = vld [vmem:[%s1349_s10 + $0x8c] ss:$16 sps:$4 sm:$0xff]   ;;  %v989_v19 = vld [vmem:[%s1349_s10 + $0x80] ss:$16 sps:$4 sm:$0xff]   ;;  %v990_v20 = vld [vmem:[%s1349_s10 + $0x88] ss:$16 sps:$4 sm:$0xff]  }
  0x70   : > { %490 = vmatpush1.bf16.msra.mxu0 %v971_v7  ;;  %531 = vmatpush1.bf16.msra.mxu1 %v972_v8  ;;  %v991_v21 = vld [vmem:[%s1349_s10 + $0xa4] ss:$16 sps:$4 sm:$0xff]   ;;  %v993_v22 = vld [vmem:[%s1349_s10 + $0xac] ss:$16 sps:$4 sm:$0xff]   ;;  %v995_v23 = vld [vmem:[%s1349_s10 + $0xa0] ss:$16 sps:$4 sm:$0xff]  }
  0x71   : > { %491 = vmatprep.subr.bf16.mxu0 %v973_v9  ;;  %532 = vmatprep.subr.bf16.mxu1 %v975_v10  ;;  %v996_v24 = vld [vmem:[%s1349_s10 + $0xa8] ss:$16 sps:$4 sm:$0xff]   ;;  %v997_v25 = vld [vmem:[%s1349_s10 + $0xc4] ss:$16 sps:$4 sm:$0xff]   ;;  %v999_v26 = vld [vmem:[%s1349_s10 + $0xcc] ss:$16 sps:$4 sm:$0xff]  }
  0x72   : > { %v1001_v27 = vld [vmem:[%s1349_s10 + $0xc0] ss:$16 sps:$4 sm:$0xff]   ;;  %v1002_v28 = vld [vmem:[%s1349_s10 + $0xc8] ss:$16 sps:$4 sm:$0xff]   ;;  %v1003_v29 = vld [vmem:[%s1349_s10 + $0xe4] ss:$16 sps:$4 sm:$0xff]  }
  0x73   : > { %v1005_v30 = vld [vmem:[%s1349_s10 + $0xec] ss:$16 sps:$4 sm:$0xff]   ;;  %v1007_v31 = vld [vmem:[%s1349_s10 + $0xe0] ss:$16 sps:$4 sm:$0xff]   ;;  %v1008_v32 = vld [vmem:[%s1349_s10 + $0xe8] ss:$16 sps:$4 sm:$0xff]  }
  0x74   : > { %492 = vmatpush1.bf16.msra.mxu0 %v977_v11  ;;  %533 = vmatpush1.bf16.msra.mxu1 %v978_v12  ;;  %v294_v33 = vld [vmem:[%s1443_s0] sm:$0x1]  ;;  %vm569_vm0 = vcmask 1041408   ;;  %s251_s13 = scalar_lea.vmem [#allocation6], %s864_s12  ;;  %s866_s15 = sshll.u32 %s1199_s19, 2 }
  0x75   : > { %493 = vmatprep.subr.bf16.mxu0 %v979_v13  ;;  %534 = vmatprep.subr.bf16.mxu1 %v981_v14  ;;  %p289_p10 = scmp.lt.s32.totalorder %s866_s15, 7 }
  0x77   : > { %s1462_s15 = smov (!%p289_p10, %s866_s15), 7 }
  0x78   : > { %494 = vmatpush1.bf16.msra.mxu0 %v983_v15  ;;  %535 = vmatpush1.bf16.msra.mxu1 %v984_v16  ;;  %s291_s5 = scalar_lea.vmem %s1447_s4, %s1462_s15 }
  0x79   : > { %495 = vmatprep.subr.bf16.mxu0 %v985_v17  ;;  %536 = vmatprep.subr.bf16.mxu1 %v987_v18 }
  0x7c   : > { %496 = vmatpush1.bf16.msra.mxu0 %v989_v19  ;;  %537 = vmatpush1.bf16.msra.mxu1 %v990_v20 }
  0x7d   : > { %497 = vmatprep.subr.bf16.mxu0 %v991_v21  ;;  %538 = vmatprep.subr.bf16.mxu1 %v993_v22 }
  0x80   : > { %498 = vmatpush1.bf16.msra.mxu0 %v995_v23  ;;  %539 = vmatpush1.bf16.msra.mxu1 %v996_v24 }
  0x81   : > { %499 = vmatprep.subr.bf16.mxu0 %v997_v25  ;;  %540 = vmatprep.subr.bf16.mxu1 %v999_v26 }
  0x84   : > { %500 = vmatpush1.bf16.msra.mxu0 %v1001_v27  ;;  %541 = vmatpush1.bf16.msra.mxu1 %v1002_v28 }
  0x85   : > { %501 = vmatprep.subr.bf16.mxu0 %v1003_v29  ;;  %542 = vmatprep.subr.bf16.mxu1 %v1005_v30 }
  0x88   : > { %502 = vmatpush1.bf16.msra.mxu0 %v1007_v31  ;;  %543 = vmatpush1.bf16.msra.mxu1 %v1008_v32 }
  0x8b   : > { %520 = vmatmul.mubr.bf16.vlgmr.msra.gmra.mrb[0].mxu0 %v294_v33  ;;  %561 = vmatmul.mubr.bf16.vlgmr.msra.gmra.mrb[0].mxu1 %v294_v33 }
 0x15e   : > { %v521_v34 = vpop.f32.mrb[0].mxu0  ;;  %v562_v35 = vpop.f32.mrb[0].mxu1 }
 0x15f   : > { %v570_v36 = vsel %vm569_vm0, %v521_v34, 0.0  ;;  %v584_v37 = vsel %vm569_vm0, %v562_v35, 0.0  ;;  %v523_v38 = vpop.f32.mrb[1].mxu0  ;;  %v564_v39 = vpop.f32.mrb[1].mxu1 }
 0x160   : > { %v571_v40 = vrot.slane %v570_v36, 4  ;;  %v585_v41 = vrot.slane %v584_v37, 4  ;;  %v577_v42 = vsel %vm569_vm0, %v523_v38, 0.0  ;;  %v591_v43 = vsel %vm569_vm0, %v564_v39, 0.0  ;;  %v525_v44 = vpop.f32.mrb[2].mxu0  ;;  %v566_v45 = vpop.f32.mrb[2].mxu1 }
 0x161   : > { %v578_v46 = vrot.slane %v577_v42, 4  ;;  %v592_v47 = vrot.slane %v591_v43, 4  ;;  %v526_v48 = vpop.f32.mrb[3].mxu0  ;;  %v567_v49 = vpop.f32.mrb[3].mxu1 }
 0x162   : > { %v572_v50 = vadd.f32 %v571_v40, %v570_v36  ;;  %v586_v51 = vadd.f32 %v585_v41, %v584_v37  ;;  %v657_v48 = vlaneseq }
 0x163   : > { %v579_v52 = vadd.f32 %v578_v46, %v577_v42  ;;  %v593_v53 = vadd.f32 %v592_v47, %v591_v43 }
 0x164   : > { %v573_v54 = vrot.slane %v572_v50, 2  ;;  %v587_v55 = vrot.slane %v586_v51, 2 }
 0x165   : > { %v580_v56 = vrot.slane %v579_v52, 2  ;;  %v594_v57 = vrot.slane %v593_v53, 2 }
 0x166   : > { %v574_v58 = vadd.f32 %v573_v54, %v572_v50  ;;  %v588_v59 = vadd.f32 %v587_v55, %v586_v51  ;;  %v658_v55 = vshrl.u32 %v657_v48, 7 }
 0x167   : > { %v581_v60 = vadd.f32 %v580_v56, %v579_v52  ;;  %v595_v61 = vadd.f32 %v594_v57, %v593_v53  ;;  %v655_v57 = vld [vmem:[%s1359_s9] sm:$0xf] }
 0x168   : > { %v575_v62 = vrot.slane %v574_v58, 1  ;;  %v589_v63 = vrot.slane %v588_v59, 1  ;;  %v659_v56 = vsub.s32 0, %v658_v55 }
 0x169   : > { %v582_v0 = vrot.slane %v581_v60, 1  ;;  %v596_v1 = vrot.slane %v595_v61, 1 }
 0x16a   : > { %v576_v2 = vadd.f32 %v575_v62, %v574_v58  ;;  %v590_v3 = vadd.f32 %v589_v63, %v588_v59  ;;  %v667_v58 = vsub.s32 2, %v658_v55  ;;  %v663_v59 = vsub.s32 1, %v658_v55 }
 0x16b   : > { %v583_v4 = vadd.f32 %v582_v0, %v581_v60  ;;  %v597_v5 = vadd.f32 %v596_v1, %v595_v61  ;;  %v681_v60 = vld [vmem:[%s251_s13] sm:$0xf]  ;;  %v671_v61 = vsub.s32 3, %v658_v55  ;;  %v660_v62 = vrot.slane %v655_v57, %v659_v56 }
 0x16c   : > { %v599_v6 = vmul.f32 0.5, %v576_v2  ;;  %v601_v7 = vmul.f32 0.5, %v590_v3  ;;  %v668_v0 = vrot.slane %v655_v57, %v667_v58  ;;  %v686_v3 = vrot.slane %v681_v60, %v659_v56 }
 0x16d   : > { %v600_v8 = vmul.f32 0.5, %v583_v4  ;;  %v602_v9 = vmul.f32 0.5, %v597_v5  ;;  %v664_v4 = vrot.slane %v655_v57, %v663_v59  ;;  %v1154_v5 = vmov 1966171168  }
 0x16e   : > { %v603_v10 = vsub.f32 %v521_v34, %v599_v6  ;;  %v1404_v11 = vsub.f32 %v562_v35, %v601_v7  ;;  %v722_v6 = vunpack.c.l.s4 %v1154_v5 }
 0x16f   : > { %v1406_v12 = vsub.f32 %v523_v38, %v600_v8  ;;  %v1408_v13 = vsub.f32 %v564_v39, %v602_v9  ;;  %v694_v9 = vrot.slane %v681_v60, %v667_v58 }
 0x170   : > { %v607_v14 = vmul.f32 %v603_v10, %v603_v10  ;;  %v609_v15 = vmul.f32 %v1404_v11, %v1404_v11 }
 0x171   : > { %v608_v16 = vmul.f32 %v1406_v12, %v1406_v12  ;;  %v610_v17 = vmul.f32 %v1408_v13, %v1408_v13 }
 0x172   : > { %v611_v18 = vsel %vm569_vm0, %v607_v14, 0.0  ;;  %v625_v19 = vsel %vm569_vm0, %v609_v15, 0.0  ;;  %v672_v14 = vrot.slane %v655_v57, %v671_v61 }
 0x173   : > { %v612_v20 = vrot.slane %v611_v18, 4  ;;  %v626_v21 = vrot.slane %v625_v19, 4  ;;  %v618_v22 = vsel %vm569_vm0, %v608_v16, 0.0  ;;  %v632_v23 = vsel %vm569_vm0, %v610_v17, 0.0 }
 0x174   : > { %v619_v24 = vrot.slane %v618_v22, 4  ;;  %v633_v25 = vrot.slane %v632_v23, 4 }
 0x175   : > { %v613_v26 = vadd.f32 %v612_v20, %v611_v18  ;;  %v627_v27 = vadd.f32 %v626_v21, %v625_v19  ;;  %v690_v18 = vrot.slane %v681_v60, %v663_v59  ;;  %v698_v21 = vrot.slane %v681_v60, %v671_v61 }
 0x176   : > { %v620_v28 = vadd.f32 %v619_v24, %v618_v22  ;;  %v634_v29 = vadd.f32 %v633_v25, %v632_v23  ;;  %v723_v23 = vunpack.c.0.s8 %v722_v6 }
 0x177   : > { %v614_v30 = vrot.slane %v613_v26, 2  ;;  %v628_v31 = vrot.slane %v627_v27, 2 }
 0x178   : > { %v621_v32 = vrot.slane %v620_v28, 2  ;;  %v635_v33 = vrot.slane %v634_v29, 2 }
 0x179   : > { %v615_v34 = vadd.f32 %v614_v30, %v613_v26  ;;  %v629_v35 = vadd.f32 %v628_v31, %v627_v27  ;;  %v726_v30 = vsub.s32 %v723_v23, %v658_v55 }
 0x17a   : > { %v622_v36 = vadd.f32 %v621_v32, %v620_v28  ;;  %v636_v37 = vadd.f32 %v635_v33, %v634_v29 }
 0x17b   : > { %v616_v38 = vrot.slane %v615_v34, 1  ;;  %v630_v39 = vrot.slane %v629_v35, 1 }
 0x17c   : > { %v623_v40 = vrot.slane %v622_v36, 1  ;;  %v637_v41 = vrot.slane %v636_v37, 1 }
 0x17d   : > { %v617_v42 = vadd.f32 %v616_v38, %v615_v34  ;;  %v631_v43 = vadd.f32 %v630_v39, %v629_v35 }
 0x17e   : > { %v624_v44 = vadd.f32 %v623_v40, %v622_v36  ;;  %v638_v45 = vadd.f32 %v637_v41, %v636_v37 }
 0x17f   : > { %v639_v46 = vmul.f32 0.5, %v617_v42  ;;  %v641_v47 = vmul.f32 0.5, %v631_v43 }
 0x180   : > { %v640_v49 = vmul.f32 0.5, %v624_v44  ;;  %v642_v50 = vmul.f32 0.5, %v638_v45 }
 0x181   : > { %v643_v51 = vadd.f32 1e-05, %v639_v46  ;;  %v645_v52 = vadd.f32 1e-05, %v641_v47 }
 0x182   : > { %v644_v53 = vadd.f32 1e-05, %v640_v49  ;;  %v646_v54 = vadd.f32 1e-05, %v642_v50 }
 0x183   : > { %1009 = vrsqrt.f32 %v643_v51 }
 0x184   : > { %1011 = vrsqrt.f32 %v645_v52 }
 0x185   : > { %1013 = vrsqrt.f32 %v644_v53 }
 0x186   : > { %1015 = vrsqrt.f32 %v646_v54 }
 0x18d   : > { %v1010_v63 = vpop.eup %1009 }
 0x18e   : > { %v1012_v1 = vpop.eup %1011  ;;  %v651_v2 = vmul.f32 %v1010_v63, %v603_v10 }
 0x18f   : > { %v1014_v7 = vpop.eup %1013  ;;  %v653_v8 = vmul.f32 %v1012_v1, %v1404_v11 }
 0x190   : > { %v1016_v15 = vpop.eup %1015  ;;  %v677_v16 = vmul.f32 %v660_v62, %v651_v2  ;;  %v652_v17 = vmul.f32 %v1014_v7, %v1406_v12 }
 0x191   : > { %v679_v19 = vmul.f32 %v668_v0, %v653_v8  ;;  %v654_v20 = vmul.f32 %v1016_v15, %v1408_v13 }
 0x192   : > { %v703_v10 = vadd.f32 %v686_v3, %v677_v16  ;;  %v678_v22 = vmul.f32 %v664_v4, %v652_v17 }
 0x193   : > { %v705_v24 = vadd.f32 %v694_v9, %v679_v19  ;;  %v680_v25 = vmul.f32 %v672_v14, %v654_v20 }
 0x194   : > { %v707_v26 = vmax.f32 %v703_v10, 0.0  ;;  %v704_v27 = vadd.f32 %v690_v18, %v678_v22 }
 0x195   : > { %v709_v11 = vmax.f32 %v705_v24, 0.0  ;;  %v706_v28 = vadd.f32 %v698_v21, %v680_v25 }
 0x196   : > { %v708_v29 = vmax.f32 %v704_v27, 0.0 }
 0x197   : > { %v710_v31 = vmax.f32 %v706_v28, 0.0 }
 0x198   : > { %v899_v12 = vpack.c.bf16 %v708_v29, %v707_v26 }
 0x199   : > { %v900_v32 = vpack.c.bf16 %v710_v31, %v709_v11 }
 0x19a   : > { %v727_v33 = vrot.slane %v899_v12, %v726_v30 }
 0x19b   : > { %v734_v34 = vrot.slane %v900_v32, %v726_v30 }
 0x19d   : > { %v735_v13 = vcombine.low %v727_v33, %v734_v34 }
 0x19f   : > { %901 = vst.sshfl [vmem:[%s291_s5] sm:$0x55 pattern:$0x73625140] %v735_v13 }
 0x1a0 PF: > { %p17_p0 = scmp.ge.s32.totalorder %s1202_s20, 4   ;;  %s1457_s15 = smov %s1137_s16 }
 0x1a1   : > { %s1458_s16 = smov %s1141_s17  ;;  %s1459_s17 = smov %s1212_s23 }
 0x1a2   : > { %s1460_s18 = smov %s1202_s20  ;;  %19 = sbr.rel (!%p17_p0) target bundleno = 5 (0x5), region = 100 }
 0x1a9   :  { %765 = vsyncpa [#allocation3], 1 }
 0x1aa   :  { %767 = vsyncpa [#allocation3 + $0x1], 1 }
 0x1ab   :  { %768 = vsyncpa [#allocation5], 1 }
 0x1ac   :  { %770 = vsyncpa [#allocation5 + $0x1], 1 }

// kernel: generator_forward.8
= control target key start
LH: loop header
LB: loop body
LE: loop exit
PB: predicated region body
PF: predicated region fallthrough
CT: control target
= control target key end

     0   :  { %vm38_vm0 = vcmask 1041408   ;;  %s411_s0 = inlined_call_operand.vmem [shape: f32[98,128], index: 0, kind: input, shape index: {}]   ;;  %s412_s1 = inlined_call_operand.vmem [shape: f32[1,128], index: 1, kind: input, shape index: {}]   ;;  %s413_s2 = inlined_call_operand.vmem [shape: f32[1,128], index: 2, kind: input, shape index: {}]   ;;  %s414_s3 = inlined_call_operand.vmem [shape: bf16[98,128], index: 3, kind: output, shape index: {}]  }
   0x1   :  { %v14_v0 = vld [vmem:[%s411_s0] sm:$0xff]  ;;  %v15_v1 = vld [vmem:[%s411_s0 + $0x8] sm:$0xff]  ;;  %v16_v2 = vld [vmem:[%s411_s0 + $0x10] sm:$0xff] }
   0x2   :  { %v27_v3 = vadd.f32 %v15_v1, %v14_v0  ;;  %v17_v4 = vld [vmem:[%s411_s0 + $0x18] sm:$0xff]  ;;  %v18_v6 = vld [vmem:[%s411_s0 + $0x20] sm:$0xff]  ;;  %v19_v8 = vld [vmem:[%s411_s0 + $0x28] sm:$0xff] }
   0x3   :  { %v20_v10 = vld [vmem:[%s411_s0 + $0x30] sm:$0xff]  ;;  %v21_v12 = vld [vmem:[%s411_s0 + $0x38] sm:$0xff]  ;;  %v22_v14 = vld [vmem:[%s411_s0 + $0x40] sm:$0xff] }
   0x4   :  { %v28_v5 = vadd.f32 %v27_v3, %v16_v2  ;;  %v23_v16 = vld [vmem:[%s411_s0 + $0x48] sm:$0xff]  ;;  %v24_v18 = vld [vmem:[%s411_s0 + $0x50] sm:$0xff]  ;;  %v26_v19 = vld [vmem:[%s411_s0 + $0x60] sm:$0x3] }
   0x5   :  { %v25_v21 = vld [vmem:[%s411_s0 + $0x58] sm:$0xff]  ;;  %v39_v23 = vsel %vm38_vm0, %v26_v19, 0.0 }
   0x6   :  { %v29_v7 = vadd.f32 %v28_v5, %v17_v4 }
   0x8   :  { %v30_v9 = vadd.f32 %v29_v7, %v18_v6 }
   0xa   :  { %v31_v11 = vadd.f32 %v30_v9, %v19_v8 }
   0xc   :  { %v32_v13 = vadd.f32 %v31_v11, %v20_v10 }
   0xe   :  { %v33_v15 = vadd.f32 %v32_v13, %v21_v12 }
  0x10   :  { %v34_v17 = vadd.f32 %v33_v15, %v22_v14 }
  0x12   :  { %v35_v20 = vadd.f32 %v34_v17, %v23_v16  ;;  %v233_v17 = vld [vmem:[%s412_s1] ss:$0 sm:$0xff] }
  0x14   :  { %v36_v22 = vadd.f32 %v35_v20, %v24_v18 }
  0x16   :  { %v37_v24 = vadd.f32 %v36_v22, %v25_v21  ;;  %v234_v22 = vld [vmem:[%s413_s2] ss:$0 sm:$0xff] }
  0x18   :  { %v40_v25 = vadd.f32 %v39_v23, %v37_v24 }
  0x1a   :  { %v41_v26 = vrot.slane %v40_v25, 4 }
  0x1c   :  { %v42_v27 = vadd.f32 %v41_v26, %v40_v25 }
  0x1e   :  { %v43_v28 = vrot.slane %v42_v27, 2 }
  0x20   :  { %v44_v29 = vadd.f32 %v43_v28, %v42_v27 }
  0x22   :  { %v45_v30 = vrot.slane %v44_v29, 1 }
  0x24   :  { %v46_v31 = vadd.f32 %v45_v30, %v44_v29 }
  0x26   :  { %v48_v32 = vmul.f32 0.010204081, %v46_v31 }
  0x28   :  { %v49_v33 = vsub.f32 %v14_v0, %v48_v32  ;;  %v50_v34 = vsub.f32 %v15_v1, %v48_v32  ;;  %v51_v35 = vsub.f32 %v16_v2, %v48_v32  ;;  %v52_v36 = vsub.f32 %v17_v4, %v48_v32 }
  0x29   :  { %v53_v39 = vsub.f32 %v18_v6, %v48_v32  ;;  %v54_v41 = vsub.f32 %v19_v8, %v48_v32  ;;  %v55_v44 = vsub.f32 %v20_v10, %v48_v32  ;;  %v56_v47 = vsub.f32 %v21_v12, %v48_v32 }
  0x2a   :  { %v62_v37 = vmul.f32 %v49_v33, %v49_v33  ;;  %v63_v38 = vmul.f32 %v50_v34, %v50_v34  ;;  %v64_v40 = vmul.f32 %v51_v35, %v51_v35  ;;  %v65_v42 = vmul.f32 %v52_v36, %v52_v36 }
  0x2b   :  { %v66_v45 = vmul.f32 %v53_v39, %v53_v39  ;;  %v67_v48 = vmul.f32 %v54_v41, %v54_v41  ;;  %v358_v50 = vsub.f32 %v22_v14, %v48_v32  ;;  %v68_v51 = vmul.f32 %v55_v44, %v55_v44 }
  0x2c   :  { %v75_v43 = vadd.f32 %v63_v38, %v62_v37  ;;  %v360_v53 = vsub.f32 %v23_v16, %v48_v32  ;;  %v69_v54 = vmul.f32 %v56_v47, %v56_v47  ;;  %v362_v56 = vsub.f32 %v24_v18, %v48_v32 }
  0x2d   :  { %v70_v57 = vmul.f32 %v358_v50, %v358_v50  ;;  %v366_v59 = vsub.f32 %v26_v19, %v48_v32  ;;  %v368_v60 = vsub.f32 %v25_v21, %v48_v32 }
  0x2e   :  { %v76_v46 = vadd.f32 %v75_v43, %v64_v40  ;;  %v71_v61 = vmul.f32 %v360_v53, %v360_v53  ;;  %v72_v63 = vmul.f32 %v362_v56, %v362_v56 }
  0x2f   :  { %v74_v1 = vmul.f32 %v366_v59, %v366_v59  ;;  %v73_v2 = vmul.f32 %v368_v60, %v368_v60 }
  0x30   :  { %v77_v49 = vadd.f32 %v76_v46, %v65_v42 }
  0x31   :  { %v86_v5 = vsel %vm38_vm0, %v74_v1, 0.0 }
  0x32   :  { %v78_v52 = vadd.f32 %v77_v49, %v66_v45 }
  0x34   :  { %v79_v55 = vadd.f32 %v78_v52, %v67_v48 }
  0x36   :  { %v80_v58 = vadd.f32 %v79_v55, %v68_v51 }
  0x38   :  { %v81_v62 = vadd.f32 %v80_v58, %v69_v54 }
  0x3a   :  { %v82_v0 = vadd.f32 %v81_v62, %v70_v57 }
  0x3c   :  { %v83_v3 = vadd.f32 %v82_v0, %v71_v61 }
  0x3e   :  { %v84_v4 = vadd.f32 %v83_v3, %v72_v63 }
  0x40   :  { %v85_v6 = vadd.f32 %v84_v4, %v73_v2 }
  0x42   :  { %v87_v7 = vadd.f32 %v86_v5, %v85_v6 }
  0x44   :  { %v88_v8 = vrot.slane %v87_v7, 4 }
  0x46   :  { %v89_v9 = vadd.f32 %v88_v8, %v87_v7 }
  0x48   :  { %v90_v10 = vrot.slane %v89_v9, 2 }
  0x4a   :  { %v91_v11 = vadd.f32 %v90_v10, %v89_v9 }
  0x4c   :  { %v92_v12 = vrot.slane %v91_v11, 1 }
  0x4e   :  { %v93_v13 = vadd.f32 %v92_v12, %v91_v11 }
  0x50   :  { %v94_v14 = vmul.f32 0.010204081, %v93_v13 }
  0x52   :  { %v95_v15 = vadd.f32 1e-05, %v94_v14 }
  0x54   :  { %296 = vrsqrt.f32 %v95_v15 }
  0x5e   :  { %v297_v16 = vpop.eup %296 }
  0x5f   :  { %v97_v18 = vmul.f32 %v297_v16, %v49_v33  ;;  %v98_v19 = vmul.f32 %v297_v16, %v50_v34  ;;  %v99_v20 = vmul.f32 %v297_v16, %v51_v35  ;;  %v100_v21 = vmul.f32 %v297_v16, %v52_v36 }
  0x60   :  { %v101_v23 = vmul.f32 %v297_v16, %v53_v39  ;;  %v102_v24 = vmul.f32 %v297_v16, %v54_v41  ;;  %v103_v25 = vmul.f32 %v297_v16, %v55_v44  ;;  %v104_v26 = vmul.f32 %v297_v16, %v56_v47 }
  0x61   :  { %v117_v27 = vmul.f32 %v233_v17, %v97_v18  ;;  %v118_v28 = vmul.f32 %v233_v17, %v98_v19  ;;  %v119_v29 = vmul.f32 %v233_v17, %v99_v20  ;;  %v120_v30 = vmul.f32 %v233_v17, %v100_v21 }
  0x62   :  { %v121_v31 = vmul.f32 %v233_v17, %v101_v23  ;;  %v122_v32 = vmul.f32 %v233_v17, %v102_v24  ;;  %v123_v37 = vmul.f32 %v233_v17, %v103_v25  ;;  %v124_v38 = vmul.f32 %v233_v17, %v104_v26 }
  0x63   :  { %v137_v33 = vadd.f32 %v234_v22, %v117_v27  ;;  %v138_v34 = vadd.f32 %v234_v22, %v118_v28  ;;  %v139_v35 = vadd.f32 %v234_v22, %v119_v29  ;;  %v140_v36 = vadd.f32 %v234_v22, %v120_v30 }
  0x64   :  { %v141_v40 = vadd.f32 %v234_v22, %v121_v31  ;;  %v142_v42 = vadd.f32 %v234_v22, %v122_v32  ;;  %v143_v43 = vadd.f32 %v234_v22, %v123_v37  ;;  %v144_v45 = vadd.f32 %v234_v22, %v124_v38 }
  0x65   :  { %v150_v39 = vmax.f32 %v137_v33, 0.0  ;;  %v151_v41 = vmax.f32 %v138_v34, 0.0  ;;  %v152_v44 = vmax.f32 %v139_v35, 0.0  ;;  %v153_v46 = vmax.f32 %v140_v36, 0.0 }
  0x66   :  { %v154_v47 = vmax.f32 %v141_v40, 0.0  ;;  %v155_v48 = vmax.f32 %v142_v42, 0.0  ;;  %v156_v49 = vmax.f32 %v143_v43, 0.0  ;;  %v157_v51 = vmax.f32 %v144_v45, 0.0 }
  0x67   :  { %v264_v52 = vpack.c.bf16 %v151_v41, %v150_v39  ;;  %v269_v54 = vpack.c.bf16 %v153_v46, %v152_v44  ;;  %v105_v55 = vmul.f32 %v297_v16, %v358_v50  ;;  %v106_v57 = vmul.f32 %v297_v16, %v360_v53 }
  0x68   :  { %v274_v58 = vpack.c.bf16 %v155_v48, %v154_v47  ;;  %v279_v61 = vpack.c.bf16 %v157_v51, %v156_v49  ;;  %v107_v62 = vmul.f32 %v297_v16, %v362_v56  ;;  %v108_v63 = vmul.f32 %v297_v16, %v368_v60 }
  0x69   :  { %265 = vst [vmem:[%s414_s3] sm:$0xff] %v264_v52   ;;  %291 = vst [vmem:[%s414_s3 + $0x8] sm:$0xff] %v269_v54   ;;  %v125_v0 = vmul.f32 %v233_v17, %v105_v55  ;;  %v126_v1 = vmul.f32 %v233_v17, %v106_v57  ;;  %v109_v50 = vmul.f32 %v297_v16, %v366_v59 }
  0x6a   :  { %292 = vst [vmem:[%s414_s3 + $0x10] sm:$0xff] %v274_v58   ;;  %293 = vst [vmem:[%s414_s3 + $0x18] sm:$0xff] %v279_v61   ;;  %v127_v53 = vmul.f32 %v233_v17, %v107_v62  ;;  %v128_v56 = vmul.f32 %v233_v17, %v108_v63 }
  0x6b   :  { %v145_v60 = vadd.f32 %v234_v22, %v125_v0  ;;  %v146_v2 = vadd.f32 %v234_v22, %v126_v1  ;;  %v129_v3 = vmul.f32 %v233_v17, %v109_v50 }
  0x6c   :  { %v147_v4 = vadd.f32 %v234_v22, %v127_v53  ;;  %v148_v5 = vadd.f32 %v234_v22, %v128_v56 }
  0x6d   :  { %v158_v6 = vmax.f32 %v145_v60, 0.0  ;;  %v159_v7 = vmax.f32 %v146_v2, 0.0  ;;  %v149_v8 = vadd.f32 %v234_v22, %v129_v3 }
  0x6e   :  { %v160_v9 = vmax.f32 %v147_v4, 0.0  ;;  %v161_v59 = vmax.f32 %v148_v5, 0.0 }
  0x6f   :  { %v284_v10 = vpack.c.bf16 %v159_v7, %v158_v6  ;;  %v162_v11 = vmax.f32 %v149_v8, 0.0 }
  0x70   :  { %v289_v12 = vpack.c.bf16 %v161_v59, %v160_v9 }
  0x71   :  { %294 = vst [vmem:[%s414_s3 + $0x20] sm:$0xff] %v284_v10   ;;  %v260_v13 = vpack.c.bf16 %v162_v11, %v162_v11 }
  0x72   :  { %295 = vst [vmem:[%s414_s3 + $0x28] sm:$0xff] %v289_v12  }
  0x73   :  { %228 = vst [vmem:[%s414_s3 + $0x30] sm:$0x1] %v260_v13 }

// kernel: generator_forward.7
= control target key start
LH: loop header
LB: loop body
LE: loop exit
PB: predicated region body
PF: predicated region fallthrough
CT: control target
= control target key end

     0   :  { %7 = vsyncpa [#allocation3], 0  ;;  %s5804_s0 = inlined_call_operand.vmem [shape: bf16[2,1024], index: 0, kind: input, shape index: {}]   ;;  %s5805_s1 = inlined_call_operand.hbm [shape: bf16[1024,6272], index: 1, kind: input, shape index: {}]   ;;  %s5806_s2 = inlined_call_operand.vmem [shape: f32[2,6272], index: 2, kind: output, shape index: {}]  }
   0x1   :  { %9 = vsyncpa [#allocation3 + $0x1], 0  ;;  %s5159_s9 = smov 0   ;;  %s5161_s10 = smov 0  }
   0x2   :  { %s5163_s11 = smov 0   ;;  %s5165_s12 = smov 0  }
   0x3 LB: > { %s3805_s13 = sadd.s32 4294967295, %s5136_s12   ;;  %s5179_s14 = sadd.s32 1, %s5136_s12   ;;  %s5136_s12 = sphi %s5165_s12, %s5812_s12   ;;  %s5132_s11 = sphi %s5163_s11, %s5811_s11   ;;  %s5128_s10 = sphi %s5161_s10, %s5810_s10   ;;  %s5124_s9 = sphi %s5159_s9, %s5809_s9  }
   0x4   : > { %s40_s15 = ssub.s32 %s5136_s12, %s5179_s14  ;;  %s43_s16 = sadd.s32 1, %s5132_s11 }
   0x5   : > { %p41_p0 = scmp.eq.s32.totalorder %s40_s15, 0  ;;  %p50_p1 = scmp.ne.s32.totalorder %s5132_s11, %s5128_s10 }
   0x6   : > { %p51_p2 = scmp.eq.s32.totalorder %s5136_s12, 0  ;;  %p56_p3 = scmp.ne.s32.totalorder %s5128_s10, %s5124_s9 }
   0x7   : > { %s5189_s17 = scalar_select %p41_p0, %s5132_s11, %s43_s16  }
   0x8   : > { %p52_p4 = por %p51_p2, %p50_p1  ;;  %p57_p5 = scmp.eq.s32.totalorder %s3805_s13, 0 }
   0x9   : > { %p4393_p6 = scmp.lt.s32.totalorder %s5136_s12, 7  ;;  %s109_s19 = sand.u32 1, %s5132_s11  }
   0xa   : > { %p5194_p7 = por %p57_p5, %p56_p3  ;;  %s4385_s20 = smul.u32 3584, %s109_s19 }
   0xb   : > { %s4262_s21 = smul.u32 448, %s5136_s12  ;;  %p5200_p8 = pnand %p4393_p6, %p52_p4 }
   0xc   : > { %s113_s26 = scalar_lea.vmem [#allocation2], %s4385_s20  ;;  %s5211_s28 = scalar_lea.sflag [#allocation3], %s109_s19 }
   0xd   : > { %s5207_s25 = scalar_lea.hbm %s5805_s1, %s4262_s21  ;;  %s120_s27 = sshll.u32 %s113_s26, 4  ;;  %s5209_s27 = int_to_ptr.vmem [resolvable:$true] %s120_s27 }
   0xe   : > { %s5072_s29 = scalar_lea.hbm %s5207_s25, 57344  ;;  %p5074_p10 = pneg %p5200_p8 }
   0xf   : > { %p5073_p9 = scmp.ne.s32.totalorder %s5207_s25, %s5072_s29  ;;  %s5077_s4 = scalar_lea.hbm %s5805_s1, 401408 }
  0x10   : > { %p5078_p13 = scmp.lt.u32.totalorder %s5207_s25, %s5805_s1  ;;  %p5079_p0 = scmp.lt.u32.totalorder %s5077_s4, %s5072_s29 }
  0x11   : > { %p5075_p11 = pnand %p5074_p10, %p5073_p9  ;;  %p5081_p2 = scmp.lt.u32.totalorder %s5072_s29, %s5207_s25 }
  0x12   : > { %p5080_p1 = por %p5079_p0, %p5078_p13 }
  0x13   : > { %p5076_p12 = pneg %p5075_p11 }
  0x14   : > { %p5082_p3 = por %p5081_p2, %p5080_p1 }
  0x16   : > { %p5083_p4 = pnand %p5082_p3, %p5076_p12 }
  0x18   : > { %5086 = shalt.err (!%p5083_p4)
}
  0x19   : > { %s5087_s7 = scalar_lea.vmem %s5209_s27, 57344  ;;  %s5138_s8 = smov [#allocation2]  }
  0x1a   : > { %p5088_p5 = scmp.ne.s32.totalorder %s5209_s27, %s5087_s7  ;;  %s5092_s9 = sshll.u32 %s5138_s8, 4  ;;  %s5093_s9 = int_to_ptr.vmem [resolvable:$false] %s5092_s9 }
  0x1b   : > { %s5094_s15 = scalar_lea.vmem %s5093_s9, 114688  ;;  %p5095_p11 = scmp.lt.s32.totalorder %s5209_s27, %s5093_s9 }
  0x1c   : > { %p5090_p6 = pnand %p5088_p5, %p5074_p10  ;;  %p5096_p13 = scmp.lt.s32.totalorder %s5094_s15, %s5087_s7 }
  0x1e   : > { %p5091_p9 = pneg %p5090_p6  ;;  %p5097_p0 = por %p5096_p13, %p5095_p11 }
  0x20   : > { %p5098_p1 = pnand %p5097_p0, %p5091_p9 }
  0x22   : > { %5101 = shalt.err (!%p5098_p1)
}
  0x23   : > { %s5139_s16 = smov 3136   ;;  %s5140_s19 = smov 448  }
  0x24   : > { %s5141_s20 = smov 28   ;;  %p3810_p10 = scmp.ge.s32.totalorder %s5136_s12, 1 }
  0x25   : > { %4392 = dma.hbm_to_vmem [thread:$0]  (!%p5200_p8), %s5207_s25, 57344, %s5209_s27, %s5211_s28, %s5139_s16, %s5140_s19, %s5141_s20  }
  0x26   : > { %p128_p12 = scmp.lt.s32.totalorder %s5136_s12, 8 }
  0x28   : > { %p129_p2 = pnand %p3810_p10, %p128_p12 }
  0x29   : > { %s134_s21 = sand.u32 (!%p129_p2), 1, %s5128_s10  }
  0x2a   : > { %132 = sbr.rel (%p129_p2) target bundleno = 722 (0x2d2), region = 28  ;;  %s135_s24 = scalar_lea.sflag (!%p129_p2), [#allocation3], %s134_s21 }
  0x2b   : > { %s4386_s23 = smul.u32 (!%p129_p2), 3584, %s134_s21 }
  0x2d   : > { %s5242_s26 = scalar_lea.vmem (!%p129_p2), [#allocation2], %s4386_s23 }
  0x31   : > { %5119 = dma.done.wait (%p5194_p7), %s135_s24, 57344  }
  0x32   : > { %5121 = vsyncadd (%p5194_p7), %s135_s24, 4294909952  ;;  %v4431_v0 = vld [vmem:[%s5242_s26 + $0x4] ss:$28 sps:$4 sm:$0xff]   ;;  %v4437_v4 = vld [vmem:[%s5242_s26 + $0x3c] ss:$28 sps:$4 sm:$0xff]   ;;  %v685_v38 = vlaneseq  ;;  %s160_s25 = smul.u32 7, %s3805_s13 }
  0x33   : > { %v4433_v1 = vld [vmem:[%s5242_s26 + $0x384] ss:$28 sps:$4 sm:$0xff]   ;;  %3042 = vmatprep.subr.bf16.mxu1 %v4431_v0  ;;  %v4439_v5 = vld [vmem:[%s5242_s26 + $0x3bc] ss:$28 sps:$4 sm:$0xff]   ;;  %v4443_v8 = vld [vmem:[%s5242_s26 + $0x74] ss:$28 sps:$4 sm:$0xff]  }
  0x34   : > { %v4435_v2 = vld [vmem:[%s5242_s26] ss:$28 sps:$4 sm:$0xff]   ;;  %3083 = vmatprep.subr.bf16.mxu0 %v4433_v1  ;;  %v4441_v6 = vld [vmem:[%s5242_s26 + $0x38] ss:$28 sps:$4 sm:$0xff]   ;;  %v4447_v10 = vld [vmem:[%s5242_s26 + $0x70] ss:$28 sps:$4 sm:$0xff]  }
  0x35   : > { %v4436_v3 = vld [vmem:[%s5242_s26 + $0x380] ss:$28 sps:$4 sm:$0xff]   ;;  %3043 = vmatpush1.bf16.msra.mxu1 %v4435_v2  ;;  %v4442_v7 = vld [vmem:[%s5242_s26 + $0x3b8] ss:$28 sps:$4 sm:$0xff]   ;;  %v4448_v11 = vld [vmem:[%s5242_s26 + $0x3f0] ss:$28 sps:$4 sm:$0xff]  }
  0x36   : > { %3084 = vmatpush1.bf16.msra.mxu0 %v4436_v3  ;;  %3044 = vmatprep.subr.bf16.mxu1 %v4437_v4  ;;  %v4445_v9 = vld [vmem:[%s5242_s26 + $0x3f4] ss:$28 sps:$4 sm:$0xff]   ;;  %v4449_v12 = vld [vmem:[%s5242_s26 + $0xac] ss:$28 sps:$4 sm:$0xff]   ;;  %v4455_v16 = vld [vmem:[%s5242_s26 + $0xe4] ss:$28 sps:$4 sm:$0xff]  }
  0x37   : > { %3085 = vmatprep.subr.bf16.mxu0 %v4439_v5  ;;  %v4451_v13 = vld [vmem:[%s5242_s26 + $0x42c] ss:$28 sps:$4 sm:$0xff]   ;;  %v4457_v17 = vld [vmem:[%s5242_s26 + $0x464] ss:$28 sps:$4 sm:$0xff]   ;;  %v4461_v20 = vld [vmem:[%s5242_s26 + $0x11c] ss:$28 sps:$4 sm:$0xff]  }
  0x38   : > { %v4453_v14 = vld [vmem:[%s5242_s26 + $0xa8] ss:$28 sps:$4 sm:$0xff]   ;;  %v4459_v18 = vld [vmem:[%s5242_s26 + $0xe0] ss:$28 sps:$4 sm:$0xff]   ;;  %v4465_v22 = vld [vmem:[%s5242_s26 + $0x118] ss:$28 sps:$4 sm:$0xff]  }
  0x39   : > { %3045 = vmatpush1.bf16.msra.mxu1 %v4441_v6  ;;  %v4454_v15 = vld [vmem:[%s5242_s26 + $0x428] ss:$28 sps:$4 sm:$0xff]   ;;  %v4460_v19 = vld [vmem:[%s5242_s26 + $0x460] ss:$28 sps:$4 sm:$0xff]   ;;  %v4466_v23 = vld [vmem:[%s5242_s26 + $0x498] ss:$28 sps:$4 sm:$0xff]  }
  0x3a   : > { %3086 = vmatpush1.bf16.msra.mxu0 %v4442_v7  ;;  %3046 = vmatprep.subr.bf16.mxu1 %v4443_v8  ;;  %v4463_v21 = vld [vmem:[%s5242_s26 + $0x49c] ss:$28 sps:$4 sm:$0xff]   ;;  %v4467_v24 = vld [vmem:[%s5242_s26 + $0x154] ss:$28 sps:$4 sm:$0xff]   ;;  %v4473_v28 = vld [vmem:[%s5242_s26 + $0x18c] ss:$28 sps:$4 sm:$0xff]  }
  0x3b   : > { %3087 = vmatprep.subr.bf16.mxu0 %v4445_v9  ;;  %v4469_v25 = vld [vmem:[%s5242_s26 + $0x4d4] ss:$28 sps:$4 sm:$0xff]   ;;  %v4475_v29 = vld [vmem:[%s5242_s26 + $0x50c] ss:$28 sps:$4 sm:$0xff]   ;;  %v4479_v32 = vld [vmem:[%s5242_s26 + $0x1c4] ss:$28 sps:$4 sm:$0xff]  }
  0x3c   : > { %v4471_v26 = vld [vmem:[%s5242_s26 + $0x150] ss:$28 sps:$4 sm:$0xff]   ;;  %v4477_v30 = vld [vmem:[%s5242_s26 + $0x188] ss:$28 sps:$4 sm:$0xff]   ;;  %v4483_v34 = vld [vmem:[%s5242_s26 + $0x1c0] ss:$28 sps:$4 sm:$0xff]  }
  0x3d   : > { %3047 = vmatpush1.bf16.msra.mxu1 %v4447_v10  ;;  %v4472_v27 = vld [vmem:[%s5242_s26 + $0x4d0] ss:$28 sps:$4 sm:$0xff]   ;;  %v4478_v31 = vld [vmem:[%s5242_s26 + $0x508] ss:$28 sps:$4 sm:$0xff]   ;;  %v4484_v35 = vld [vmem:[%s5242_s26 + $0x540] ss:$28 sps:$4 sm:$0xff]  }
  0x3e   : > { %3088 = vmatpush1.bf16.msra.mxu0 %v4448_v11  ;;  %3048 = vmatprep.subr.bf16.mxu1 %v4449_v12  ;;  %v4481_v33 = vld [vmem:[%s5242_s26 + $0x544] ss:$28 sps:$4 sm:$0xff]   ;;  %v5142_v36 = vmov 1966171168   ;;  %v4485_v39 = vld [vmem:[%s5242_s26 + $0x1fc] ss:$28 sps:$4 sm:$0xff]  }
  0x3f   : > { %3089 = vmatprep.subr.bf16.mxu0 %v4451_v13  ;;  %v683_v37 = vunpack.c.l.s4 %v5142_v36  ;;  %v4487_v40 = vld [vmem:[%s5242_s26 + $0x57c] ss:$28 sps:$4 sm:$0xff]   ;;  %v5287_v43 = vshrl.u32 %v685_v38, 7  ;;  %v4491_v45 = vld [vmem:[%s5242_s26 + $0x234] ss:$28 sps:$4 sm:$0xff]   ;;  %v167_v52 = vld [vmem:[%s5804_s0] sm:$0xff] }
  0x40   : > { %v4489_v41 = vld [vmem:[%s5242_s26 + $0x1f8] ss:$28 sps:$4 sm:$0xff]   ;;  %v4495_v47 = vld [vmem:[%s5242_s26 + $0x230] ss:$28 sps:$4 sm:$0xff]   ;;  %v4501_v53 = vld [vmem:[%s5242_s26 + $0x268] ss:$28 sps:$4 sm:$0xff]   ;;  %v681_v55 = vcombine.high %v167_v52, %v167_v52 }
  0x41   : > { %3049 = vmatpush1.bf16.msra.mxu1 %v4453_v14  ;;  %v684_v42 = vunpack.c.0.s8 %v683_v37  ;;  %v4490_v44 = vld [vmem:[%s5242_s26 + $0x578] ss:$28 sps:$4 sm:$0xff]   ;;  %v4496_v48 = vld [vmem:[%s5242_s26 + $0x5b0] ss:$28 sps:$4 sm:$0xff]   ;;  %v4502_v56 = vld [vmem:[%s5242_s26 + $0x5e8] ss:$28 sps:$4 sm:$0xff]  }
  0x42   : > { %3090 = vmatpush1.bf16.msra.mxu0 %v4454_v15  ;;  %3050 = vmatprep.subr.bf16.mxu1 %v4455_v16  ;;  %v4493_v46 = vld [vmem:[%s5242_s26 + $0x5b4] ss:$28 sps:$4 sm:$0xff]   ;;  %v4497_v50 = vld [vmem:[%s5242_s26 + $0x26c] ss:$28 sps:$4 sm:$0xff]   ;;  %v4503_v57 = vld [vmem:[%s5242_s26 + $0x2a4] ss:$28 sps:$4 sm:$0xff]  }
  0x43   : > { %3091 = vmatprep.subr.bf16.mxu0 %v4457_v17  ;;  %v5295_v49 = vsub.s32 %v684_v42, %v5287_v43  ;;  %v4499_v51 = vld [vmem:[%s5242_s26 + $0x5ec] ss:$28 sps:$4 sm:$0xff]   ;;  %v4505_v58 = vld [vmem:[%s5242_s26 + $0x624] ss:$28 sps:$4 sm:$0xff]   ;;  %v4509_v1 = vld [vmem:[%s5242_s26 + $0x2dc] ss:$28 sps:$4 sm:$0xff]  }
  0x44   : > { %v4507_v61 = vld [vmem:[%s5242_s26 + $0x2a0] ss:$28 sps:$4 sm:$0xff]   ;;  %v4513_v4 = vld [vmem:[%s5242_s26 + $0x2d8] ss:$28 sps:$4 sm:$0xff]   ;;  %v4519_v8 = vld [vmem:[%s5242_s26 + $0x310] ss:$28 sps:$4 sm:$0xff]  }
  0x45   : > { %3051 = vmatpush1.bf16.msra.mxu1 %v4459_v18  ;;  %v688_v54 = vrot.slane %v167_v52, %v5295_v49  ;;  %v695_v60 = vrot.slane %v681_v55, %v5295_v49  ;;  %v4508_v0 = vld [vmem:[%s5242_s26 + $0x620] ss:$28 sps:$4 sm:$0xff]   ;;  %v4514_v5 = vld [vmem:[%s5242_s26 + $0x658] ss:$28 sps:$4 sm:$0xff]   ;;  %v4520_v9 = vld [vmem:[%s5242_s26 + $0x690] ss:$28 sps:$4 sm:$0xff]  }
  0x46   : > { %3092 = vmatpush1.bf16.msra.mxu0 %v4460_v19  ;;  %3052 = vmatprep.subr.bf16.mxu1 %v4461_v20  ;;  %v4511_v2 = vld [vmem:[%s5242_s26 + $0x65c] ss:$28 sps:$4 sm:$0xff]   ;;  %v4515_v6 = vld [vmem:[%s5242_s26 + $0x314] ss:$28 sps:$4 sm:$0xff]   ;;  %v4521_v10 = vld [vmem:[%s5242_s26 + $0x34c] ss:$28 sps:$4 sm:$0xff]  }
  0x47   : > { %3093 = vmatprep.subr.bf16.mxu0 %v4463_v21  ;;  %v696_v59 = vcombine.high %v688_v54, %v688_v54  ;;  %v5313_v63 = vrot.slane %v695_v60, %v5295_v49  ;;  %v4517_v7 = vld [vmem:[%s5242_s26 + $0x694] ss:$28 sps:$4 sm:$0xff]   ;;  %v4523_v11 = vld [vmem:[%s5242_s26 + $0x6cc] ss:$28 sps:$4 sm:$0xff]   ;;  %v5334_v13 = vrot.slane %v688_v54, %v5295_v49  ;;  %v4529_v15 = vld [vmem:[%s5242_s26 + $0x704] ss:$28 sps:$4 sm:$0xff]   ;;  %v697_v17 = vcombine.high %v695_v60, %v695_v60 }
  0x48   : > { %v4525_v12 = vld [vmem:[%s5242_s26 + $0x348] ss:$28 sps:$4 sm:$0xff]   ;;  %v4527_v18 = vld [vmem:[%s5242_s26 + $0x700] ss:$28 sps:$4 sm:$0xff]   ;;  %v4565_v42 = vld [vmem:[%s5242_s26 + $0x854] ss:$28 sps:$4 sm:$0xff]  }
  0x49   : > { %3053 = vmatpush1.bf16.msra.mxu1 %v4465_v22  ;;  %v5310_v62 = vrot.slane %v696_v59, %v5295_v49  ;;  %v4526_v14 = vld [vmem:[%s5242_s26 + $0x6c8] ss:$28 sps:$4 sm:$0xff]   ;;  %v5342_v19 = vcombine.high %v5334_v13, %v5334_v13  ;;  %v4535_v21 = vld [vmem:[%s5242_s26 + $0x73c] ss:$28 sps:$4 sm:$0xff]   ;;  %v4589_v59 = vld [vmem:[%s5242_s26 + $0x934] ss:$28 sps:$4 sm:$0xff]  }
  0x4a   : > { %3094 = vmatpush1.bf16.msra.mxu0 %v4466_v23  ;;  %3054 = vmatprep.subr.bf16.mxu1 %v4467_v24  ;;  %v4532_v16 = vld [vmem:[%s5242_s26 + $0xc] ss:$28 sps:$4 sm:$0xff]   ;;  %v4538_v22 = vld [vmem:[%s5242_s26 + $0x44] ss:$28 sps:$4 sm:$0xff]   ;;  %v5348_v23 = vrot.slane %v697_v17, %v5295_v49  ;;  %v4533_v24 = vld [vmem:[%s5242_s26 + $0x738] ss:$28 sps:$4 sm:$0xff]  }
  0x4b   : > { %3095 = vmatprep.subr.bf16.mxu0 %v4469_v25  ;;  %v5320_v3 = vcombine.high %v5310_v62, %v5310_v62  ;;  %3074 = vmatprep.mubr.bf16.mxu1 %v5310_v62  ;;  %v4530_v20 = vld [vmem:[%s5242_s26 + $0x8] ss:$28 sps:$4 sm:$0xff]   ;;  %v4536_v25 = vld [vmem:[%s5242_s26 + $0x40] ss:$28 sps:$4 sm:$0xff]   ;;  %v4611_v17 = vld [vmem:[%s5242_s26 + $0xa10] ss:$28 sps:$4 sm:$0xff]  }
  0x4c   : > { %v4551_v36 = vld [vmem:[%s5242_s26 + $0x7e0] ss:$28 sps:$4 sm:$0xff]   ;;  %v4554_v37 = vld [vmem:[%s5242_s26 + $0xe8] ss:$28 sps:$4 sm:$0xff]   ;;  %p161_p7 = scmp.lt.s32.totalorder %s160_s25, 48 }
  0x4d   : > { %3055 = vmatpush1.bf16.msra.mxu1 %v4471_v26  ;;  %3115 = vmatprep.mubr.bf16.mxu0 %v5320_v3  ;;  %v4541_v26 = vld [vmem:[%s5242_s26 + $0x774] ss:$28 sps:$4 sm:$0xff]   ;;  %v4559_v38 = vld [vmem:[%s5242_s26 + $0x81c] ss:$28 sps:$4 sm:$0xff]   ;;  %v4569_v49 = vld [vmem:[%s5242_s26 + $0x888] ss:$28 sps:$4 sm:$0xff]  }
  0x4e   : > { %3096 = vmatpush1.bf16.msra.mxu0 %v4472_v27  ;;  %3056 = vmatprep.subr.bf16.mxu1 %v4473_v28  ;;  %v4544_v27 = vld [vmem:[%s5242_s26 + $0x7c] ss:$28 sps:$4 sm:$0xff]   ;;  %v4539_v28 = vld [vmem:[%s5242_s26 + $0x770] ss:$28 sps:$4 sm:$0xff]   ;;  %v4578_v54 = vld [vmem:[%s5242_s26 + $0x1c8] ss:$28 sps:$4 sm:$0xff]  }
  0x4f   : > { %3097 = vmatprep.subr.bf16.mxu0 %v4475_v29  ;;  %v4542_v29 = vld [vmem:[%s5242_s26 + $0x78] ss:$28 sps:$4 sm:$0xff]   ;;  %v4580_v52 = vld [vmem:[%s5242_s26 + $0x1cc] ss:$28 sps:$4 sm:$0xff]   ;;  %s5814_s25 = smov (!%p161_p7, %s160_s25), 48 }
  0x50   : > { %v4583_v55 = vld [vmem:[%s5242_s26 + $0x8fc] ss:$28 sps:$4 sm:$0xff]   ;;  %s3811_s27 = sshll.u32 %s5814_s25, 1 }
  0x51   : > { %3057 = vmatpush1.bf16.msra.mxu1 %v4477_v30  ;;  %v4547_v30 = vld [vmem:[%s5242_s26 + $0x7ac] ss:$28 sps:$4 sm:$0xff]   ;;  %v4592_v60 = vld [vmem:[%s5242_s26 + $0x23c] ss:$28 sps:$4 sm:$0xff]   ;;  %s5787_s28 = scalar_lea.vmem %s5806_s2, %s3811_s27 }
  0x52   : > { %3098 = vmatpush1.bf16.msra.mxu0 %v4478_v31  ;;  %3058 = vmatprep.subr.bf16.mxu1 %v4479_v32  ;;  %v4550_v31 = vld [vmem:[%s5242_s26 + $0xb4] ss:$28 sps:$4 sm:$0xff]   ;;  %v4545_v32 = vld [vmem:[%s5242_s26 + $0x7a8] ss:$28 sps:$4 sm:$0xff]  }
  0x53   : > { %3099 = vmatprep.subr.bf16.mxu0 %v4481_v33  ;;  %v4548_v33 = vld [vmem:[%s5242_s26 + $0xb0] ss:$28 sps:$4 sm:$0xff]  }
  0x55   : > { %3059 = vmatpush1.bf16.msra.mxu1 %v4483_v34  ;;  %v4553_v34 = vld [vmem:[%s5242_s26 + $0x7e4] ss:$28 sps:$4 sm:$0xff]  }
  0x56   : > { %3100 = vmatpush1.bf16.msra.mxu0 %v4484_v35  ;;  %3060 = vmatprep.subr.bf16.mxu1 %v4485_v39  ;;  %v4556_v35 = vld [vmem:[%s5242_s26 + $0xec] ss:$28 sps:$4 sm:$0xff]   ;;  %v4562_v39 = vld [vmem:[%s5242_s26 + $0x124] ss:$28 sps:$4 sm:$0xff]  }
  0x57   : > { %3101 = vmatprep.subr.bf16.mxu0 %v4487_v40  ;;  %v4557_v40 = vld [vmem:[%s5242_s26 + $0x818] ss:$28 sps:$4 sm:$0xff]  }
  0x59   : > { %3061 = vmatpush1.bf16.msra.mxu1 %v4489_v41  ;;  %v4560_v41 = vld [vmem:[%s5242_s26 + $0x120] ss:$28 sps:$4 sm:$0xff]  }
  0x5a   : > { %3102 = vmatpush1.bf16.msra.mxu0 %v4490_v44  ;;  %3062 = vmatprep.subr.bf16.mxu1 %v4491_v45  ;;  %v4568_v44 = vld [vmem:[%s5242_s26 + $0x15c] ss:$28 sps:$4 sm:$0xff]   ;;  %v4563_v45 = vld [vmem:[%s5242_s26 + $0x850] ss:$28 sps:$4 sm:$0xff]  }
  0x5b   : > { %3103 = vmatprep.subr.bf16.mxu0 %v4493_v46  ;;  %v4566_v46 = vld [vmem:[%s5242_s26 + $0x158] ss:$28 sps:$4 sm:$0xff]  }
  0x5d   : > { %3063 = vmatpush1.bf16.msra.mxu1 %v4495_v47  ;;  %v4571_v47 = vld [vmem:[%s5242_s26 + $0x88c] ss:$28 sps:$4 sm:$0xff]  }
  0x5e   : > { %3104 = vmatpush1.bf16.msra.mxu0 %v4496_v48  ;;  %3064 = vmatprep.subr.bf16.mxu1 %v4497_v50  ;;  %v4574_v48 = vld [vmem:[%s5242_s26 + $0x194] ss:$28 sps:$4 sm:$0xff]  }
  0x5f   : > { %3105 = vmatprep.subr.bf16.mxu0 %v4499_v51  ;;  %v4572_v50 = vld [vmem:[%s5242_s26 + $0x190] ss:$28 sps:$4 sm:$0xff]   ;;  %v4577_v51 = vld [vmem:[%s5242_s26 + $0x8c4] ss:$28 sps:$4 sm:$0xff]  }
  0x61   : > { %3065 = vmatpush1.bf16.msra.mxu1 %v4501_v53  ;;  %v4575_v53 = vld [vmem:[%s5242_s26 + $0x8c0] ss:$28 sps:$4 sm:$0xff]  }
  0x62   : > { %3106 = vmatpush1.bf16.msra.mxu0 %v4502_v56  ;;  %3066 = vmatprep.subr.bf16.mxu1 %v4503_v57  ;;  %v4586_v56 = vld [vmem:[%s5242_s26 + $0x204] ss:$28 sps:$4 sm:$0xff]   ;;  %v4581_v57 = vld [vmem:[%s5242_s26 + $0x8f8] ss:$28 sps:$4 sm:$0xff]  }
  0x63   : > { %3107 = vmatprep.subr.bf16.mxu0 %v4505_v58  ;;  %v4584_v58 = vld [vmem:[%s5242_s26 + $0x200] ss:$28 sps:$4 sm:$0xff]  }
  0x65   : > { %3067 = vmatpush1.bf16.msra.mxu1 %v4507_v61  ;;  %v4587_v61 = vld [vmem:[%s5242_s26 + $0x930] ss:$28 sps:$4 sm:$0xff]  }
  0x66   : > { %3108 = vmatpush1.bf16.msra.mxu0 %v4508_v0  ;;  %3068 = vmatprep.subr.bf16.mxu1 %v4509_v1  ;;  %v4590_v0 = vld [vmem:[%s5242_s26 + $0x238] ss:$28 sps:$4 sm:$0xff]   ;;  %v4595_v1 = vld [vmem:[%s5242_s26 + $0x96c] ss:$28 sps:$4 sm:$0xff]  }
  0x67   : > { %3109 = vmatprep.subr.bf16.mxu0 %v4511_v2  ;;  %v4598_v2 = vld [vmem:[%s5242_s26 + $0x274] ss:$28 sps:$4 sm:$0xff]  }
  0x69   : > { %3069 = vmatpush1.bf16.msra.mxu1 %v4513_v4  ;;  %v4593_v4 = vld [vmem:[%s5242_s26 + $0x968] ss:$28 sps:$4 sm:$0xff]  }
  0x6a   : > { %3110 = vmatpush1.bf16.msra.mxu0 %v4514_v5  ;;  %3070 = vmatprep.subr.bf16.mxu1 %v4515_v6  ;;  %v4596_v5 = vld [vmem:[%s5242_s26 + $0x270] ss:$28 sps:$4 sm:$0xff]   ;;  %v4601_v6 = vld [vmem:[%s5242_s26 + $0x9a4] ss:$28 sps:$4 sm:$0xff]  }
  0x6b   : > { %3111 = vmatprep.subr.bf16.mxu0 %v4517_v7  ;;  %v4604_v7 = vld [vmem:[%s5242_s26 + $0x2ac] ss:$28 sps:$4 sm:$0xff]  }
  0x6d   : > { %3071 = vmatpush1.bf16.msra.mxu1 %v4519_v8  ;;  %v4599_v8 = vld [vmem:[%s5242_s26 + $0x9a0] ss:$28 sps:$4 sm:$0xff]  }
  0x6e   : > { %3112 = vmatpush1.bf16.msra.mxu0 %v4520_v9  ;;  %3072 = vmatprep.subr.bf16.mxu1 %v4521_v10  ;;  %v4602_v9 = vld [vmem:[%s5242_s26 + $0x2a8] ss:$28 sps:$4 sm:$0xff]   ;;  %v4607_v10 = vld [vmem:[%s5242_s26 + $0x9dc] ss:$28 sps:$4 sm:$0xff]  }
  0x6f   : > { %3113 = vmatprep.subr.bf16.mxu0 %v4523_v11  ;;  %v4610_v11 = vld [vmem:[%s5242_s26 + $0x2e4] ss:$28 sps:$4 sm:$0xff]  }
  0x71   : > { %3073 = vmatpush1.bf16.msra.mxu1 %v4525_v12  ;;  %v4605_v12 = vld [vmem:[%s5242_s26 + $0x9d8] ss:$28 sps:$4 sm:$0xff]  }
  0x72   : > { %3114 = vmatpush1.bf16.msra.mxu0 %v4526_v14  ;;  %3206 = vmatprep.subr.bf16.mxu1 %v4532_v16  ;;  %v4608_v14 = vld [vmem:[%s5242_s26 + $0x2e0] ss:$28 sps:$4 sm:$0xff]  }
  0x73   : > { %3124 = vmatprep.subr.bf16.mxu0 %v4529_v15  ;;  %v4613_v15 = vld [vmem:[%s5242_s26 + $0xa14] ss:$28 sps:$4 sm:$0xff]   ;;  %v4616_v16 = vld [vmem:[%s5242_s26 + $0x31c] ss:$28 sps:$4 sm:$0xff]  }
  0x74   : > { %3075 = vmatmul.mubr.bf16.vlgmr.msra.gmra.mrb[0].mxu1 %v5334_v13 }
  0x75   : > { %3116 = vmatmul.mubr.bf16.vlgmr.msra.gmra.mrb[0].mxu0 %v5342_v19  ;;  %3207 = vmatpush1.bf16.msra.mxu1 %v4530_v20  ;;  %v4619_v20 = vld [vmem:[%s5242_s26 + $0xa4c] ss:$28 sps:$4 sm:$0xff]  }
  0x76   : > { %3125 = vmatpush1.bf16.msra.mxu0 %v4527_v18  ;;  %3208 = vmatprep.subr.bf16.mxu1 %v4538_v22  ;;  %v4614_v18 = vld [vmem:[%s5242_s26 + $0x318] ss:$28 sps:$4 sm:$0xff]   ;;  %v4617_v22 = vld [vmem:[%s5242_s26 + $0xa48] ss:$28 sps:$4 sm:$0xff]  }
  0x77   : > { %3126 = vmatprep.subr.bf16.mxu0 %v4535_v21  ;;  %3156 = vmatprep.mubr.bf16.mxu0 %v5348_v23  ;;  %v4622_v21 = vld [vmem:[%s5242_s26 + $0x354] ss:$28 sps:$4 sm:$0xff]  }
  0x78   : > { %3238 = vmatprep.mubr.bf16.mxu1 %v5310_v62 }
  0x79   : > { %3209 = vmatpush1.bf16.msra.mxu1 %v4536_v25  ;;  %v4626_v25 = vld [vmem:[%s5242_s26 + $0xa84] ss:$28 sps:$4 sm:$0xff]  }
  0x7a   : > { %3127 = vmatpush1.bf16.msra.mxu0 %v4533_v24  ;;  %3210 = vmatprep.subr.bf16.mxu1 %v4544_v27  ;;  %v4620_v24 = vld [vmem:[%s5242_s26 + $0x350] ss:$28 sps:$4 sm:$0xff]   ;;  %v4624_v27 = vld [vmem:[%s5242_s26 + $0xa80] ss:$28 sps:$4 sm:$0xff]  }
  0x7b   : > { %3128 = vmatprep.subr.bf16.mxu0 %v4541_v26  ;;  %v4629_v26 = vld [vmem:[%s5242_s26 + $0x38c] ss:$28 sps:$4 sm:$0xff]  }
  0x7d   : > { %3211 = vmatpush1.bf16.msra.mxu1 %v4542_v29  ;;  %v4632_v29 = vld [vmem:[%s5242_s26 + $0xabc] ss:$28 sps:$4 sm:$0xff]  }
  0x7e   : > { %3129 = vmatpush1.bf16.msra.mxu0 %v4539_v28  ;;  %3212 = vmatprep.subr.bf16.mxu1 %v4550_v31  ;;  %v4627_v28 = vld [vmem:[%s5242_s26 + $0x388] ss:$28 sps:$4 sm:$0xff]   ;;  %v5420_v31 = vcombine.high %v5348_v23, %v5348_v23 }
  0x7f   : > { %3130 = vmatprep.subr.bf16.mxu0 %v4547_v30  ;;  %v4635_v30 = vld [vmem:[%s5242_s26 + $0x3c4] ss:$28 sps:$4 sm:$0xff]  }
  0x81   : > { %3213 = vmatpush1.bf16.msra.mxu1 %v4548_v33  ;;  %v4633_v33 = vld [vmem:[%s5242_s26 + $0x3c0] ss:$28 sps:$4 sm:$0xff]  }
  0x82   : > { %3131 = vmatpush1.bf16.msra.mxu0 %v4545_v32  ;;  %3214 = vmatprep.subr.bf16.mxu1 %v4556_v35  ;;  %v4630_v32 = vld [vmem:[%s5242_s26 + $0xab8] ss:$28 sps:$4 sm:$0xff]  }
  0x83   : > { %3132 = vmatprep.subr.bf16.mxu0 %v4553_v34  ;;  %v4638_v34 = vld [vmem:[%s5242_s26 + $0xaf4] ss:$28 sps:$4 sm:$0xff]   ;;  %v4641_v35 = vld [vmem:[%s5242_s26 + $0x3fc] ss:$28 sps:$4 sm:$0xff]  }
  0x85   : > { %3215 = vmatpush1.bf16.msra.mxu1 %v4554_v37  ;;  %v4639_v37 = vld [vmem:[%s5242_s26 + $0x3f8] ss:$28 sps:$4 sm:$0xff]  }
  0x86   : > { %3133 = vmatpush1.bf16.msra.mxu0 %v4551_v36  ;;  %3216 = vmatprep.subr.bf16.mxu1 %v4562_v39  ;;  %v4636_v36 = vld [vmem:[%s5242_s26 + $0xaf0] ss:$28 sps:$4 sm:$0xff]  }
  0x87   : > { %3134 = vmatprep.subr.bf16.mxu0 %v4559_v38  ;;  %v4644_v38 = vld [vmem:[%s5242_s26 + $0xb2c] ss:$28 sps:$4 sm:$0xff]   ;;  %v4647_v39 = vld [vmem:[%s5242_s26 + $0x434] ss:$28 sps:$4 sm:$0xff]  }
  0x89   : > { %3217 = vmatpush1.bf16.msra.mxu1 %v4560_v41  ;;  %v4645_v41 = vld [vmem:[%s5242_s26 + $0x430] ss:$28 sps:$4 sm:$0xff]  }
  0x8a   : > { %3135 = vmatpush1.bf16.msra.mxu0 %v4557_v40  ;;  %3218 = vmatprep.subr.bf16.mxu1 %v4568_v44  ;;  %v4642_v40 = vld [vmem:[%s5242_s26 + $0xb28] ss:$28 sps:$4 sm:$0xff]  }
  0x8b   : > { %3136 = vmatprep.subr.bf16.mxu0 %v4565_v42  ;;  %v4650_v42 = vld [vmem:[%s5242_s26 + $0xb64] ss:$28 sps:$4 sm:$0xff]   ;;  %v4653_v44 = vld [vmem:[%s5242_s26 + $0x46c] ss:$28 sps:$4 sm:$0xff]  }
  0x8d   : > { %3219 = vmatpush1.bf16.msra.mxu1 %v4566_v46  ;;  %v4651_v46 = vld [vmem:[%s5242_s26 + $0x468] ss:$28 sps:$4 sm:$0xff]  }
  0x8e   : > { %3137 = vmatpush1.bf16.msra.mxu0 %v4563_v45  ;;  %3220 = vmatprep.subr.bf16.mxu1 %v4574_v48  ;;  %v4648_v45 = vld [vmem:[%s5242_s26 + $0xb60] ss:$28 sps:$4 sm:$0xff]  }
  0x8f   : > { %3138 = vmatprep.subr.bf16.mxu0 %v4571_v47  ;;  %v4656_v47 = vld [vmem:[%s5242_s26 + $0xb9c] ss:$28 sps:$4 sm:$0xff]   ;;  %v4659_v48 = vld [vmem:[%s5242_s26 + $0x4a4] ss:$28 sps:$4 sm:$0xff]  }
  0x91   : > { %3221 = vmatpush1.bf16.msra.mxu1 %v4572_v50  ;;  %v4657_v50 = vld [vmem:[%s5242_s26 + $0x4a0] ss:$28 sps:$4 sm:$0xff]  }
  0x92   : > { %3139 = vmatpush1.bf16.msra.mxu0 %v4569_v49  ;;  %3222 = vmatprep.subr.bf16.mxu1 %v4580_v52  ;;  %v4654_v49 = vld [vmem:[%s5242_s26 + $0xb98] ss:$28 sps:$4 sm:$0xff]  }
  0x93   : > { %3140 = vmatprep.subr.bf16.mxu0 %v4577_v51  ;;  %v4662_v51 = vld [vmem:[%s5242_s26 + $0xbd4] ss:$28 sps:$4 sm:$0xff]   ;;  %v4665_v52 = vld [vmem:[%s5242_s26 + $0x4dc] ss:$28 sps:$4 sm:$0xff]  }
  0x95   : > { %3223 = vmatpush1.bf16.msra.mxu1 %v4578_v54  ;;  %v4663_v54 = vld [vmem:[%s5242_s26 + $0x4d8] ss:$28 sps:$4 sm:$0xff]  }
  0x96   : > { %3141 = vmatpush1.bf16.msra.mxu0 %v4575_v53  ;;  %3224 = vmatprep.subr.bf16.mxu1 %v4586_v56  ;;  %v4660_v53 = vld [vmem:[%s5242_s26 + $0xbd0] ss:$28 sps:$4 sm:$0xff]  }
  0x97   : > { %3142 = vmatprep.subr.bf16.mxu0 %v4583_v55  ;;  %v4668_v55 = vld [vmem:[%s5242_s26 + $0xc0c] ss:$28 sps:$4 sm:$0xff]   ;;  %v4671_v56 = vld [vmem:[%s5242_s26 + $0x514] ss:$28 sps:$4 sm:$0xff]  }
  0x99   : > { %3225 = vmatpush1.bf16.msra.mxu1 %v4584_v58  ;;  %v4669_v58 = vld [vmem:[%s5242_s26 + $0x510] ss:$28 sps:$4 sm:$0xff]  }
  0x9a   : > { %3143 = vmatpush1.bf16.msra.mxu0 %v4581_v57  ;;  %3226 = vmatprep.subr.bf16.mxu1 %v4592_v60  ;;  %v4666_v57 = vld [vmem:[%s5242_s26 + $0xc08] ss:$28 sps:$4 sm:$0xff]  }
  0x9b   : > { %3144 = vmatprep.subr.bf16.mxu0 %v4589_v59  ;;  %v4674_v59 = vld [vmem:[%s5242_s26 + $0xc44] ss:$28 sps:$4 sm:$0xff]   ;;  %v4677_v60 = vld [vmem:[%s5242_s26 + $0x54c] ss:$28 sps:$4 sm:$0xff]  }
  0x9d   : > { %3227 = vmatpush1.bf16.msra.mxu1 %v4590_v0  ;;  %v4675_v0 = vld [vmem:[%s5242_s26 + $0x548] ss:$28 sps:$4 sm:$0xff]  }
  0x9e   : > { %3145 = vmatpush1.bf16.msra.mxu0 %v4587_v61  ;;  %3228 = vmatprep.subr.bf16.mxu1 %v4598_v2  ;;  %v4672_v61 = vld [vmem:[%s5242_s26 + $0xc40] ss:$28 sps:$4 sm:$0xff]  }
  0x9f   : > { %3146 = vmatprep.subr.bf16.mxu0 %v4595_v1  ;;  %v4680_v1 = vld [vmem:[%s5242_s26 + $0xc7c] ss:$28 sps:$4 sm:$0xff]   ;;  %v4683_v2 = vld [vmem:[%s5242_s26 + $0x584] ss:$28 sps:$4 sm:$0xff]  }
  0xa1   : > { %3229 = vmatpush1.bf16.msra.mxu1 %v4596_v5  ;;  %v4681_v5 = vld [vmem:[%s5242_s26 + $0x580] ss:$28 sps:$4 sm:$0xff]  }
  0xa2   : > { %3147 = vmatpush1.bf16.msra.mxu0 %v4593_v4  ;;  %3230 = vmatprep.subr.bf16.mxu1 %v4604_v7  ;;  %v4678_v4 = vld [vmem:[%s5242_s26 + $0xc78] ss:$28 sps:$4 sm:$0xff]  }
  0xa3   : > { %3148 = vmatprep.subr.bf16.mxu0 %v4601_v6  ;;  %v4686_v6 = vld [vmem:[%s5242_s26 + $0xcb4] ss:$28 sps:$4 sm:$0xff]   ;;  %v4689_v7 = vld [vmem:[%s5242_s26 + $0x5bc] ss:$28 sps:$4 sm:$0xff]  }
  0xa5   : > { %3231 = vmatpush1.bf16.msra.mxu1 %v4602_v9  ;;  %v4687_v9 = vld [vmem:[%s5242_s26 + $0x5b8] ss:$28 sps:$4 sm:$0xff]  }
  0xa6   : > { %3149 = vmatpush1.bf16.msra.mxu0 %v4599_v8  ;;  %3232 = vmatprep.subr.bf16.mxu1 %v4610_v11  ;;  %v4684_v8 = vld [vmem:[%s5242_s26 + $0xcb0] ss:$28 sps:$4 sm:$0xff]  }
  0xa7   : > { %3150 = vmatprep.subr.bf16.mxu0 %v4607_v10  ;;  %v4692_v10 = vld [vmem:[%s5242_s26 + $0xcec] ss:$28 sps:$4 sm:$0xff]   ;;  %v4695_v11 = vld [vmem:[%s5242_s26 + $0x5f4] ss:$28 sps:$4 sm:$0xff]  }
  0xa9   : > { %3233 = vmatpush1.bf16.msra.mxu1 %v4608_v14  ;;  %v4693_v14 = vld [vmem:[%s5242_s26 + $0x5f0] ss:$28 sps:$4 sm:$0xff]  }
  0xaa   : > { %3151 = vmatpush1.bf16.msra.mxu0 %v4605_v12  ;;  %3234 = vmatprep.subr.bf16.mxu1 %v4616_v16  ;;  %v4690_v12 = vld [vmem:[%s5242_s26 + $0xce8] ss:$28 sps:$4 sm:$0xff]  }
  0xab   : > { %3152 = vmatprep.subr.bf16.mxu0 %v4613_v15  ;;  %v4698_v15 = vld [vmem:[%s5242_s26 + $0xd24] ss:$28 sps:$4 sm:$0xff]   ;;  %v4701_v16 = vld [vmem:[%s5242_s26 + $0x62c] ss:$28 sps:$4 sm:$0xff]  }
  0xad   : > { %3235 = vmatpush1.bf16.msra.mxu1 %v4614_v18  ;;  %v4699_v18 = vld [vmem:[%s5242_s26 + $0x628] ss:$28 sps:$4 sm:$0xff]  }
  0xae   : > { %3153 = vmatpush1.bf16.msra.mxu0 %v4611_v17  ;;  %3236 = vmatprep.subr.bf16.mxu1 %v4622_v21  ;;  %v4696_v17 = vld [vmem:[%s5242_s26 + $0xd20] ss:$28 sps:$4 sm:$0xff]  }
  0xaf   : > { %3154 = vmatprep.subr.bf16.mxu0 %v4619_v20  ;;  %v4704_v20 = vld [vmem:[%s5242_s26 + $0xd5c] ss:$28 sps:$4 sm:$0xff]   ;;  %v4707_v21 = vld [vmem:[%s5242_s26 + $0x664] ss:$28 sps:$4 sm:$0xff]  }
  0xb1   : > { %3237 = vmatpush1.bf16.msra.mxu1 %v4620_v24  ;;  %v4705_v24 = vld [vmem:[%s5242_s26 + $0x660] ss:$28 sps:$4 sm:$0xff]  }
  0xb2   : > { %3155 = vmatpush1.bf16.msra.mxu0 %v4617_v22  ;;  %3247 = vmatprep.subr.bf16.mxu1 %v4629_v26  ;;  %v4702_v22 = vld [vmem:[%s5242_s26 + $0xd58] ss:$28 sps:$4 sm:$0xff]  }
  0xb3   : > { %3165 = vmatprep.subr.bf16.mxu0 %v4626_v25  ;;  %v4710_v25 = vld [vmem:[%s5242_s26 + $0xd94] ss:$28 sps:$4 sm:$0xff]   ;;  %v4713_v26 = vld [vmem:[%s5242_s26 + $0x69c] ss:$28 sps:$4 sm:$0xff]  }
  0xb4   : > { %3239 = vmatmul.mubr.bf16.vlgmr.msra.gmra.mrb[4].mxu1 %v5334_v13 }
  0xb5   : > { %3157 = vmatmul.mubr.bf16.vlgmr.msra.gmra.mrb[0].mxu0 %v5313_v63  ;;  %3248 = vmatpush1.bf16.msra.mxu1 %v4627_v28  ;;  %v4711_v28 = vld [vmem:[%s5242_s26 + $0x698] ss:$28 sps:$4 sm:$0xff]  }
  0xb6   : > { %3166 = vmatpush1.bf16.msra.mxu0 %v4624_v27  ;;  %3249 = vmatprep.subr.bf16.mxu1 %v4635_v30  ;;  %v4708_v27 = vld [vmem:[%s5242_s26 + $0xd90] ss:$28 sps:$4 sm:$0xff]  }
  0xb7   : > { %3167 = vmatprep.subr.bf16.mxu0 %v4632_v29  ;;  %3197 = vmatprep.mubr.bf16.mxu0 %v5420_v31  ;;  %v4716_v29 = vld [vmem:[%s5242_s26 + $0xdcc] ss:$28 sps:$4 sm:$0xff]   ;;  %v4719_v30 = vld [vmem:[%s5242_s26 + $0x6d4] ss:$28 sps:$4 sm:$0xff]  }
  0xb8   : > { %3279 = vmatprep.mubr.bf16.mxu1 %v5320_v3 }
  0xb9   : > { %3250 = vmatpush1.bf16.msra.mxu1 %v4633_v33  ;;  %v4717_v33 = vld [vmem:[%s5242_s26 + $0x6d0] ss:$28 sps:$4 sm:$0xff]  }
  0xba   : > { %3168 = vmatpush1.bf16.msra.mxu0 %v4630_v32  ;;  %3251 = vmatprep.subr.bf16.mxu1 %v4641_v35  ;;  %v4714_v32 = vld [vmem:[%s5242_s26 + $0xdc8] ss:$28 sps:$4 sm:$0xff]   ;;  %v4725_v35 = vld [vmem:[%s5242_s26 + $0x14] ss:$28 sps:$4 sm:$0xff]  }
  0xbb   : > { %3169 = vmatprep.subr.bf16.mxu0 %v4638_v34  ;;  %v4722_v34 = vld [vmem:[%s5242_s26 + $0x70c] ss:$28 sps:$4 sm:$0xff]  }
  0xbd   : > { %3252 = vmatpush1.bf16.msra.mxu1 %v4639_v37  ;;  %v4720_v37 = vld [vmem:[%s5242_s26 + $0x708] ss:$28 sps:$4 sm:$0xff]  }
  0xbe   : > { %3170 = vmatpush1.bf16.msra.mxu0 %v4636_v36  ;;  %3253 = vmatprep.subr.bf16.mxu1 %v4647_v39  ;;  %v5488_v36 = vcombine.high %v5313_v63, %v5313_v63  ;;  %v4728_v39 = vld [vmem:[%s5242_s26 + $0x744] ss:$28 sps:$4 sm:$0xff]  }
  0xbf   : > { %3171 = vmatprep.subr.bf16.mxu0 %v4644_v38  ;;  %v4723_v38 = vld [vmem:[%s5242_s26 + $0x10] ss:$28 sps:$4 sm:$0xff]  }
  0xc1   : > { %3254 = vmatpush1.bf16.msra.mxu1 %v4645_v41  ;;  %v4726_v41 = vld [vmem:[%s5242_s26 + $0x740] ss:$28 sps:$4 sm:$0xff]  }
  0xc2   : > { %3172 = vmatpush1.bf16.msra.mxu0 %v4642_v40  ;;  %3255 = vmatprep.subr.bf16.mxu1 %v4653_v44  ;;  %v4731_v40 = vld [vmem:[%s5242_s26 + $0x4c] ss:$28 sps:$4 sm:$0xff]   ;;  %v4734_v44 = vld [vmem:[%s5242_s26 + $0x77c] ss:$28 sps:$4 sm:$0xff]  }
  0xc3   : > { %3173 = vmatprep.subr.bf16.mxu0 %v4650_v42  ;;  %v4729_v42 = vld [vmem:[%s5242_s26 + $0x48] ss:$28 sps:$4 sm:$0xff]  }
  0xc5   : > { %3256 = vmatpush1.bf16.msra.mxu1 %v4651_v46  ;;  %v4732_v46 = vld [vmem:[%s5242_s26 + $0x778] ss:$28 sps:$4 sm:$0xff]  }
  0xc6   : > { %3174 = vmatpush1.bf16.msra.mxu0 %v4648_v45  ;;  %3257 = vmatprep.subr.bf16.mxu1 %v4659_v48  ;;  %v4737_v45 = vld [vmem:[%s5242_s26 + $0x84] ss:$28 sps:$4 sm:$0xff]   ;;  %v4740_v48 = vld [vmem:[%s5242_s26 + $0x7b4] ss:$28 sps:$4 sm:$0xff]  }
  0xc7   : > { %3175 = vmatprep.subr.bf16.mxu0 %v4656_v47  ;;  %v4735_v47 = vld [vmem:[%s5242_s26 + $0x80] ss:$28 sps:$4 sm:$0xff]  }
  0xc9   : > { %3258 = vmatpush1.bf16.msra.mxu1 %v4657_v50  ;;  %v4738_v50 = vld [vmem:[%s5242_s26 + $0x7b0] ss:$28 sps:$4 sm:$0xff]  }
  0xca   : > { %3176 = vmatpush1.bf16.msra.mxu0 %v4654_v49  ;;  %3259 = vmatprep.subr.bf16.mxu1 %v4665_v52  ;;  %v4743_v49 = vld [vmem:[%s5242_s26 + $0xbc] ss:$28 sps:$4 sm:$0xff]   ;;  %v4746_v52 = vld [vmem:[%s5242_s26 + $0x7ec] ss:$28 sps:$4 sm:$0xff]  }
  0xcb   : > { %3177 = vmatprep.subr.bf16.mxu0 %v4662_v51  ;;  %v4741_v51 = vld [vmem:[%s5242_s26 + $0xb8] ss:$28 sps:$4 sm:$0xff]  }
  0xcd   : > { %3260 = vmatpush1.bf16.msra.mxu1 %v4663_v54  ;;  %v4744_v54 = vld [vmem:[%s5242_s26 + $0x7e8] ss:$28 sps:$4 sm:$0xff]  }
  0xce   : > { %3178 = vmatpush1.bf16.msra.mxu0 %v4660_v53  ;;  %3261 = vmatprep.subr.bf16.mxu1 %v4671_v56  ;;  %v4749_v53 = vld [vmem:[%s5242_s26 + $0xf4] ss:$28 sps:$4 sm:$0xff]   ;;  %v4752_v56 = vld [vmem:[%s5242_s26 + $0x824] ss:$28 sps:$4 sm:$0xff]  }
  0xcf   : > { %3179 = vmatprep.subr.bf16.mxu0 %v4668_v55  ;;  %v4747_v55 = vld [vmem:[%s5242_s26 + $0xf0] ss:$28 sps:$4 sm:$0xff]  }
  0xd1   : > { %3262 = vmatpush1.bf16.msra.mxu1 %v4669_v58  ;;  %v4750_v58 = vld [vmem:[%s5242_s26 + $0x820] ss:$28 sps:$4 sm:$0xff]  }
  0xd2   : > { %3180 = vmatpush1.bf16.msra.mxu0 %v4666_v57  ;;  %3263 = vmatprep.subr.bf16.mxu1 %v4677_v60  ;;  %v4755_v57 = vld [vmem:[%s5242_s26 + $0x12c] ss:$28 sps:$4 sm:$0xff]   ;;  %v4758_v60 = vld [vmem:[%s5242_s26 + $0x85c] ss:$28 sps:$4 sm:$0xff]  }
  0xd3   : > { %3181 = vmatprep.subr.bf16.mxu0 %v4674_v59  ;;  %v4753_v59 = vld [vmem:[%s5242_s26 + $0x128] ss:$28 sps:$4 sm:$0xff]  }
  0xd5   : > { %3264 = vmatpush1.bf16.msra.mxu1 %v4675_v0  ;;  %v4756_v0 = vld [vmem:[%s5242_s26 + $0x858] ss:$28 sps:$4 sm:$0xff]  }
  0xd6   : > { %3182 = vmatpush1.bf16.msra.mxu0 %v4672_v61  ;;  %3265 = vmatprep.subr.bf16.mxu1 %v4683_v2  ;;  %v4761_v61 = vld [vmem:[%s5242_s26 + $0x164] ss:$28 sps:$4 sm:$0xff]   ;;  %v4764_v2 = vld [vmem:[%s5242_s26 + $0x894] ss:$28 sps:$4 sm:$0xff]  }
  0xd7   : > { %3183 = vmatprep.subr.bf16.mxu0 %v4680_v1  ;;  %v4759_v1 = vld [vmem:[%s5242_s26 + $0x160] ss:$28 sps:$4 sm:$0xff]  }
  0xd9   : > { %3266 = vmatpush1.bf16.msra.mxu1 %v4681_v5  ;;  %v4762_v5 = vld [vmem:[%s5242_s26 + $0x890] ss:$28 sps:$4 sm:$0xff]  }
  0xda   : > { %3184 = vmatpush1.bf16.msra.mxu0 %v4678_v4  ;;  %3267 = vmatprep.subr.bf16.mxu1 %v4689_v7  ;;  %v4767_v4 = vld [vmem:[%s5242_s26 + $0x19c] ss:$28 sps:$4 sm:$0xff]   ;;  %v4770_v7 = vld [vmem:[%s5242_s26 + $0x8cc] ss:$28 sps:$4 sm:$0xff]  }
  0xdb   : > { %3185 = vmatprep.subr.bf16.mxu0 %v4686_v6  ;;  %v4765_v6 = vld [vmem:[%s5242_s26 + $0x198] ss:$28 sps:$4 sm:$0xff]  }
  0xdd   : > { %3268 = vmatpush1.bf16.msra.mxu1 %v4687_v9  ;;  %v4768_v9 = vld [vmem:[%s5242_s26 + $0x8c8] ss:$28 sps:$4 sm:$0xff]  }
  0xde   : > { %3186 = vmatpush1.bf16.msra.mxu0 %v4684_v8  ;;  %3269 = vmatprep.subr.bf16.mxu1 %v4695_v11  ;;  %v4773_v8 = vld [vmem:[%s5242_s26 + $0x1d4] ss:$28 sps:$4 sm:$0xff]   ;;  %v4776_v11 = vld [vmem:[%s5242_s26 + $0x904] ss:$28 sps:$4 sm:$0xff]  }
  0xdf   : > { %3187 = vmatprep.subr.bf16.mxu0 %v4692_v10  ;;  %v4771_v10 = vld [vmem:[%s5242_s26 + $0x1d0] ss:$28 sps:$4 sm:$0xff]  }
  0xe1   : > { %3270 = vmatpush1.bf16.msra.mxu1 %v4693_v14  ;;  %v4774_v14 = vld [vmem:[%s5242_s26 + $0x900] ss:$28 sps:$4 sm:$0xff]  }
  0xe2   : > { %3188 = vmatpush1.bf16.msra.mxu0 %v4690_v12  ;;  %3271 = vmatprep.subr.bf16.mxu1 %v4701_v16  ;;  %v4779_v12 = vld [vmem:[%s5242_s26 + $0x20c] ss:$28 sps:$4 sm:$0xff]   ;;  %v4782_v16 = vld [vmem:[%s5242_s26 + $0x93c] ss:$28 sps:$4 sm:$0xff]  }
  0xe3   : > { %3189 = vmatprep.subr.bf16.mxu0 %v4698_v15  ;;  %v4777_v15 = vld [vmem:[%s5242_s26 + $0x208] ss:$28 sps:$4 sm:$0xff]  }
  0xe5   : > { %3272 = vmatpush1.bf16.msra.mxu1 %v4699_v18  ;;  %v4780_v18 = vld [vmem:[%s5242_s26 + $0x938] ss:$28 sps:$4 sm:$0xff]  }
  0xe6   : > { %3190 = vmatpush1.bf16.msra.mxu0 %v4696_v17  ;;  %3273 = vmatprep.subr.bf16.mxu1 %v4707_v21  ;;  %v4785_v17 = vld [vmem:[%s5242_s26 + $0x244] ss:$28 sps:$4 sm:$0xff]   ;;  %v4788_v21 = vld [vmem:[%s5242_s26 + $0x974] ss:$28 sps:$4 sm:$0xff]  }
  0xe7   : > { %3191 = vmatprep.subr.bf16.mxu0 %v4704_v20  ;;  %v4783_v20 = vld [vmem:[%s5242_s26 + $0x240] ss:$28 sps:$4 sm:$0xff]  }
  0xe9   : > { %3274 = vmatpush1.bf16.msra.mxu1 %v4705_v24  ;;  %v4786_v24 = vld [vmem:[%s5242_s26 + $0x970] ss:$28 sps:$4 sm:$0xff]  }
  0xea   : > { %3192 = vmatpush1.bf16.msra.mxu0 %v4702_v22  ;;  %3275 = vmatprep.subr.bf16.mxu1 %v4713_v26  ;;  %v4791_v22 = vld [vmem:[%s5242_s26 + $0x27c] ss:$28 sps:$4 sm:$0xff]   ;;  %v4794_v26 = vld [vmem:[%s5242_s26 + $0x9ac] ss:$28 sps:$4 sm:$0xff]  }
  0xeb   : > { %3193 = vmatprep.subr.bf16.mxu0 %v4710_v25  ;;  %v4789_v25 = vld [vmem:[%s5242_s26 + $0x278] ss:$28 sps:$4 sm:$0xff]  }
  0xed   : > { %3276 = vmatpush1.bf16.msra.mxu1 %v4711_v28  ;;  %v4792_v28 = vld [vmem:[%s5242_s26 + $0x9a8] ss:$28 sps:$4 sm:$0xff]  }
  0xee   : > { %3194 = vmatpush1.bf16.msra.mxu0 %v4708_v27  ;;  %3277 = vmatprep.subr.bf16.mxu1 %v4719_v30  ;;  %v4797_v27 = vld [vmem:[%s5242_s26 + $0x2b4] ss:$28 sps:$4 sm:$0xff]   ;;  %v4800_v30 = vld [vmem:[%s5242_s26 + $0x9e4] ss:$28 sps:$4 sm:$0xff]  }
  0xef   : > { %3195 = vmatprep.subr.bf16.mxu0 %v4716_v29  ;;  %v4795_v29 = vld [vmem:[%s5242_s26 + $0x2b0] ss:$28 sps:$4 sm:$0xff]  }
  0xf1   : > { %3278 = vmatpush1.bf16.msra.mxu1 %v4717_v33  ;;  %v4798_v33 = vld [vmem:[%s5242_s26 + $0x9e0] ss:$28 sps:$4 sm:$0xff]  }
  0xf2   : > { %3196 = vmatpush1.bf16.msra.mxu0 %v4714_v32  ;;  %3288 = vmatprep.subr.bf16.mxu1 %v4722_v34  ;;  %v4803_v32 = vld [vmem:[%s5242_s26 + $0x2ec] ss:$28 sps:$4 sm:$0xff]  }
  0xf3   : > { %3370 = vmatprep.subr.bf16.mxu0 %v4725_v35  ;;  %v4801_v34 = vld [vmem:[%s5242_s26 + $0x2e8] ss:$28 sps:$4 sm:$0xff]   ;;  %v4806_v35 = vld [vmem:[%s5242_s26 + $0xa1c] ss:$28 sps:$4 sm:$0xff]  }
  0xf4   : > { %3280 = vmatmul.mubr.bf16.vlgmr.msra.gmra.mrb[4].mxu1 %v5342_v19 }
  0xf5   : > { %3198 = vmatmul.mubr.bf16.vlgmr.msra.gmra.mrb[0].mxu0 %v5488_v36  ;;  %3289 = vmatpush1.bf16.msra.mxu1 %v4720_v37  ;;  %v4809_v37 = vld [vmem:[%s5242_s26 + $0x324] ss:$28 sps:$4 sm:$0xff]  }
  0xf6   : > { %3371 = vmatpush1.bf16.msra.mxu0 %v4723_v38  ;;  %3290 = vmatprep.subr.bf16.mxu1 %v4728_v39  ;;  %v4804_v38 = vld [vmem:[%s5242_s26 + $0xa18] ss:$28 sps:$4 sm:$0xff]   ;;  %v4807_v39 = vld [vmem:[%s5242_s26 + $0x320] ss:$28 sps:$4 sm:$0xff]  }
  0xf7   : > { %3372 = vmatprep.subr.bf16.mxu0 %v4731_v40  ;;  %3320 = vmatprep.mubr.bf16.mxu1 %v5348_v23  ;;  %v4812_v40 = vld [vmem:[%s5242_s26 + $0xa54] ss:$28 sps:$4 sm:$0xff]  }
  0xf8   : > { %3402 = vmatprep.mubr.bf16.mxu0 %v5310_v62 }
  0xf9   : > { %3291 = vmatpush1.bf16.msra.mxu1 %v4726_v41  ;;  %v4815_v41 = vld [vmem:[%s5242_s26 + $0x35c] ss:$28 sps:$4 sm:$0xff]  }
  0xfa   : > { %3373 = vmatpush1.bf16.msra.mxu0 %v4729_v42  ;;  %3292 = vmatprep.subr.bf16.mxu1 %v4734_v44  ;;  %v4810_v42 = vld [vmem:[%s5242_s26 + $0xa50] ss:$28 sps:$4 sm:$0xff]   ;;  %v4813_v44 = vld [vmem:[%s5242_s26 + $0x358] ss:$28 sps:$4 sm:$0xff]  }
  0xfb   : > { %3374 = vmatprep.subr.bf16.mxu0 %v4737_v45  ;;  %v4818_v45 = vld [vmem:[%s5242_s26 + $0xa8c] ss:$28 sps:$4 sm:$0xff]  }
  0xfd   : > { %3293 = vmatpush1.bf16.msra.mxu1 %v4732_v46  ;;  %v4821_v46 = vld [vmem:[%s5242_s26 + $0x394] ss:$28 sps:$4 sm:$0xff]  }
  0xfe   : > { %3375 = vmatpush1.bf16.msra.mxu0 %v4735_v47  ;;  %3294 = vmatprep.subr.bf16.mxu1 %v4740_v48  ;;  %v4816_v47 = vld [vmem:[%s5242_s26 + $0xa88] ss:$28 sps:$4 sm:$0xff]   ;;  %v4819_v48 = vld [vmem:[%s5242_s26 + $0x390] ss:$28 sps:$4 sm:$0xff]  }
  0xff   : > { %3376 = vmatprep.subr.bf16.mxu0 %v4743_v49  ;;  %v4824_v49 = vld [vmem:[%s5242_s26 + $0xac4] ss:$28 sps:$4 sm:$0xff]  }
 0x101   : > { %3295 = vmatpush1.bf16.msra.mxu1 %v4738_v50  ;;  %v4827_v50 = vld [vmem:[%s5242_s26 + $0x3cc] ss:$28 sps:$4 sm:$0xff]  }
 0x102   : > { %3377 = vmatpush1.bf16.msra.mxu0 %v4741_v51  ;;  %3296 = vmatprep.subr.bf16.mxu1 %v4746_v52  ;;  %v4822_v51 = vld [vmem:[%s5242_s26 + $0xac0] ss:$28 sps:$4 sm:$0xff]   ;;  %v4825_v52 = vld [vmem:[%s5242_s26 + $0x3c8] ss:$28 sps:$4 sm:$0xff]  }
 0x103   : > { %3378 = vmatprep.subr.bf16.mxu0 %v4749_v53  ;;  %v4830_v53 = vld [vmem:[%s5242_s26 + $0xafc] ss:$28 sps:$4 sm:$0xff]  }
 0x105   : > { %3297 = vmatpush1.bf16.msra.mxu1 %v4744_v54  ;;  %v4833_v54 = vld [vmem:[%s5242_s26 + $0x404] ss:$28 sps:$4 sm:$0xff]  }
 0x106   : > { %3379 = vmatpush1.bf16.msra.mxu0 %v4747_v55  ;;  %3298 = vmatprep.subr.bf16.mxu1 %v4752_v56  ;;  %v4828_v55 = vld [vmem:[%s5242_s26 + $0xaf8] ss:$28 sps:$4 sm:$0xff]   ;;  %v4831_v56 = vld [vmem:[%s5242_s26 + $0x400] ss:$28 sps:$4 sm:$0xff]  }
 0x107   : > { %3380 = vmatprep.subr.bf16.mxu0 %v4755_v57  ;;  %v4836_v57 = vld [vmem:[%s5242_s26 + $0xb34] ss:$28 sps:$4 sm:$0xff]  }
 0x109   : > { %3299 = vmatpush1.bf16.msra.mxu1 %v4750_v58  ;;  %v4839_v58 = vld [vmem:[%s5242_s26 + $0x43c] ss:$28 sps:$4 sm:$0xff]  }
 0x10a   : > { %3381 = vmatpush1.bf16.msra.mxu0 %v4753_v59  ;;  %3300 = vmatprep.subr.bf16.mxu1 %v4758_v60  ;;  %v4834_v59 = vld [vmem:[%s5242_s26 + $0xb30] ss:$28 sps:$4 sm:$0xff]   ;;  %v4837_v60 = vld [vmem:[%s5242_s26 + $0x438] ss:$28 sps:$4 sm:$0xff]  }
 0x10b   : > { %3382 = vmatprep.subr.bf16.mxu0 %v4761_v61  ;;  %v4842_v61 = vld [vmem:[%s5242_s26 + $0xb6c] ss:$28 sps:$4 sm:$0xff]  }
 0x10d   : > { %3301 = vmatpush1.bf16.msra.mxu1 %v4756_v0  ;;  %v4845_v0 = vld [vmem:[%s5242_s26 + $0x474] ss:$28 sps:$4 sm:$0xff]  }
 0x10e   : > { %3383 = vmatpush1.bf16.msra.mxu0 %v4759_v1  ;;  %3302 = vmatprep.subr.bf16.mxu1 %v4764_v2  ;;  %v4840_v1 = vld [vmem:[%s5242_s26 + $0xb68] ss:$28 sps:$4 sm:$0xff]   ;;  %v4843_v2 = vld [vmem:[%s5242_s26 + $0x470] ss:$28 sps:$4 sm:$0xff]  }
 0x10f   : > { %3384 = vmatprep.subr.bf16.mxu0 %v4767_v4  ;;  %v4848_v4 = vld [vmem:[%s5242_s26 + $0xba4] ss:$28 sps:$4 sm:$0xff]  }
 0x111   : > { %3303 = vmatpush1.bf16.msra.mxu1 %v4762_v5  ;;  %v4851_v5 = vld [vmem:[%s5242_s26 + $0x4ac] ss:$28 sps:$4 sm:$0xff]  }
 0x112   : > { %3385 = vmatpush1.bf16.msra.mxu0 %v4765_v6  ;;  %3304 = vmatprep.subr.bf16.mxu1 %v4770_v7  ;;  %v4846_v6 = vld [vmem:[%s5242_s26 + $0xba0] ss:$28 sps:$4 sm:$0xff]   ;;  %v4849_v7 = vld [vmem:[%s5242_s26 + $0x4a8] ss:$28 sps:$4 sm:$0xff]  }
 0x113   : > { %3386 = vmatprep.subr.bf16.mxu0 %v4773_v8  ;;  %v4854_v8 = vld [vmem:[%s5242_s26 + $0xbdc] ss:$28 sps:$4 sm:$0xff]  }
 0x115   : > { %3305 = vmatpush1.bf16.msra.mxu1 %v4768_v9  ;;  %v4857_v9 = vld [vmem:[%s5242_s26 + $0x4e4] ss:$28 sps:$4 sm:$0xff]  }
 0x116   : > { %3387 = vmatpush1.bf16.msra.mxu0 %v4771_v10  ;;  %3306 = vmatprep.subr.bf16.mxu1 %v4776_v11  ;;  %v4852_v11 = vld [vmem:[%s5242_s26 + $0xbd8] ss:$28 sps:$4 sm:$0xff]  }
 0x117   : > { %3388 = vmatprep.subr.bf16.mxu0 %v4779_v12 }
 0x119   : > { %3307 = vmatpush1.bf16.msra.mxu1 %v4774_v14  ;;  %v4855_v14 = vld [vmem:[%s5242_s26 + $0x4e0] ss:$28 sps:$4 sm:$0xff]  }
 0x11a   : > { %3389 = vmatpush1.bf16.msra.mxu0 %v4777_v15  ;;  %3308 = vmatprep.subr.bf16.mxu1 %v4782_v16 }
 0x11b   : > { %3390 = vmatprep.subr.bf16.mxu0 %v4785_v17  ;;  %v4860_v17 = vld [vmem:[%s5242_s26 + $0xc14] ss:$28 sps:$4 sm:$0xff]  }
 0x11d   : > { %3309 = vmatpush1.bf16.msra.mxu1 %v4780_v18  ;;  %v4863_v18 = vld [vmem:[%s5242_s26 + $0x51c] ss:$28 sps:$4 sm:$0xff]  }
 0x11e   : > { %3391 = vmatpush1.bf16.msra.mxu0 %v4783_v20  ;;  %3310 = vmatprep.subr.bf16.mxu1 %v4788_v21  ;;  %v4858_v20 = vld [vmem:[%s5242_s26 + $0xc10] ss:$28 sps:$4 sm:$0xff]   ;;  %v4861_v21 = vld [vmem:[%s5242_s26 + $0x518] ss:$28 sps:$4 sm:$0xff]  }
 0x11f   : > { %3392 = vmatprep.subr.bf16.mxu0 %v4791_v22  ;;  %v4866_v22 = vld [vmem:[%s5242_s26 + $0xc4c] ss:$28 sps:$4 sm:$0xff]  }
 0x121   : > { %3311 = vmatpush1.bf16.msra.mxu1 %v4786_v24  ;;  %v4869_v24 = vld [vmem:[%s5242_s26 + $0x554] ss:$28 sps:$4 sm:$0xff]  }
 0x122   : > { %3393 = vmatpush1.bf16.msra.mxu0 %v4789_v25  ;;  %3312 = vmatprep.subr.bf16.mxu1 %v4794_v26  ;;  %v4864_v25 = vld [vmem:[%s5242_s26 + $0xc48] ss:$28 sps:$4 sm:$0xff]   ;;  %v4867_v26 = vld [vmem:[%s5242_s26 + $0x550] ss:$28 sps:$4 sm:$0xff]  }
 0x123   : > { %3394 = vmatprep.subr.bf16.mxu0 %v4797_v27  ;;  %v4872_v27 = vld [vmem:[%s5242_s26 + $0xc84] ss:$28 sps:$4 sm:$0xff]  }
 0x125   : > { %3313 = vmatpush1.bf16.msra.mxu1 %v4792_v28  ;;  %v4875_v28 = vld [vmem:[%s5242_s26 + $0x58c] ss:$28 sps:$4 sm:$0xff]  }
 0x126   : > { %3395 = vmatpush1.bf16.msra.mxu0 %v4795_v29  ;;  %3314 = vmatprep.subr.bf16.mxu1 %v4800_v30  ;;  %v4870_v29 = vld [vmem:[%s5242_s26 + $0xc80] ss:$28 sps:$4 sm:$0xff]   ;;  %v4873_v30 = vld [vmem:[%s5242_s26 + $0x588] ss:$28 sps:$4 sm:$0xff]  }
 0x127   : > { %3396 = vmatprep.subr.bf16.mxu0 %v4803_v32  ;;  %v4878_v32 = vld [vmem:[%s5242_s26 + $0xcbc] ss:$28 sps:$4 sm:$0xff]  }
 0x129   : > { %3315 = vmatpush1.bf16.msra.mxu1 %v4798_v33  ;;  %v4881_v33 = vld [vmem:[%s5242_s26 + $0x5c4] ss:$28 sps:$4 sm:$0xff]  }
 0x12a   : > { %3397 = vmatpush1.bf16.msra.mxu0 %v4801_v34  ;;  %3316 = vmatprep.subr.bf16.mxu1 %v4806_v35  ;;  %v4876_v34 = vld [vmem:[%s5242_s26 + $0xcb8] ss:$28 sps:$4 sm:$0xff]   ;;  %v4879_v35 = vld [vmem:[%s5242_s26 + $0x5c0] ss:$28 sps:$4 sm:$0xff]  }
 0x12b   : > { %3398 = vmatprep.subr.bf16.mxu0 %v4809_v37  ;;  %v4884_v37 = vld [vmem:[%s5242_s26 + $0xcf4] ss:$28 sps:$4 sm:$0xff]  }
 0x12d   : > { %3317 = vmatpush1.bf16.msra.mxu1 %v4804_v38  ;;  %v4887_v38 = vld [vmem:[%s5242_s26 + $0x5fc] ss:$28 sps:$4 sm:$0xff]  }
 0x12e   : > { %3399 = vmatpush1.bf16.msra.mxu0 %v4807_v39  ;;  %3318 = vmatprep.subr.bf16.mxu1 %v4812_v40  ;;  %v4882_v39 = vld [vmem:[%s5242_s26 + $0xcf0] ss:$28 sps:$4 sm:$0xff]   ;;  %v4885_v40 = vld [vmem:[%s5242_s26 + $0x5f8] ss:$28 sps:$4 sm:$0xff]  }
 0x12f   : > { %3400 = vmatprep.subr.bf16.mxu0 %v4815_v41  ;;  %v4890_v41 = vld [vmem:[%s5242_s26 + $0xd2c] ss:$28 sps:$4 sm:$0xff]  }
 0x131   : > { %3319 = vmatpush1.bf16.msra.mxu1 %v4810_v42  ;;  %v4893_v42 = vld [vmem:[%s5242_s26 + $0x634] ss:$28 sps:$4 sm:$0xff]  }
 0x132   : > { %3401 = vmatpush1.bf16.msra.mxu0 %v4813_v44  ;;  %3329 = vmatprep.subr.bf16.mxu1 %v4818_v45  ;;  %v4888_v44 = vld [vmem:[%s5242_s26 + $0xd28] ss:$28 sps:$4 sm:$0xff]   ;;  %v4891_v45 = vld [vmem:[%s5242_s26 + $0x630] ss:$28 sps:$4 sm:$0xff]  }
 0x133   : > { %3411 = vmatprep.subr.bf16.mxu0 %v4821_v46  ;;  %v4896_v46 = vld [vmem:[%s5242_s26 + $0xd64] ss:$28 sps:$4 sm:$0xff]  }
 0x134   : > { %3321 = vmatmul.mubr.bf16.vlgmr.msra.gmra.mrb[4].mxu1 %v5313_v63 }
 0x135   : > { %3403 = vmatmul.mubr.bf16.vlgmr.msra.gmra.mrb[4].mxu0 %v5334_v13  ;;  %3330 = vmatpush1.bf16.msra.mxu1 %v4816_v47  ;;  %v4899_v47 = vld [vmem:[%s5242_s26 + $0x66c] ss:$28 sps:$4 sm:$0xff]  }
 0x136   : > { %3412 = vmatpush1.bf16.msra.mxu0 %v4819_v48  ;;  %3331 = vmatprep.subr.bf16.mxu1 %v4824_v49  ;;  %v4894_v48 = vld [vmem:[%s5242_s26 + $0xd60] ss:$28 sps:$4 sm:$0xff]   ;;  %v4897_v49 = vld [vmem:[%s5242_s26 + $0x668] ss:$28 sps:$4 sm:$0xff]  }
 0x137   : > { %3413 = vmatprep.subr.bf16.mxu0 %v4827_v50  ;;  %3361 = vmatprep.mubr.bf16.mxu1 %v5420_v31  ;;  %v4902_v50 = vld [vmem:[%s5242_s26 + $0xd9c] ss:$28 sps:$4 sm:$0xff]  }
 0x138   : > { %3443 = vmatprep.mubr.bf16.mxu0 %v5320_v3 }
 0x139   : > { %3332 = vmatpush1.bf16.msra.mxu1 %v4822_v51  ;;  %v4905_v51 = vld [vmem:[%s5242_s26 + $0x6a4] ss:$28 sps:$4 sm:$0xff]  }
 0x13a   : > { %3414 = vmatpush1.bf16.msra.mxu0 %v4825_v52  ;;  %3333 = vmatprep.subr.bf16.mxu1 %v4830_v53  ;;  %v4900_v52 = vld [vmem:[%s5242_s26 + $0xd98] ss:$28 sps:$4 sm:$0xff]   ;;  %v4903_v53 = vld [vmem:[%s5242_s26 + $0x6a0] ss:$28 sps:$4 sm:$0xff]  }
 0x13b   : > { %3415 = vmatprep.subr.bf16.mxu0 %v4833_v54  ;;  %v4908_v54 = vld [vmem:[%s5242_s26 + $0xdd4] ss:$28 sps:$4 sm:$0xff]  }
 0x13d   : > { %3334 = vmatpush1.bf16.msra.mxu1 %v4828_v55  ;;  %v4911_v55 = vld [vmem:[%s5242_s26 + $0x6dc] ss:$28 sps:$4 sm:$0xff]  }
 0x13e   : > { %3416 = vmatpush1.bf16.msra.mxu0 %v4831_v56  ;;  %3335 = vmatprep.subr.bf16.mxu1 %v4836_v57  ;;  %v4906_v56 = vld [vmem:[%s5242_s26 + $0xdd0] ss:$28 sps:$4 sm:$0xff]   ;;  %v4909_v57 = vld [vmem:[%s5242_s26 + $0x6d8] ss:$28 sps:$4 sm:$0xff]  }
 0x13f   : > { %3417 = vmatprep.subr.bf16.mxu0 %v4839_v58  ;;  %v4914_v58 = vld [vmem:[%s5242_s26 + $0x714] ss:$28 sps:$4 sm:$0xff]  }
 0x141   : > { %3336 = vmatpush1.bf16.msra.mxu1 %v4834_v59  ;;  %v4915_v59 = vld [vmem:[%s5242_s26 + $0x1d8] ss:$28 sps:$4 sm:$0xff]  }
 0x142   : > { %3418 = vmatpush1.bf16.msra.mxu0 %v4837_v60  ;;  %3337 = vmatprep.subr.bf16.mxu1 %v4842_v61  ;;  %v4912_v60 = vld [vmem:[%s5242_s26 + $0x710] ss:$28 sps:$4 sm:$0xff]   ;;  %v4916_v61 = vld [vmem:[%s5242_s26 + $0x18] ss:$28 sps:$4 sm:$0xff]  }
 0x143   : > { %3419 = vmatprep.subr.bf16.mxu0 %v4845_v0  ;;  %v4919_v0 = vld [vmem:[%s5242_s26 + $0x74c] ss:$28 sps:$4 sm:$0xff]  }
 0x145   : > { %3338 = vmatpush1.bf16.msra.mxu1 %v4840_v1  ;;  %v4920_v1 = vld [vmem:[%s5242_s26 + $0x210] ss:$28 sps:$4 sm:$0xff]  }
 0x146   : > { %3420 = vmatpush1.bf16.msra.mxu0 %v4843_v2  ;;  %3339 = vmatprep.subr.bf16.mxu1 %v4848_v4  ;;  %v4917_v2 = vld [vmem:[%s5242_s26 + $0x748] ss:$28 sps:$4 sm:$0xff]   ;;  %v4921_v4 = vld [vmem:[%s5242_s26 + $0x50] ss:$28 sps:$4 sm:$0xff]  }
 0x147   : > { %3421 = vmatprep.subr.bf16.mxu0 %v4851_v5  ;;  %v5586_v10 = vpop.f32.mrb[0].mxu1  ;;  %v4924_v5 = vld [vmem:[%s5242_s26 + $0x784] ss:$28 sps:$4 sm:$0xff]  }
 0x148   : > { %v5589_v12 = vpop.f32.mrb[1].mxu1 }
 0x149   : > { %v3080_v15 = vpop.f32.mrb[2].mxu1  ;;  %3340 = vmatpush1.bf16.msra.mxu1 %v4846_v6  ;;  %v4925_v6 = vld [vmem:[%s5242_s26 + $0x248] ss:$28 sps:$4 sm:$0xff]  }
 0x14a   : > { %3422 = vmatpush1.bf16.msra.mxu0 %v4849_v7  ;;  %v3081_v16 = vpop.f32.mrb[3].mxu1  ;;  %3341 = vmatprep.subr.bf16.mxu1 %v4854_v8  ;;  %v4922_v7 = vld [vmem:[%s5242_s26 + $0x780] ss:$28 sps:$4 sm:$0xff]   ;;  %v4926_v8 = vld [vmem:[%s5242_s26 + $0x88] ss:$28 sps:$4 sm:$0xff]  }
 0x14b   : > { %3423 = vmatprep.subr.bf16.mxu0 %v4857_v9  ;;  %v4929_v9 = vld [vmem:[%s5242_s26 + $0x7bc] ss:$28 sps:$4 sm:$0xff]   ;;  %v4934_v15 = vld [vmem:[%s5242_s26 + $0x7f4] ss:$28 sps:$4 sm:$0xff]  }
 0x14c   : > { %v4935_v16 = vld [vmem:[%s5242_s26 + $0x2b8] ss:$28 sps:$4 sm:$0xff]  }
 0x14d   : > { %3342 = vmatpush1.bf16.msra.mxu1 %v4852_v11  ;;  %v4930_v11 = vld [vmem:[%s5242_s26 + $0x280] ss:$28 sps:$4 sm:$0xff]  }
 0x14e   : > { %3424 = vmatpush1.bf16.msra.mxu0 %v4855_v14  ;;  %3343 = vmatprep.subr.bf16.mxu1 %v4860_v17  ;;  %v4927_v14 = vld [vmem:[%s5242_s26 + $0x7b8] ss:$28 sps:$4 sm:$0xff]   ;;  %v4932_v17 = vld [vmem:[%s5242_s26 + $0x7f0] ss:$28 sps:$4 sm:$0xff]  }
 0x14f   : > { %3425 = vmatprep.subr.bf16.mxu0 %v4863_v18  ;;  %v4936_v18 = vld [vmem:[%s5242_s26 + $0xf8] ss:$28 sps:$4 sm:$0xff]  }
 0x151   : > { %3344 = vmatpush1.bf16.msra.mxu1 %v4858_v20  ;;  %v4939_v20 = vld [vmem:[%s5242_s26 + $0x82c] ss:$28 sps:$4 sm:$0xff]  }
 0x152   : > { %3426 = vmatpush1.bf16.msra.mxu0 %v4861_v21  ;;  %3345 = vmatprep.subr.bf16.mxu1 %v4866_v22  ;;  %v4940_v21 = vld [vmem:[%s5242_s26 + $0x2f0] ss:$28 sps:$4 sm:$0xff]   ;;  %v4937_v22 = vld [vmem:[%s5242_s26 + $0x828] ss:$28 sps:$4 sm:$0xff]  }
 0x153   : > { %3427 = vmatprep.subr.bf16.mxu0 %v4869_v24  ;;  %v4941_v24 = vld [vmem:[%s5242_s26 + $0x130] ss:$28 sps:$4 sm:$0xff]  }
 0x155   : > { %3346 = vmatpush1.bf16.msra.mxu1 %v4864_v25  ;;  %v4944_v25 = vld [vmem:[%s5242_s26 + $0x864] ss:$28 sps:$4 sm:$0xff]  }
 0x156   : > { %3428 = vmatpush1.bf16.msra.mxu0 %v4867_v26  ;;  %3347 = vmatprep.subr.bf16.mxu1 %v4872_v27  ;;  %v4945_v26 = vld [vmem:[%s5242_s26 + $0x328] ss:$28 sps:$4 sm:$0xff]   ;;  %v4942_v27 = vld [vmem:[%s5242_s26 + $0x860] ss:$28 sps:$4 sm:$0xff]  }
 0x157   : > { %3429 = vmatprep.subr.bf16.mxu0 %v4875_v28  ;;  %v4946_v28 = vld [vmem:[%s5242_s26 + $0x168] ss:$28 sps:$4 sm:$0xff]  }
 0x159   : > { %3348 = vmatpush1.bf16.msra.mxu1 %v4870_v29  ;;  %v4949_v29 = vld [vmem:[%s5242_s26 + $0x89c] ss:$28 sps:$4 sm:$0xff]  }
 0x15a   : > { %3430 = vmatpush1.bf16.msra.mxu0 %v4873_v30  ;;  %3349 = vmatprep.subr.bf16.mxu1 %v4878_v32  ;;  %v4950_v30 = vld [vmem:[%s5242_s26 + $0x360] ss:$28 sps:$4 sm:$0xff]   ;;  %v4947_v32 = vld [vmem:[%s5242_s26 + $0x898] ss:$28 sps:$4 sm:$0xff]  }
 0x15b   : > { %3431 = vmatprep.subr.bf16.mxu0 %v4881_v33  ;;  %v4951_v33 = vld [vmem:[%s5242_s26 + $0x1a0] ss:$28 sps:$4 sm:$0xff]  }
 0x15d   : > { %3350 = vmatpush1.bf16.msra.mxu1 %v4876_v34  ;;  %v4954_v34 = vld [vmem:[%s5242_s26 + $0x8d4] ss:$28 sps:$4 sm:$0xff]  }
 0x15e   : > { %3432 = vmatpush1.bf16.msra.mxu0 %v4879_v35  ;;  %3351 = vmatprep.subr.bf16.mxu1 %v4884_v37  ;;  %v4955_v35 = vld [vmem:[%s5242_s26 + $0x558] ss:$28 sps:$4 sm:$0xff]   ;;  %v4952_v37 = vld [vmem:[%s5242_s26 + $0x8d0] ss:$28 sps:$4 sm:$0xff]  }
 0x15f   : > { %3433 = vmatprep.subr.bf16.mxu0 %v4887_v38  ;;  %v4956_v38 = vld [vmem:[%s5242_s26 + $0x398] ss:$28 sps:$4 sm:$0xff]  }
 0x161   : > { %3352 = vmatpush1.bf16.msra.mxu1 %v4882_v39  ;;  %v4959_v39 = vld [vmem:[%s5242_s26 + $0x90c] ss:$28 sps:$4 sm:$0xff]  }
 0x162   : > { %3434 = vmatpush1.bf16.msra.mxu0 %v4885_v40  ;;  %3353 = vmatprep.subr.bf16.mxu1 %v4890_v41  ;;  %v4960_v40 = vld [vmem:[%s5242_s26 + $0x590] ss:$28 sps:$4 sm:$0xff]   ;;  %v4957_v41 = vld [vmem:[%s5242_s26 + $0x908] ss:$28 sps:$4 sm:$0xff]  }
 0x163   : > { %3435 = vmatprep.subr.bf16.mxu0 %v4893_v42  ;;  %v4961_v42 = vld [vmem:[%s5242_s26 + $0x3d0] ss:$28 sps:$4 sm:$0xff]  }
 0x165   : > { %3354 = vmatpush1.bf16.msra.mxu1 %v4888_v44  ;;  %v4964_v44 = vld [vmem:[%s5242_s26 + $0x944] ss:$28 sps:$4 sm:$0xff]  }
 0x166   : > { %3436 = vmatpush1.bf16.msra.mxu0 %v4891_v45  ;;  %3355 = vmatprep.subr.bf16.mxu1 %v4896_v46  ;;  %v4965_v45 = vld [vmem:[%s5242_s26 + $0x5c8] ss:$28 sps:$4 sm:$0xff]   ;;  %v4962_v46 = vld [vmem:[%s5242_s26 + $0x940] ss:$28 sps:$4 sm:$0xff]  }
 0x167   : > { %3437 = vmatprep.subr.bf16.mxu0 %v4899_v47  ;;  %v4969_v47 = vld [vmem:[%s5242_s26 + $0x97c] ss:$28 sps:$4 sm:$0xff]  }
 0x169   : > { %3356 = vmatpush1.bf16.msra.mxu1 %v4894_v48  ;;  %v4970_v48 = vld [vmem:[%s5242_s26 + $0x600] ss:$28 sps:$4 sm:$0xff]  }
 0x16a   : > { %3438 = vmatpush1.bf16.msra.mxu0 %v4897_v49  ;;  %3357 = vmatprep.subr.bf16.mxu1 %v4902_v50  ;;  %v4967_v49 = vld [vmem:[%s5242_s26 + $0x978] ss:$28 sps:$4 sm:$0xff]   ;;  %v4971_v50 = vld [vmem:[%s5242_s26 + $0x440] ss:$28 sps:$4 sm:$0xff]  }
 0x16b   : > { %3439 = vmatprep.subr.bf16.mxu0 %v4905_v51  ;;  %v4975_v51 = vld [vmem:[%s5242_s26 + $0x638] ss:$28 sps:$4 sm:$0xff]  }
 0x16d   : > { %3358 = vmatpush1.bf16.msra.mxu1 %v4900_v52  ;;  %v4972_v52 = vld [vmem:[%s5242_s26 + $0x9b0] ss:$28 sps:$4 sm:$0xff]  }
 0x16e   : > { %3440 = vmatpush1.bf16.msra.mxu0 %v4903_v53  ;;  %3359 = vmatprep.subr.bf16.mxu1 %v4908_v54  ;;  %v4976_v53 = vld [vmem:[%s5242_s26 + $0x478] ss:$28 sps:$4 sm:$0xff]   ;;  %v4979_v54 = vld [vmem:[%s5242_s26 + $0x9ec] ss:$28 sps:$4 sm:$0xff]  }
 0x16f   : > { %3441 = vmatprep.subr.bf16.mxu0 %v4911_v55  ;;  %v4980_v55 = vld [vmem:[%s5242_s26 + $0x670] ss:$28 sps:$4 sm:$0xff]  }
 0x171   : > { %3360 = vmatpush1.bf16.msra.mxu1 %v4906_v56  ;;  %v4977_v56 = vld [vmem:[%s5242_s26 + $0x9e8] ss:$28 sps:$4 sm:$0xff]  }
 0x172   : > { %3442 = vmatpush1.bf16.msra.mxu0 %v4909_v57  ;;  %4263 = vmatprep.subr.bf16.mxu1 %v4915_v59  ;;  %v4981_v57 = vld [vmem:[%s5242_s26 + $0x4b0] ss:$28 sps:$4 sm:$0xff]   ;;  %v4985_v59 = vld [vmem:[%s5242_s26 + $0x6a8] ss:$28 sps:$4 sm:$0xff]  }
 0x173   : > { %3452 = vmatprep.subr.bf16.mxu0 %v4914_v58  ;;  %v4984_v58 = vld [vmem:[%s5242_s26 + $0xa24] ss:$28 sps:$4 sm:$0xff]  }
 0x174   : > { %3362 = vmatmul.mubr.bf16.vlgmr.msra.gmra.mrb[4].mxu1 %v5488_v36 }
 0x175   : > { %3444 = vmatmul.mubr.bf16.vlgmr.msra.gmra.mrb[4].mxu0 %v5342_v19  ;;  %4264 = vmatpush3.bf16.msra.mxu1 %v4916_v61  ;;  %v4986_v61 = vld [vmem:[%s5242_s26 + $0x4e8] ss:$28 sps:$4 sm:$0xff]  }
 0x176   : > { %3453 = vmatpush1.bf16.msra.mxu0 %v4912_v60  ;;  %4265 = vmatprep.subr.bf16.mxu1 %v4920_v1  ;;  %v4982_v60 = vld [vmem:[%s5242_s26 + $0xa20] ss:$28 sps:$4 sm:$0xff]  }
 0x177   : > { %3454 = vmatprep.subr.bf16.mxu0 %v4919_v0  ;;  %3566 = vmatprep.mubr.bf16.mxu1 %v5310_v62  ;;  %v4931_v62 = vld [vmem:[%s5242_s26 + $0xc0] ss:$28 sps:$4 sm:$0xff]  }
 0x178   : > { %3484 = vmatprep.mubr.bf16.mxu0 %v5348_v23  ;;  %v4989_v0 = vld [vmem:[%s5242_s26 + $0xa5c] ss:$28 sps:$4 sm:$0xff]  }
 0x179   : > { %4266 = vmatpush3.bf16.msra.mxu1 %v4921_v4  ;;  %v4990_v1 = vld [vmem:[%s5242_s26 + $0x6e0] ss:$28 sps:$4 sm:$0xff]  }
 0x17a   : > { %3455 = vmatpush1.bf16.msra.mxu0 %v4917_v2  ;;  %4267 = vmatprep.subr.bf16.mxu1 %v4925_v6  ;;  %v4987_v2 = vld [vmem:[%s5242_s26 + $0xa58] ss:$28 sps:$4 sm:$0xff]   ;;  %v4991_v4 = vld [vmem:[%s5242_s26 + $0x520] ss:$28 sps:$4 sm:$0xff]  }
 0x17b   : > { %3456 = vmatprep.subr.bf16.mxu0 %v4924_v5  ;;  %v4994_v5 = vld [vmem:[%s5242_s26 + $0xa94] ss:$28 sps:$4 sm:$0xff]  }
 0x17c   : > { %v4995_v6 = vld [vmem:[%s5242_s26 + $0x8d8] ss:$28 sps:$4 sm:$0xff]  }
 0x17d   : > { %4268 = vmatpush3.bf16.msra.mxu1 %v4926_v8  ;;  %v4996_v8 = vld [vmem:[%s5242_s26 + $0x718] ss:$28 sps:$4 sm:$0xff]  }
 0x17e   : > { %3457 = vmatpush1.bf16.msra.mxu0 %v4922_v7  ;;  %4269 = vmatprep.subr.bf16.mxu1 %v4930_v11  ;;  %v4992_v7 = vld [vmem:[%s5242_s26 + $0xa90] ss:$28 sps:$4 sm:$0xff]  }
 0x17f   : > { %3458 = vmatprep.subr.bf16.mxu0 %v4929_v9  ;;  %v4999_v9 = vld [vmem:[%s5242_s26 + $0xacc] ss:$28 sps:$4 sm:$0xff]  }
 0x180   : > { %v5000_v11 = vld [vmem:[%s5242_s26 + $0x910] ss:$28 sps:$4 sm:$0xff]  }
 0x181   : > { %4270 = vmatpush3.bf16.msra.mxu1 %v4931_v62  ;;  %v5001_v62 = vld [vmem:[%s5242_s26 + $0x750] ss:$28 sps:$4 sm:$0xff]  }
 0x182   : > { %3459 = vmatpush1.bf16.msra.mxu0 %v4927_v14  ;;  %4271 = vmatprep.subr.bf16.mxu1 %v4935_v16  ;;  %v4997_v14 = vld [vmem:[%s5242_s26 + $0xac8] ss:$28 sps:$4 sm:$0xff]  }
 0x183   : > { %3460 = vmatprep.subr.bf16.mxu0 %v4934_v15  ;;  %v5004_v15 = vld [vmem:[%s5242_s26 + $0xb04] ss:$28 sps:$4 sm:$0xff]  }
 0x184   : > { %v5005_v16 = vld [vmem:[%s5242_s26 + $0x948] ss:$28 sps:$4 sm:$0xff]  }
 0x185   : > { %4272 = vmatpush3.bf16.msra.mxu1 %v4936_v18  ;;  %v5009_v18 = vld [vmem:[%s5242_s26 + $0xb3c] ss:$28 sps:$4 sm:$0xff]  }
 0x186   : > { %3461 = vmatpush1.bf16.msra.mxu0 %v4932_v17  ;;  %4273 = vmatprep.subr.bf16.mxu1 %v4940_v21  ;;  %v5006_v17 = vld [vmem:[%s5242_s26 + $0x788] ss:$28 sps:$4 sm:$0xff]   ;;  %v5007_v21 = vld [vmem:[%s5242_s26 + $0xb38] ss:$28 sps:$4 sm:$0xff]  }
 0x187   : > { %3462 = vmatprep.subr.bf16.mxu0 %v4939_v20  ;;  %v5010_v20 = vld [vmem:[%s5242_s26 + $0x980] ss:$28 sps:$4 sm:$0xff]  }
 0x189   : > { %4274 = vmatpush3.bf16.msra.mxu1 %v4941_v24  ;;  %v5015_v24 = vld [vmem:[%s5242_s26 + $0x9b8] ss:$28 sps:$4 sm:$0xff]  }
 0x18a   : > { %3463 = vmatpush1.bf16.msra.mxu0 %v4937_v22  ;;  %4275 = vmatprep.subr.bf16.mxu1 %v4945_v26  ;;  %v5014_v22 = vld [vmem:[%s5242_s26 + $0xb74] ss:$28 sps:$4 sm:$0xff]  }
 0x18b   : > { %3464 = vmatprep.subr.bf16.mxu0 %v4944_v25  ;;  %v5012_v25 = vld [vmem:[%s5242_s26 + $0xb70] ss:$28 sps:$4 sm:$0xff]   ;;  %v5016_v26 = vld [vmem:[%s5242_s26 + $0x7f8] ss:$28 sps:$4 sm:$0xff]  }
 0x18d   : > { %4276 = vmatpush3.bf16.msra.mxu1 %v4946_v28  ;;  %v5020_v28 = vld [vmem:[%s5242_s26 + $0x9f0] ss:$28 sps:$4 sm:$0xff]  }
 0x18e   : > { %3465 = vmatpush1.bf16.msra.mxu0 %v4942_v27  ;;  %4277 = vmatprep.subr.bf16.mxu1 %v4950_v30  ;;  %v5019_v27 = vld [vmem:[%s5242_s26 + $0xbac] ss:$28 sps:$4 sm:$0xff]  }
 0x18f   : > { %3466 = vmatprep.subr.bf16.mxu0 %v4949_v29  ;;  %v5017_v29 = vld [vmem:[%s5242_s26 + $0xba8] ss:$28 sps:$4 sm:$0xff]   ;;  %v5021_v30 = vld [vmem:[%s5242_s26 + $0x830] ss:$28 sps:$4 sm:$0xff]  }
 0x191   : > { %4278 = vmatpush3.bf16.msra.mxu1 %v4951_v33  ;;  %v5025_v33 = vld [vmem:[%s5242_s26 + $0xa28] ss:$28 sps:$4 sm:$0xff]  }
 0x192   : > { %3467 = vmatpush1.bf16.msra.mxu0 %v4947_v32  ;;  %4285 = vmatprep.subr.bf16.mxu1 %v4955_v35  ;;  %v5024_v32 = vld [vmem:[%s5242_s26 + $0xbe4] ss:$28 sps:$4 sm:$0xff]  }
 0x193   : > { %3468 = vmatprep.subr.bf16.mxu0 %v4954_v34 }
 0x194   : > { %3567 = vmatmul.mubr.bf16.vlgmr.msra.gmra.mrb[8].mxu1 %v5334_v13  ;;  %v4966_v13 = vld [vmem:[%s5242_s26 + $0x408] ss:$28 sps:$4 sm:$0xff]  }
 0x195   : > { %4286 = vmatpush3.bf16.msra.mxu1 %v4956_v38  ;;  %3606 = vmatprep.mubr.bf16.mxu1 %v5320_v3  ;;  %v4974_v3 = vld [vmem:[%s5242_s26 + $0x9b4] ss:$28 sps:$4 sm:$0xff]  }
 0x196   : > { %3469 = vmatpush1.bf16.msra.mxu0 %v4952_v37  ;;  %4287 = vmatprep.subr.bf16.mxu1 %v4960_v40  ;;  %v5022_v40 = vld [vmem:[%s5242_s26 + $0xbe0] ss:$28 sps:$4 sm:$0xff]  }
 0x197   : > { %3470 = vmatprep.subr.bf16.mxu0 %v4959_v39 }
 0x199   : > { %4288 = vmatpush3.bf16.msra.mxu1 %v4961_v42 }
 0x19a   : > { %3471 = vmatpush1.bf16.msra.mxu0 %v4957_v41  ;;  %4289 = vmatprep.subr.bf16.mxu1 %v4965_v45  ;;  %v5026_v41 = vld [vmem:[%s5242_s26 + $0x868] ss:$28 sps:$4 sm:$0xff]  }
 0x19b   : > { %3472 = vmatprep.subr.bf16.mxu0 %v4964_v44  ;;  %v5030_v44 = vld [vmem:[%s5242_s26 + $0xa60] ss:$28 sps:$4 sm:$0xff]  }
 0x19d   : > { %4290 = vmatpush3.bf16.msra.mxu1 %v4966_v13  ;;  %v5034_v13 = vld [vmem:[%s5242_s26 + $0xc54] ss:$28 sps:$4 sm:$0xff]  }
 0x19e   : > { %3473 = vmatpush1.bf16.msra.mxu0 %v4962_v46  ;;  %4291 = vmatprep.subr.bf16.mxu1 %v4970_v48  ;;  %v5031_v46 = vld [vmem:[%s5242_s26 + $0x8a0] ss:$28 sps:$4 sm:$0xff]   ;;  %v5032_v48 = vld [vmem:[%s5242_s26 + $0xc50] ss:$28 sps:$4 sm:$0xff]  }
 0x19f   : > { %3474 = vmatprep.subr.bf16.mxu0 %v4969_v47  ;;  %v5035_v47 = vld [vmem:[%s5242_s26 + $0xc58] ss:$28 sps:$4 sm:$0xff]  }
 0x1a1   : > { %4292 = vmatpush3.bf16.msra.mxu1 %v4971_v50  ;;  %v5039_v50 = vld [vmem:[%s5242_s26 + $0xc8c] ss:$28 sps:$4 sm:$0xff]  }
 0x1a2   : > { %3475 = vmatpush1.bf16.msra.mxu0 %v4967_v49  ;;  %4293 = vmatprep.subr.bf16.mxu1 %v4975_v51  ;;  %v5036_v49 = vld [vmem:[%s5242_s26 + $0xa98] ss:$28 sps:$4 sm:$0xff]   ;;  %v5037_v51 = vld [vmem:[%s5242_s26 + $0xc88] ss:$28 sps:$4 sm:$0xff]  }
 0x1a3   : > { %3476 = vmatprep.subr.bf16.mxu0 %v4974_v3  ;;  %v5040_v3 = vld [vmem:[%s5242_s26 + $0xc90] ss:$28 sps:$4 sm:$0xff]  }
 0x1a5   : > { %4294 = vmatpush3.bf16.msra.mxu1 %v4976_v53  ;;  %v5044_v53 = vld [vmem:[%s5242_s26 + $0xcc4] ss:$28 sps:$4 sm:$0xff]  }
 0x1a6   : > { %3477 = vmatpush1.bf16.msra.mxu0 %v4972_v52  ;;  %4295 = vmatprep.subr.bf16.mxu1 %v4980_v55  ;;  %v5041_v52 = vld [vmem:[%s5242_s26 + $0xad0] ss:$28 sps:$4 sm:$0xff]   ;;  %v5042_v55 = vld [vmem:[%s5242_s26 + $0xcc0] ss:$28 sps:$4 sm:$0xff]  }
 0x1a7   : > { %3478 = vmatprep.subr.bf16.mxu0 %v4979_v54  ;;  %v5045_v54 = vld [vmem:[%s5242_s26 + $0xcc8] ss:$28 sps:$4 sm:$0xff]  }
 0x1a9   : > { %4296 = vmatpush3.bf16.msra.mxu1 %v4981_v57  ;;  %v5050_v57 = vld [vmem:[%s5242_s26 + $0xd00] ss:$28 sps:$4 sm:$0xff]  }
 0x1aa   : > { %3479 = vmatpush1.bf16.msra.mxu0 %v4977_v56  ;;  %4297 = vmatprep.subr.bf16.mxu1 %v4985_v59  ;;  %v5049_v56 = vld [vmem:[%s5242_s26 + $0xcfc] ss:$28 sps:$4 sm:$0xff]  }
 0x1ab   : > { %3480 = vmatprep.subr.bf16.mxu0 %v4984_v58  ;;  %v5047_v58 = vld [vmem:[%s5242_s26 + $0xcf8] ss:$28 sps:$4 sm:$0xff]   ;;  %v5051_v59 = vld [vmem:[%s5242_s26 + $0xb40] ss:$28 sps:$4 sm:$0xff]  }
 0x1ad   : > { %4298 = vmatpush3.bf16.msra.mxu1 %v4986_v61  ;;  %v5052_v61 = vld [vmem:[%s5242_s26 + $0xd30] ss:$28 sps:$4 sm:$0xff]  }
 0x1ae   : > { %3481 = vmatpush1.bf16.msra.mxu0 %v4982_v60  ;;  %4299 = vmatprep.subr.bf16.mxu1 %v4990_v1  ;;  %v5055_v60 = vld [vmem:[%s5242_s26 + $0xd38] ss:$28 sps:$4 sm:$0xff]   ;;  %v5059_v1 = vld [vmem:[%s5242_s26 + $0xd6c] ss:$28 sps:$4 sm:$0xff]  }
 0x1af   : > { %3482 = vmatprep.subr.bf16.mxu0 %v4989_v0  ;;  %v5056_v0 = vld [vmem:[%s5242_s26 + $0xb78] ss:$28 sps:$4 sm:$0xff]  }
 0x1b1   : > { %4300 = vmatpush3.bf16.msra.mxu1 %v4991_v4  ;;  %v5057_v4 = vld [vmem:[%s5242_s26 + $0xd68] ss:$28 sps:$4 sm:$0xff]  }
 0x1b2   : > { %3483 = vmatpush1.bf16.msra.mxu0 %v4987_v2  ;;  %4307 = vmatprep.subr.bf16.mxu1 %v4995_v6  ;;  %v5060_v2 = vld [vmem:[%s5242_s26 + $0xd70] ss:$28 sps:$4 sm:$0xff]   ;;  %v5064_v6 = vld [vmem:[%s5242_s26 + $0xda4] ss:$28 sps:$4 sm:$0xff]  }
 0x1b3   : > { %3493 = vmatprep.subr.bf16.mxu0 %v4994_v5  ;;  %v5061_v5 = vld [vmem:[%s5242_s26 + $0xbb0] ss:$28 sps:$4 sm:$0xff]  }
 0x1b4   : > { %3607 = vmatmul.mubr.bf16.vlgmr.msra.gmra.mrb[12].mxu1 %v5342_v19  ;;  %v5002_v19 = vld [vmem:[%s5242_s26 + $0xb00] ss:$28 sps:$4 sm:$0xff]  }
 0x1b5   : > { %3485 = vmatmul.mubr.bf16.vlgmr.msra.gmra.mrb[4].mxu0 %v5313_v63  ;;  %4308 = vmatpush3.bf16.msra.mxu1 %v4996_v8  ;;  %v5062_v8 = vld [vmem:[%s5242_s26 + $0xda0] ss:$28 sps:$4 sm:$0xff]  }
 0x1b6   : > { %3494 = vmatpush1.bf16.msra.mxu0 %v4992_v7  ;;  %4309 = vmatprep.subr.bf16.mxu1 %v5000_v11  ;;  %v5065_v7 = vld [vmem:[%s5242_s26 + $0xda8] ss:$28 sps:$4 sm:$0xff]   ;;  %v5069_v11 = vld [vmem:[%s5242_s26 + $0xddc] ss:$28 sps:$4 sm:$0xff]  }
 0x1b7   : > { %3495 = vmatprep.subr.bf16.mxu0 %v4999_v9  ;;  %3646 = vmatprep.mubr.bf16.mxu1 %v5348_v23  ;;  %v5011_v23 = vld [vmem:[%s5242_s26 + $0x7c0] ss:$28 sps:$4 sm:$0xff]   ;;  %v5066_v9 = vld [vmem:[%s5242_s26 + $0xbe8] ss:$28 sps:$4 sm:$0xff]  }
 0x1b8   : > { %3525 = vmatprep.mubr.bf16.mxu0 %v5420_v31 }
 0x1b9   : > { %4310 = vmatpush3.bf16.msra.mxu1 %v5001_v62  ;;  %v5067_v62 = vld [vmem:[%s5242_s26 + $0xdd8] ss:$28 sps:$4 sm:$0xff]  }
 0x1ba   : > { %3496 = vmatpush1.bf16.msra.mxu0 %v4997_v14  ;;  %4311 = vmatprep.subr.bf16.mxu1 %v5005_v16  ;;  %v5070_v14 = vld [vmem:[%s5242_s26 + $0xde0] ss:$28 sps:$4 sm:$0xff]   ;;  %v5143_v16 = vmov 1983009808  }
 0x1bb   : > { %3497 = vmatprep.subr.bf16.mxu0 %v5004_v15  ;;  %v5071_v15 = vld [vmem:[%s5242_s26 + $0xc20] ss:$28 sps:$4 sm:$0xff]  }
 0x1bd   : > { %4312 = vmatpush3.bf16.msra.mxu1 %v5006_v17 }
 0x1be   : > { %3498 = vmatpush1.bf16.msra.mxu0 %v5002_v19  ;;  %4313 = vmatprep.subr.bf16.mxu1 %v5010_v20  ;;  %v3704_v19 = vunpack.c.l.s4 %v5143_v16 }
 0x1bf   : > { %3499 = vmatprep.subr.bf16.mxu0 %v5009_v18 }
 0x1c0   : > { %v3705_v17 = vunpack.c.0.s8 %v3704_v19 }
 0x1c1   : > { %4314 = vmatpush3.bf16.msra.mxu1 %v5011_v23 }
 0x1c2   : > { %3500 = vmatpush1.bf16.msra.mxu0 %v5007_v21  ;;  %4315 = vmatprep.subr.bf16.mxu1 %v5015_v24  ;;  %v3708_v18 = vsub.s32 %v3705_v17, %v5287_v43 }
 0x1c3   : > { %3501 = vmatprep.subr.bf16.mxu0 %v5014_v22 }
 0x1c5   : > { %4316 = vmatpush3.bf16.msra.mxu1 %v5016_v26 }
 0x1c6   : > { %3502 = vmatpush1.bf16.msra.mxu0 %v5012_v25  ;;  %4317 = vmatprep.subr.bf16.mxu1 %v5020_v28 }
 0x1c7   : > { %3503 = vmatprep.subr.bf16.mxu0 %v5019_v27 }
 0x1c8   : > { %v3199_v34 = vpop.f32.mrb[0].mxu0 }
 0x1c9   : > { %v5729_v35 = vadd.f32 %v3199_v34, %v5586_v10  ;;  %v3201_v37 = vpop.f32.mrb[1].mxu0  ;;  %4318 = vmatpush3.bf16.msra.mxu1 %v5021_v30  ;;  %v5029_v10 = vld [vmem:[%s5242_s26 + $0xc1c] ss:$28 sps:$4 sm:$0xff]  }
 0x1ca   : > { %v5732_v38 = vadd.f32 %v3201_v37, %v5589_v12  ;;  %v3203_v39 = vpop.f32.mrb[2].mxu0  ;;  %3504 = vmatpush1.bf16.msra.mxu0 %v5017_v29  ;;  %4319 = vmatprep.subr.bf16.mxu1 %v5025_v33  ;;  %v5027_v12 = vld [vmem:[%s5242_s26 + $0xc18] ss:$28 sps:$4 sm:$0xff]  }
 0x1cb   : > { %v3204_v42 = vpop.f32.mrb[3].mxu0  ;;  %3505 = vmatprep.subr.bf16.mxu0 %v5024_v32 }
 0x1cc   : > { %v3701_v45 = vcombine.low %v5729_v35, %v5732_v38 }
 0x1cd   : > { %4320 = vmatpush3.bf16.msra.mxu1 %v5026_v41 }
 0x1ce   : > { %3506 = vmatpush1.bf16.msra.mxu0 %v5022_v40  ;;  %4321 = vmatprep.subr.bf16.mxu1 %v5030_v44  ;;  %v3709_v25 = vrot.slane %v3701_v45, %v3708_v18 }
 0x1cf   : > { %3507 = vmatprep.subr.bf16.mxu0 %v5029_v10 }
 0x1d1   : > { %4322 = vmatpush3.bf16.msra.mxu1 %v5031_v46 }
 0x1d2   : > { %3508 = vmatpush1.bf16.msra.mxu0 %v5027_v12  ;;  %4329 = vmatprep.subr.bf16.mxu1 %v5035_v47 }
 0x1d3   : > { %3509 = vmatprep.subr.bf16.mxu0 %v5034_v13 }
 0x1d4   : > { %3647 = vmatmul.mubr.bf16.vlgmr.msra.gmra.mrb[16].mxu1 %v5313_v63  ;;  %v5046_v63 = vld [vmem:[%s5242_s26 + $0xb08] ss:$28 sps:$4 sm:$0xff]  }
 0x1d5   : > { %4330 = vmatpush3.bf16.msra.mxu1 %v5036_v49  ;;  %3686 = vmatprep.mubr.bf16.mxu1 %v5420_v31  ;;  %v5054_v31 = vld [vmem:[%s5242_s26 + $0xd34] ss:$28 sps:$4 sm:$0xff]  }
 0x1d6   : > { %3510 = vmatpush1.bf16.msra.mxu0 %v5032_v48  ;;  %4331 = vmatprep.subr.bf16.mxu1 %v5040_v3 }
 0x1d7   : > { %3511 = vmatprep.subr.bf16.mxu0 %v5039_v50 }
 0x1d9   : > { %4332 = vmatpush3.bf16.msra.mxu1 %v5041_v52 }
 0x1da   : > { %3512 = vmatpush1.bf16.msra.mxu0 %v5037_v51  ;;  %4333 = vmatprep.subr.bf16.mxu1 %v5045_v54 }
 0x1db   : > { %3513 = vmatprep.subr.bf16.mxu0 %v5044_v53 }
 0x1dd   : > { %4334 = vmatpush3.bf16.msra.mxu1 %v5046_v63 }
 0x1de   : > { %3514 = vmatpush1.bf16.msra.mxu0 %v5042_v55  ;;  %4335 = vmatprep.subr.bf16.mxu1 %v5050_v57 }
 0x1df   : > { %3515 = vmatprep.subr.bf16.mxu0 %v5049_v56 }
 0x1e1   : > { %4336 = vmatpush3.bf16.msra.mxu1 %v5051_v59 }
 0x1e2   : > { %3516 = vmatpush1.bf16.msra.mxu0 %v5047_v58  ;;  %4337 = vmatprep.subr.bf16.mxu1 %v5055_v60 }
 0x1e3   : > { %3517 = vmatprep.subr.bf16.mxu0 %v5054_v31 }
 0x1e5   : > { %4338 = vmatpush3.bf16.msra.mxu1 %v5056_v0 }
 0x1e6   : > { %3518 = vmatpush1.bf16.msra.mxu0 %v5052_v61  ;;  %4339 = vmatprep.subr.bf16.mxu1 %v5060_v2 }
 0x1e7   : > { %3519 = vmatprep.subr.bf16.mxu0 %v5059_v1 }
 0x1e9   : > { %4340 = vmatpush3.bf16.msra.mxu1 %v5061_v5 }
 0x1ea   : > { %3520 = vmatpush1.bf16.msra.mxu0 %v5057_v4  ;;  %4341 = vmatprep.subr.bf16.mxu1 %v5065_v7 }
 0x1eb   : > { %3521 = vmatprep.subr.bf16.mxu0 %v5064_v6 }
 0x1ed   : > { %4342 = vmatpush3.bf16.msra.mxu1 %v5066_v9 }
 0x1ee   : > { %3522 = vmatpush1.bf16.msra.mxu0 %v5062_v8  ;;  %4343 = vmatprep.subr.bf16.mxu1 %v5070_v14 }
 0x1ef   : > { %3523 = vmatprep.subr.bf16.mxu0 %v5069_v11 }
 0x1f1   : > { %4344 = vmatpush3.bf16.msra.mxu1 %v5071_v15 }
 0x1f2   : > { %3524 = vmatpush1.bf16.msra.mxu0 %v5067_v62 }
 0x1f4   : > { %3687 = vmatmul.mubr.bf16.vlgmr.msra.gmra.mrb[20].mxu1 %v5488_v36 }
 0x1f5   : > { %3526 = vmatmul.mubr.bf16.vlgmr.msra.gmra.mrb[4].mxu0 %v5488_v36 }
 0x247   : > { %v3363_v20 = vpop.f32.mrb[4].mxu1 }
 0x248   : > { %v3365_v21 = vpop.f32.mrb[5].mxu1 }
 0x249   : > { %v3702_v23 = vcombine.low %v3363_v20, %v3365_v21  ;;  %v3367_v22 = vpop.f32.mrb[6].mxu1 }
 0x24a   : > { %v3368_v24 = vpop.f32.mrb[7].mxu1 }
 0x24b   : > { %v3716_v36 = vrot.slane %v3702_v23, %v3708_v18 }
 0x24d   : > { %v3717_v26 = vcombine.low %v3709_v25, %v3716_v36 }
 0x24f   : > { %3736 = vst [vmem:[%s5787_s28] sm:$0xff] %v3717_v26 }
 0x267   : > { %v4279_v43 = vpop.f32.mrb[8].mxu1 }
 0x268   : > { %v4280_v27 = vpop.f32.mrb[9].mxu1 }
 0x269   : > { %v4281_v28 = vadd.f32 %v4280_v27, %v4279_v43  ;;  %v4282_v29 = vpop.f32.mrb[10].mxu1 }
 0x26a   : > { %v4283_v30 = vpop.f32.mrb[11].mxu1 }
 0x287   : > { %v4301_v32 = vpop.f32.mrb[12].mxu1 }
 0x288   : > { %v4302_v33 = vpop.f32.mrb[13].mxu1 }
 0x289   : > { %v4303_v34 = vadd.f32 %v4302_v33, %v4301_v32  ;;  %v4304_v37 = vpop.f32.mrb[14].mxu1 }
 0x28a   : > { %v4305_v35 = vpop.f32.mrb[15].mxu1 }
 0x28b   : > { %v3609_v38 = vadd.f32 %v4303_v34, %v4281_v28 }
 0x2a7   : > { %v4323_v39 = vpop.f32.mrb[16].mxu1 }
 0x2a8   : > { %v4324_v40 = vpop.f32.mrb[17].mxu1 }
 0x2a9   : > { %v4325_v41 = vadd.f32 %v4324_v40, %v4323_v39  ;;  %v4326_v42 = vpop.f32.mrb[18].mxu1 }
 0x2aa   : > { %v4327_v10 = vpop.f32.mrb[19].mxu1 }
 0x2ab   : > { %v3649_v44 = vadd.f32 %v4325_v41, %v3609_v38 }
 0x2c7   : > { %v4345_v12 = vpop.f32.mrb[20].mxu1 }
 0x2c8   : > { %v3527_v45 = vpop.f32.mrb[4].mxu0  ;;  %v4346_v13 = vpop.f32.mrb[21].mxu1 }
 0x2c9   : > { %v3529_v46 = vpop.f32.mrb[5].mxu0  ;;  %v4347_v48 = vadd.f32 %v4346_v13, %v4345_v12  ;;  %v4348_v50 = vpop.f32.mrb[22].mxu1 }
 0x2ca   : > { %v3718_v47 = vcombine.low %v3527_v45, %v3529_v46  ;;  %v3531_v49 = vpop.f32.mrb[6].mxu0  ;;  %v4349_v51 = vpop.f32.mrb[23].mxu1 }
 0x2cb   : > { %v3532_v3 = vpop.f32.mrb[7].mxu0  ;;  %v3689_v52 = vadd.f32 %v4347_v48, %v3649_v44 }
 0x2cc   : > { %v3725_v53 = vrot.slane %v3718_v47, %v3708_v18 }
 0x2cd   : > { %v3732_v54 = vrot.slane %v3689_v52, %v3708_v18 }
 0x2cf   : > { %v3733_v55 = vcombine.low %v3725_v53, %v3732_v54 }
 0x2d1   : > { %3737 = vst [vmem:[%s5787_s28 + $0x8] sm:$0x3f] %v3733_v55 }
 0x2d2 PF: > { %p12_p8 = scmp.ge.s32.totalorder %s5179_s14, 9   ;;  %s5809_s9 = smov %s5128_s10 }
 0x2d3   : > { %s5810_s10 = smov %s5132_s11  ;;  %s5811_s11 = smov %s5189_s17 }
 0x2d4   : > { %s5812_s12 = smov %s5179_s14  ;;  %14 = sbr.rel (!%p12_p8) target bundleno = 3 (0x3), region = 68 }
 0x2db   :  { %3760 = vsyncpa [#allocation3], 1 }
 0x2dc   :  { %3762 = vsyncpa [#allocation3 + $0x1], 1 }

// kernel: generator_forward.10
= control target key start
LH: loop header
LB: loop body
LE: loop exit
PB: predicated region body
PF: predicated region fallthrough
CT: control target
= control target key end

     0   :  { %vm63_vm0 = vcmask 523264   ;;  %vm780_vm1 = vcmask 519168   ;;  %s2048_s0 = inlined_call_operand.vmem [shape: f32[392,64], index: 0, kind: input, shape index: {}]   ;;  %s2049_s1 = inlined_call_operand.vmem [shape: f32[1,64], index: 1, kind: input, shape index: {}]   ;;  %s2050_s2 = inlined_call_operand.vmem [shape: f32[1,64], index: 2, kind: input, shape index: {}]   ;;  %s2051_s3 = inlined_call_operand.vmem [shape: bf16[392,64], index: 3, kind: output, shape index: {}]  }
   0x1   :  { %v959_v0 = vld [vmem:[%s2048_s0] sm:$0xff]  ;;  %v964_v1 = vld [vmem:[%s2048_s0 + $0x8] sm:$0xff]  ;;  %v969_v2 = vld [vmem:[%s2048_s0 + $0x10] sm:$0xff] }
   0x2   :  { %v974_v3 = vld [vmem:[%s2048_s0 + $0x18] sm:$0xff]  ;;  %v64_v4 = vsel %vm63_vm0, %v959_v0, 0.0  ;;  %v65_v5 = vsel %vm63_vm0, %v964_v1, 0.0  ;;  %v67_v6 = vsel %vm63_vm0, %v969_v2, 0.0  ;;  %v985_v7 = vld [vmem:[%s2048_s0 + $0x20] sm:$0xff]  ;;  %v992_v10 = vld [vmem:[%s2048_s0 + $0x28] sm:$0xff] }
   0x3   :  { %v66_v8 = vadd.f32 %v65_v5, %v64_v4  ;;  %v69_v9 = vsel %vm63_vm0, %v974_v3, 0.0  ;;  %v71_v12 = vsel %vm63_vm0, %v985_v7, 0.0  ;;  %v999_v13 = vld [vmem:[%s2048_s0 + $0x30] sm:$0xff]  ;;  %v73_v15 = vsel %vm63_vm0, %v992_v10, 0.0  ;;  %v1006_v16 = vld [vmem:[%s2048_s0 + $0x38] sm:$0xff]  ;;  %v1013_v19 = vld [vmem:[%s2048_s0 + $0x40] sm:$0xff] }
   0x4   :  { %v75_v18 = vsel %vm63_vm0, %v999_v13, 0.0  ;;  %v77_v21 = vsel %vm63_vm0, %v1006_v16, 0.0  ;;  %v1020_v22 = vld [vmem:[%s2048_s0 + $0x48] sm:$0xff]  ;;  %v79_v24 = vsel %vm63_vm0, %v1013_v19, 0.0  ;;  %v1027_v25 = vld [vmem:[%s2048_s0 + $0x50] sm:$0xff]  ;;  %v1034_v28 = vld [vmem:[%s2048_s0 + $0x58] sm:$0xff] }
   0x5   :  { %v68_v11 = vadd.f32 %v67_v6, %v66_v8  ;;  %v81_v27 = vsel %vm63_vm0, %v1020_v22, 0.0  ;;  %v83_v30 = vsel %vm63_vm0, %v1027_v25, 0.0  ;;  %v1041_v31 = vld [vmem:[%s2048_s0 + $0x60] sm:$0xff]  ;;  %v85_v33 = vsel %vm63_vm0, %v1034_v28, 0.0  ;;  %v1048_v34 = vld [vmem:[%s2048_s0 + $0x68] sm:$0xff]  ;;  %v1055_v37 = vld [vmem:[%s2048_s0 + $0x70] sm:$0xff] }
   0x6   :  { %v87_v36 = vsel %vm63_vm0, %v1041_v31, 0.0  ;;  %v89_v39 = vsel %vm63_vm0, %v1048_v34, 0.0  ;;  %v1062_v40 = vld [vmem:[%s2048_s0 + $0x78] sm:$0xff]  ;;  %v91_v42 = vsel %vm63_vm0, %v1055_v37, 0.0  ;;  %v1069_v43 = vld [vmem:[%s2048_s0 + $0x80] sm:$0xff]  ;;  %v1076_v46 = vld [vmem:[%s2048_s0 + $0x88] sm:$0xff] }
   0x7   :  { %v70_v14 = vadd.f32 %v69_v9, %v68_v11  ;;  %v93_v45 = vsel %vm63_vm0, %v1062_v40, 0.0  ;;  %v95_v48 = vsel %vm63_vm0, %v1069_v43, 0.0  ;;  %v1083_v49 = vld [vmem:[%s2048_s0 + $0x90] sm:$0xff]  ;;  %v97_v51 = vsel %vm63_vm0, %v1076_v46, 0.0  ;;  %v1090_v52 = vld [vmem:[%s2048_s0 + $0x98] sm:$0xff]  ;;  %v1097_v55 = vld [vmem:[%s2048_s0 + $0xa0] sm:$0xff] }
   0x8   :  { %v99_v54 = vsel %vm63_vm0, %v1083_v49, 0.0  ;;  %v101_v57 = vsel %vm63_vm0, %v1090_v52, 0.0  ;;  %v1104_v58 = vld [vmem:[%s2048_s0 + $0xa8] sm:$0xff]  ;;  %v103_v60 = vsel %vm63_vm0, %v1097_v55, 0.0  ;;  %v1111_v61 = vld [vmem:[%s2048_s0 + $0xb0] sm:$0xff]  ;;  %v1118_v4 = vld [vmem:[%s2048_s0 + $0xb8] sm:$0xff] }
   0x9   :  { %v72_v17 = vadd.f32 %v71_v12, %v70_v14  ;;  %v105_v63 = vsel %vm63_vm0, %v1104_v58, 0.0  ;;  %v107_v6 = vsel %vm63_vm0, %v1111_v61, 0.0  ;;  %v1125_v8 = vld [vmem:[%s2048_s0 + $0xc0] sm:$0xff]  ;;  %v109_v11 = vsel %vm63_vm0, %v1118_v4, 0.0  ;;  %v1132_v12 = vld [vmem:[%s2048_s0 + $0xc8] sm:$0xff] }
   0xb   :  { %v74_v20 = vadd.f32 %v73_v15, %v72_v17  ;;  %v111_v15 = vsel %vm63_vm0, %v1125_v8, 0.0  ;;  %v1139_v17 = vld [vmem:[%s2048_s0 + $0xd0] sm:$0xff] }
   0xd   :  { %v76_v23 = vadd.f32 %v75_v18, %v74_v20  ;;  %v113_v20 = vsel %vm63_vm0, %v1132_v12, 0.0 }
   0xf   :  { %v78_v26 = vadd.f32 %v77_v21, %v76_v23  ;;  %v1146_v21 = vld [vmem:[%s2048_s0 + $0xd8] sm:$0xff] }
  0x11   :  { %v80_v29 = vadd.f32 %v79_v24, %v78_v26  ;;  %v115_v24 = vsel %vm63_vm0, %v1139_v17, 0.0  ;;  %v1153_v26 = vld [vmem:[%s2048_s0 + $0xe0] sm:$0xff] }
  0x13   :  { %v82_v32 = vadd.f32 %v81_v27, %v80_v29  ;;  %v117_v29 = vsel %vm63_vm0, %v1146_v21, 0.0 }
  0x15   :  { %v84_v35 = vadd.f32 %v83_v30, %v82_v32  ;;  %v1160_v30 = vld [vmem:[%s2048_s0 + $0xe8] sm:$0xff] }
  0x17   :  { %v86_v38 = vadd.f32 %v85_v33, %v84_v35  ;;  %v119_v33 = vsel %vm63_vm0, %v1153_v26, 0.0  ;;  %v1167_v35 = vld [vmem:[%s2048_s0 + $0xf0] sm:$0xff] }
  0x19   :  { %v88_v41 = vadd.f32 %v87_v36, %v86_v38  ;;  %v121_v38 = vsel %vm63_vm0, %v1160_v30, 0.0 }
  0x1b   :  { %v90_v44 = vadd.f32 %v89_v39, %v88_v41  ;;  %v1174_v39 = vld [vmem:[%s2048_s0 + $0xf8] sm:$0xff] }
  0x1d   :  { %v92_v47 = vadd.f32 %v91_v42, %v90_v44  ;;  %v123_v42 = vsel %vm63_vm0, %v1167_v35, 0.0  ;;  %v1181_v44 = vld [vmem:[%s2048_s0 + $0x100] sm:$0xff] }
  0x1f   :  { %v94_v50 = vadd.f32 %v93_v45, %v92_v47  ;;  %v125_v47 = vsel %vm63_vm0, %v1174_v39, 0.0 }
  0x21   :  { %v96_v53 = vadd.f32 %v95_v48, %v94_v50  ;;  %v1188_v48 = vld [vmem:[%s2048_s0 + $0x108] sm:$0xff] }
  0x23   :  { %v98_v56 = vadd.f32 %v97_v51, %v96_v53  ;;  %v127_v51 = vsel %vm63_vm0, %v1181_v44, 0.0  ;;  %v1195_v53 = vld [vmem:[%s2048_s0 + $0x110] sm:$0xff] }
  0x25   :  { %v100_v59 = vadd.f32 %v99_v54, %v98_v56  ;;  %v129_v56 = vsel %vm63_vm0, %v1188_v48, 0.0 }
  0x27   :  { %v102_v62 = vadd.f32 %v101_v57, %v100_v59  ;;  %v1202_v57 = vld [vmem:[%s2048_s0 + $0x118] sm:$0xff] }
  0x29   :  { %v104_v5 = vadd.f32 %v103_v60, %v102_v62  ;;  %v131_v60 = vsel %vm63_vm0, %v1195_v53, 0.0  ;;  %v1209_v62 = vld [vmem:[%s2048_s0 + $0x120] sm:$0xff] }
  0x2b   :  { %v106_v9 = vadd.f32 %v105_v63, %v104_v5  ;;  %v133_v5 = vsel %vm63_vm0, %v1202_v57, 0.0 }
  0x2d   :  { %v108_v14 = vadd.f32 %v107_v6, %v106_v9  ;;  %v1216_v6 = vld [vmem:[%s2048_s0 + $0x128] sm:$0xff] }
  0x2f   :  { %v110_v18 = vadd.f32 %v109_v11, %v108_v14  ;;  %v135_v11 = vsel %vm63_vm0, %v1209_v62, 0.0  ;;  %v1223_v14 = vld [vmem:[%s2048_s0 + $0x130] sm:$0xff] }
  0x31   :  { %v112_v23 = vadd.f32 %v111_v15, %v110_v18  ;;  %v137_v18 = vsel %vm63_vm0, %v1216_v6, 0.0 }
  0x33   :  { %v114_v27 = vadd.f32 %v113_v20, %v112_v23  ;;  %v1230_v20 = vld [vmem:[%s2048_s0 + $0x138] sm:$0xff] }
  0x35   :  { %v116_v32 = vadd.f32 %v115_v24, %v114_v27  ;;  %v139_v24 = vsel %vm63_vm0, %v1223_v14, 0.0  ;;  %v1237_v27 = vld [vmem:[%s2048_s0 + $0x140] sm:$0xff] }
  0x37   :  { %v118_v36 = vadd.f32 %v117_v29, %v116_v32  ;;  %v141_v32 = vsel %vm63_vm0, %v1230_v20, 0.0 }
  0x39   :  { %v120_v41 = vadd.f32 %v119_v33, %v118_v36  ;;  %v1244_v33 = vld [vmem:[%s2048_s0 + $0x148] sm:$0xff] }
  0x3b   :  { %v122_v45 = vadd.f32 %v121_v38, %v120_v41  ;;  %v143_v38 = vsel %vm63_vm0, %v1237_v27, 0.0  ;;  %v1251_v41 = vld [vmem:[%s2048_s0 + $0x150] sm:$0xff] }
  0x3d   :  { %v124_v50 = vadd.f32 %v123_v42, %v122_v45  ;;  %v145_v45 = vsel %vm63_vm0, %v1244_v33, 0.0 }
  0x3f   :  { %v126_v54 = vadd.f32 %v125_v47, %v124_v50  ;;  %v1258_v47 = vld [vmem:[%s2048_s0 + $0x158] sm:$0xff] }
  0x41   :  { %v128_v59 = vadd.f32 %v127_v51, %v126_v54  ;;  %v147_v51 = vsel %vm63_vm0, %v1251_v41, 0.0  ;;  %v1265_v54 = vld [vmem:[%s2048_s0 + $0x160] sm:$0xff] }
  0x43   :  { %v130_v63 = vadd.f32 %v129_v56, %v128_v59  ;;  %v149_v59 = vsel %vm63_vm0, %v1258_v47, 0.0 }
  0x45   :  { %v132_v9 = vadd.f32 %v131_v60, %v130_v63  ;;  %v1272_v60 = vld [vmem:[%s2048_s0 + $0x168] sm:$0xff] }
  0x47   :  { %v134_v15 = vadd.f32 %v133_v5, %v132_v9  ;;  %v151_v5 = vsel %vm63_vm0, %v1265_v54, 0.0  ;;  %v1279_v9 = vld [vmem:[%s2048_s0 + $0x170] sm:$0xff] }
  0x48   :  { %2059 = vst [vmem:[#allocation2_spill] sm:$0xff] %v1279_v9 }
  0x49   :  { %v136_v23 = vadd.f32 %v135_v11, %v134_v15  ;;  %v153_v15 = vsel %vm63_vm0, %v1272_v60, 0.0 }
  0x4b   :  { %v138_v29 = vadd.f32 %v137_v18, %v136_v23  ;;  %v1286_v18 = vld [vmem:[%s2048_s0 + $0x178] sm:$0xff] }
  0x4d   :  { %v140_v36 = vadd.f32 %v139_v24, %v138_v29  ;;  %v155_v24 = vsel %vm63_vm0, %v1279_v9, 0.0  ;;  %v1293_v29 = vld [vmem:[%s2048_s0 + $0x180] sm:$0xff] }
  0x4f   :  { %v142_v42 = vadd.f32 %v141_v32, %v140_v36  ;;  %v157_v36 = vsel %vm63_vm0, %v1286_v18, 0.0 }
  0x51   :  { %v144_v50 = vadd.f32 %v143_v38, %v142_v42  ;;  %v159_v42 = vsel %vm63_vm0, %v1293_v29, 0.0 }
  0x53   :  { %v146_v56 = vadd.f32 %v145_v45, %v144_v50 }
  0x55   :  { %v148_v63 = vadd.f32 %v147_v51, %v146_v56 }
  0x57   :  { %v150_v11 = vadd.f32 %v149_v59, %v148_v63 }
  0x59   :  { %v152_v23 = vadd.f32 %v151_v5, %v150_v11 }
  0x5b   :  { %v154_v32 = vadd.f32 %v153_v15, %v152_v23 }
  0x5d   :  { %v156_v38 = vadd.f32 %v155_v24, %v154_v32 }
  0x5f   :  { %v158_v45 = vadd.f32 %v157_v36, %v156_v38 }
  0x61   :  { %v160_v50 = vadd.f32 %v159_v42, %v158_v45 }
  0x63   :  { %v161_v51 = vrot.slane %v160_v50, 4 }
  0x65   :  { %v162_v56 = vadd.f32 %v161_v51, %v160_v50 }
  0x67   :  { %v163_v59 = vrot.slane %v162_v56, 2 }
  0x69   :  { %v164_v63 = vadd.f32 %v163_v59, %v162_v56 }
  0x6b   :  { %v165_v5 = vrot.slane %v164_v63, 1 }
  0x6d   :  { %v166_v11 = vadd.f32 %v165_v5, %v164_v63 }
  0x6f   :  { %v1299_v9 = vmul.f32 0.0025510204, %v166_v11 }
  0x71   :  { %v1303_v15 = vsub.f32 %v959_v0, %v1299_v9  ;;  %v1307_v23 = vsub.f32 %v964_v1, %v1299_v9  ;;  %v1311_v24 = vsub.f32 %v969_v2, %v1299_v9  ;;  %v1315_v32 = vsub.f32 %v974_v3, %v1299_v9 }
  0x72   :  { %v1319_v36 = vsub.f32 %v985_v7, %v1299_v9  ;;  %v1329_v2 = vsub.f32 %v992_v10, %v1299_v9  ;;  %v1335_v7 = vsub.f32 %v999_v13, %v1299_v9  ;;  %v1344_v10 = vsub.f32 %v1006_v16, %v1299_v9 }
  0x73   :  { %v218_v0 = vmul.f32 %v1303_v15, %v1303_v15  ;;  %v219_v38 = vmul.f32 %v1307_v23, %v1307_v23  ;;  %v220_v1 = vmul.f32 %v1311_v24, %v1311_v24  ;;  %v221_v3 = vmul.f32 %v1315_v32, %v1315_v32 }
  0x74   :  { %v222_v42 = vmul.f32 %v1319_v36, %v1319_v36  ;;  %v223_v59 = vmul.f32 %v1329_v2, %v1329_v2  ;;  %v1351_v5 = vsub.f32 %v1013_v19, %v1299_v9  ;;  %v224_v11 = vmul.f32 %v1335_v7, %v1335_v7 }
  0x75   :  { %v267_v45 = vsel %vm63_vm0, %v218_v0, 0.0  ;;  %v268_v50 = vsel %vm63_vm0, %v219_v38, 0.0  ;;  %v270_v56 = vsel %vm63_vm0, %v220_v1, 0.0  ;;  %v272_v13 = vsel %vm63_vm0, %v221_v3, 0.0 }
  0x76   :  { %v269_v51 = vadd.f32 %v268_v50, %v267_v45  ;;  %v274_v0 = vsel %vm63_vm0, %v222_v42, 0.0  ;;  %v1358_v16 = vsub.f32 %v1020_v22, %v1299_v9  ;;  %v225_v1 = vmul.f32 %v1344_v10, %v1344_v10 }
  0x77   :  { %v276_v3 = vsel %vm63_vm0, %v223_v59, 0.0  ;;  %v1365_v19 = vsub.f32 %v1027_v25, %v1299_v9  ;;  %v226_v50 = vmul.f32 %v1351_v5, %v1351_v5  ;;  %v278_v42 = vsel %vm63_vm0, %v224_v11, 0.0 }
  0x78   :  { %v271_v63 = vadd.f32 %v270_v56, %v269_v51  ;;  %v1372_v22 = vsub.f32 %v1034_v28, %v1299_v9  ;;  %v227_v56 = vmul.f32 %v1358_v16, %v1358_v16  ;;  %v280_v59 = vsel %vm63_vm0, %v225_v1, 0.0 }
  0x79   :  { %v1379_v25 = vsub.f32 %v1041_v31, %v1299_v9  ;;  %v282_v11 = vsel %vm63_vm0, %v226_v50, 0.0  ;;  %v1386_v28 = vsub.f32 %v1048_v34, %v1299_v9  ;;  %v1393_v31 = vsub.f32 %v1055_v37, %v1299_v9 }
  0x7a   :  { %v273_v38 = vadd.f32 %v272_v13, %v271_v63  ;;  %v228_v63 = vmul.f32 %v1365_v19, %v1365_v19  ;;  %v284_v1 = vsel %vm63_vm0, %v227_v56, 0.0  ;;  %v1400_v34 = vsub.f32 %v1062_v40, %v1299_v9 }
  0x7b   :  { %v1407_v37 = vsub.f32 %v1069_v43, %v1299_v9  ;;  %v1414_v40 = vsub.f32 %v1076_v46, %v1299_v9  ;;  %v1421_v43 = vsub.f32 %v1083_v49, %v1299_v9  ;;  %v1428_v46 = vsub.f32 %v1090_v52, %v1299_v9 }
  0x7c   :  { %v275_v45 = vadd.f32 %v274_v0, %v273_v38  ;;  %v229_v38 = vmul.f32 %v1372_v22, %v1372_v22  ;;  %v286_v50 = vsel %vm63_vm0, %v228_v63, 0.0  ;;  %v1435_v49 = vsub.f32 %v1097_v55, %v1299_v9 }
  0x7d   :  { %v1442_v52 = vsub.f32 %v1104_v58, %v1299_v9  ;;  %v1449_v55 = vsub.f32 %v1111_v61, %v1299_v9  ;;  %v1456_v58 = vsub.f32 %v1118_v4, %v1299_v9  ;;  %v1463_v61 = vsub.f32 %v1125_v8, %v1299_v9 }
  0x7e   :  { %v277_v51 = vadd.f32 %v276_v3, %v275_v45  ;;  %v230_v45 = vmul.f32 %v1379_v25, %v1379_v25  ;;  %v288_v56 = vsel %vm63_vm0, %v229_v38, 0.0  ;;  %v1470_v4 = vsub.f32 %v1132_v12, %v1299_v9 }
  0x7f   :  { %v1477_v8 = vsub.f32 %v1139_v17, %v1299_v9  ;;  %v1484_v12 = vsub.f32 %v1146_v21, %v1299_v9  ;;  %v1491_v17 = vsub.f32 %v1153_v26, %v1299_v9  ;;  %v1498_v21 = vsub.f32 %v1160_v30, %v1299_v9 }
  0x80   :  { %v279_v13 = vadd.f32 %v278_v42, %v277_v51  ;;  %v231_v51 = vmul.f32 %v1386_v28, %v1386_v28  ;;  %v290_v63 = vsel %vm63_vm0, %v230_v45, 0.0  ;;  %v1505_v26 = vsub.f32 %v1167_v35, %v1299_v9 }
  0x81   :  { %v1512_v30 = vsub.f32 %v1174_v39, %v1299_v9  ;;  %v1519_v35 = vsub.f32 %v1181_v44, %v1299_v9  ;;  %v1526_v39 = vsub.f32 %v1188_v48, %v1299_v9  ;;  %v1533_v44 = vsub.f32 %v1195_v53, %v1299_v9 }
  0x82   :  { %v281_v0 = vadd.f32 %v280_v59, %v279_v13  ;;  %v232_v13 = vmul.f32 %v1393_v31, %v1393_v31  ;;  %v292_v38 = vsel %vm63_vm0, %v231_v51, 0.0  ;;  %v1540_v48 = vsub.f32 %v1202_v57, %v1299_v9 }
  0x83   :  { %v1547_v53 = vsub.f32 %v1209_v62, %v1299_v9  ;;  %v1554_v57 = vsub.f32 %v1216_v6, %v1299_v9  ;;  %v1561_v62 = vsub.f32 %v1223_v14, %v1299_v9  ;;  %v1568_v6 = vsub.f32 %v1230_v20, %v1299_v9 }
  0x84   :  { %v283_v3 = vadd.f32 %v282_v11, %v281_v0  ;;  %v233_v0 = vmul.f32 %v1400_v34, %v1400_v34  ;;  %v294_v45 = vsel %vm63_vm0, %v232_v13, 0.0  ;;  %v1575_v14 = vsub.f32 %v1237_v27, %v1299_v9 }
  0x85   :  { %v1582_v20 = vsub.f32 %v1244_v33, %v1299_v9  ;;  %v1589_v27 = vsub.f32 %v1251_v41, %v1299_v9  ;;  %v1596_v33 = vsub.f32 %v1258_v47, %v1299_v9  ;;  %v1603_v41 = vsub.f32 %v1265_v54, %v1299_v9 }
  0x86   :  { %v285_v42 = vadd.f32 %v284_v1, %v283_v3  ;;  %v234_v3 = vmul.f32 %v1407_v37, %v1407_v37  ;;  %v296_v51 = vsel %vm63_vm0, %v233_v0, 0.0  ;;  %v1610_v47 = vsub.f32 %v1272_v60, %v1299_v9 }
  0x87   :  { %2060 = vst [vmem:[#allocation3_spill] sm:$0xff] %v1596_v33  ;;  %2061 = vst [vmem:[#allocation4_spill] sm:$0xff] %v1603_v41  ;;  %v1624_v60 = vsub.f32 %v1286_v18, %v1299_v9 }
  0x88   :  { %v287_v59 = vadd.f32 %v286_v50, %v285_v42  ;;  %v235_v42 = vmul.f32 %v1414_v40, %v1414_v40  ;;  %v298_v13 = vsel %vm63_vm0, %v234_v3, 0.0  ;;  %2062 = vst [vmem:[#allocation5_spill] sm:$0xff] %v1610_v47 }
  0x89   :  { %2065 = vst [vmem:[#allocation6_spill] sm:$0xff] %v1624_v60  ;;  %v265_v18 = vmul.f32 %v1624_v60, %v1624_v60 }
  0x8a   :  { %v289_v11 = vadd.f32 %v288_v56, %v287_v59  ;;  %v236_v59 = vmul.f32 %v1421_v43, %v1421_v43  ;;  %v300_v0 = vsel %vm63_vm0, %v235_v42, 0.0 }
  0x8c   :  { %v291_v1 = vadd.f32 %v290_v63, %v289_v11  ;;  %v237_v11 = vmul.f32 %v1428_v46, %v1428_v46  ;;  %v302_v3 = vsel %vm63_vm0, %v236_v59, 0.0 }
  0x8e   :  { %v293_v50 = vadd.f32 %v292_v38, %v291_v1  ;;  %v238_v1 = vmul.f32 %v1435_v49, %v1435_v49  ;;  %v304_v42 = vsel %vm63_vm0, %v237_v11, 0.0 }
  0x90   :  { %v295_v56 = vadd.f32 %v294_v45, %v293_v50  ;;  %v239_v50 = vmul.f32 %v1442_v52, %v1442_v52  ;;  %v306_v59 = vsel %vm63_vm0, %v238_v1, 0.0 }
  0x92   :  { %v297_v63 = vadd.f32 %v296_v51, %v295_v56  ;;  %v240_v56 = vmul.f32 %v1449_v55, %v1449_v55  ;;  %v308_v11 = vsel %vm63_vm0, %v239_v50, 0.0 }
  0x94   :  { %v299_v38 = vadd.f32 %v298_v13, %v297_v63  ;;  %v241_v63 = vmul.f32 %v1456_v58, %v1456_v58  ;;  %v310_v1 = vsel %vm63_vm0, %v240_v56, 0.0 }
  0x96   :  { %v301_v45 = vadd.f32 %v300_v0, %v299_v38  ;;  %v242_v38 = vmul.f32 %v1463_v61, %v1463_v61  ;;  %v312_v50 = vsel %vm63_vm0, %v241_v63, 0.0 }
  0x98   :  { %v303_v51 = vadd.f32 %v302_v3, %v301_v45  ;;  %v243_v45 = vmul.f32 %v1470_v4, %v1470_v4  ;;  %v314_v56 = vsel %vm63_vm0, %v242_v38, 0.0 }
  0x9a   :  { %v305_v13 = vadd.f32 %v304_v42, %v303_v51  ;;  %v244_v51 = vmul.f32 %v1477_v8, %v1477_v8  ;;  %v316_v63 = vsel %vm63_vm0, %v243_v45, 0.0 }
  0x9c   :  { %v307_v0 = vadd.f32 %v306_v59, %v305_v13  ;;  %v245_v13 = vmul.f32 %v1484_v12, %v1484_v12  ;;  %v318_v38 = vsel %vm63_vm0, %v244_v51, 0.0 }
  0x9e   :  { %v309_v3 = vadd.f32 %v308_v11, %v307_v0  ;;  %v246_v0 = vmul.f32 %v1491_v17, %v1491_v17  ;;  %v320_v45 = vsel %vm63_vm0, %v245_v13, 0.0 }
  0xa0   :  { %v311_v42 = vadd.f32 %v310_v1, %v309_v3  ;;  %v247_v3 = vmul.f32 %v1498_v21, %v1498_v21  ;;  %v322_v51 = vsel %vm63_vm0, %v246_v0, 0.0 }
  0xa2   :  { %v313_v59 = vadd.f32 %v312_v50, %v311_v42  ;;  %v248_v42 = vmul.f32 %v1505_v26, %v1505_v26  ;;  %v324_v13 = vsel %vm63_vm0, %v247_v3, 0.0 }
  0xa4   :  { %v315_v11 = vadd.f32 %v314_v56, %v313_v59  ;;  %v249_v59 = vmul.f32 %v1512_v30, %v1512_v30  ;;  %v326_v0 = vsel %vm63_vm0, %v248_v42, 0.0 }
  0xa6   :  { %v317_v1 = vadd.f32 %v316_v63, %v315_v11  ;;  %v250_v11 = vmul.f32 %v1519_v35, %v1519_v35  ;;  %v328_v3 = vsel %vm63_vm0, %v249_v59, 0.0 }
  0xa8   :  { %v319_v50 = vadd.f32 %v318_v38, %v317_v1  ;;  %v251_v1 = vmul.f32 %v1526_v39, %v1526_v39  ;;  %v330_v42 = vsel %vm63_vm0, %v250_v11, 0.0 }
  0xaa   :  { %v321_v56 = vadd.f32 %v320_v45, %v319_v50  ;;  %v252_v50 = vmul.f32 %v1533_v44, %v1533_v44  ;;  %v332_v59 = vsel %vm63_vm0, %v251_v1, 0.0 }
  0xac   :  { %v323_v63 = vadd.f32 %v322_v51, %v321_v56  ;;  %v253_v56 = vmul.f32 %v1540_v48, %v1540_v48  ;;  %v334_v11 = vsel %vm63_vm0, %v252_v50, 0.0 }
  0xae   :  { %v325_v38 = vadd.f32 %v324_v13, %v323_v63  ;;  %v254_v63 = vmul.f32 %v1547_v53, %v1547_v53  ;;  %v336_v1 = vsel %vm63_vm0, %v253_v56, 0.0 }
  0xb0   :  { %v327_v45 = vadd.f32 %v326_v0, %v325_v38  ;;  %v255_v38 = vmul.f32 %v1554_v57, %v1554_v57  ;;  %v338_v50 = vsel %vm63_vm0, %v254_v63, 0.0 }
  0xb2   :  { %v329_v51 = vadd.f32 %v328_v3, %v327_v45  ;;  %v256_v45 = vmul.f32 %v1561_v62, %v1561_v62  ;;  %v340_v56 = vsel %vm63_vm0, %v255_v38, 0.0 }
  0xb4   :  { %v331_v13 = vadd.f32 %v330_v42, %v329_v51  ;;  %v257_v51 = vmul.f32 %v1568_v6, %v1568_v6  ;;  %v342_v63 = vsel %vm63_vm0, %v256_v45, 0.0 }
  0xb6   :  { %v333_v0 = vadd.f32 %v332_v59, %v331_v13  ;;  %v258_v13 = vmul.f32 %v1575_v14, %v1575_v14  ;;  %v344_v38 = vsel %vm63_vm0, %v257_v51, 0.0 }
  0xb8   :  { %v335_v3 = vadd.f32 %v334_v11, %v333_v0  ;;  %v259_v0 = vmul.f32 %v1582_v20, %v1582_v20  ;;  %v346_v45 = vsel %vm63_vm0, %v258_v13, 0.0 }
  0xba   :  { %v337_v42 = vadd.f32 %v336_v1, %v335_v3  ;;  %v260_v3 = vmul.f32 %v1589_v27, %v1589_v27  ;;  %v348_v51 = vsel %vm63_vm0, %v259_v0, 0.0 }
  0xbc   :  { %v339_v59 = vadd.f32 %v338_v50, %v337_v42  ;;  %v261_v42 = vmul.f32 %v1596_v33, %v1596_v33  ;;  %v350_v13 = vsel %vm63_vm0, %v260_v3, 0.0 }
  0xbe   :  { %v341_v11 = vadd.f32 %v340_v56, %v339_v59  ;;  %v2063_v59 = vld [vmem:[#allocation2_spill] sm:$0xff]  ;;  %v352_v0 = vsel %vm63_vm0, %v261_v42, 0.0 }
  0xbf   :  { %v1617_v54 = vsub.f32 %v2063_v59, %v1299_v9 }
  0xc0   :  { %v343_v1 = vadd.f32 %v342_v63, %v341_v11  ;;  %v262_v63 = vmul.f32 %v1603_v41, %v1603_v41 }
  0xc1   :  { %2064 = vst [vmem:[#allocation2_spill] sm:$0xff] %v1617_v54 }
  0xc2   :  { %v345_v50 = vadd.f32 %v344_v38, %v343_v1  ;;  %v263_v38 = vmul.f32 %v1610_v47, %v1610_v47  ;;  %v354_v3 = vsel %vm63_vm0, %v262_v63, 0.0 }
  0xc4   :  { %v347_v56 = vadd.f32 %v346_v45, %v345_v50  ;;  %v1631_v45 = vsub.f32 %v1293_v29, %v1299_v9  ;;  %v264_v50 = vmul.f32 %v1617_v54, %v1617_v54  ;;  %v360_v9 = vsel %vm63_vm0, %v265_v18, 0.0 }
  0xc6   :  { %v349_v11 = vadd.f32 %v348_v51, %v347_v56  ;;  %2066 = vst [vmem:[#allocation7_spill] sm:$0xff] %v1631_v45  ;;  %v356_v56 = vsel %vm63_vm0, %v263_v38, 0.0  ;;  %v266_v42 = vmul.f32 %v1631_v45, %v1631_v45 }
  0xc8   :  { %v351_v1 = vadd.f32 %v350_v13, %v349_v11  ;;  %v358_v13 = vsel %vm63_vm0, %v264_v50, 0.0  ;;  %v362_v54 = vsel %vm63_vm0, %v266_v42, 0.0  ;;  %v1649_v50 = vld [vmem:[%s2049_s1] ss:$0 sm:$0xff] }
  0xca   :  { %v353_v51 = vadd.f32 %v352_v0, %v351_v1 }
  0xcc   :  { %v355_v59 = vadd.f32 %v354_v3, %v353_v51 }
  0xce   :  { %v357_v11 = vadd.f32 %v356_v56, %v355_v59 }
  0xd0   :  { %v359_v29 = vadd.f32 %v358_v13, %v357_v11 }
  0xd2   :  { %v361_v47 = vadd.f32 %v360_v9, %v359_v29 }
  0xd4   :  { %v363_v63 = vadd.f32 %v362_v54, %v361_v47 }
  0xd6   :  { %v364_v0 = vrot.slane %v363_v63, 4 }
  0xd8   :  { %v365_v1 = vadd.f32 %v364_v0, %v363_v63 }
  0xda   :  { %v366_v41 = vrot.slane %v365_v1, 2 }
  0xdc   :  { %v367_v60 = vadd.f32 %v366_v41, %v365_v1 }
  0xde   :  { %v368_v33 = vrot.slane %v367_v60, 1 }
  0xe0   :  { %v369_v38 = vadd.f32 %v368_v33, %v367_v60  ;;  %v1662_v60 = vld [vmem:[%s2050_s2] ss:$0 sm:$0xff] }
  0xe2   :  { %v370_v3 = vmul.f32 0.0025510204, %v369_v38 }
  0xe4   :  { %v371_v51 = vadd.f32 1e-05, %v370_v3 }
  0xe6   :  { %934 = vrsqrt.f32 %v371_v51 }
  0xf0   :  { %v1644_v45 = vpop.eup %934 }
  0xf1   :  { %v373_v47 = vmul.f32 %v1644_v45, %v1303_v15  ;;  %v374_v54 = vmul.f32 %v1644_v45, %v1307_v23  ;;  %v375_v33 = vmul.f32 %v1644_v45, %v1311_v24  ;;  %v376_v41 = vmul.f32 %v1644_v45, %v1315_v32 }
  0xf2   :  { %v377_v18 = vmul.f32 %v1644_v45, %v1319_v36  ;;  %v378_v15 = vmul.f32 %v1644_v45, %v1329_v2  ;;  %v379_v23 = vmul.f32 %v1644_v45, %v1335_v7  ;;  %v380_v24 = vmul.f32 %v1644_v45, %v1344_v10 }
  0xf3   :  { %v429_v56 = vmul.f32 %v1649_v50, %v373_v47  ;;  %v430_v32 = vmul.f32 %v1649_v50, %v374_v54  ;;  %v431_v59 = vmul.f32 %v1649_v50, %v375_v33  ;;  %v432_v42 = vmul.f32 %v1649_v50, %v376_v41 }
  0xf4   :  { %v433_v13 = vmul.f32 %v1649_v50, %v377_v18  ;;  %v434_v36 = vmul.f32 %v1649_v50, %v378_v15  ;;  %v435_v2 = vmul.f32 %v1649_v50, %v379_v23  ;;  %v436_v11 = vmul.f32 %v1649_v50, %v380_v24 }
  0xf5   :  { %v485_v7 = vadd.f32 %v1662_v60, %v429_v56  ;;  %v486_v10 = vadd.f32 %v1662_v60, %v430_v32  ;;  %v487_v9 = vadd.f32 %v1662_v60, %v431_v59  ;;  %v488_v29 = vadd.f32 %v1662_v60, %v432_v42 }
  0xf6   :  { %v489_v63 = vadd.f32 %v1662_v60, %v433_v13  ;;  %v490_v0 = vadd.f32 %v1662_v60, %v434_v36  ;;  %v491_v1 = vadd.f32 %v1662_v60, %v435_v2  ;;  %v492_v38 = vadd.f32 %v1662_v60, %v436_v11 }
  0xf7   :  { %v534_v3 = vmax.f32 %v485_v7, 0.0  ;;  %v535_v51 = vmax.f32 %v486_v10, 0.0  ;;  %v536_v47 = vmax.f32 %v487_v9, 0.0  ;;  %v537_v54 = vmax.f32 %v488_v29, 0.0 }
  0xf8   :  { %v538_v33 = vmax.f32 %v489_v63, 0.0  ;;  %v539_v41 = vmax.f32 %v490_v0, 0.0  ;;  %v540_v18 = vmax.f32 %v491_v1, 0.0  ;;  %v541_v15 = vmax.f32 %v492_v38, 0.0 }
  0xf9   :  { %v885_v23 = vpack.c.bf16 %v534_v3, %v534_v3  ;;  %v886_v24 = vpack.c.bf16 %v535_v51, %v535_v51  ;;  %v887_v56 = vpack.c.bf16 %v536_v47, %v536_v47  ;;  %v888_v32 = vpack.c.bf16 %v537_v54, %v537_v54 }
  0xfa   :  { %v889_v59 = vpack.c.bf16 %v538_v33, %v538_v33  ;;  %v890_v42 = vpack.c.bf16 %v539_v41, %v539_v41  ;;  %v891_v13 = vpack.c.bf16 %v540_v18, %v540_v18  ;;  %v892_v36 = vpack.c.bf16 %v541_v15, %v541_v15 }
  0xfb   :  { %781 = vst.msk [vmem:[%s2051_s3] sm:$0xf] %vm780_vm1, %v885_v23  ;;  %782 = vst.msk [vmem:[%s2051_s3 + $0x4] sm:$0xf] %vm780_vm1, %v886_v24  ;;  %v381_v2 = vmul.f32 %v1644_v45, %v1351_v5  ;;  %v382_v11 = vmul.f32 %v1644_v45, %v1358_v16  ;;  %v383_v7 = vmul.f32 %v1644_v45, %v1365_v19 }
  0xfc   :  { %783 = vst.msk [vmem:[%s2051_s3 + $0x8] sm:$0xf] %vm780_vm1, %v887_v56  ;;  %784 = vst.msk [vmem:[%s2051_s3 + $0xc] sm:$0xf] %vm780_vm1, %v888_v32  ;;  %v384_v10 = vmul.f32 %v1644_v45, %v1372_v22  ;;  %v385_v5 = vmul.f32 %v1644_v45, %v1379_v25  ;;  %v386_v16 = vmul.f32 %v1644_v45, %v1386_v28 }
  0xfd   :  { %785 = vst.msk [vmem:[%s2051_s3 + $0x10] sm:$0xf] %vm780_vm1, %v889_v59  ;;  %786 = vst.msk [vmem:[%s2051_s3 + $0x14] sm:$0xf] %vm780_vm1, %v890_v42  ;;  %v387_v19 = vmul.f32 %v1644_v45, %v1393_v31  ;;  %v388_v22 = vmul.f32 %v1644_v45, %v1400_v34  ;;  %v437_v9 = vmul.f32 %v1649_v50, %v381_v2 }
  0xfe   :  { %787 = vst.msk [vmem:[%s2051_s3 + $0x18] sm:$0xf] %vm780_vm1, %v891_v13  ;;  %788 = vst.msk [vmem:[%s2051_s3 + $0x1c] sm:$0xf] %vm780_vm1, %v892_v36  ;;  %v438_v29 = vmul.f32 %v1649_v50, %v382_v11  ;;  %v439_v63 = vmul.f32 %v1649_v50, %v383_v7  ;;  %v440_v0 = vmul.f32 %v1649_v50, %v384_v10 }
  0xff   :  { %v441_v1 = vmul.f32 %v1649_v50, %v385_v5  ;;  %v442_v25 = vmul.f32 %v1649_v50, %v386_v16  ;;  %v443_v28 = vmul.f32 %v1649_v50, %v387_v19  ;;  %v444_v38 = vmul.f32 %v1649_v50, %v388_v22 }
 0x100   :  { %v493_v31 = vadd.f32 %v1662_v60, %v437_v9  ;;  %v494_v34 = vadd.f32 %v1662_v60, %v438_v29  ;;  %v495_v3 = vadd.f32 %v1662_v60, %v439_v63  ;;  %v496_v51 = vadd.f32 %v1662_v60, %v440_v0 }
 0x101   :  { %v497_v47 = vadd.f32 %v1662_v60, %v441_v1  ;;  %v498_v54 = vadd.f32 %v1662_v60, %v442_v25  ;;  %v499_v33 = vadd.f32 %v1662_v60, %v443_v28  ;;  %v500_v41 = vadd.f32 %v1662_v60, %v444_v38 }
 0x102   :  { %v542_v18 = vmax.f32 %v493_v31, 0.0  ;;  %v543_v15 = vmax.f32 %v494_v34, 0.0  ;;  %v544_v23 = vmax.f32 %v495_v3, 0.0  ;;  %v545_v24 = vmax.f32 %v496_v51, 0.0 }
 0x103   :  { %v546_v56 = vmax.f32 %v497_v47, 0.0  ;;  %v547_v32 = vmax.f32 %v498_v54, 0.0  ;;  %v548_v59 = vmax.f32 %v499_v33, 0.0  ;;  %v549_v42 = vmax.f32 %v500_v41, 0.0 }
 0x104   :  { %v893_v13 = vpack.c.bf16 %v542_v18, %v542_v18  ;;  %v894_v36 = vpack.c.bf16 %v543_v15, %v543_v15  ;;  %v895_v2 = vpack.c.bf16 %v544_v23, %v544_v23  ;;  %v896_v11 = vpack.c.bf16 %v545_v24, %v545_v24 }
 0x105   :  { %v897_v7 = vpack.c.bf16 %v546_v56, %v546_v56  ;;  %v898_v10 = vpack.c.bf16 %v547_v32, %v547_v32  ;;  %v899_v5 = vpack.c.bf16 %v548_v59, %v548_v59  ;;  %v900_v16 = vpack.c.bf16 %v549_v42, %v549_v42 }
 0x106   :  { %789 = vst.msk [vmem:[%s2051_s3 + $0x20] sm:$0xf] %vm780_vm1, %v893_v13  ;;  %790 = vst.msk [vmem:[%s2051_s3 + $0x24] sm:$0xf] %vm780_vm1, %v894_v36  ;;  %v389_v19 = vmul.f32 %v1644_v45, %v1407_v37  ;;  %v390_v22 = vmul.f32 %v1644_v45, %v1414_v40  ;;  %v391_v9 = vmul.f32 %v1644_v45, %v1421_v43 }
 0x107   :  { %791 = vst.msk [vmem:[%s2051_s3 + $0x28] sm:$0xf] %vm780_vm1, %v895_v2  ;;  %792 = vst.msk [vmem:[%s2051_s3 + $0x2c] sm:$0xf] %vm780_vm1, %v896_v11  ;;  %v392_v29 = vmul.f32 %v1644_v45, %v1428_v46  ;;  %v393_v37 = vmul.f32 %v1644_v45, %v1435_v49  ;;  %v394_v40 = vmul.f32 %v1644_v45, %v1442_v52 }
 0x108   :  { %793 = vst.msk [vmem:[%s2051_s3 + $0x30] sm:$0xf] %vm780_vm1, %v897_v7  ;;  %794 = vst.msk [vmem:[%s2051_s3 + $0x34] sm:$0xf] %vm780_vm1, %v898_v10  ;;  %v395_v43 = vmul.f32 %v1644_v45, %v1449_v55  ;;  %v396_v46 = vmul.f32 %v1644_v45, %v1456_v58  ;;  %v445_v63 = vmul.f32 %v1649_v50, %v389_v19 }
 0x109   :  { %795 = vst.msk [vmem:[%s2051_s3 + $0x38] sm:$0xf] %vm780_vm1, %v899_v5  ;;  %796 = vst.msk [vmem:[%s2051_s3 + $0x3c] sm:$0xf] %vm780_vm1, %v900_v16  ;;  %v446_v0 = vmul.f32 %v1649_v50, %v390_v22  ;;  %v447_v1 = vmul.f32 %v1649_v50, %v391_v9  ;;  %v448_v25 = vmul.f32 %v1649_v50, %v392_v29 }
 0x10a   :  { %v449_v28 = vmul.f32 %v1649_v50, %v393_v37  ;;  %v450_v49 = vmul.f32 %v1649_v50, %v394_v40  ;;  %v451_v52 = vmul.f32 %v1649_v50, %v395_v43  ;;  %v452_v38 = vmul.f32 %v1649_v50, %v396_v46 }
 0x10b   :  { %v501_v55 = vadd.f32 %v1662_v60, %v445_v63  ;;  %v502_v58 = vadd.f32 %v1662_v60, %v446_v0  ;;  %v503_v31 = vadd.f32 %v1662_v60, %v447_v1  ;;  %v504_v34 = vadd.f32 %v1662_v60, %v448_v25 }
 0x10c   :  { %v505_v3 = vadd.f32 %v1662_v60, %v449_v28  ;;  %v506_v51 = vadd.f32 %v1662_v60, %v450_v49  ;;  %v507_v47 = vadd.f32 %v1662_v60, %v451_v52  ;;  %v508_v54 = vadd.f32 %v1662_v60, %v452_v38 }
 0x10d   :  { %v550_v33 = vmax.f32 %v501_v55, 0.0  ;;  %v551_v41 = vmax.f32 %v502_v58, 0.0  ;;  %v552_v18 = vmax.f32 %v503_v31, 0.0  ;;  %v553_v15 = vmax.f32 %v504_v34, 0.0 }
 0x10e   :  { %v554_v23 = vmax.f32 %v505_v3, 0.0  ;;  %v555_v24 = vmax.f32 %v506_v51, 0.0  ;;  %v556_v56 = vmax.f32 %v507_v47, 0.0  ;;  %v557_v32 = vmax.f32 %v508_v54, 0.0 }
 0x10f   :  { %v901_v59 = vpack.c.bf16 %v550_v33, %v550_v33  ;;  %v902_v42 = vpack.c.bf16 %v551_v41, %v551_v41  ;;  %v903_v13 = vpack.c.bf16 %v552_v18, %v552_v18  ;;  %v904_v36 = vpack.c.bf16 %v553_v15, %v553_v15 }
 0x110   :  { %v905_v2 = vpack.c.bf16 %v554_v23, %v554_v23  ;;  %v906_v11 = vpack.c.bf16 %v555_v24, %v555_v24  ;;  %v907_v7 = vpack.c.bf16 %v556_v56, %v556_v56  ;;  %v908_v10 = vpack.c.bf16 %v557_v32, %v557_v32 }
 0x111   :  { %797 = vst.msk [vmem:[%s2051_s3 + $0x40] sm:$0xf] %vm780_vm1, %v901_v59  ;;  %798 = vst.msk [vmem:[%s2051_s3 + $0x44] sm:$0xf] %vm780_vm1, %v902_v42  ;;  %v397_v5 = vmul.f32 %v1644_v45, %v1463_v61  ;;  %v398_v16 = vmul.f32 %v1644_v45, %v1470_v4  ;;  %v399_v19 = vmul.f32 %v1644_v45, %v1477_v8 }
 0x112   :  { %799 = vst.msk [vmem:[%s2051_s3 + $0x48] sm:$0xf] %vm780_vm1, %v903_v13  ;;  %800 = vst.msk [vmem:[%s2051_s3 + $0x4c] sm:$0xf] %vm780_vm1, %v904_v36  ;;  %v400_v22 = vmul.f32 %v1644_v45, %v1484_v12  ;;  %v401_v61 = vmul.f32 %v1644_v45, %v1491_v17  ;;  %v402_v4 = vmul.f32 %v1644_v45, %v1498_v21 }
 0x113   :  { %801 = vst.msk [vmem:[%s2051_s3 + $0x50] sm:$0xf] %vm780_vm1, %v905_v2  ;;  %802 = vst.msk [vmem:[%s2051_s3 + $0x54] sm:$0xf] %vm780_vm1, %v906_v11  ;;  %v403_v8 = vmul.f32 %v1644_v45, %v1505_v26  ;;  %v404_v12 = vmul.f32 %v1644_v45, %v1512_v30  ;;  %v453_v9 = vmul.f32 %v1649_v50, %v397_v5 }
 0x114   :  { %803 = vst.msk [vmem:[%s2051_s3 + $0x58] sm:$0xf] %vm780_vm1, %v907_v7  ;;  %804 = vst.msk [vmem:[%s2051_s3 + $0x5c] sm:$0xf] %vm780_vm1, %v908_v10  ;;  %v454_v29 = vmul.f32 %v1649_v50, %v398_v16  ;;  %v455_v37 = vmul.f32 %v1649_v50, %v399_v19  ;;  %v456_v40 = vmul.f32 %v1649_v50, %v400_v22 }
 0x115   :  { %v457_v43 = vmul.f32 %v1649_v50, %v401_v61  ;;  %v458_v17 = vmul.f32 %v1649_v50, %v402_v4  ;;  %v459_v21 = vmul.f32 %v1649_v50, %v403_v8  ;;  %v460_v46 = vmul.f32 %v1649_v50, %v404_v12 }
 0x116   :  { %v509_v26 = vadd.f32 %v1662_v60, %v453_v9  ;;  %v510_v30 = vadd.f32 %v1662_v60, %v454_v29  ;;  %v511_v63 = vadd.f32 %v1662_v60, %v455_v37  ;;  %v512_v0 = vadd.f32 %v1662_v60, %v456_v40 }
 0x117   :  { %v513_v1 = vadd.f32 %v1662_v60, %v457_v43  ;;  %v514_v25 = vadd.f32 %v1662_v60, %v458_v17  ;;  %v515_v28 = vadd.f32 %v1662_v60, %v459_v21  ;;  %v516_v49 = vadd.f32 %v1662_v60, %v460_v46 }
 0x118   :  { %v558_v52 = vmax.f32 %v509_v26, 0.0  ;;  %v559_v38 = vmax.f32 %v510_v30, 0.0  ;;  %v560_v55 = vmax.f32 %v511_v63, 0.0  ;;  %v561_v58 = vmax.f32 %v512_v0, 0.0 }
 0x119   :  { %v562_v31 = vmax.f32 %v513_v1, 0.0  ;;  %v563_v34 = vmax.f32 %v514_v25, 0.0  ;;  %v564_v3 = vmax.f32 %v515_v28, 0.0  ;;  %v565_v51 = vmax.f32 %v516_v49, 0.0 }
 0x11a   :  { %v909_v47 = vpack.c.bf16 %v558_v52, %v558_v52  ;;  %v910_v54 = vpack.c.bf16 %v559_v38, %v559_v38  ;;  %v911_v33 = vpack.c.bf16 %v560_v55, %v560_v55  ;;  %v912_v41 = vpack.c.bf16 %v561_v58, %v561_v58  ;;  %v2067_v38 = vld [vmem:[#allocation3_spill] sm:$0xff] }
 0x11b   :  { %v913_v18 = vpack.c.bf16 %v562_v31, %v562_v31  ;;  %v914_v15 = vpack.c.bf16 %v563_v34, %v563_v34  ;;  %v915_v23 = vpack.c.bf16 %v564_v3, %v564_v3  ;;  %v916_v24 = vpack.c.bf16 %v565_v51, %v565_v51  ;;  %v2070_v31 = vld [vmem:[#allocation2_spill] sm:$0xff] }
 0x11c   :  { %805 = vst.msk [vmem:[%s2051_s3 + $0x60] sm:$0xf] %vm780_vm1, %v909_v47  ;;  %806 = vst.msk [vmem:[%s2051_s3 + $0x64] sm:$0xf] %vm780_vm1, %v910_v54  ;;  %v405_v56 = vmul.f32 %v1644_v45, %v1519_v35  ;;  %v406_v32 = vmul.f32 %v1644_v45, %v1526_v39  ;;  %v407_v59 = vmul.f32 %v1644_v45, %v1533_v44  ;;  %v2071_v3 = vld [vmem:[#allocation6_spill] sm:$0xff] }
 0x11d   :  { %807 = vst.msk [vmem:[%s2051_s3 + $0x68] sm:$0xf] %vm780_vm1, %v911_v33  ;;  %808 = vst.msk [vmem:[%s2051_s3 + $0x6c] sm:$0xf] %vm780_vm1, %v912_v41  ;;  %v408_v42 = vmul.f32 %v1644_v45, %v1540_v48  ;;  %v409_v35 = vmul.f32 %v1644_v45, %v1547_v53  ;;  %v410_v39 = vmul.f32 %v1644_v45, %v1554_v57 }
 0x11e   :  { %809 = vst.msk [vmem:[%s2051_s3 + $0x70] sm:$0xf] %vm780_vm1, %v913_v18  ;;  %810 = vst.msk [vmem:[%s2051_s3 + $0x74] sm:$0xf] %vm780_vm1, %v914_v15  ;;  %v411_v44 = vmul.f32 %v1644_v45, %v1561_v62  ;;  %v412_v48 = vmul.f32 %v1644_v45, %v1568_v6  ;;  %v461_v13 = vmul.f32 %v1649_v50, %v405_v56 }
 0x11f   :  { %811 = vst.msk [vmem:[%s2051_s3 + $0x78] sm:$0xf] %vm780_vm1, %v915_v23  ;;  %812 = vst.msk [vmem:[%s2051_s3 + $0x7c] sm:$0xf] %vm780_vm1, %v916_v24  ;;  %v462_v36 = vmul.f32 %v1649_v50, %v406_v32  ;;  %v463_v2 = vmul.f32 %v1649_v50, %v407_v59  ;;  %v464_v11 = vmul.f32 %v1649_v50, %v408_v42 }
 0x120   :  { %v465_v7 = vmul.f32 %v1649_v50, %v409_v35  ;;  %v466_v53 = vmul.f32 %v1649_v50, %v410_v39  ;;  %v467_v57 = vmul.f32 %v1649_v50, %v411_v44  ;;  %v468_v10 = vmul.f32 %v1649_v50, %v412_v48 }
 0x121   :  { %v517_v62 = vadd.f32 %v1662_v60, %v461_v13  ;;  %v518_v6 = vadd.f32 %v1662_v60, %v462_v36  ;;  %v519_v5 = vadd.f32 %v1662_v60, %v463_v2  ;;  %v520_v16 = vadd.f32 %v1662_v60, %v464_v11 }
 0x122   :  { %v521_v19 = vadd.f32 %v1662_v60, %v465_v7  ;;  %v522_v22 = vadd.f32 %v1662_v60, %v466_v53  ;;  %v523_v61 = vadd.f32 %v1662_v60, %v467_v57  ;;  %v524_v4 = vadd.f32 %v1662_v60, %v468_v10 }
 0x123   :  { %v566_v8 = vmax.f32 %v517_v62, 0.0  ;;  %v567_v12 = vmax.f32 %v518_v6, 0.0  ;;  %v568_v9 = vmax.f32 %v519_v5, 0.0  ;;  %v569_v29 = vmax.f32 %v520_v16, 0.0 }
 0x124   :  { %v570_v37 = vmax.f32 %v521_v19, 0.0  ;;  %v571_v40 = vmax.f32 %v522_v22, 0.0  ;;  %v572_v43 = vmax.f32 %v523_v61, 0.0  ;;  %v573_v17 = vmax.f32 %v524_v4, 0.0 }
 0x125   :  { %v917_v21 = vpack.c.bf16 %v566_v8, %v566_v8  ;;  %v918_v46 = vpack.c.bf16 %v567_v12, %v567_v12  ;;  %v919_v26 = vpack.c.bf16 %v568_v9, %v568_v9  ;;  %v920_v30 = vpack.c.bf16 %v569_v29, %v569_v29  ;;  %v2072_v8 = vld [vmem:[#allocation7_spill] sm:$0xff] }
 0x126   :  { %v921_v63 = vpack.c.bf16 %v570_v37, %v570_v37  ;;  %v922_v0 = vpack.c.bf16 %v571_v40, %v571_v40  ;;  %v923_v1 = vpack.c.bf16 %v572_v43, %v572_v43  ;;  %v924_v25 = vpack.c.bf16 %v573_v17, %v573_v17 }
 0x127   :  { %813 = vst.msk [vmem:[%s2051_s3 + $0x80] sm:$0xf] %vm780_vm1, %v917_v21  ;;  %814 = vst.msk [vmem:[%s2051_s3 + $0x84] sm:$0xf] %vm780_vm1, %v918_v46  ;;  %v413_v28 = vmul.f32 %v1644_v45, %v1575_v14  ;;  %v414_v49 = vmul.f32 %v1644_v45, %v1582_v20  ;;  %v415_v52 = vmul.f32 %v1644_v45, %v1589_v27  ;;  %v2068_v14 = vld [vmem:[#allocation4_spill] sm:$0xff]  ;;  %v2069_v27 = vld [vmem:[#allocation5_spill] sm:$0xff] }
 0x128   :  { %815 = vst.msk [vmem:[%s2051_s3 + $0x88] sm:$0xf] %vm780_vm1, %v919_v26  ;;  %816 = vst.msk [vmem:[%s2051_s3 + $0x8c] sm:$0xf] %vm780_vm1, %v920_v30  ;;  %v416_v55 = vmul.f32 %v1644_v45, %v2067_v38  ;;  %v417_v20 = vmul.f32 %v1644_v45, %v2068_v14  ;;  %v418_v58 = vmul.f32 %v1644_v45, %v2069_v27 }
 0x129   :  { %817 = vst.msk [vmem:[%s2051_s3 + $0x90] sm:$0xf] %vm780_vm1, %v921_v63  ;;  %818 = vst.msk [vmem:[%s2051_s3 + $0x94] sm:$0xf] %vm780_vm1, %v922_v0  ;;  %v419_v34 = vmul.f32 %v1644_v45, %v2070_v31  ;;  %v420_v51 = vmul.f32 %v1644_v45, %v2071_v3  ;;  %v469_v47 = vmul.f32 %v1649_v50, %v413_v28 }
 0x12a   :  { %819 = vst.msk [vmem:[%s2051_s3 + $0x98] sm:$0xf] %vm780_vm1, %v923_v1  ;;  %820 = vst.msk [vmem:[%s2051_s3 + $0x9c] sm:$0xf] %vm780_vm1, %v924_v25  ;;  %v470_v54 = vmul.f32 %v1649_v50, %v414_v49  ;;  %v471_v33 = vmul.f32 %v1649_v50, %v415_v52  ;;  %v472_v41 = vmul.f32 %v1649_v50, %v416_v55 }
 0x12b   :  { %v473_v18 = vmul.f32 %v1649_v50, %v417_v20  ;;  %v474_v15 = vmul.f32 %v1649_v50, %v418_v58  ;;  %v475_v23 = vmul.f32 %v1649_v50, %v419_v34  ;;  %v476_v24 = vmul.f32 %v1649_v50, %v420_v51 }
 0x12c   :  { %v525_v56 = vadd.f32 %v1662_v60, %v469_v47  ;;  %v526_v32 = vadd.f32 %v1662_v60, %v470_v54  ;;  %v527_v59 = vadd.f32 %v1662_v60, %v471_v33  ;;  %v528_v42 = vadd.f32 %v1662_v60, %v472_v41 }
 0x12d   :  { %v529_v35 = vadd.f32 %v1662_v60, %v473_v18  ;;  %v530_v39 = vadd.f32 %v1662_v60, %v474_v15  ;;  %v531_v44 = vadd.f32 %v1662_v60, %v475_v23  ;;  %v532_v48 = vadd.f32 %v1662_v60, %v476_v24 }
 0x12e   :  { %v574_v13 = vmax.f32 %v525_v56, 0.0  ;;  %v575_v36 = vmax.f32 %v526_v32, 0.0  ;;  %v576_v2 = vmax.f32 %v527_v59, 0.0  ;;  %v577_v11 = vmax.f32 %v528_v42, 0.0 }
 0x12f   :  { %v578_v7 = vmax.f32 %v529_v35, 0.0  ;;  %v579_v53 = vmax.f32 %v530_v39, 0.0  ;;  %v580_v57 = vmax.f32 %v531_v44, 0.0  ;;  %v581_v10 = vmax.f32 %v532_v48, 0.0 }
 0x130   :  { %v925_v62 = vpack.c.bf16 %v574_v13, %v574_v13  ;;  %v926_v6 = vpack.c.bf16 %v575_v36, %v575_v36  ;;  %v927_v5 = vpack.c.bf16 %v576_v2, %v576_v2  ;;  %v928_v16 = vpack.c.bf16 %v577_v11, %v577_v11 }
 0x131   :  { %v929_v19 = vpack.c.bf16 %v578_v7, %v578_v7  ;;  %v930_v22 = vpack.c.bf16 %v579_v53, %v579_v53  ;;  %v931_v61 = vpack.c.bf16 %v580_v57, %v580_v57  ;;  %v932_v4 = vpack.c.bf16 %v581_v10, %v581_v10 }
 0x132   :  { %821 = vst.msk [vmem:[%s2051_s3 + $0xa0] sm:$0xf] %vm780_vm1, %v925_v62  ;;  %822 = vst.msk [vmem:[%s2051_s3 + $0xa4] sm:$0xf] %vm780_vm1, %v926_v6  ;;  %v421_v12 = vmul.f32 %v1644_v45, %v2072_v8 }
 0x133   :  { %823 = vst.msk [vmem:[%s2051_s3 + $0xa8] sm:$0xf] %vm780_vm1, %v927_v5  ;;  %824 = vst.msk [vmem:[%s2051_s3 + $0xac] sm:$0xf] %vm780_vm1, %v928_v16 }
 0x134   :  { %825 = vst.msk [vmem:[%s2051_s3 + $0xb0] sm:$0xf] %vm780_vm1, %v929_v19  ;;  %826 = vst.msk [vmem:[%s2051_s3 + $0xb4] sm:$0xf] %vm780_vm1, %v930_v22  ;;  %v477_v45 = vmul.f32 %v1649_v50, %v421_v12 }
 0x135   :  { %827 = vst.msk [vmem:[%s2051_s3 + $0xb8] sm:$0xf] %vm780_vm1, %v931_v61  ;;  %828 = vst.msk [vmem:[%s2051_s3 + $0xbc] sm:$0xf] %vm780_vm1, %v932_v4 }
 0x136   :  { %v533_v9 = vadd.f32 %v1662_v60, %v477_v45 }
 0x138   :  { %v582_v29 = vmax.f32 %v533_v9, 0.0 }
 0x13a   :  { %v933_v37 = vpack.c.bf16 %v582_v29, %v582_v29 }
 0x13c   :  { %829 = vst.msk [vmem:[%s2051_s3 + $0xc0] sm:$0xf] %vm780_vm1, %v933_v37 }

// kernel: generator_forward.9
= control target key start
LH: loop header
LB: loop body
LE: loop exit
PB: predicated region body
PF: predicated region fallthrough
CT: control target
= control target key end

     0   :  { %s2979_s9 = smov 0   ;;  %s2981_s10 = smov 0   ;;  %s3690_s0 = inlined_call_operand.vmem [shape: bf16[98,1152], index: 0, kind: input, shape index: {}]   ;;  %s3691_s1 = inlined_call_operand.vmem [shape: bf16[1152,256], index: 1, kind: input, shape index: {}]   ;;  %s3692_s2 = inlined_call_operand.vmem [shape: f32[98,256], index: 2, kind: output, shape index: {}]  }
   0x1   :  { %s2983_s11 = smov 0  }
   0x2 LB: > { %s2299_s12 = sadd.s32 4294967295, %s2960_s11   ;;  %s2996_s13 = sadd.s32 1, %s2960_s11   ;;  %s2960_s11 = sphi %s2983_s11, %s3696_s11   ;;  %s2956_s10 = sphi %s2981_s10, %s3695_s10   ;;  %s2952_s9 = sphi %s2979_s9, %s3694_s9  }
   0x3   : > { %s37_s14 = ssub.s32 %s2960_s11, %s2996_s13  ;;  %s40_s15 = sadd.s32 1, %s2956_s10 }
   0x4   : > { %p38_p0 = scmp.eq.s32.totalorder %s37_s14, 0  ;;  %p47_p1 = scmp.ne.s32.totalorder %s2956_s10, %s2952_s9 }
   0x5   : > { %p48_p2 = scmp.eq.s32.totalorder %s2960_s11, 0  ;;  %p77_p3 = scmp.eq.s32.totalorder %s2299_s12, 1 }
   0x6   : > { %s3007_s16 = scalar_select %p38_p0, %s2956_s10, %s40_s15  }
   0x7   : > { %p49_p4 = por %p48_p2, %p47_p1  ;;  %p3009_p5 = por %p77_p3, %p47_p1 }
   0x8   : > { %p2302_p6 = scmp.ge.s32.totalorder %s2960_s11, 2 }
   0xa   : > { %102 = sbr.rel (%p2302_p6) target bundleno = 117 (0x75), region = 20 }
  0x11   : > { %105 = sbr.rel (!%p49_p4) target bundleno = 117 (0x75), region = 24  ;;  %s107_s18 = sand.u32 (%p49_p4), 1, %s2956_s10  }
  0x12   : > { %s2303_s19 = sshll.u32 (%p49_p4), %s2960_s11, 2  ;;  %s2750_s20 = smul.u32 (%p49_p4), 576, %s107_s18 }
  0x13   : > { %s3019_s23 = scalar_lea.vmem (%p49_p4), %s3691_s1, %s2303_s19 }
  0x14   : > { %v127_v0 = vld [vmem:[%s3019_s23] sm:$0xf] (%p49_p4)  ;;  %v129_v1 = vld [vmem:[%s3019_s23 + $0x8] sm:$0xf] (%p49_p4)  ;;  %v131_v2 = vld [vmem:[%s3019_s23 + $0x10] sm:$0xf] (%p49_p4) }
  0x15   : > { %v133_v3 = vld [vmem:[%s3019_s23 + $0x18] sm:$0xf] (%p49_p4)  ;;  %v135_v4 = vld [vmem:[%s3019_s23 + $0x20] sm:$0xf] (%p49_p4)  ;;  %s3026_s24 = scalar_lea.vmem (%p49_p4), [#allocation2], %s2750_s20 }
  0x16   : > { %128 = vst [vmem:[%s3026_s24] sm:$0xf] (%p49_p4), %v127_v0  ;;  %130 = vst [vmem:[%s3026_s24 + $0x4] sm:$0xf] (%p49_p4), %v129_v1  ;;  %v137_v5 = vld [vmem:[%s3019_s23 + $0x28] sm:$0xf] (%p49_p4) }
  0x17   : > { %132 = vst [vmem:[%s3026_s24 + $0x8] sm:$0xf] (%p49_p4), %v131_v2  ;;  %134 = vst [vmem:[%s3026_s24 + $0xc] sm:$0xf] (%p49_p4), %v133_v3  ;;  %v139_v6 = vld [vmem:[%s3019_s23 + $0x30] sm:$0xf] (%p49_p4) }
  0x18   : > { %136 = vst [vmem:[%s3026_s24 + $0x10] sm:$0xf] %v135_v4  ;;  %v141_v7 = vld [vmem:[%s3019_s23 + $0x38] sm:$0xf]  ;;  %138 = vst [vmem:[%s3026_s24 + $0x14] sm:$0xf] %v137_v5 }
  0x19   : > { %140 = vst [vmem:[%s3026_s24 + $0x18] sm:$0xf] %v139_v6  ;;  %142 = vst [vmem:[%s3026_s24 + $0x1c] sm:$0xf] %v141_v7  ;;  %v143_v8 = vld [vmem:[%s3019_s23 + $0x40] sm:$0xf] }
  0x1a   : > { %v145_v9 = vld [vmem:[%s3019_s23 + $0x48] sm:$0xf]  ;;  %v147_v10 = vld [vmem:[%s3019_s23 + $0x50] sm:$0xf]  ;;  %144 = vst [vmem:[%s3026_s24 + $0x20] sm:$0xf] %v143_v8 }
  0x1b   : > { %146 = vst [vmem:[%s3026_s24 + $0x24] sm:$0xf] %v145_v9  ;;  %148 = vst [vmem:[%s3026_s24 + $0x28] sm:$0xf] %v147_v10  ;;  %v149_v11 = vld [vmem:[%s3019_s23 + $0x58] sm:$0xf] }
  0x1c   : > { %v151_v12 = vld [vmem:[%s3019_s23 + $0x60] sm:$0xf]  ;;  %v153_v13 = vld [vmem:[%s3019_s23 + $0x68] sm:$0xf]  ;;  %150 = vst [vmem:[%s3026_s24 + $0x2c] sm:$0xf] %v149_v11 }
  0x1d   : > { %152 = vst [vmem:[%s3026_s24 + $0x30] sm:$0xf] %v151_v12  ;;  %154 = vst [vmem:[%s3026_s24 + $0x34] sm:$0xf] %v153_v13  ;;  %v155_v14 = vld [vmem:[%s3019_s23 + $0x70] sm:$0xf] }
  0x1e   : > { %v157_v15 = vld [vmem:[%s3019_s23 + $0x78] sm:$0xf]  ;;  %v159_v16 = vld [vmem:[%s3019_s23 + $0x80] sm:$0xf]  ;;  %156 = vst [vmem:[%s3026_s24 + $0x38] sm:$0xf] %v155_v14 }
  0x1f   : > { %158 = vst [vmem:[%s3026_s24 + $0x3c] sm:$0xf] %v157_v15  ;;  %160 = vst [vmem:[%s3026_s24 + $0x40] sm:$0xf] %v159_v16  ;;  %v161_v17 = vld [vmem:[%s3019_s23 + $0x88] sm:$0xf] }
  0x20   : > { %v163_v18 = vld [vmem:[%s3019_s23 + $0x90] sm:$0xf]  ;;  %v165_v19 = vld [vmem:[%s3019_s23 + $0x98] sm:$0xf]  ;;  %162 = vst [vmem:[%s3026_s24 + $0x44] sm:$0xf] %v161_v17 }
  0x21   : > { %164 = vst [vmem:[%s3026_s24 + $0x48] sm:$0xf] %v163_v18  ;;  %166 = vst [vmem:[%s3026_s24 + $0x4c] sm:$0xf] %v165_v19  ;;  %v167_v20 = vld [vmem:[%s3019_s23 + $0xa0] sm:$0xf] }
  0x22   : > { %v169_v21 = vld [vmem:[%s3019_s23 + $0xa8] sm:$0xf]  ;;  %v171_v22 = vld [vmem:[%s3019_s23 + $0xb0] sm:$0xf]  ;;  %168 = vst [vmem:[%s3026_s24 + $0x50] sm:$0xf] %v167_v20 }
  0x23   : > { %170 = vst [vmem:[%s3026_s24 + $0x54] sm:$0xf] %v169_v21  ;;  %172 = vst [vmem:[%s3026_s24 + $0x58] sm:$0xf] %v171_v22  ;;  %v173_v23 = vld [vmem:[%s3019_s23 + $0xb8] sm:$0xf] }
  0x24   : > { %v175_v24 = vld [vmem:[%s3019_s23 + $0xc0] sm:$0xf]  ;;  %v177_v25 = vld [vmem:[%s3019_s23 + $0xc8] sm:$0xf]  ;;  %174 = vst [vmem:[%s3026_s24 + $0x5c] sm:$0xf] %v173_v23 }
  0x25   : > { %176 = vst [vmem:[%s3026_s24 + $0x60] sm:$0xf] %v175_v24  ;;  %178 = vst [vmem:[%s3026_s24 + $0x64] sm:$0xf] %v177_v25  ;;  %v179_v26 = vld [vmem:[%s3019_s23 + $0xd0] sm:$0xf] }
  0x26   : > { %v181_v27 = vld [vmem:[%s3019_s23 + $0xd8] sm:$0xf]  ;;  %v183_v28 = vld [vmem:[%s3019_s23 + $0xe0] sm:$0xf]  ;;  %180 = vst [vmem:[%s3026_s24 + $0x68] sm:$0xf] %v179_v26 }
  0x27   : > { %182 = vst [vmem:[%s3026_s24 + $0x6c] sm:$0xf] %v181_v27  ;;  %184 = vst [vmem:[%s3026_s24 + $0x70] sm:$0xf] %v183_v28  ;;  %v185_v29 = vld [vmem:[%s3019_s23 + $0xe8] sm:$0xf] }
  0x28   : > { %v187_v30 = vld [vmem:[%s3019_s23 + $0xf0] sm:$0xf]  ;;  %v189_v31 = vld [vmem:[%s3019_s23 + $0xf8] sm:$0xf]  ;;  %186 = vst [vmem:[%s3026_s24 + $0x74] sm:$0xf] %v185_v29 }
  0x29   : > { %188 = vst [vmem:[%s3026_s24 + $0x78] sm:$0xf] %v187_v30  ;;  %190 = vst [vmem:[%s3026_s24 + $0x7c] sm:$0xf] %v189_v31  ;;  %v191_v32 = vld [vmem:[%s3019_s23 + $0x100] sm:$0xf] }
  0x2a   : > { %v193_v33 = vld [vmem:[%s3019_s23 + $0x108] sm:$0xf]  ;;  %v195_v34 = vld [vmem:[%s3019_s23 + $0x110] sm:$0xf]  ;;  %192 = vst [vmem:[%s3026_s24 + $0x80] sm:$0xf] %v191_v32 }
  0x2b   : > { %194 = vst [vmem:[%s3026_s24 + $0x84] sm:$0xf] %v193_v33  ;;  %196 = vst [vmem:[%s3026_s24 + $0x88] sm:$0xf] %v195_v34  ;;  %v197_v35 = vld [vmem:[%s3019_s23 + $0x118] sm:$0xf] }
  0x2c   : > { %v199_v36 = vld [vmem:[%s3019_s23 + $0x120] sm:$0xf]  ;;  %v201_v37 = vld [vmem:[%s3019_s23 + $0x128] sm:$0xf]  ;;  %198 = vst [vmem:[%s3026_s24 + $0x8c] sm:$0xf] %v197_v35 }
  0x2d   : > { %200 = vst [vmem:[%s3026_s24 + $0x90] sm:$0xf] %v199_v36  ;;  %202 = vst [vmem:[%s3026_s24 + $0x94] sm:$0xf] %v201_v37  ;;  %v203_v38 = vld [vmem:[%s3019_s23 + $0x130] sm:$0xf] }
  0x2e   : > { %v205_v39 = vld [vmem:[%s3019_s23 + $0x138] sm:$0xf]  ;;  %v207_v40 = vld [vmem:[%s3019_s23 + $0x140] sm:$0xf]  ;;  %204 = vst [vmem:[%s3026_s24 + $0x98] sm:$0xf] %v203_v38 }
  0x2f   : > { %206 = vst [vmem:[%s3026_s24 + $0x9c] sm:$0xf] %v205_v39  ;;  %208 = vst [vmem:[%s3026_s24 + $0xa0] sm:$0xf] %v207_v40  ;;  %v209_v41 = vld [vmem:[%s3019_s23 + $0x148] sm:$0xf] }
  0x30   : > { %v211_v42 = vld [vmem:[%s3019_s23 + $0x150] sm:$0xf]  ;;  %v213_v43 = vld [vmem:[%s3019_s23 + $0x158] sm:$0xf]  ;;  %210 = vst [vmem:[%s3026_s24 + $0xa4] sm:$0xf] %v209_v41 }
  0x31   : > { %212 = vst [vmem:[%s3026_s24 + $0xa8] sm:$0xf] %v211_v42  ;;  %214 = vst [vmem:[%s3026_s24 + $0xac] sm:$0xf] %v213_v43  ;;  %v215_v44 = vld [vmem:[%s3019_s23 + $0x160] sm:$0xf] }
  0x32   : > { %v217_v45 = vld [vmem:[%s3019_s23 + $0x168] sm:$0xf]  ;;  %v219_v46 = vld [vmem:[%s3019_s23 + $0x170] sm:$0xf]  ;;  %216 = vst [vmem:[%s3026_s24 + $0xb0] sm:$0xf] %v215_v44 }
  0x33   : > { %218 = vst [vmem:[%s3026_s24 + $0xb4] sm:$0xf] %v217_v45  ;;  %220 = vst [vmem:[%s3026_s24 + $0xb8] sm:$0xf] %v219_v46  ;;  %v221_v47 = vld [vmem:[%s3019_s23 + $0x178] sm:$0xf] }
  0x34   : > { %v223_v48 = vld [vmem:[%s3019_s23 + $0x180] sm:$0xf]  ;;  %v225_v49 = vld [vmem:[%s3019_s23 + $0x188] sm:$0xf]  ;;  %222 = vst [vmem:[%s3026_s24 + $0xbc] sm:$0xf] %v221_v47 }
  0x35   : > { %224 = vst [vmem:[%s3026_s24 + $0xc0] sm:$0xf] %v223_v48  ;;  %226 = vst [vmem:[%s3026_s24 + $0xc4] sm:$0xf] %v225_v49  ;;  %v227_v50 = vld [vmem:[%s3019_s23 + $0x190] sm:$0xf] }
  0x36   : > { %v229_v51 = vld [vmem:[%s3019_s23 + $0x198] sm:$0xf]  ;;  %v231_v52 = vld [vmem:[%s3019_s23 + $0x1a0] sm:$0xf]  ;;  %228 = vst [vmem:[%s3026_s24 + $0xc8] sm:$0xf] %v227_v50 }
  0x37   : > { %230 = vst [vmem:[%s3026_s24 + $0xcc] sm:$0xf] %v229_v51  ;;  %232 = vst [vmem:[%s3026_s24 + $0xd0] sm:$0xf] %v231_v52  ;;  %v233_v53 = vld [vmem:[%s3019_s23 + $0x1a8] sm:$0xf] }
  0x38   : > { %v235_v54 = vld [vmem:[%s3019_s23 + $0x1b0] sm:$0xf]  ;;  %v237_v55 = vld [vmem:[%s3019_s23 + $0x1b8] sm:$0xf]  ;;  %234 = vst [vmem:[%s3026_s24 + $0xd4] sm:$0xf] %v233_v53 }
  0x39   : > { %236 = vst [vmem:[%s3026_s24 + $0xd8] sm:$0xf] %v235_v54  ;;  %238 = vst [vmem:[%s3026_s24 + $0xdc] sm:$0xf] %v237_v55  ;;  %v239_v56 = vld [vmem:[%s3019_s23 + $0x1c0] sm:$0xf] }
  0x3a   : > { %v241_v57 = vld [vmem:[%s3019_s23 + $0x1c8] sm:$0xf]  ;;  %v243_v58 = vld [vmem:[%s3019_s23 + $0x1d0] sm:$0xf]  ;;  %240 = vst [vmem:[%s3026_s24 + $0xe0] sm:$0xf] %v239_v56 }
  0x3b   : > { %242 = vst [vmem:[%s3026_s24 + $0xe4] sm:$0xf] %v241_v57  ;;  %244 = vst [vmem:[%s3026_s24 + $0xe8] sm:$0xf] %v243_v58  ;;  %v245_v59 = vld [vmem:[%s3019_s23 + $0x1d8] sm:$0xf] }
  0x3c   : > { %v247_v60 = vld [vmem:[%s3019_s23 + $0x1e0] sm:$0xf]  ;;  %v249_v61 = vld [vmem:[%s3019_s23 + $0x1e8] sm:$0xf]  ;;  %246 = vst [vmem:[%s3026_s24 + $0xec] sm:$0xf] %v245_v59 }
  0x3d   : > { %248 = vst [vmem:[%s3026_s24 + $0xf0] sm:$0xf] %v247_v60  ;;  %250 = vst [vmem:[%s3026_s24 + $0xf4] sm:$0xf] %v249_v61  ;;  %v251_v62 = vld [vmem:[%s3019_s23 + $0x1f0] sm:$0xf] }
  0x3e   : > { %v253_v63 = vld [vmem:[%s3019_s23 + $0x1f8] sm:$0xf]  ;;  %v255_v0 = vld [vmem:[%s3019_s23 + $0x200] sm:$0xf]  ;;  %252 = vst [vmem:[%s3026_s24 + $0xf8] sm:$0xf] %v251_v62 }
  0x3f   : > { %254 = vst [vmem:[%s3026_s24 + $0xfc] sm:$0xf] %v253_v63  ;;  %256 = vst [vmem:[%s3026_s24 + $0x100] sm:$0xf] %v255_v0  ;;  %v257_v1 = vld [vmem:[%s3019_s23 + $0x208] sm:$0xf] }
  0x40   : > { %v259_v2 = vld [vmem:[%s3019_s23 + $0x210] sm:$0xf]  ;;  %v261_v3 = vld [vmem:[%s3019_s23 + $0x218] sm:$0xf]  ;;  %258 = vst [vmem:[%s3026_s24 + $0x104] sm:$0xf] %v257_v1 }
  0x41   : > { %260 = vst [vmem:[%s3026_s24 + $0x108] sm:$0xf] %v259_v2  ;;  %262 = vst [vmem:[%s3026_s24 + $0x10c] sm:$0xf] %v261_v3  ;;  %v263_v4 = vld [vmem:[%s3019_s23 + $0x220] sm:$0xf] }
  0x42   : > { %v265_v5 = vld [vmem:[%s3019_s23 + $0x228] sm:$0xf]  ;;  %v267_v6 = vld [vmem:[%s3019_s23 + $0x230] sm:$0xf]  ;;  %264 = vst [vmem:[%s3026_s24 + $0x110] sm:$0xf] %v263_v4 }
  0x43   : > { %266 = vst [vmem:[%s3026_s24 + $0x114] sm:$0xf] %v265_v5  ;;  %268 = vst [vmem:[%s3026_s24 + $0x118] sm:$0xf] %v267_v6  ;;  %v269_v7 = vld [vmem:[%s3019_s23 + $0x238] sm:$0xf] }
  0x44   : > { %v271_v8 = vld [vmem:[%s3019_s23 + $0x240] sm:$0xf]  ;;  %v273_v9 = vld [vmem:[%s3019_s23 + $0x248] sm:$0xf]  ;;  %270 = vst [vmem:[%s3026_s24 + $0x11c] sm:$0xf] %v269_v7 }
  0x45   : > { %272 = vst [vmem:[%s3026_s24 + $0x120] sm:$0xf] %v271_v8  ;;  %274 = vst [vmem:[%s3026_s24 + $0x124] sm:$0xf] %v273_v9  ;;  %v275_v10 = vld [vmem:[%s3019_s23 + $0x250] sm:$0xf] }
  0x46   : > { %v277_v11 = vld [vmem:[%s3019_s23 + $0x258] sm:$0xf]  ;;  %v279_v12 = vld [vmem:[%s3019_s23 + $0x260] sm:$0xf]  ;;  %276 = vst [vmem:[%s3026_s24 + $0x128] sm:$0xf] %v275_v10 }
  0x47   : > { %278 = vst [vmem:[%s3026_s24 + $0x12c] sm:$0xf] %v277_v11  ;;  %280 = vst [vmem:[%s3026_s24 + $0x130] sm:$0xf] %v279_v12  ;;  %v281_v13 = vld [vmem:[%s3019_s23 + $0x268] sm:$0xf] }
  0x48   : > { %v283_v14 = vld [vmem:[%s3019_s23 + $0x270] sm:$0xf]  ;;  %v285_v15 = vld [vmem:[%s3019_s23 + $0x278] sm:$0xf]  ;;  %282 = vst [vmem:[%s3026_s24 + $0x134] sm:$0xf] %v281_v13 }
  0x49   : > { %284 = vst [vmem:[%s3026_s24 + $0x138] sm:$0xf] %v283_v14  ;;  %286 = vst [vmem:[%s3026_s24 + $0x13c] sm:$0xf] %v285_v15  ;;  %v287_v16 = vld [vmem:[%s3019_s23 + $0x280] sm:$0xf] }
  0x4a   : > { %v289_v17 = vld [vmem:[%s3019_s23 + $0x288] sm:$0xf]  ;;  %v291_v18 = vld [vmem:[%s3019_s23 + $0x290] sm:$0xf]  ;;  %288 = vst [vmem:[%s3026_s24 + $0x140] sm:$0xf] %v287_v16 }
  0x4b   : > { %290 = vst [vmem:[%s3026_s24 + $0x144] sm:$0xf] %v289_v17  ;;  %292 = vst [vmem:[%s3026_s24 + $0x148] sm:$0xf] %v291_v18  ;;  %v293_v19 = vld [vmem:[%s3019_s23 + $0x298] sm:$0xf] }
  0x4c   : > { %v295_v20 = vld [vmem:[%s3019_s23 + $0x2a0] sm:$0xf]  ;;  %v297_v21 = vld [vmem:[%s3019_s23 + $0x2a8] sm:$0xf]  ;;  %294 = vst [vmem:[%s3026_s24 + $0x14c] sm:$0xf] %v293_v19 }
  0x4d   : > { %296 = vst [vmem:[%s3026_s24 + $0x150] sm:$0xf] %v295_v20  ;;  %298 = vst [vmem:[%s3026_s24 + $0x154] sm:$0xf] %v297_v21  ;;  %v299_v22 = vld [vmem:[%s3019_s23 + $0x2b0] sm:$0xf] }
  0x4e   : > { %v301_v23 = vld [vmem:[%s3019_s23 + $0x2b8] sm:$0xf]  ;;  %v303_v24 = vld [vmem:[%s3019_s23 + $0x2c0] sm:$0xf]  ;;  %300 = vst [vmem:[%s3026_s24 + $0x158] sm:$0xf] %v299_v22 }
  0x4f   : > { %302 = vst [vmem:[%s3026_s24 + $0x15c] sm:$0xf] %v301_v23  ;;  %304 = vst [vmem:[%s3026_s24 + $0x160] sm:$0xf] %v303_v24  ;;  %v305_v25 = vld [vmem:[%s3019_s23 + $0x2c8] sm:$0xf] }
  0x50   : > { %v307_v26 = vld [vmem:[%s3019_s23 + $0x2d0] sm:$0xf]  ;;  %v309_v27 = vld [vmem:[%s3019_s23 + $0x2d8] sm:$0xf]  ;;  %306 = vst [vmem:[%s3026_s24 + $0x164] sm:$0xf] %v305_v25 }
  0x51   : > { %308 = vst [vmem:[%s3026_s24 + $0x168] sm:$0xf] %v307_v26  ;;  %310 = vst [vmem:[%s3026_s24 + $0x16c] sm:$0xf] %v309_v27  ;;  %v311_v28 = vld [vmem:[%s3019_s23 + $0x2e0] sm:$0xf] }
  0x52   : > { %v313_v29 = vld [vmem:[%s3019_s23 + $0x2e8] sm:$0xf]  ;;  %v315_v30 = vld [vmem:[%s3019_s23 + $0x2f0] sm:$0xf]  ;;  %312 = vst [vmem:[%s3026_s24 + $0x170] sm:$0xf] %v311_v28 }
  0x53   : > { %314 = vst [vmem:[%s3026_s24 + $0x174] sm:$0xf] %v313_v29  ;;  %316 = vst [vmem:[%s3026_s24 + $0x178] sm:$0xf] %v315_v30  ;;  %v317_v31 = vld [vmem:[%s3019_s23 + $0x2f8] sm:$0xf] }
  0x54   : > { %v319_v32 = vld [vmem:[%s3019_s23 + $0x300] sm:$0xf]  ;;  %v321_v33 = vld [vmem:[%s3019_s23 + $0x308] sm:$0xf]  ;;  %318 = vst [vmem:[%s3026_s24 + $0x17c] sm:$0xf] %v317_v31 }
  0x55   : > { %320 = vst [vmem:[%s3026_s24 + $0x180] sm:$0xf] %v319_v32  ;;  %322 = vst [vmem:[%s3026_s24 + $0x184] sm:$0xf] %v321_v33  ;;  %v323_v34 = vld [vmem:[%s3019_s23 + $0x310] sm:$0xf] }
  0x56   : > { %v325_v35 = vld [vmem:[%s3019_s23 + $0x318] sm:$0xf]  ;;  %v327_v36 = vld [vmem:[%s3019_s23 + $0x320] sm:$0xf]  ;;  %324 = vst [vmem:[%s3026_s24 + $0x188] sm:$0xf] %v323_v34 }
  0x57   : > { %326 = vst [vmem:[%s3026_s24 + $0x18c] sm:$0xf] %v325_v35  ;;  %328 = vst [vmem:[%s3026_s24 + $0x190] sm:$0xf] %v327_v36  ;;  %v329_v37 = vld [vmem:[%s3019_s23 + $0x328] sm:$0xf] }
  0x58   : > { %v331_v38 = vld [vmem:[%s3019_s23 + $0x330] sm:$0xf]  ;;  %v333_v39 = vld [vmem:[%s3019_s23 + $0x338] sm:$0xf]  ;;  %330 = vst [vmem:[%s3026_s24 + $0x194] sm:$0xf] %v329_v37 }
  0x59   : > { %332 = vst [vmem:[%s3026_s24 + $0x198] sm:$0xf] %v331_v38  ;;  %334 = vst [vmem:[%s3026_s24 + $0x19c] sm:$0xf] %v333_v39  ;;  %v335_v40 = vld [vmem:[%s3019_s23 + $0x340] sm:$0xf] }
  0x5a   : > { %v337_v41 = vld [vmem:[%s3019_s23 + $0x348] sm:$0xf]  ;;  %v339_v42 = vld [vmem:[%s3019_s23 + $0x350] sm:$0xf]  ;;  %336 = vst [vmem:[%s3026_s24 + $0x1a0] sm:$0xf] %v335_v40 }
  0x5b   : > { %338 = vst [vmem:[%s3026_s24 + $0x1a4] sm:$0xf] %v337_v41  ;;  %340 = vst [vmem:[%s3026_s24 + $0x1a8] sm:$0xf] %v339_v42  ;;  %v341_v43 = vld [vmem:[%s3019_s23 + $0x358] sm:$0xf] }
  0x5c   : > { %v343_v44 = vld [vmem:[%s3019_s23 + $0x360] sm:$0xf]  ;;  %v345_v45 = vld [vmem:[%s3019_s23 + $0x368] sm:$0xf]  ;;  %342 = vst [vmem:[%s3026_s24 + $0x1ac] sm:$0xf] %v341_v43 }
  0x5d   : > { %344 = vst [vmem:[%s3026_s24 + $0x1b0] sm:$0xf] %v343_v44  ;;  %346 = vst [vmem:[%s3026_s24 + $0x1b4] sm:$0xf] %v345_v45  ;;  %v347_v46 = vld [vmem:[%s3019_s23 + $0x370] sm:$0xf] }
  0x5e   : > { %v349_v47 = vld [vmem:[%s3019_s23 + $0x378] sm:$0xf]  ;;  %v351_v48 = vld [vmem:[%s3019_s23 + $0x380] sm:$0xf]  ;;  %348 = vst [vmem:[%s3026_s24 + $0x1b8] sm:$0xf] %v347_v46 }
  0x5f   : > { %350 = vst [vmem:[%s3026_s24 + $0x1bc] sm:$0xf] %v349_v47  ;;  %352 = vst [vmem:[%s3026_s24 + $0x1c0] sm:$0xf] %v351_v48  ;;  %v353_v49 = vld [vmem:[%s3019_s23 + $0x388] sm:$0xf] }
  0x60   : > { %v355_v50 = vld [vmem:[%s3019_s23 + $0x390] sm:$0xf]  ;;  %v357_v51 = vld [vmem:[%s3019_s23 + $0x398] sm:$0xf]  ;;  %354 = vst [vmem:[%s3026_s24 + $0x1c4] sm:$0xf] %v353_v49 }
  0x61   : > { %356 = vst [vmem:[%s3026_s24 + $0x1c8] sm:$0xf] %v355_v50  ;;  %358 = vst [vmem:[%s3026_s24 + $0x1cc] sm:$0xf] %v357_v51  ;;  %v359_v52 = vld [vmem:[%s3019_s23 + $0x3a0] sm:$0xf] }
  0x62   : > { %v361_v53 = vld [vmem:[%s3019_s23 + $0x3a8] sm:$0xf]  ;;  %v363_v54 = vld [vmem:[%s3019_s23 + $0x3b0] sm:$0xf]  ;;  %360 = vst [vmem:[%s3026_s24 + $0x1d0] sm:$0xf] %v359_v52 }
  0x63   : > { %362 = vst [vmem:[%s3026_s24 + $0x1d4] sm:$0xf] %v361_v53  ;;  %364 = vst [vmem:[%s3026_s24 + $0x1d8] sm:$0xf] %v363_v54  ;;  %v365_v55 = vld [vmem:[%s3019_s23 + $0x3b8] sm:$0xf] }
  0x64   : > { %v367_v56 = vld [vmem:[%s3019_s23 + $0x3c0] sm:$0xf]  ;;  %v369_v57 = vld [vmem:[%s3019_s23 + $0x3c8] sm:$0xf]  ;;  %366 = vst [vmem:[%s3026_s24 + $0x1dc] sm:$0xf] %v365_v55 }
  0x65   : > { %368 = vst [vmem:[%s3026_s24 + $0x1e0] sm:$0xf] %v367_v56  ;;  %370 = vst [vmem:[%s3026_s24 + $0x1e4] sm:$0xf] %v369_v57  ;;  %v371_v58 = vld [vmem:[%s3019_s23 + $0x3d0] sm:$0xf] }
  0x66   : > { %v373_v59 = vld [vmem:[%s3019_s23 + $0x3d8] sm:$0xf]  ;;  %v375_v60 = vld [vmem:[%s3019_s23 + $0x3e0] sm:$0xf]  ;;  %372 = vst [vmem:[%s3026_s24 + $0x1e8] sm:$0xf] %v371_v58 }
  0x67   : > { %374 = vst [vmem:[%s3026_s24 + $0x1ec] sm:$0xf] %v373_v59  ;;  %376 = vst [vmem:[%s3026_s24 + $0x1f0] sm:$0xf] %v375_v60  ;;  %v377_v61 = vld [vmem:[%s3019_s23 + $0x3e8] sm:$0xf] }
  0x68   : > { %v379_v62 = vld [vmem:[%s3019_s23 + $0x3f0] sm:$0xf]  ;;  %v381_v63 = vld [vmem:[%s3019_s23 + $0x3f8] sm:$0xf]  ;;  %378 = vst [vmem:[%s3026_s24 + $0x1f4] sm:$0xf] %v377_v61 }
  0x69   : > { %380 = vst [vmem:[%s3026_s24 + $0x1f8] sm:$0xf] %v379_v62  ;;  %382 = vst [vmem:[%s3026_s24 + $0x1fc] sm:$0xf] %v381_v63  ;;  %v383_v0 = vld [vmem:[%s3019_s23 + $0x400] sm:$0xf] }
  0x6a   : > { %v385_v1 = vld [vmem:[%s3019_s23 + $0x408] sm:$0xf]  ;;  %v387_v2 = vld [vmem:[%s3019_s23 + $0x410] sm:$0xf]  ;;  %384 = vst [vmem:[%s3026_s24 + $0x200] sm:$0xf] %v383_v0 }
  0x6b   : > { %386 = vst [vmem:[%s3026_s24 + $0x204] sm:$0xf] %v385_v1  ;;  %388 = vst [vmem:[%s3026_s24 + $0x208] sm:$0xf] %v387_v2  ;;  %v389_v3 = vld [vmem:[%s3019_s23 + $0x418] sm:$0xf] }
  0x6c   : > { %v391_v4 = vld [vmem:[%s3019_s23 + $0x420] sm:$0xf]  ;;  %v393_v5 = vld [vmem:[%s3019_s23 + $0x428] sm:$0xf]  ;;  %390 = vst [vmem:[%s3026_s24 + $0x20c] sm:$0xf] %v389_v3 }
  0x6d   : > { %392 = vst [vmem:[%s3026_s24 + $0x210] sm:$0xf] %v391_v4  ;;  %394 = vst [vmem:[%s3026_s24 + $0x214] sm:$0xf] %v393_v5  ;;  %v395_v6 = vld [vmem:[%s3019_s23 + $0x430] sm:$0xf] }
  0x6e   : > { %v397_v7 = vld [vmem:[%s3019_s23 + $0x438] sm:$0xf]  ;;  %v399_v8 = vld [vmem:[%s3019_s23 + $0x440] sm:$0xf]  ;;  %396 = vst [vmem:[%s3026_s24 + $0x218] sm:$0xf] %v395_v6 }
  0x6f   : > { %398 = vst [vmem:[%s3026_s24 + $0x21c] sm:$0xf] %v397_v7  ;;  %400 = vst [vmem:[%s3026_s24 + $0x220] sm:$0xf] %v399_v8  ;;  %v401_v9 = vld [vmem:[%s3019_s23 + $0x448] sm:$0xf] }
  0x70   : > { %v403_v10 = vld [vmem:[%s3019_s23 + $0x450] sm:$0xf]  ;;  %v405_v11 = vld [vmem:[%s3019_s23 + $0x458] sm:$0xf]  ;;  %402 = vst [vmem:[%s3026_s24 + $0x224] sm:$0xf] %v401_v9 }
  0x71   : > { %404 = vst [vmem:[%s3026_s24 + $0x228] sm:$0xf] %v403_v10  ;;  %406 = vst [vmem:[%s3026_s24 + $0x22c] sm:$0xf] %v405_v11  ;;  %v407_v12 = vld [vmem:[%s3019_s23 + $0x460] sm:$0xf] }
  0x72   : > { %v409_v13 = vld [vmem:[%s3019_s23 + $0x468] sm:$0xf]  ;;  %v411_v14 = vld [vmem:[%s3019_s23 + $0x470] sm:$0xf]  ;;  %408 = vst [vmem:[%s3026_s24 + $0x230] sm:$0xf] %v407_v12 }
  0x73   : > { %410 = vst [vmem:[%s3026_s24 + $0x234] sm:$0xf] %v409_v13  ;;  %412 = vst [vmem:[%s3026_s24 + $0x238] sm:$0xf] %v411_v14  ;;  %v413_v15 = vld [vmem:[%s3019_s23 + $0x478] sm:$0xf] }
  0x74   : > { %414 = vst [vmem:[%s3026_s24 + $0x23c] sm:$0xf] %v413_v15 }
  0x75 PF: > { %p2304_p7 = scmp.ge.s32.totalorder %s2960_s11, 1  ;;  %p724_p8 = scmp.lt.s32.totalorder %s2960_s11, 3 }
  0x77   : > { %p725_p9 = pnand %p2304_p7, %p724_p8 }
  0x78   : > { %s731_s25 = sand.u32 (!%p725_p9), 1, %s2952_s9   ;;  %v2797_v16 = vld [vmem:[%s3690_s0 + $0x124] ss:$36 sps:$4 sm:$0xff] (!%p725_p9)   ;;  %v2810_v41 = vld [vmem:[%s3690_s0 + $0x4c] ss:$36 sps:$4 sm:$0xff] (!%p725_p9)   ;;  %vm2963_vm0 = vmmov (!%p725_p9), 0  }
  0x79   : > { %728 = sbr.rel (%p725_p9) target bundleno = 522 (0x20a), region = 65  ;;  %v2801_v17 = vld [vmem:[%s3690_s0 + $0x4] ss:$36 sps:$4 sm:$0xff] (!%p725_p9)   ;;  %1765 = vmatprep.mubr.bf16.mxu1 (!%p725_p9), %v2797_v16  ;;  %v2817_v43 = vld [vmem:[%s3690_s0 + $0x16c] ss:$36 sps:$4 sm:$0xff] (!%p725_p9)  }
  0x7a   : > { %s2751_s26 = smul.u32 (!%p725_p9), 576, %s731_s25  ;;  %1733 = vmatprep.mubr.bf16.mxu0 (!%p725_p9), %v2801_v17  ;;  %v2795_v35 = vld [vmem:[%s3690_s0 + $0x120] ss:$36 sps:$4 sm:$0xff] (!%p725_p9)   ;;  %v2813_v47 = vld [vmem:[%s3690_s0 + $0x48] ss:$36 sps:$4 sm:$0xff] (!%p725_p9)  }
  0x7b   : > { %v2799_v36 = vld [vmem:[%s3690_s0] ss:$36 sps:$4 sm:$0xff] (!%p725_p9)   ;;  %v2820_v51 = vld [vmem:[%s3690_s0 + $0x168] ss:$36 sps:$4 sm:$0xff] (!%p725_p9)   ;;  %v812_v53 = vld [vmem:[%s3690_s0 + $0x1b0] sm:$0x11] (!%p725_p9) }
  0x7c   : > { %s3322_s3 = scalar_lea.vmem (!%p725_p9), [#allocation2], %s2751_s26  ;;  %v2824_v56 = vld [vmem:[%s3690_s0 + $0x94] ss:$36 sps:$4 sm:$0xff] (!%p725_p9)   ;;  %v2360_v57 = vcombine.high (!%p725_p9), %v812_v53, %v812_v53  ;;  %v2359_v0 = vcombine.low (!%p725_p9), %v812_v53, %v812_v53  ;;  %v2837_v4 = vld [vmem:[%s3690_s0 + $0xdc] ss:$36 sps:$4 sm:$0xff] (!%p725_p9)   ;;  %s2752_s28 = smul.u32 (!%p725_p9), 104, %s731_s25 }
  0x7d   : > { %v2779_v18 = vld [vmem:[%s3322_s3 + $0x40] sm:$0xff] (!%p725_p9)   ;;  %v2781_v20 = vld [vmem:[%s3322_s3 + $0x48] sm:$0xff] (!%p725_p9)   ;;  %v2783_v22 = vld [vmem:[%s3322_s3 + $0x50] sm:$0xff] (!%p725_p9)  }
  0x7e   : > { %v2780_v19 = vld [vmem:[%s3322_s3] sm:$0xff] (!%p725_p9)   ;;  %2734 = vmatprep.subr.bf16.mxu1 (!%p725_p9), %v2779_v18  ;;  %2443 = vmatprep.subr.bf16.mxu0 (!%p725_p9), %v2779_v18  ;;  %v2782_v21 = vld [vmem:[%s3322_s3 + $0x8] sm:$0xff] (!%p725_p9)   ;;  %v2784_v23 = vld [vmem:[%s3322_s3 + $0x10] sm:$0xff] (!%p725_p9)   ;;  %s3634_s29 = scalar_lea.vmem (!%p725_p9), [#allocation3], %s2752_s28 }
  0x7f   : > { %2742 = vmatpush3.bf16.msra.mxu1 (!%p725_p9), %v2780_v19  ;;  %2444 = vmatpush3.bf16.msra.mxu0 (!%p725_p9), %v2780_v19  ;;  %v2785_v24 = vld [vmem:[%s3322_s3 + $0x58] sm:$0xff] (!%p725_p9)   ;;  %v2787_v26 = vld [vmem:[%s3322_s3 + $0x60] sm:$0xff] (!%p725_p9)   ;;  %v2789_v28 = vld [vmem:[%s3322_s3 + $0x68] sm:$0xff] (!%p725_p9)  }
  0x80   : > { %2735 = vmatprep.subr.bf16.mxu1 %v2781_v20  ;;  %2445 = vmatprep.subr.bf16.mxu0 %v2781_v20  ;;  %v2786_v25 = vld [vmem:[%s3322_s3 + $0x18] sm:$0xff]   ;;  %v2788_v27 = vld [vmem:[%s3322_s3 + $0x20] sm:$0xff]   ;;  %v2790_v29 = vld [vmem:[%s3322_s3 + $0x28] sm:$0xff]   ;;  %s2440_s9 = sshll.u32 (%p3009_p5), %s2299_s12, 3 }
  0x81   : > { %v2791_v30 = vld [vmem:[%s3322_s3 + $0x70] sm:$0xff]   ;;  %v2793_v32 = vld [vmem:[%s3322_s3 + $0x78] sm:$0xff]   ;;  %v2798_v34 = vld [vmem:[%s3322_s3 + $0xc0] sm:$0xff]   ;;  %s2162_s17 = scalar_lea.vmem (%p3009_p5), %s3692_s2, %s2440_s9 }
  0x82   : > { %v2792_v31 = vld [vmem:[%s3322_s3 + $0x30] sm:$0xff]   ;;  %v2794_v33 = vld [vmem:[%s3322_s3 + $0x38] sm:$0xff]   ;;  %v2803_v37 = vld [vmem:[%s3322_s3 + $0x140] sm:$0xff]  }
  0x83   : > { %2743 = vmatpush3.bf16.msra.mxu1 %v2782_v21  ;;  %2446 = vmatpush3.bf16.msra.mxu0 %v2782_v21  ;;  %v2802_v38 = vld [vmem:[%s3322_s3 + $0x80] sm:$0xff]   ;;  %v2805_v40 = vld [vmem:[%s3322_s3 + $0xc8] sm:$0xff]   ;;  %v2809_v46 = vld [vmem:[%s3322_s3 + $0xd0] sm:$0xff]  }
  0x84   : > { %2736 = vmatprep.subr.bf16.mxu1 %v2783_v22  ;;  %2447 = vmatprep.subr.bf16.mxu0 %v2783_v22  ;;  %v2804_v39 = vld [vmem:[%s3322_s3 + $0x100] sm:$0xff]   ;;  %v2807_v42 = vld [vmem:[%s3322_s3 + $0x148] sm:$0xff]   ;;  %v2814_v48 = vld [vmem:[%s3322_s3 + $0x150] sm:$0xff]  }
  0x85   : > { %v2806_v44 = vld [vmem:[%s3322_s3 + $0x88] sm:$0xff]   ;;  %v2812_v49 = vld [vmem:[%s3322_s3 + $0x90] sm:$0xff]   ;;  %v2816_v52 = vld [vmem:[%s3322_s3 + $0xd8] sm:$0xff]  }
  0x86   : > { %v2808_v45 = vld [vmem:[%s3322_s3 + $0x108] sm:$0xff]   ;;  %v2815_v50 = vld [vmem:[%s3322_s3 + $0x110] sm:$0xff]   ;;  %v2821_v54 = vld [vmem:[%s3322_s3 + $0x158] sm:$0xff]  }
  0x87   : > { %2744 = vmatpush3.bf16.msra.mxu1 %v2784_v23  ;;  %2448 = vmatpush3.bf16.msra.mxu0 %v2784_v23  ;;  %v2819_v55 = vld [vmem:[%s3322_s3 + $0x98] sm:$0xff]   ;;  %v2823_v59 = vld [vmem:[%s3322_s3 + $0xe0] sm:$0xff]   ;;  %v2827_v62 = vld [vmem:[%s3690_s0 + $0x90] ss:$36 sps:$4 sm:$0xff]   ;;  %v2962_v23 = vmov 0.0  }
  0x88   : > { %2737 = vmatprep.subr.bf16.mxu1 %v2785_v24  ;;  %2449 = vmatprep.subr.bf16.mxu0 %v2785_v24  ;;  %v2822_v58 = vld [vmem:[%s3322_s3 + $0x118] sm:$0xff]   ;;  %v2828_v60 = vld [vmem:[%s3322_s3 + $0x160] sm:$0xff]   ;;  %v2830_v1 = vld [vmem:[%s3322_s3 + $0xe8] sm:$0xff]  }
  0x89   : > { %v2826_v61 = vld [vmem:[%s3322_s3 + $0xa0] sm:$0xff]   ;;  %v2834_v2 = vld [vmem:[%s3322_s3 + $0x168] sm:$0xff]   ;;  %v2836_v6 = vld [vmem:[%s3322_s3 + $0xf0] sm:$0xff]  }
  0x8a   : > { %v2829_v63 = vld [vmem:[%s3322_s3 + $0x120] sm:$0xff]   ;;  %v2832_v3 = vld [vmem:[%s3322_s3 + $0xa8] sm:$0xff]   ;;  %v2841_v7 = vld [vmem:[%s3322_s3 + $0x170] sm:$0xff]  }
  0x8b   : > { %2745 = vmatpush3.bf16.msra.mxu1 %v2786_v25  ;;  %2450 = vmatpush3.bf16.msra.mxu0 %v2786_v25  ;;  %v2835_v5 = vld [vmem:[%s3322_s3 + $0x128] sm:$0xff]   ;;  %v2839_v9 = vld [vmem:[%s3322_s3 + $0xb0] sm:$0xff]   ;;  %v2840_v10 = vld [vmem:[%s3690_s0 + $0xd8] ss:$36 sps:$4 sm:$0xff]  }
  0x8c   : > { %2738 = vmatprep.subr.bf16.mxu1 %v2787_v26  ;;  %2451 = vmatprep.subr.bf16.mxu0 %v2787_v26  ;;  %v2848_v8 = vld [vmem:[%s3690_s0 + $0xc] ss:$36 sps:$4 sm:$0xff]   ;;  %v2843_v12 = vld [vmem:[%s3322_s3 + $0xf8] sm:$0xff]   ;;  %v2850_v18 = vld [vmem:[%s3322_s3 + $0x1c0] sm:$0xff]  }
  0x8d   : > { %v2842_v11 = vld [vmem:[%s3322_s3 + $0x130] sm:$0xff]   ;;  %v2845_v13 = vld [vmem:[%s3322_s3 + $0x178] sm:$0xff]   ;;  %v2846_v17 = vld [vmem:[%s3690_s0 + $0x8] ss:$36 sps:$4 sm:$0xff]  }
  0x8e   : > { %v2853_v14 = vld [vmem:[%s3690_s0 + $0x14] ss:$36 sps:$4 sm:$0xff]   ;;  %v2854_v20 = vld [vmem:[%s3322_s3 + $0x180] sm:$0xff]   ;;  %v2858_v24 = vld [vmem:[%s3322_s3 + $0x1c8] sm:$0xff]  }
  0x8f   : > { %2746 = vmatpush3.bf16.msra.mxu1 %v2788_v27  ;;  %2452 = vmatpush3.bf16.msra.mxu0 %v2788_v27  ;;  %v2844_v15 = vld [vmem:[%s3322_s3 + $0xb8] sm:$0xff]   ;;  %v2851_v19 = vld [vmem:[%s3690_s0 + $0x10] ss:$36 sps:$4 sm:$0xff]   ;;  %v2855_v21 = vld [vmem:[%s3322_s3 + $0x200] sm:$0xff]  }
  0x90   : > { %2739 = vmatprep.subr.bf16.mxu1 %v2789_v28  ;;  %2453 = vmatprep.subr.bf16.mxu0 %v2789_v28  ;;  %v2849_v16 = vld [vmem:[%s3322_s3 + $0x138] sm:$0xff]   ;;  %v2860_v26 = vld [vmem:[%s3322_s3 + $0x188] sm:$0xff]   ;;  %v2859_v28 = vld [vmem:[%s3690_s0 + $0x50] ss:$36 sps:$4 sm:$0xff]  }
  0x91   : > { %v2856_v22 = vld [vmem:[%s3690_s0 + $0x54] ss:$36 sps:$4 sm:$0xff]   ;;  %v2861_v25 = vld [vmem:[%s3690_s0 + $0x5c] ss:$36 sps:$4 sm:$0xff]   ;;  %v2864_v27 = vld [vmem:[%s3322_s3 + $0x208] sm:$0xff]  }
  0x92   : > { %v2902_v53 = vld [vmem:[%s3322_s3 + $0x1b0] sm:$0xff]  }
  0x93   : > { %2747 = vmatpush3.bf16.msra.mxu1 %v2790_v29  ;;  %2454 = vmatpush3.bf16.msra.mxu0 %v2790_v29  ;;  %v2865_v29 = vld [vmem:[%s3322_s3 + $0x1d0] sm:$0xff]  }
  0x94   : > { %2740 = vmatprep.subr.bf16.mxu1 %v2791_v30  ;;  %2455 = vmatprep.subr.bf16.mxu0 %v2791_v30  ;;  %v2863_v30 = vld [vmem:[%s3690_s0 + $0x58] ss:$36 sps:$4 sm:$0xff]  }
  0x97   : > { %2748 = vmatpush3.bf16.msra.mxu1 %v2792_v31  ;;  %2456 = vmatpush3.bf16.msra.mxu0 %v2792_v31  ;;  %v2866_v31 = vld [vmem:[%s3690_s0 + $0x9c] ss:$36 sps:$4 sm:$0xff]  }
  0x98   : > { %2741 = vmatprep.subr.bf16.mxu1 %v2793_v32  ;;  %2457 = vmatprep.subr.bf16.mxu0 %v2793_v32  ;;  %v2868_v32 = vld [vmem:[%s3322_s3 + $0x190] sm:$0xff]  }
  0x9b   : > { %2749 = vmatpush3.bf16.msra.mxu1 %v2794_v33  ;;  %2458 = vmatpush3.bf16.msra.mxu0 %v2794_v33  ;;  %v2870_v33 = vld [vmem:[%s3690_s0 + $0xa4] ss:$36 sps:$4 sm:$0xff]  }
  0x9c   : > { %2501 = vmatprep.subr.bf16.mxu1 %v2798_v34  ;;  %2559 = vmatprep.subr.bf16.mxu0 %v2803_v37  ;;  %v2873_v34 = vld [vmem:[%s3322_s3 + $0x210] sm:$0xff]   ;;  %v2882_v37 = vld [vmem:[%s3322_s3 + $0x218] sm:$0xff]  }
  0x9e   : > { %1766 = vmatmul.mubr.bf16.vlgmr.msra.gmra.mrb[0].mxu1 %v2795_v35  ;;  %1734 = vmatmul.mubr.bf16.vlgmr.msra.gmra.mrb[0].mxu0 %v2799_v36  ;;  %v2874_v35 = vld [vmem:[%s3322_s3 + $0x1d8] sm:$0xff]  }
  0x9f   : > { %2502 = vmatpush3.bf16.msra.mxu1 %v2802_v38  ;;  %2560 = vmatpush3.bf16.msra.mxu0 %v2804_v39  ;;  %v2875_v36 = vld [vmem:[%s3322_s3 + $0x198] sm:$0xff]   ;;  %v2883_v39 = vld [vmem:[%s3322_s3 + $0x1e0] sm:$0xff]  }
  0xa0   : > { %2503 = vmatprep.subr.bf16.mxu1 %v2805_v40  ;;  %2561 = vmatprep.subr.bf16.mxu0 %v2807_v42  ;;  %v2869_v38 = vld [vmem:[%s3690_s0 + $0x98] ss:$36 sps:$4 sm:$0xff]   ;;  %v2872_v40 = vld [vmem:[%s3690_s0 + $0xa0] ss:$36 sps:$4 sm:$0xff]   ;;  %v2879_v42 = vld [vmem:[%s3690_s0 + $0xec] ss:$36 sps:$4 sm:$0xff]  }
  0xa1   : > { %1741 = vmatprep.mubr.bf16.mxu0 %v2810_v41  ;;  %1773 = vmatprep.mubr.bf16.mxu1 %v2817_v43  ;;  %v2876_v41 = vld [vmem:[%s3690_s0 + $0xe4] ss:$36 sps:$4 sm:$0xff]  }
  0xa2   : > { %v2884_v43 = vld [vmem:[%s3322_s3 + $0x1a0] sm:$0xff]  }
  0xa3   : > { %2504 = vmatpush3.bf16.msra.mxu1 %v2806_v44  ;;  %2562 = vmatpush3.bf16.msra.mxu0 %v2808_v45  ;;  %v2891_v44 = vld [vmem:[%s3322_s3 + $0x220] sm:$0xff]   ;;  %v2892_v45 = vld [vmem:[%s3322_s3 + $0x1e8] sm:$0xff]  }
  0xa4   : > { %2505 = vmatprep.subr.bf16.mxu1 %v2809_v46  ;;  %2563 = vmatprep.subr.bf16.mxu0 %v2814_v48  ;;  %v2878_v46 = vld [vmem:[%s3690_s0 + $0xe0] ss:$36 sps:$4 sm:$0xff]   ;;  %v2893_v48 = vld [vmem:[%s3322_s3 + $0x1a8] sm:$0xff]  }
  0xa6   : > { %1742 = vmatmul.mubr.bf16.gmra.mrb[4].mxu0 %v2813_v47  ;;  %1774 = vmatmul.mubr.bf16.gmra.mrb[4].mxu1 %v2820_v51  ;;  %v2881_v47 = vld [vmem:[%s3690_s0 + $0xe8] ss:$36 sps:$4 sm:$0xff]   ;;  %v2888_v51 = vld [vmem:[%s3690_s0 + $0x134] ss:$36 sps:$4 sm:$0xff]  }
  0xa7   : > { %2506 = vmatpush3.bf16.msra.mxu1 %v2812_v49  ;;  %2564 = vmatpush3.bf16.msra.mxu0 %v2815_v50  ;;  %v2885_v49 = vld [vmem:[%s3690_s0 + $0x12c] ss:$36 sps:$4 sm:$0xff]  }
  0xa8   : > { %2507 = vmatprep.subr.bf16.mxu1 %v2816_v52  ;;  %2565 = vmatprep.subr.bf16.mxu0 %v2821_v54  ;;  %v2899_v50 = vld [vmem:[%s3322_s3 + $0x228] sm:$0xff]   ;;  %v2901_v52 = vld [vmem:[%s3322_s3 + $0x1f0] sm:$0xff]  }
  0xa9   : > { %1749 = vmatprep.mubr.bf16.mxu0 %v2824_v56  ;;  %1781 = vmatprep.mubr.bf16.mxu1 %v2360_v57  ;;  %v2905_v54 = vld [vmem:[%s3322_s3 + $0x230] sm:$0xff]   ;;  %v2887_v56 = vld [vmem:[%s3690_s0 + $0x128] ss:$36 sps:$4 sm:$0xff]  }
  0xaa   : > { %v2890_v57 = vld [vmem:[%s3690_s0 + $0x130] ss:$36 sps:$4 sm:$0xff]  }
  0xab   : > { %2508 = vmatpush3.bf16.msra.mxu1 %v2819_v55  ;;  %2566 = vmatpush3.bf16.msra.mxu0 %v2822_v58  ;;  %v2907_v55 = vld [vmem:[%s3322_s3 + $0x1f8] sm:$0xff]  }
  0xac   : > { %2509 = vmatprep.subr.bf16.mxu1 %v2823_v59  ;;  %2567 = vmatprep.subr.bf16.mxu0 %v2828_v60  ;;  %v2909_v58 = vld [vmem:[%s3322_s3 + $0x1b8] sm:$0xff]  }
  0xad   : > { %v2894_v59 = vld [vmem:[%s3690_s0 + $0x174] ss:$36 sps:$4 sm:$0xff]  }
  0xae   : > { %1750 = vmatmul.mubr.bf16.gmra.mrb[8].mxu0 %v2827_v62  ;;  %1782 = vmatmul.mubr.bf16.gmra.mrb[8].mxu1 %v2359_v0  ;;  %v2913_v60 = vld [vmem:[%s3322_s3 + $0x238] sm:$0xff]   ;;  %v2896_v0 = vld [vmem:[%s3690_s0 + $0x170] ss:$36 sps:$4 sm:$0xff]  }
  0xaf   : > { %2510 = vmatpush3.bf16.msra.mxu1 %v2826_v61  ;;  %2568 = vmatpush3.bf16.msra.mxu0 %v2829_v63  ;;  %v2897_v61 = vld [vmem:[%s3690_s0 + $0x17c] ss:$36 sps:$4 sm:$0xff]  }
  0xb0   : > { %2511 = vmatprep.subr.bf16.mxu1 %v2830_v1  ;;  %2569 = vmatprep.subr.bf16.mxu0 %v2834_v2  ;;  %v813_v62 = vld [vmem:[%s3690_s0 + $0x1b8] sm:$0x11]  ;;  %v814_v63 = vld [vmem:[%s3690_s0 + $0x1c0] sm:$0x11] }
  0xb1   : > { %1757 = vmatprep.mubr.bf16.mxu0 %v2837_v4  ;;  %1821 = vmatprep.mubr.bf16.mxu1 %v2848_v8  ;;  %v2900_v1 = vld [vmem:[%s3690_s0 + $0x178] ss:$36 sps:$4 sm:$0xff]   ;;  %v2362_v2 = vcombine.high %v813_v62, %v813_v62  ;;  %v2361_v4 = vcombine.low %v813_v62, %v813_v62  ;;  %v2914_v8 = vld [vmem:[%s3690_s0 + $0x20] ss:$36 sps:$4 sm:$0xff]  }
  0xb3   : > { %2512 = vmatpush3.bf16.msra.mxu1 %v2832_v3  ;;  %2570 = vmatpush3.bf16.msra.mxu0 %v2835_v5  ;;  %v2364_v3 = vcombine.high %v814_v63, %v814_v63  ;;  %v2363_v5 = vcombine.low %v814_v63, %v814_v63 }
  0xb4   : > { %2513 = vmatprep.subr.bf16.mxu1 %v2836_v6  ;;  %2571 = vmatprep.subr.bf16.mxu0 %v2841_v7  ;;  %v2912_v6 = vld [vmem:[%s3690_s0 + $0x1c] ss:$36 sps:$4 sm:$0xff]  }
  0xb5   : > { %v2910_v7 = vld [vmem:[%s3690_s0 + $0x18] ss:$36 sps:$4 sm:$0xff]  }
  0xb6   : > { %1758 = vmatmul.mubr.bf16.gmra.mrb[12].mxu0 %v2840_v10  ;;  %v2917_v10 = vld [vmem:[%s3690_s0 + $0x60] ss:$36 sps:$4 sm:$0xff]  }
  0xb7   : > { %2514 = vmatpush3.bf16.msra.mxu1 %v2839_v9  ;;  %2572 = vmatpush3.bf16.msra.mxu0 %v2842_v11  ;;  %v2915_v9 = vld [vmem:[%s3690_s0 + $0x64] ss:$36 sps:$4 sm:$0xff]  }
  0xb8   : > { %2515 = vmatprep.subr.bf16.mxu1 %v2843_v12  ;;  %2573 = vmatprep.subr.bf16.mxu0 %v2845_v13  ;;  %v2918_v11 = vld [vmem:[%s3690_s0 + $0x68] ss:$36 sps:$4 sm:$0xff]  }
  0xb9   : > { %1909 = vmatprep.mubr.bf16.mxu0 %v2853_v14  ;;  %v2919_v12 = vld [vmem:[%s3690_s0 + $0xac] ss:$36 sps:$4 sm:$0xff]  }
  0xba   : > { %v2921_v13 = vld [vmem:[%s3690_s0 + $0xa8] ss:$36 sps:$4 sm:$0xff]   ;;  %v2922_v14 = vld [vmem:[%s3690_s0 + $0xb0] ss:$36 sps:$4 sm:$0xff]  }
  0xbb   : > { %2516 = vmatpush3.bf16.msra.mxu1 %v2844_v15  ;;  %2574 = vmatpush3.bf16.msra.mxu0 %v2849_v16  ;;  %v2923_v15 = vld [vmem:[%s3690_s0 + $0xf4] ss:$36 sps:$4 sm:$0xff]  }
  0xbc   : > { %2617 = vmatprep.subr.bf16.mxu1 %v2850_v18  ;;  %2690 = vmatprep.subr.bf16.mxu0 %v2962_v23  ;;  %v2925_v16 = vld [vmem:[%s3690_s0 + $0xf0] ss:$36 sps:$4 sm:$0xff]   ;;  %v2927_v18 = vld [vmem:[%s3690_s0 + $0x13c] ss:$36 sps:$4 sm:$0xff]  }
  0xbe   : > { %1822 = vmatmul.mubr.bf16.vlgmr.msra.gmra.mrb[12].mxu1 %v2846_v17  ;;  %1910 = vmatmul.mubr.bf16.vlgmr.msra.gmra.mrb[16].mxu0 %v2851_v19  ;;  %v2926_v17 = vld [vmem:[%s3690_s0 + $0xf8] ss:$36 sps:$4 sm:$0xff]  }
  0xbf   : > { %2618 = vmatpush3.bf16.msra.mxu1 %v2854_v20  ;;  %2691 = vmatpush3.bf16.msra.mxu0 %v2855_v21  ;;  %v2929_v19 = vld [vmem:[%s3690_s0 + $0x138] ss:$36 sps:$4 sm:$0xff]   ;;  %v2930_v20 = vld [vmem:[%s3690_s0 + $0x140] ss:$36 sps:$4 sm:$0xff]  }
  0xc0   : > { %1829 = vmatprep.mubr.bf16.mxu1 %v2856_v22  ;;  %2619 = vmatprep.subr.bf16.mxu1 %v2858_v24  ;;  %v2931_v21 = vld [vmem:[%s3690_s0 + $0x184] ss:$36 sps:$4 sm:$0xff]  }
  0xc1   : > { %1917 = vmatprep.mubr.bf16.mxu0 %v2861_v25  ;;  %2692 = vmatprep.subr.bf16.mxu0 %v2962_v23  ;;  %v815_v22 = vld [vmem:[%s3690_s0 + $0x1c8] sm:$0x11]  ;;  %v2933_v24 = vld [vmem:[%s3690_s0 + $0x180] ss:$36 sps:$4 sm:$0xff]  }
  0xc2   : > { %v2934_v25 = vld [vmem:[%s3690_s0 + $0x188] ss:$36 sps:$4 sm:$0xff]  }
  0xc3   : > { %2620 = vmatpush3.bf16.msra.mxu1 %v2860_v26  ;;  %2693 = vmatpush3.bf16.msra.mxu0 %v2864_v27  ;;  %v2366_v26 = vcombine.high %v815_v22, %v815_v22  ;;  %v2365_v27 = vcombine.low %v815_v22, %v815_v22 }
  0xc4   : > { %2621 = vmatprep.subr.bf16.mxu1 %v2865_v29  ;;  %2694 = vmatprep.subr.bf16.mxu0 %v2962_v23 }
  0xc6   : > { %1830 = vmatmul.mubr.bf16.gmra.mrb[16].mxu1 %v2859_v28  ;;  %1918 = vmatmul.mubr.bf16.gmra.mrb[20].mxu0 %v2863_v30  ;;  %v2937_v28 = vld [vmem:[%s3690_s0 + $0x1d0] ss:$0 sps:$4 sm:$0x11]  }
  0xc7   : > { %1837 = vmatprep.mubr.bf16.mxu1 %v2866_v31  ;;  %2622 = vmatpush3.bf16.msra.mxu1 %v2868_v32 }
  0xc8   : > { %1925 = vmatprep.mubr.bf16.mxu0 %v2870_v33  ;;  %2695 = vmatpush3.bf16.msra.mxu0 %v2873_v34 }
  0xc9   : > { %2623 = vmatprep.subr.bf16.mxu1 %v2874_v35  ;;  %2696 = vmatprep.subr.bf16.mxu0 %v2962_v23 }
  0xcb   : > { %2624 = vmatpush3.bf16.msra.mxu1 %v2875_v36 }
  0xcc   : > { %2697 = vmatpush3.bf16.msra.mxu0 %v2882_v37  ;;  %2625 = vmatprep.subr.bf16.mxu1 %v2883_v39 }
  0xcd   : > { %2698 = vmatprep.subr.bf16.mxu0 %v2962_v23 }
  0xce   : > { %1838 = vmatmul.mubr.bf16.gmra.mrb[20].mxu1 %v2869_v38  ;;  %1926 = vmatmul.mubr.bf16.gmra.mrb[24].mxu0 %v2872_v40 }
  0xcf   : > { %1845 = vmatprep.mubr.bf16.mxu1 %v2876_v41  ;;  %1933 = vmatprep.mubr.bf16.mxu0 %v2879_v42 }
  0xd0   : > { %2626 = vmatpush3.bf16.msra.mxu1 %v2884_v43  ;;  %2699 = vmatpush3.bf16.msra.mxu0 %v2891_v44 }
  0xd1   : > { %2627 = vmatprep.subr.bf16.mxu1 %v2892_v45  ;;  %2700 = vmatprep.subr.bf16.mxu0 %v2962_v23 }
  0xd4   : > { %2628 = vmatpush3.bf16.msra.mxu1 %v2893_v48  ;;  %2701 = vmatpush3.bf16.msra.mxu0 %v2899_v50 }
  0xd5   : > { %2629 = vmatprep.subr.bf16.mxu1 %v2901_v52  ;;  %2702 = vmatprep.subr.bf16.mxu0 %v2962_v23 }
  0xd6   : > { %1846 = vmatmul.mubr.bf16.gmra.mrb[24].mxu1 %v2878_v46  ;;  %1934 = vmatmul.mubr.bf16.gmra.mrb[28].mxu0 %v2881_v47 }
  0xd7   : > { %1853 = vmatprep.mubr.bf16.mxu1 %v2885_v49  ;;  %1941 = vmatprep.mubr.bf16.mxu0 %v2888_v51 }
  0xd8   : > { %2630 = vmatpush3.bf16.msra.mxu1 %v2902_v53  ;;  %2703 = vmatpush3.bf16.msra.mxu0 %v2905_v54 }
  0xd9   : > { %2631 = vmatprep.subr.bf16.mxu1 %v2907_v55  ;;  %2704 = vmatprep.subr.bf16.mxu0 %v2962_v23 }
  0xdc   : > { %2632 = vmatpush3.bf16.msra.mxu1 %v2909_v58  ;;  %2705 = vmatpush3.bf16.msra.mxu0 %v2913_v60 }
  0xde   : > { %1854 = vmatmul.mubr.bf16.gmra.mrb[28].mxu1 %v2887_v56  ;;  %1942 = vmatmul.mubr.bf16.gmra.mrb[32].mxu0 %v2890_v57 }
  0xdf   : > { %1861 = vmatprep.mubr.bf16.mxu1 %v2894_v59  ;;  %1949 = vmatprep.mubr.bf16.mxu0 %v2897_v61 }
  0xe6   : > { %1862 = vmatmul.mubr.bf16.gmra.mrb[32].mxu1 %v2896_v0  ;;  %1950 = vmatmul.mubr.bf16.gmra.mrb[36].mxu0 %v2900_v1 }
  0xe7   : > { %1869 = vmatprep.mubr.bf16.mxu1 %v2362_v2  ;;  %1957 = vmatprep.mubr.bf16.mxu0 %v2364_v3 }
  0xee   : > { %1870 = vmatmul.mubr.bf16.gmra.mrb[36].mxu1 %v2361_v4  ;;  %1958 = vmatmul.mubr.bf16.gmra.mrb[40].mxu0 %v2363_v5 }
  0xef   : > { %1997 = vmatprep.mubr.bf16.mxu1 %v2912_v6  ;;  %2706 = vmatprep.mubr.msk.bf16.mxu0 %vm2963_vm0, %v2962_v23 }
  0xf6   : > { %1998 = vmatmul.mubr.bf16.vlgmr.msra.gmra.mrb[40].mxu1 %v2910_v7  ;;  %2707 = vmatmul.mubr.bf16.vlgmr.msra.gmra.mrb[44].mxu0 %v2914_v8 }
  0xf7   : > { %2005 = vmatprep.mubr.bf16.mxu1 %v2915_v9  ;;  %2710 = vmatprep.mubr.msk.bf16.mxu0 %vm2963_vm0, %v2962_v23 }
  0xfe   : > { %2006 = vmatmul.mubr.bf16.gmra.mrb[44].mxu1 %v2917_v10  ;;  %2711 = vmatmul.mubr.bf16.gmra.mrb[48].mxu0 %v2918_v11 }
  0xff   : > { %2013 = vmatprep.mubr.bf16.mxu1 %v2919_v12  ;;  %2714 = vmatprep.mubr.msk.bf16.mxu0 %vm2963_vm0, %v2962_v23 }
 0x106   : > { %2014 = vmatmul.mubr.bf16.gmra.mrb[48].mxu1 %v2921_v13  ;;  %2715 = vmatmul.mubr.bf16.gmra.mrb[52].mxu0 %v2922_v14 }
 0x107   : > { %2021 = vmatprep.mubr.bf16.mxu1 %v2923_v15  ;;  %2718 = vmatprep.mubr.msk.bf16.mxu0 %vm2963_vm0, %v2962_v23 }
 0x10e   : > { %2022 = vmatmul.mubr.bf16.gmra.mrb[52].mxu1 %v2925_v16  ;;  %2719 = vmatmul.mubr.bf16.gmra.mrb[56].mxu0 %v2926_v17 }
 0x10f   : > { %2029 = vmatprep.mubr.bf16.mxu1 %v2927_v18  ;;  %2722 = vmatprep.mubr.msk.bf16.mxu0 %vm2963_vm0, %v2962_v23 }
 0x116   : > { %2030 = vmatmul.mubr.bf16.gmra.mrb[56].mxu1 %v2929_v19  ;;  %2723 = vmatmul.mubr.bf16.gmra.mrb[60].mxu0 %v2930_v20 }
 0x117   : > { %2037 = vmatprep.mubr.bf16.mxu1 %v2931_v21  ;;  %2726 = vmatprep.mubr.msk.bf16.mxu0 %vm2963_vm0, %v2962_v23 }
 0x11e   : > { %2038 = vmatmul.mubr.bf16.gmra.mrb[60].mxu1 %v2933_v24  ;;  %2727 = vmatmul.mubr.bf16.gmra.mrb[64].mxu0 %v2934_v25 }
 0x11f   : > { %2045 = vmatprep.mubr.bf16.mxu1 %v2366_v26  ;;  %2730 = vmatprep.mubr.msk.bf16.mxu0 %vm2963_vm0, %v2962_v23 }
 0x126   : > { %2046 = vmatmul.mubr.bf16.gmra.mrb[64].mxu1 %v2365_v27  ;;  %2731 = vmatmul.mubr.bf16.gmra.mrb[68].mxu0 %v2937_v28 }
 0x171   : > { %v2483_v29 = vpop.f32.mrb[0].mxu1  ;;  %v2459_v30 = vpop.f32.mrb[0].mxu0 }
 0x172   : > { %v2484_v31 = vpop.f32.mrb[1].mxu1  ;;  %v2460_v32 = vpop.f32.mrb[1].mxu0 }
 0x173   : > { %v3589_v33 = vadd.f32 %v2484_v31, %v2483_v29  ;;  %v2486_v34 = vpop.f32.mrb[2].mxu1  ;;  %v2461_v35 = vadd.f32 %v2460_v32, %v2459_v30  ;;  %v2462_v36 = vpop.f32.mrb[2].mxu0 }
 0x174   : > { %v2487_v37 = vpop.f32.mrb[3].mxu1  ;;  %v2463_v38 = vpop.f32.mrb[3].mxu0 }
 0x175   : > { %v3591_v39 = vadd.f32 %v2487_v37, %v2486_v34  ;;  %v2464_v23 = vadd.f32 %v2463_v38, %v2462_v36 }
 0x179   : > { %v2465_v40 = vpop.f32.mrb[4].mxu0  ;;  %v2489_v41 = vpop.f32.mrb[4].mxu1 }
 0x17a   : > { %v2466_v42 = vpop.f32.mrb[5].mxu0  ;;  %v2490_v43 = vpop.f32.mrb[5].mxu1 }
 0x17b   : > { %v2467_v44 = vadd.f32 %v2466_v42, %v2465_v40  ;;  %v2468_v45 = vpop.f32.mrb[6].mxu0  ;;  %v3593_v46 = vadd.f32 %v2490_v43, %v2489_v41  ;;  %v2492_v47 = vpop.f32.mrb[6].mxu1 }
 0x17c   : > { %v2469_v48 = vpop.f32.mrb[7].mxu0  ;;  %v2493_v49 = vpop.f32.mrb[7].mxu1 }
 0x17d   : > { %v2470_v50 = vadd.f32 %v2469_v48, %v2468_v45  ;;  %v3595_v51 = vadd.f32 %v2493_v49, %v2492_v47 }
 0x181   : > { %v2471_v52 = vpop.f32.mrb[8].mxu0  ;;  %v2495_v53 = vpop.f32.mrb[8].mxu1 }
 0x182   : > { %v2472_v54 = vpop.f32.mrb[9].mxu0  ;;  %v2496_v55 = vpop.f32.mrb[9].mxu1 }
 0x183   : > { %v2473_v56 = vadd.f32 %v2472_v54, %v2471_v52  ;;  %v2474_v57 = vpop.f32.mrb[10].mxu0  ;;  %v3597_v58 = vadd.f32 %v2496_v55, %v2495_v53  ;;  %v2498_v59 = vpop.f32.mrb[10].mxu1 }
 0x184   : > { %v2475_v60 = vpop.f32.mrb[11].mxu0  ;;  %v2499_v61 = vpop.f32.mrb[11].mxu1 }
 0x185   : > { %v2476_v62 = vadd.f32 %v2475_v60, %v2474_v57 }
 0x189   : > { %v2477_v63 = vpop.f32.mrb[12].mxu0 }
 0x18a   : > { %v2478_v0 = vpop.f32.mrb[13].mxu0 }
 0x18b   : > { %v2479_v1 = vadd.f32 %v2478_v0, %v2477_v63  ;;  %v2480_v2 = vpop.f32.mrb[14].mxu0 }
 0x18c   : > { %v2481_v3 = vpop.f32.mrb[15].mxu0 }
 0x18d   : > { %v2482_v4 = vadd.f32 %v2481_v3, %v2480_v2 }
 0x191   : > { %v2517_v5 = vpop.f32.mrb[12].mxu1  ;;  %v2575_v6 = vpop.f32.mrb[16].mxu0 }
 0x192   : > { %v2518_v7 = vpop.f32.mrb[13].mxu1  ;;  %v2576_v8 = vpop.f32.mrb[17].mxu0 }
 0x193   : > { %v2519_v9 = vadd.f32 %v2518_v7, %v2517_v5  ;;  %v2520_v10 = vpop.f32.mrb[14].mxu1  ;;  %v2577_v11 = vadd.f32 %v2576_v8, %v2575_v6  ;;  %v2578_v12 = vpop.f32.mrb[18].mxu0 }
 0x194   : > { %v2521_v13 = vpop.f32.mrb[15].mxu1  ;;  %v2579_v14 = vpop.f32.mrb[19].mxu0 }
 0x195   : > { %v1824_v15 = vadd.f32 %v2519_v9, %v2461_v35  ;;  %v2522_v16 = vadd.f32 %v2521_v13, %v2520_v10  ;;  %v2580_v17 = vadd.f32 %v2579_v14, %v2578_v12 }
 0x197   : > { %v1827_v18 = vadd.f32 %v2522_v16, %v2464_v23  ;;  %v3599_v19 = vadd.f32 %v2577_v11, %v1824_v15 }
 0x199   : > { %v3601_v20 = vadd.f32 %v2580_v17, %v1827_v18  ;;  %v2523_v21 = vpop.f32.mrb[16].mxu1  ;;  %v2581_v22 = vpop.f32.mrb[20].mxu0 }
 0x19a   : > { %v2524_v24 = vpop.f32.mrb[17].mxu1  ;;  %v2582_v25 = vpop.f32.mrb[21].mxu0 }
 0x19b   : > { %v2525_v26 = vadd.f32 %v2524_v24, %v2523_v21  ;;  %v2526_v27 = vpop.f32.mrb[18].mxu1  ;;  %v2583_v28 = vadd.f32 %v2582_v25, %v2581_v22  ;;  %v2584_v29 = vpop.f32.mrb[22].mxu0 }
 0x19c   : > { %v2527_v30 = vpop.f32.mrb[19].mxu1  ;;  %v2585_v31 = vpop.f32.mrb[23].mxu0 }
 0x19d   : > { %v1832_v32 = vadd.f32 %v2525_v26, %v2467_v44  ;;  %v2528_v34 = vadd.f32 %v2527_v30, %v2526_v27  ;;  %v2586_v35 = vadd.f32 %v2585_v31, %v2584_v29 }
 0x19f   : > { %v1835_v36 = vadd.f32 %v2528_v34, %v2470_v50  ;;  %v3603_v37 = vadd.f32 %v2583_v28, %v1832_v32 }
 0x1a1   : > { %v3605_v38 = vadd.f32 %v2586_v35, %v1835_v36  ;;  %v2529_v23 = vpop.f32.mrb[20].mxu1  ;;  %v2587_v40 = vpop.f32.mrb[24].mxu0 }
 0x1a2   : > { %v2530_v41 = vpop.f32.mrb[21].mxu1  ;;  %v2588_v42 = vpop.f32.mrb[25].mxu0 }
 0x1a3   : > { %v2531_v43 = vadd.f32 %v2530_v41, %v2529_v23  ;;  %v2532_v45 = vpop.f32.mrb[22].mxu1  ;;  %v2589_v47 = vadd.f32 %v2588_v42, %v2587_v40  ;;  %v2590_v48 = vpop.f32.mrb[26].mxu0 }
 0x1a4   : > { %v2533_v49 = vpop.f32.mrb[23].mxu1  ;;  %v2591_v52 = vpop.f32.mrb[27].mxu0 }
 0x1a5   : > { %v1840_v53 = vadd.f32 %v2531_v43, %v2473_v56  ;;  %v2534_v54 = vadd.f32 %v2533_v49, %v2532_v45  ;;  %v2592_v44 = vadd.f32 %v2591_v52, %v2590_v48 }
 0x1a7   : > { %v1843_v55 = vadd.f32 %v2534_v54, %v2476_v62  ;;  %v3607_v57 = vadd.f32 %v2589_v47, %v1840_v53 }
 0x1a9   : > { %v3609_v50 = vadd.f32 %v2592_v44, %v1843_v55  ;;  %v2535_v59 = vpop.f32.mrb[24].mxu1  ;;  %v2593_v60 = vpop.f32.mrb[28].mxu0 }
 0x1aa   : > { %v2536_v61 = vpop.f32.mrb[25].mxu1  ;;  %v2594_v63 = vpop.f32.mrb[29].mxu0 }
 0x1ab   : > { %v2537_v0 = vadd.f32 %v2536_v61, %v2535_v59  ;;  %v2538_v2 = vpop.f32.mrb[26].mxu1  ;;  %v2595_v3 = vadd.f32 %v2594_v63, %v2593_v60  ;;  %v2596_v5 = vpop.f32.mrb[30].mxu0 }
 0x1ac   : > { %v2539_v6 = vpop.f32.mrb[27].mxu1  ;;  %v2597_v7 = vpop.f32.mrb[31].mxu0 }
 0x1ad   : > { %v1848_v8 = vadd.f32 %v2537_v0, %v2479_v1  ;;  %v2540_v9 = vadd.f32 %v2539_v6, %v2538_v2  ;;  %v2598_v56 = vadd.f32 %v2597_v7, %v2596_v5 }
 0x1af   : > { %v1851_v10 = vadd.f32 %v2540_v9, %v2482_v4  ;;  %v3611_v11 = vadd.f32 %v2595_v3, %v1848_v8 }
 0x1b1   : > { %v3613_v62 = vadd.f32 %v2598_v56, %v1851_v10  ;;  %v2541_v12 = vpop.f32.mrb[28].mxu1  ;;  %v2599_v13 = vpop.f32.mrb[32].mxu0 }
 0x1b2   : > { %v2542_v14 = vpop.f32.mrb[29].mxu1  ;;  %v2600_v15 = vpop.f32.mrb[33].mxu0 }
 0x1b3   : > { %v2543_v16 = vadd.f32 %v2542_v14, %v2541_v12  ;;  %v2544_v17 = vpop.f32.mrb[30].mxu1  ;;  %v2601_v18 = vadd.f32 %v2600_v15, %v2599_v13  ;;  %v2602_v21 = vpop.f32.mrb[34].mxu0 }
 0x1b4   : > { %v2545_v22 = vpop.f32.mrb[31].mxu1  ;;  %v2603_v24 = vpop.f32.mrb[35].mxu0 }
 0x1b5   : > { %v1856_v25 = vadd.f32 %v2543_v16, %v3589_v33  ;;  %v2546_v1 = vadd.f32 %v2545_v22, %v2544_v17  ;;  %v2604_v26 = vadd.f32 %v2603_v24, %v2602_v21 }
 0x1b7   : > { %v1859_v4 = vadd.f32 %v2546_v1, %v3591_v39  ;;  %v3617_v27 = vadd.f32 %v2601_v18, %v1856_v25 }
 0x1b9   : > { %v3619_v28 = vadd.f32 %v2604_v26, %v1859_v4  ;;  %v2547_v29 = vpop.f32.mrb[32].mxu1  ;;  %v2605_v30 = vpop.f32.mrb[36].mxu0 }
 0x1ba   : > { %v2548_v31 = vpop.f32.mrb[33].mxu1  ;;  %v2606_v32 = vpop.f32.mrb[37].mxu0 }
 0x1bb   : > { %v2549_v34 = vadd.f32 %v2548_v31, %v2547_v29  ;;  %v2550_v35 = vpop.f32.mrb[34].mxu1  ;;  %v2607_v36 = vadd.f32 %v2606_v32, %v2605_v30  ;;  %v2608_v23 = vpop.f32.mrb[38].mxu0 }
 0x1bc   : > { %v2551_v40 = vpop.f32.mrb[35].mxu1  ;;  %v2609_v41 = vpop.f32.mrb[39].mxu0 }
 0x1bd   : > { %v1864_v33 = vadd.f32 %v2549_v34, %v3593_v46  ;;  %v2552_v42 = vadd.f32 %v2551_v40, %v2550_v35  ;;  %v2610_v43 = vadd.f32 %v2609_v41, %v2608_v23 }
 0x1bf   : > { %v1867_v39 = vadd.f32 %v2552_v42, %v3595_v51  ;;  %v3623_v45 = vadd.f32 %v2607_v36, %v1864_v33 }
 0x1c1   : > { %v3625_v47 = vadd.f32 %v2610_v43, %v1867_v39  ;;  %v2553_v48 = vpop.f32.mrb[36].mxu1  ;;  %v2611_v49 = vpop.f32.mrb[40].mxu0 }
 0x1c2   : > { %v2554_v52 = vpop.f32.mrb[37].mxu1  ;;  %v2612_v53 = vpop.f32.mrb[41].mxu0 }
 0x1c3   : > { %v2555_v54 = vadd.f32 %v2554_v52, %v2553_v48  ;;  %v2556_v44 = vpop.f32.mrb[38].mxu1  ;;  %v2613_v55 = vadd.f32 %v2612_v53, %v2611_v49  ;;  %v2614_v59 = vpop.f32.mrb[42].mxu0 }
 0x1c4   : > { %v2557_v60 = vpop.f32.mrb[39].mxu1  ;;  %v2615_v61 = vpop.f32.mrb[43].mxu0 }
 0x1c5   : > { %v1872_v46 = vadd.f32 %v2555_v54, %v3597_v58 }
 0x1c7   : > { %v3628_v63 = vadd.f32 %v2613_v55, %v1872_v46 }
 0x1c9   : > { %v2633_v51 = vpop.f32.mrb[40].mxu1  ;;  %v2087_v0 = vpop.f32.mrb[44].mxu0 }
 0x1ca   : > { %v2634_v2 = vpop.f32.mrb[41].mxu1  ;;  %v2708_v3 = vpop.f32.mrb[45].mxu0 }
 0x1cb   : > { %v2635_v5 = vadd.f32 %v2634_v2, %v2633_v51  ;;  %v2636_v6 = vpop.f32.mrb[42].mxu1  ;;  %v2090_v7 = vpop.f32.mrb[46].mxu0 }
 0x1cc   : > { %v2637_v8 = vpop.f32.mrb[43].mxu1  ;;  %v2709_v9 = vpop.f32.mrb[47].mxu0 }
 0x1cd   : > { %v2638_v56 = vadd.f32 %v2637_v8, %v2636_v6  ;;  %v2000_v10 = vadd.f32 %v2635_v5, %v3599_v19 }
 0x1cf   : > { %v2088_v12 = vadd.f32 %v2087_v0, %v2000_v10  ;;  %v2003_v13 = vadd.f32 %v2638_v56, %v3601_v20 }
 0x1d1   : > { %2141 = vst [vmem:[%s3634_s29] sm:$0xff] %v2088_v12  ;;  %v2091_v58 = vadd.f32 %v2090_v7, %v2003_v13  ;;  %v2639_v14 = vpop.f32.mrb[44].mxu1  ;;  %v2095_v15 = vpop.f32.mrb[48].mxu0 }
 0x1d2   : > { %v2640_v16 = vpop.f32.mrb[45].mxu1  ;;  %v2712_v17 = vpop.f32.mrb[49].mxu0 }
 0x1d3   : > { %2142 = vst [vmem:[%s3634_s29 + $0x8] sm:$0xff] %v2091_v58  ;;  %v2641_v18 = vadd.f32 %v2640_v16, %v2639_v14  ;;  %v2642_v21 = vpop.f32.mrb[46].mxu1  ;;  %v2098_v22 = vpop.f32.mrb[50].mxu0 }
 0x1d4   : > { %v2643_v19 = vpop.f32.mrb[47].mxu1  ;;  %v2713_v24 = vpop.f32.mrb[51].mxu0 }
 0x1d5   : > { %v2644_v25 = vadd.f32 %v2643_v19, %v2642_v21  ;;  %v2008_v20 = vadd.f32 %v2641_v18, %v3603_v37 }
 0x1d7   : > { %v2096_v1 = vadd.f32 %v2095_v15, %v2008_v20  ;;  %v2011_v26 = vadd.f32 %v2644_v25, %v3605_v38 }
 0x1d9   : > { %2143 = vst [vmem:[%s3634_s29 + $0x10] sm:$0xff] %v2096_v1  ;;  %v2099_v4 = vadd.f32 %v2098_v22, %v2011_v26  ;;  %v2645_v29 = vpop.f32.mrb[48].mxu1  ;;  %v2103_v30 = vpop.f32.mrb[52].mxu0 }
 0x1da   : > { %v2646_v31 = vpop.f32.mrb[49].mxu1  ;;  %v2716_v32 = vpop.f32.mrb[53].mxu0 }
 0x1db   : > { %2144 = vst [vmem:[%s3634_s29 + $0x18] sm:$0xff] %v2099_v4  ;;  %v2647_v34 = vadd.f32 %v2646_v31, %v2645_v29  ;;  %v2648_v35 = vpop.f32.mrb[50].mxu1  ;;  %v2106_v36 = vpop.f32.mrb[54].mxu0 }
 0x1dc   : > { %v2649_v23 = vpop.f32.mrb[51].mxu1  ;;  %v2717_v40 = vpop.f32.mrb[55].mxu0 }
 0x1dd   : > { %v2650_v41 = vadd.f32 %v2649_v23, %v2648_v35  ;;  %v2016_v37 = vadd.f32 %v2647_v34, %v3607_v57 }
 0x1df   : > { %v2104_v33 = vadd.f32 %v2103_v30, %v2016_v37  ;;  %v2019_v38 = vadd.f32 %v2650_v41, %v3609_v50 }
 0x1e1   : > { %2145 = vst [vmem:[%s3634_s29 + $0x20] sm:$0xff] %v2104_v33  ;;  %v2107_v42 = vadd.f32 %v2106_v36, %v2019_v38  ;;  %v2651_v43 = vpop.f32.mrb[52].mxu1  ;;  %v2111_v39 = vpop.f32.mrb[56].mxu0 }
 0x1e2   : > { %v2652_v48 = vpop.f32.mrb[53].mxu1  ;;  %v2720_v49 = vpop.f32.mrb[57].mxu0  ;;  %v2220_v36 = vld [vmem:[%s3634_s29 + $0x18] sm:$0xff] (%p3009_p5) }
 0x1e3   : > { %2146 = vst [vmem:[%s3634_s29 + $0x28] sm:$0xff] %v2107_v42  ;;  %v2653_v52 = vadd.f32 %v2652_v48, %v2651_v43  ;;  %v2654_v53 = vpop.f32.mrb[54].mxu1  ;;  %v2114_v54 = vpop.f32.mrb[58].mxu0  ;;  %2221 = vst [vmem:[%s2162_s17 + $0x30] sm:$0xff] (%p3009_p5), %v2220_v36 }
 0x1e4   : > { %v2655_v44 = vpop.f32.mrb[55].mxu1  ;;  %v2721_v55 = vpop.f32.mrb[59].mxu0 }
 0x1e5   : > { %v2656_v59 = vadd.f32 %v2655_v44, %v2654_v53  ;;  %v2024_v57 = vadd.f32 %v2653_v52, %v3611_v11 }
 0x1e7   : > { %v2112_v60 = vadd.f32 %v2111_v39, %v2024_v57  ;;  %v2027_v50 = vadd.f32 %v2656_v59, %v3613_v62 }
 0x1e8   : > { %v2222_v23 = vld [vmem:[%s3634_s29 + $0x20] sm:$0xff] (%p3009_p5) }
 0x1e9   : > { %2147 = vst [vmem:[%s3634_s29 + $0x30] sm:$0xff] %v2112_v60  ;;  %v2115_v61 = vadd.f32 %v2114_v54, %v2027_v50  ;;  %v2657_v46 = vpop.f32.mrb[56].mxu1  ;;  %v2119_v51 = vpop.f32.mrb[60].mxu0  ;;  %2223 = vst [vmem:[%s2162_s17 + $0x40] sm:$0xff] (%p3009_p5), %v2222_v23 }
 0x1ea   : > { %v2658_v0 = vpop.f32.mrb[57].mxu1  ;;  %v2724_v2 = vpop.f32.mrb[61].mxu0  ;;  %v2224_v40 = vld [vmem:[%s3634_s29 + $0x28] sm:$0xff] (%p3009_p5) }
 0x1eb   : > { %2148 = vst [vmem:[%s3634_s29 + $0x38] sm:$0xff] %v2115_v61  ;;  %v2659_v3 = vadd.f32 %v2658_v0, %v2657_v46  ;;  %v2660_v5 = vpop.f32.mrb[58].mxu1  ;;  %v2122_v6 = vpop.f32.mrb[62].mxu0  ;;  %2225 = vst [vmem:[%s2162_s17 + $0x50] sm:$0xff] (%p3009_p5), %v2224_v40 }
 0x1ec   : > { %v2661_v7 = vpop.f32.mrb[59].mxu1  ;;  %v2725_v8 = vpop.f32.mrb[63].mxu0 }
 0x1ed   : > { %v2662_v9 = vadd.f32 %v2661_v7, %v2660_v5  ;;  %v2032_v11 = vadd.f32 %v2659_v3, %v3617_v27 }
 0x1ef   : > { %v2120_v56 = vadd.f32 %v2119_v51, %v2032_v11  ;;  %v2035_v62 = vadd.f32 %v2662_v9, %v3619_v28 }
 0x1f0   : > { %v2226_v41 = vld [vmem:[%s3634_s29 + $0x30] sm:$0xff] (%p3009_p5) }
 0x1f1   : > { %2149 = vst [vmem:[%s3634_s29 + $0x40] sm:$0xff] %v2120_v56  ;;  %v2123_v10 = vadd.f32 %v2122_v6, %v2035_v62  ;;  %v2663_v12 = vpop.f32.mrb[60].mxu1  ;;  %v2127_v13 = vpop.f32.mrb[64].mxu0  ;;  %2227 = vst [vmem:[%s2162_s17 + $0x60] sm:$0xff] (%p3009_p5), %v2226_v41 }
 0x1f2   : > { %v2664_v58 = vpop.f32.mrb[61].mxu1  ;;  %v2728_v14 = vpop.f32.mrb[65].mxu0  ;;  %v2228_v37 = vld [vmem:[%s3634_s29 + $0x38] sm:$0xff] (%p3009_p5) }
 0x1f3   : > { %2150 = vst [vmem:[%s3634_s29 + $0x48] sm:$0xff] %v2123_v10  ;;  %v2665_v15 = vadd.f32 %v2664_v58, %v2663_v12  ;;  %v2666_v16 = vpop.f32.mrb[62].mxu1  ;;  %v2130_v17 = vpop.f32.mrb[66].mxu0  ;;  %2229 = vst [vmem:[%s2162_s17 + $0x70] sm:$0xff] (%p3009_p5), %v2228_v37 }
 0x1f4   : > { %v2667_v18 = vpop.f32.mrb[63].mxu1  ;;  %v2729_v21 = vpop.f32.mrb[67].mxu0 }
 0x1f5   : > { %v2668_v22 = vadd.f32 %v2667_v18, %v2666_v16  ;;  %v2040_v27 = vadd.f32 %v2665_v15, %v3623_v45  ;;  %v2214_v45 = vld [vmem:[%s3634_s29] sm:$0xff] (%p3009_p5) }
 0x1f6   : > { %2215 = vst [vmem:[%s2162_s17] sm:$0xff] (%p3009_p5), %v2214_v45 }
 0x1f7   : > { %v2128_v19 = vadd.f32 %v2127_v13, %v2040_v27  ;;  %v2043_v28 = vadd.f32 %v2668_v22, %v3625_v47  ;;  %v2216_v47 = vld [vmem:[%s3634_s29 + $0x8] sm:$0xff] (%p3009_p5) }
 0x1f8   : > { %2217 = vst [vmem:[%s2162_s17 + $0x10] sm:$0xff] (%p3009_p5), %v2216_v47  ;;  %v2230_v33 = vld [vmem:[%s3634_s29 + $0x40] sm:$0xff] (%p3009_p5) }
 0x1f9   : > { %2151 = vst [vmem:[%s3634_s29 + $0x50] sm:$0xff] %v2128_v19  ;;  %v2131_v24 = vadd.f32 %v2130_v17, %v2043_v28  ;;  %v2669_v25 = vpop.f32.mrb[64].mxu1  ;;  %v2135_v20 = vpop.f32.mrb[68].mxu0  ;;  %2231 = vst [vmem:[%s2162_s17 + $0x80] sm:$0xff] (%p3009_p5), %v2230_v33 }
 0x1fa   : > { %v2670_v1 = vpop.f32.mrb[65].mxu1  ;;  %v2732_v26 = vpop.f32.mrb[69].mxu0  ;;  %v2232_v38 = vld [vmem:[%s3634_s29 + $0x48] sm:$0xff] (%p3009_p5) }
 0x1fb   : > { %2152 = vst [vmem:[%s3634_s29 + $0x58] sm:$0xff] %v2131_v24  ;;  %v2671_v4 = vadd.f32 %v2670_v1, %v2669_v25  ;;  %v2672_v29 = vpop.f32.mrb[66].mxu1  ;;  %v2138_v30 = vpop.f32.mrb[70].mxu0  ;;  %2160 = sbr.rel (!%p3009_p5) target bundleno = 522 (0x20a), region = 73  ;;  %2233 = vst [vmem:[%s2162_s17 + $0x90] sm:$0xff] (%p3009_p5), %v2232_v38 }
 0x1fc   : > { %v2673_v31 = vpop.f32.mrb[67].mxu1  ;;  %v2733_v32 = vpop.f32.mrb[71].mxu0 }
 0x1fd   : > { %v2048_v34 = vadd.f32 %v2671_v4, %v3628_v63  ;;  %v2218_v63 = vld [vmem:[%s3634_s29 + $0x10] sm:$0xff] (%p3009_p5) }
 0x1fe   : > { %2219 = vst [vmem:[%s2162_s17 + $0x20] sm:$0xff] (%p3009_p5), %v2218_v63 }
 0x1ff   : > { %v2136_v35 = vadd.f32 %v2135_v20, %v2048_v34 }
 0x200   : > { %v2234_v42 = vld [vmem:[%s3634_s29 + $0x50] sm:$0xff] (%p3009_p5) }
 0x201   : > { %2153 = vst [vmem:[%s3634_s29 + $0x60] sm:$0x3] %v2136_v35  ;;  %2235 = vst [vmem:[%s2162_s17 + $0xa0] sm:$0xff] (%p3009_p5), %v2234_v42 }
 0x202   : > { %v2236_v43 = vld [vmem:[%s3634_s29 + $0x58] sm:$0xff] }
 0x203   : > { %2237 = vst [vmem:[%s2162_s17 + $0xb0] sm:$0xff] %v2236_v43 }
 0x208   : > { %v2238_v39 = vld [vmem:[%s3634_s29 + $0x60] sm:$0xff] }
 0x209   : > { %2239 = vst [vmem:[%s2162_s17 + $0xc0] sm:$0xff] %v2238_v39 }
 0x20a PF: > { %p9_p10 = scmp.ge.s32.totalorder %s2996_s13, 4   ;;  %s3694_s9 = smov %s2956_s10 }
 0x20b   : > { %s3695_s10 = smov %s3007_s16  ;;  %s3696_s11 = smov %s2996_s13 }
 0x20c   :  { %11 = sbr.rel (!%p9_p10) target bundleno = 2 (0x2), region = 142 }

// kernel: generator_forward.11
= control target key start
LH: loop header
LB: loop body
LE: loop exit
PB: predicated region body
PF: predicated region fallthrough
CT: control target
= control target key end

     0   :  { %v3096_v0 = vmov 0   ;;  %v3097_v40 = vmov 0.0   ;;  %vm3098_vm0 = vmmov 0   ;;  %vm1064_vm1 = vcmask 523264   ;;  %s4056_s1 = inlined_call_operand.vmem [shape: bf16[576,4], index: 1, kind: input, shape index: {}]   ;;  %s4057_s0 = inlined_call_operand.vmem [shape: bf16[392,576], index: 0, kind: input, shape index: {}]   ;;  %s4058_s2 = inlined_call_operand.vmem [shape: f32[392,4], index: 2, kind: output, shape index: {}]  }
   0x1   :  { %1140 = vmatprep.subr.bf16.mxu1 %v3096_v0  ;;  %1372 = vmatprep.subr.bf16.mxu0 %v3096_v0  ;;  %v2691_v1 = vld [vmem:[%s4056_s1] sm:$0xff]   ;;  %v2693_v3 = vld [vmem:[%s4056_s1 + $0x8] sm:$0xff]   ;;  %v2695_v5 = vld [vmem:[%s4056_s1 + $0x10] sm:$0xff]   ;;  %vm2130_vm2 = vcmask 31744  }
   0x2   :  { %v3122_v2 = vld [vmem:[%s4056_s1 + $0x80] sm:$0xff]   ;;  %1141 = vmatpush1.bf16.msra.mxu1 %v2691_v1  ;;  %v3132_v4 = vld [vmem:[%s4056_s1 + $0x88] sm:$0xff]   ;;  %v3143_v6 = vld [vmem:[%s4056_s1 + $0x90] sm:$0xff]  }
   0x3   :  { %1373 = vmatpush1.bf16.msra.mxu0 %v3122_v2  ;;  %1142 = vmatprep.subr.bf16.mxu1 %v3096_v0  ;;  %v2697_v7 = vld [vmem:[%s4056_s1 + $0x18] sm:$0xff]   ;;  %v2699_v9 = vld [vmem:[%s4056_s1 + $0x20] sm:$0xff]   ;;  %v2701_v11 = vld [vmem:[%s4056_s1 + $0x28] sm:$0xff]  }
   0x4   :  { %1374 = vmatprep.subr.bf16.mxu0 %v3096_v0  ;;  %v3154_v8 = vld [vmem:[%s4056_s1 + $0x98] sm:$0xff]   ;;  %v3165_v10 = vld [vmem:[%s4056_s1 + $0xa0] sm:$0xff]   ;;  %v3176_v12 = vld [vmem:[%s4056_s1 + $0xa8] sm:$0xff]  }
   0x5   :  { %v2703_v13 = vld [vmem:[%s4056_s1 + $0x30] sm:$0xff]   ;;  %v2705_v15 = vld [vmem:[%s4056_s1 + $0x38] sm:$0xff]   ;;  %v2707_v17 = vld [vmem:[%s4056_s1 + $0x40] sm:$0xff]  }
   0x6   :  { %1143 = vmatpush1.bf16.msra.mxu1 %v2693_v3  ;;  %v3187_v14 = vld [vmem:[%s4056_s1 + $0xb0] sm:$0xff]   ;;  %v3198_v16 = vld [vmem:[%s4056_s1 + $0xb8] sm:$0xff]   ;;  %v3209_v18 = vld [vmem:[%s4056_s1 + $0xc0] sm:$0xff]  }
   0x7   :  { %1375 = vmatpush1.bf16.msra.mxu0 %v3132_v4  ;;  %1144 = vmatprep.subr.bf16.mxu1 %v3096_v0  ;;  %v2725_v19 = vld [vmem:[%s4057_s0 + $0x4] ss:$20 sps:$4 sm:$0xff]   ;;  %v2709_v20 = vld [vmem:[%s4056_s1 + $0x48] sm:$0xff]   ;;  %v2711_v23 = vld [vmem:[%s4056_s1 + $0x50] sm:$0xff]  }
   0x8   :  { %1376 = vmatprep.subr.bf16.mxu0 %v3096_v0  ;;  %v2728_v21 = vld [vmem:[%s4057_s0 + $0xc] ss:$20 sps:$4 sm:$0xff]   ;;  %1172 = vmatprep.mubr.bf16.mxu1 %v2725_v19  ;;  %v3237_v24 = vld [vmem:[%s4056_s1 + $0xd0] sm:$0xff]   ;;  %v2713_v25 = vld [vmem:[%s4056_s1 + $0x58] sm:$0xff]  }
   0x9   :  { %v3226_v22 = vld [vmem:[%s4056_s1 + $0xc8] sm:$0xff]   ;;  %1404 = vmatprep.mubr.bf16.mxu0 %v2728_v21  ;;  %v3248_v26 = vld [vmem:[%s4056_s1 + $0xd8] sm:$0xff]   ;;  %v2715_v27 = vld [vmem:[%s4056_s1 + $0x60] sm:$0xff]  }
   0xa   :  { %1145 = vmatpush1.bf16.msra.mxu1 %v2695_v5  ;;  %v3259_v28 = vld [vmem:[%s4056_s1 + $0xe0] sm:$0xff]   ;;  %v2717_v29 = vld [vmem:[%s4056_s1 + $0x68] sm:$0xff]   ;;  %v2719_v31 = vld [vmem:[%s4056_s1 + $0x70] sm:$0xff]  }
   0xb   :  { %1377 = vmatpush1.bf16.msra.mxu0 %v3143_v6  ;;  %1146 = vmatprep.subr.bf16.mxu1 %v3096_v0  ;;  %v3270_v30 = vld [vmem:[%s4056_s1 + $0xe8] sm:$0xff]   ;;  %v3281_v32 = vld [vmem:[%s4056_s1 + $0xf0] sm:$0xff]   ;;  %v2721_v33 = vld [vmem:[%s4056_s1 + $0x78] sm:$0xff]  }
   0xc   :  { %1378 = vmatprep.subr.bf16.mxu0 %v3096_v0  ;;  %v3292_v34 = vld [vmem:[%s4056_s1 + $0xf8] sm:$0xff]   ;;  %v2723_v35 = vld [vmem:[%s4057_s0] ss:$20 sps:$4 sm:$0xff]   ;;  %v2748_v41 = vld [vmem:[%s4056_s1 + $0x108] sm:$0xff]  }
   0xd   :  { %v2726_v36 = vld [vmem:[%s4057_s0 + $0x8] ss:$20 sps:$4 sm:$0xff]   ;;  %v2729_v37 = vld [vmem:[%s4056_s1 + $0x100] sm:$0xff]   ;;  %v2767_v46 = vld [vmem:[%s4056_s1 + $0x110] sm:$0xff]  }
   0xe   :  { %1147 = vmatpush1.bf16.msra.mxu1 %v2697_v7  ;;  %v2730_v38 = vld [vmem:[%s4057_s0 + $0x2c] ss:$20 sps:$4 sm:$0xff]   ;;  %v2732_v39 = vld [vmem:[%s4057_s0 + $0x34] ss:$20 sps:$4 sm:$0xff]   ;;  %v2735_v43 = vld [vmem:[%s4057_s0 + $0x30] ss:$20 sps:$4 sm:$0xff]  }
   0xf   :  { %1379 = vmatpush1.bf16.msra.mxu0 %v3154_v8  ;;  %1148 = vmatprep.subr.bf16.mxu1 %v3096_v0  ;;  %v2734_v42 = vld [vmem:[%s4057_s0 + $0x28] ss:$20 sps:$4 sm:$0xff]   ;;  %v2740_v48 = vld [vmem:[%s4057_s0 + $0x50] ss:$20 sps:$4 sm:$0xff]   ;;  %v2741_v49 = vld [vmem:[%s4057_s0 + $0x58] ss:$20 sps:$4 sm:$0xff]  }
  0x10   :  { %1380 = vmatprep.subr.bf16.mxu0 %v3096_v0  ;;  %v2736_v44 = vld [vmem:[%s4057_s0 + $0x54] ss:$20 sps:$4 sm:$0xff]   ;;  %v2738_v45 = vld [vmem:[%s4057_s0 + $0x5c] ss:$20 sps:$4 sm:$0xff]   ;;  %v2744_v51 = vld [vmem:[%s4057_s0 + $0x84] ss:$20 sps:$4 sm:$0xff]  }
  0x11   :  { %v2790_v47 = vld [vmem:[%s4056_s1 + $0x118] sm:$0xff]   ;;  %v2747_v53 = vld [vmem:[%s4057_s0 + $0x80] ss:$20 sps:$4 sm:$0xff]   ;;  %v2760_v61 = vld [vmem:[%s4057_s0 + $0xd0] ss:$20 sps:$4 sm:$0xff]  }
  0x12   :  { %1149 = vmatpush1.bf16.msra.mxu1 %v2699_v9  ;;  %v2742_v50 = vld [vmem:[%s4057_s0 + $0x7c] ss:$20 sps:$4 sm:$0xff]   ;;  %v2746_v52 = vld [vmem:[%s4057_s0 + $0x78] ss:$20 sps:$4 sm:$0xff]   ;;  %v2753_v56 = vld [vmem:[%s4057_s0 + $0xa0] ss:$20 sps:$4 sm:$0xff]  }
  0x13   :  { %1381 = vmatpush1.bf16.msra.mxu0 %v3165_v10  ;;  %1150 = vmatprep.subr.bf16.mxu1 %v3096_v0  ;;  %v2749_v54 = vld [vmem:[%s4057_s0 + $0xa4] ss:$20 sps:$4 sm:$0xff]   ;;  %v2751_v55 = vld [vmem:[%s4057_s0 + $0xac] ss:$20 sps:$4 sm:$0xff]   ;;  %v2754_v57 = vld [vmem:[%s4057_s0 + $0xa8] ss:$20 sps:$4 sm:$0xff]  }
  0x14   :  { %1382 = vmatprep.subr.bf16.mxu0 %v3096_v0  ;;  %v2755_v58 = vld [vmem:[%s4057_s0 + $0xcc] ss:$20 sps:$4 sm:$0xff]   ;;  %v2757_v59 = vld [vmem:[%s4057_s0 + $0xd4] ss:$20 sps:$4 sm:$0xff]   ;;  %v2763_v63 = vld [vmem:[%s4057_s0 + $0xfc] ss:$20 sps:$4 sm:$0xff]  }
  0x15   :  { %v2759_v60 = vld [vmem:[%s4057_s0 + $0xc8] ss:$20 sps:$4 sm:$0xff]   ;;  %v2765_v1 = vld [vmem:[%s4057_s0 + $0xf0] ss:$20 sps:$4 sm:$0xff]   ;;  %v2772_v5 = vld [vmem:[%s4057_s0 + $0x118] ss:$20 sps:$4 sm:$0xff]  }
  0x16   :  { %1151 = vmatpush1.bf16.msra.mxu1 %v2701_v11  ;;  %v2761_v62 = vld [vmem:[%s4057_s0 + $0xf4] ss:$20 sps:$4 sm:$0xff]   ;;  %v2768_v3 = vld [vmem:[%s4057_s0 + $0x11c] ss:$20 sps:$4 sm:$0xff]   ;;  %v2774_v7 = vld [vmem:[%s4057_s0 + $0x144] ss:$20 sps:$4 sm:$0xff]  }
  0x17   :  { %1383 = vmatpush1.bf16.msra.mxu0 %v3176_v12  ;;  %1152 = vmatprep.subr.bf16.mxu1 %v3096_v0  ;;  %v2778_v9 = vld [vmem:[%s4057_s0 + $0x140] ss:$20 sps:$4 sm:$0xff]   ;;  %v2795_v19 = vld [vmem:[%s4057_s0 + $0x1c4] ss:$20 sps:$4 sm:$0xff]  }
  0x18   :  { %1384 = vmatprep.subr.bf16.mxu0 %v3096_v0  ;;  %v2780_v11 = vld [vmem:[%s4057_s0 + $0x16c] ss:$20 sps:$4 sm:$0xff]  }
  0x19   :  { %v2798_v21 = vld [vmem:[%s4057_s0 + $0x1c0] ss:$20 sps:$4 sm:$0xff]  }
  0x1a   :  { %1153 = vmatpush1.bf16.msra.mxu1 %v2703_v13  ;;  %v2785_v13 = vld [vmem:[%s4057_s0 + $0x170] ss:$20 sps:$4 sm:$0xff]  }
  0x1b   :  { %1385 = vmatpush1.bf16.msra.mxu0 %v3187_v14  ;;  %1154 = vmatprep.subr.bf16.mxu1 %v3096_v0 }
  0x1c   :  { %1386 = vmatprep.subr.bf16.mxu0 %v3096_v0 }
  0x1e   :  { %1155 = vmatpush1.bf16.msra.mxu1 %v2705_v15  ;;  %v2788_v15 = vld [vmem:[%s4057_s0 + $0x19c] ss:$20 sps:$4 sm:$0xff]  }
  0x1f   :  { %1387 = vmatpush1.bf16.msra.mxu0 %v3198_v16  ;;  %1156 = vmatprep.subr.bf16.mxu1 %v3096_v0 }
  0x20   :  { %1388 = vmatprep.subr.bf16.mxu0 %v3096_v0 }
  0x22   :  { %1157 = vmatpush1.bf16.msra.mxu1 %v2707_v17  ;;  %v2792_v17 = vld [vmem:[%s4057_s0 + $0x198] ss:$20 sps:$4 sm:$0xff]  }
  0x23   :  { %1389 = vmatpush1.bf16.msra.mxu0 %v3209_v18  ;;  %1158 = vmatprep.subr.bf16.mxu1 %v3096_v0 }
  0x24   :  { %1390 = vmatprep.subr.bf16.mxu0 %v3096_v0 }
  0x26   :  { %1159 = vmatpush1.bf16.msra.mxu1 %v2709_v20  ;;  %v2797_v20 = vld [vmem:[%s4057_s0 + $0x1b8] ss:$20 sps:$4 sm:$0xff]  }
  0x27   :  { %1391 = vmatpush1.bf16.msra.mxu0 %v3226_v22  ;;  %1160 = vmatprep.subr.bf16.mxu1 %v3096_v0 }
  0x28   :  { %1392 = vmatprep.subr.bf16.mxu0 %v3096_v0 }
  0x2a   :  { %1161 = vmatpush1.bf16.msra.mxu1 %v2711_v23  ;;  %v2801_v23 = vld [vmem:[%s4057_s0 + $0x1ec] ss:$20 sps:$4 sm:$0xff]  }
  0x2b   :  { %1393 = vmatpush1.bf16.msra.mxu0 %v3237_v24  ;;  %1162 = vmatprep.subr.bf16.mxu1 %v3096_v0 }
  0x2c   :  { %1394 = vmatprep.subr.bf16.mxu0 %v3096_v0 }
  0x2e   :  { %1163 = vmatpush1.bf16.msra.mxu1 %v2713_v25  ;;  %v2804_v25 = vld [vmem:[%s4057_s0 + $0x1e8] ss:$20 sps:$4 sm:$0xff]  }
  0x2f   :  { %1395 = vmatpush1.bf16.msra.mxu0 %v3248_v26  ;;  %1164 = vmatprep.subr.bf16.mxu1 %v3096_v0 }
  0x30   :  { %1396 = vmatprep.subr.bf16.mxu0 %v3096_v0 }
  0x32   :  { %1165 = vmatpush1.bf16.msra.mxu1 %v2715_v27  ;;  %v2807_v27 = vld [vmem:[%s4057_s0 + $0x208] ss:$20 sps:$4 sm:$0xff]  }
  0x33   :  { %1397 = vmatpush1.bf16.msra.mxu0 %v3259_v28  ;;  %1166 = vmatprep.subr.bf16.mxu1 %v3096_v0 }
  0x34   :  { %1398 = vmatprep.subr.bf16.mxu0 %v3096_v0 }
  0x36   :  { %1167 = vmatpush1.bf16.msra.mxu1 %v2717_v29  ;;  %v2809_v29 = vld [vmem:[%s4057_s0 + $0x234] ss:$20 sps:$4 sm:$0xff]  }
  0x37   :  { %1399 = vmatpush1.bf16.msra.mxu0 %v3270_v30  ;;  %1168 = vmatprep.subr.bf16.mxu1 %v3096_v0 }
  0x38   :  { %1400 = vmatprep.subr.bf16.mxu0 %v3096_v0 }
  0x3a   :  { %1169 = vmatpush1.bf16.msra.mxu1 %v2719_v31  ;;  %v2812_v31 = vld [vmem:[%s4057_s0 + $0x38] ss:$20 sps:$4 sm:$0xff]  }
  0x3b   :  { %1401 = vmatpush1.bf16.msra.mxu0 %v3281_v32  ;;  %1170 = vmatprep.subr.bf16.mxu1 %v3096_v0 }
  0x3c   :  { %1402 = vmatprep.subr.bf16.mxu0 %v3096_v0 }
  0x3e   :  { %1171 = vmatpush1.bf16.msra.mxu1 %v2721_v33  ;;  %v2815_v33 = vld [vmem:[%s4057_s0 + $0x258] ss:$20 sps:$4 sm:$0xff]  }
  0x3f   :  { %1403 = vmatpush1.bf16.msra.mxu0 %v3292_v34  ;;  %2507 = vmatprep.subr.bf16.mxu1 %v3096_v0 }
  0x40   :  { %2399 = vmatprep.subr.bf16.mxu0 %v3097_v40 }
  0x41   :  { %1173 = vmatmul.mubr.bf16.vlgmr.msra.gmra.mrb[0].mxu1 %v2723_v35  ;;  %v2817_v35 = vld [vmem:[%s4057_s0 + $0x284] ss:$20 sps:$4 sm:$0xff]  }
  0x42   :  { %1405 = vmatmul.mubr.bf16.vlgmr.msra.gmra.mrb[0].mxu0 %v2726_v36  ;;  %1180 = vmatprep.mubr.bf16.mxu1 %v2730_v38  ;;  %v2819_v36 = vld [vmem:[%s4057_s0 + $0x280] ss:$20 sps:$4 sm:$0xff]  }
  0x43   :  { %2400 = vmatpush3.bf16.msra.mxu0 %v2729_v37  ;;  %1412 = vmatprep.mubr.bf16.mxu0 %v2732_v39  ;;  %v2820_v37 = vld [vmem:[%s4057_s0 + $0x88] ss:$20 sps:$4 sm:$0xff]   ;;  %v2821_v38 = vld [vmem:[%s4057_s0 + $0x2ac] ss:$20 sps:$4 sm:$0xff]  }
  0x44   :  { %2523 = vmatpush1.bf16.msra.mxu1 %v3122_v2  ;;  %2401 = vmatprep.subr.bf16.mxu0 %v3097_v40  ;;  %v2766_v2 = vld [vmem:[%s4057_s0 + $0xf8] ss:$20 sps:$4 sm:$0xff]   ;;  %v2823_v39 = vld [vmem:[%s4057_s0 + $0x2a8] ss:$20 sps:$4 sm:$0xff]  }
  0x45   :  { %2508 = vmatprep.subr.bf16.mxu1 %v3096_v0 }
  0x47   :  { %2402 = vmatpush3.bf16.msra.mxu0 %v2748_v41  ;;  %v2824_v41 = vld [vmem:[%s4057_s0 + $0xb0] ss:$20 sps:$4 sm:$0xff]  }
  0x48   :  { %2524 = vmatpush1.bf16.msra.mxu1 %v3132_v4  ;;  %2403 = vmatprep.subr.bf16.mxu0 %v3097_v40  ;;  %v2770_v4 = vld [vmem:[%s4057_s0 + $0x124] ss:$20 sps:$4 sm:$0xff]  }
  0x49   :  { %1181 = vmatmul.mubr.bf16.gmra.mrb[4].mxu1 %v2734_v42  ;;  %2509 = vmatprep.subr.bf16.mxu1 %v3096_v0  ;;  %v2825_v42 = vld [vmem:[%s4057_s0 + $0x2d4] ss:$20 sps:$4 sm:$0xff]  }
  0x4a   :  { %1413 = vmatmul.mubr.bf16.gmra.mrb[4].mxu0 %v2735_v43  ;;  %1188 = vmatprep.mubr.bf16.mxu1 %v2736_v44  ;;  %v2827_v43 = vld [vmem:[%s4057_s0 + $0x2d0] ss:$20 sps:$4 sm:$0xff]   ;;  %v2828_v44 = vld [vmem:[%s4057_s0 + $0xd8] ss:$20 sps:$4 sm:$0xff]  }
  0x4b   :  { %1420 = vmatprep.mubr.bf16.mxu0 %v2738_v45  ;;  %2404 = vmatpush3.bf16.msra.mxu0 %v2767_v46  ;;  %v2829_v45 = vld [vmem:[%s4057_s0 + $0x2fc] ss:$20 sps:$4 sm:$0xff]   ;;  %v2831_v46 = vld [vmem:[%s4057_s0 + $0x2f8] ss:$20 sps:$4 sm:$0xff]  }
  0x4c   :  { %2525 = vmatpush1.bf16.msra.mxu1 %v3143_v6  ;;  %2405 = vmatprep.subr.bf16.mxu0 %v3097_v40  ;;  %v2773_v6 = vld [vmem:[%s4057_s0 + $0x120] ss:$20 sps:$4 sm:$0xff]  }
  0x4d   :  { %2510 = vmatprep.subr.bf16.mxu1 %v3096_v0 }
  0x4f   :  { %2406 = vmatpush3.bf16.msra.mxu0 %v2790_v47  ;;  %v2832_v47 = vld [vmem:[%s4057_s0 + $0x100] ss:$20 sps:$4 sm:$0xff]  }
  0x50   :  { %2526 = vmatpush1.bf16.msra.mxu1 %v3154_v8  ;;  %v2776_v8 = vld [vmem:[%s4057_s0 + $0x14c] ss:$20 sps:$4 sm:$0xff]  }
  0x51   :  { %1189 = vmatmul.mubr.bf16.gmra.mrb[8].mxu1 %v2740_v48  ;;  %2511 = vmatprep.subr.bf16.mxu1 %v3096_v0  ;;  %v2833_v48 = vld [vmem:[%s4057_s0 + $0x324] ss:$20 sps:$4 sm:$0xff]  }
  0x52   :  { %1421 = vmatmul.mubr.bf16.gmra.mrb[8].mxu0 %v2741_v49  ;;  %1196 = vmatprep.mubr.bf16.mxu1 %v2742_v50  ;;  %v2835_v49 = vld [vmem:[%s4057_s0 + $0x320] ss:$20 sps:$4 sm:$0xff]   ;;  %v2836_v50 = vld [vmem:[%s4057_s0 + $0x128] ss:$20 sps:$4 sm:$0xff]  }
  0x53   :  { %1428 = vmatprep.mubr.bf16.mxu0 %v2744_v51  ;;  %v2837_v51 = vld [vmem:[%s4057_s0 + $0x34c] ss:$20 sps:$4 sm:$0xff]  }
  0x54   :  { %2527 = vmatpush1.bf16.msra.mxu1 %v3165_v10  ;;  %v2779_v10 = vld [vmem:[%s4057_s0 + $0x148] ss:$20 sps:$4 sm:$0xff]  }
  0x55   :  { %2512 = vmatprep.subr.bf16.mxu1 %v3096_v0 }
  0x58   :  { %2528 = vmatpush1.bf16.msra.mxu1 %v3176_v12  ;;  %v2782_v12 = vld [vmem:[%s4057_s0 + $0x174] ss:$20 sps:$4 sm:$0xff]  }
  0x59   :  { %1197 = vmatmul.mubr.bf16.gmra.mrb[12].mxu1 %v2746_v52  ;;  %2513 = vmatprep.subr.bf16.mxu1 %v3096_v0  ;;  %v2839_v52 = vld [vmem:[%s4057_s0 + $0x348] ss:$20 sps:$4 sm:$0xff]  }
  0x5a   :  { %1429 = vmatmul.mubr.bf16.gmra.mrb[12].mxu0 %v2747_v53  ;;  %1204 = vmatprep.mubr.bf16.mxu1 %v2749_v54  ;;  %v2840_v53 = vld [vmem:[%s4057_s0 + $0x150] ss:$20 sps:$4 sm:$0xff]   ;;  %v2841_v54 = vld [vmem:[%s4057_s0 + $0x374] ss:$20 sps:$4 sm:$0xff]  }
  0x5b   :  { %1436 = vmatprep.mubr.bf16.mxu0 %v2751_v55  ;;  %v2843_v55 = vld [vmem:[%s4057_s0 + $0x370] ss:$20 sps:$4 sm:$0xff]  }
  0x5c   :  { %2529 = vmatpush1.bf16.msra.mxu1 %v3187_v14  ;;  %v2786_v14 = vld [vmem:[%s4057_s0 + $0x194] ss:$20 sps:$4 sm:$0xff]  }
  0x5d   :  { %2514 = vmatprep.subr.bf16.mxu1 %v3096_v0 }
  0x60   :  { %2530 = vmatpush1.bf16.msra.mxu1 %v3198_v16  ;;  %v2791_v16 = vld [vmem:[%s4057_s0 + $0x190] ss:$20 sps:$4 sm:$0xff]  }
  0x61   :  { %1205 = vmatmul.mubr.bf16.gmra.mrb[16].mxu1 %v2753_v56  ;;  %2515 = vmatprep.subr.bf16.mxu1 %v3096_v0  ;;  %v2844_v56 = vld [vmem:[%s4057_s0 + $0x178] ss:$20 sps:$4 sm:$0xff]  }
  0x62   :  { %1437 = vmatmul.mubr.bf16.gmra.mrb[16].mxu0 %v2754_v57  ;;  %1212 = vmatprep.mubr.bf16.mxu1 %v2755_v58  ;;  %v2845_v57 = vld [vmem:[%s4057_s0 + $0x39c] ss:$20 sps:$4 sm:$0xff]   ;;  %v156_v58 = vld [vmem:[%s4057_s0 + $0x3c0] sm:$0xff] }
  0x63   :  { %1444 = vmatprep.mubr.bf16.mxu0 %v2757_v59  ;;  %v2847_v59 = vld [vmem:[%s4057_s0 + $0x398] ss:$20 sps:$4 sm:$0xff]  }
  0x64   :  { %2531 = vmatpush1.bf16.msra.mxu1 %v3209_v18  ;;  %v2793_v18 = vld [vmem:[%s4057_s0 + $0x1bc] ss:$20 sps:$4 sm:$0xff]  }
  0x65   :  { %2516 = vmatprep.subr.bf16.mxu1 %v3096_v0 }
  0x68   :  { %2532 = vmatpush1.bf16.msra.mxu1 %v3226_v22  ;;  %v2799_v22 = vld [vmem:[%s4057_s0 + $0x1e4] ss:$20 sps:$4 sm:$0xff]  }
  0x69   :  { %1213 = vmatmul.mubr.bf16.gmra.mrb[20].mxu1 %v2759_v60  ;;  %2517 = vmatprep.subr.bf16.mxu1 %v3096_v0  ;;  %v2848_v60 = vld [vmem:[%s4057_s0 + $0x1a0] ss:$20 sps:$4 sm:$0xff]  }
  0x6a   :  { %1445 = vmatmul.mubr.bf16.gmra.mrb[20].mxu0 %v2760_v61  ;;  %1220 = vmatprep.mubr.bf16.mxu1 %v2761_v62  ;;  %v2305_v61 = vcombine.high %v156_v58, %v156_v58  ;;  %v2304_v62 = vcombine.low %v156_v58, %v156_v58  ;;  %v2890_v58 = vld [vmem:[%s4057_s0 + $0x378] ss:$20 sps:$4 sm:$0xff]  }
  0x6b   :  { %1452 = vmatprep.mubr.bf16.mxu0 %v2763_v63  ;;  %v2851_v63 = vld [vmem:[%s4057_s0 + $0x1c8] ss:$20 sps:$4 sm:$0xff]  }
  0x6c   :  { %2533 = vmatpush1.bf16.msra.mxu1 %v3237_v24  ;;  %v2803_v24 = vld [vmem:[%s4057_s0 + $0x1e0] ss:$20 sps:$4 sm:$0xff]  }
  0x6d   :  { %2518 = vmatprep.subr.bf16.mxu1 %v3096_v0 }
  0x70   :  { %2534 = vmatpush1.bf16.msra.mxu1 %v3248_v26  ;;  %v2805_v26 = vld [vmem:[%s4057_s0 + $0x20c] ss:$20 sps:$4 sm:$0xff]  }
  0x71   :  { %1221 = vmatmul.mubr.bf16.gmra.mrb[24].mxu1 %v2765_v1  ;;  %2519 = vmatprep.subr.bf16.mxu1 %v3096_v0  ;;  %v2854_v1 = vld [vmem:[%s4057_s0 + $0x214] ss:$20 sps:$4 sm:$0xff]  }
  0x72   :  { %1453 = vmatmul.mubr.bf16.gmra.mrb[24].mxu0 %v2766_v2  ;;  %1228 = vmatprep.mubr.bf16.mxu1 %v2768_v3  ;;  %v2852_v2 = vld [vmem:[%s4057_s0 + $0x210] ss:$20 sps:$4 sm:$0xff]  }
  0x73   :  { %1460 = vmatprep.mubr.bf16.mxu0 %v2770_v4  ;;  %v2855_v3 = vld [vmem:[%s4057_s0 + $0x1f0] ss:$20 sps:$4 sm:$0xff]  }
  0x74   :  { %2535 = vmatpush1.bf16.msra.mxu1 %v3259_v28  ;;  %v2808_v28 = vld [vmem:[%s4057_s0 + $0x10] ss:$20 sps:$4 sm:$0xff]  }
  0x75   :  { %2520 = vmatprep.subr.bf16.mxu1 %v3096_v0  ;;  %v2856_v4 = vld [vmem:[%s4057_s0 + $0x23c] ss:$20 sps:$4 sm:$0xff]  }
  0x78   :  { %2536 = vmatpush1.bf16.msra.mxu1 %v3270_v30  ;;  %v2811_v30 = vld [vmem:[%s4057_s0 + $0x230] ss:$20 sps:$4 sm:$0xff]  }
  0x79   :  { %1229 = vmatmul.mubr.bf16.gmra.mrb[28].mxu1 %v2772_v5  ;;  %2521 = vmatprep.subr.bf16.mxu1 %v3096_v0  ;;  %v2858_v5 = vld [vmem:[%s4057_s0 + $0x238] ss:$20 sps:$4 sm:$0xff]  }
  0x7a   :  { %1461 = vmatmul.mubr.bf16.gmra.mrb[28].mxu0 %v2773_v6  ;;  %1236 = vmatprep.mubr.bf16.mxu1 %v2774_v7  ;;  %v2859_v6 = vld [vmem:[%s4057_s0 + $0x218] ss:$20 sps:$4 sm:$0xff]  }
  0x7b   :  { %1468 = vmatprep.mubr.bf16.mxu0 %v2776_v8  ;;  %v2860_v7 = vld [vmem:[%s4057_s0 + $0x264] ss:$20 sps:$4 sm:$0xff]  }
  0x7c   :  { %2537 = vmatpush1.bf16.msra.mxu1 %v3281_v32  ;;  %v2813_v32 = vld [vmem:[%s4057_s0 + $0x25c] ss:$20 sps:$4 sm:$0xff]  }
  0x7d   :  { %2522 = vmatprep.subr.bf16.mxu1 %v3096_v0  ;;  %v2784_v0 = vld [vmem:[%s4057_s0 + $0x168] ss:$20 sps:$4 sm:$0xff]  }
  0x80   :  { %2538 = vmatpush1.bf16.msra.mxu1 %v3292_v34  ;;  %v2816_v34 = vld [vmem:[%s4057_s0 + $0x60] ss:$20 sps:$4 sm:$0xff]  }
  0x81   :  { %1237 = vmatmul.mubr.bf16.gmra.mrb[32].mxu1 %v2778_v9  ;;  %v2862_v9 = vld [vmem:[%s4057_s0 + $0x260] ss:$20 sps:$4 sm:$0xff]  }
  0x82   :  { %1469 = vmatmul.mubr.bf16.gmra.mrb[32].mxu0 %v2779_v10  ;;  %1244 = vmatprep.mubr.bf16.mxu1 %v2780_v11  ;;  %v2863_v11 = vld [vmem:[%s4057_s0 + $0x240] ss:$20 sps:$4 sm:$0xff]  }
  0x83   :  { %1476 = vmatprep.mubr.bf16.mxu0 %v2782_v12 }
  0x89   :  { %1245 = vmatmul.mubr.bf16.gmra.mrb[36].mxu1 %v2784_v0  ;;  %v2864_v0 = vld [vmem:[%s4057_s0 + $0x28c] ss:$20 sps:$4 sm:$0xff]  }
  0x8a   :  { %1477 = vmatmul.mubr.bf16.gmra.mrb[36].mxu0 %v2785_v13  ;;  %1252 = vmatprep.mubr.bf16.mxu1 %v2786_v14 }
  0x8b   :  { %1484 = vmatprep.mubr.bf16.mxu0 %v2788_v15  ;;  %v2866_v15 = vld [vmem:[%s4057_s0 + $0x288] ss:$20 sps:$4 sm:$0xff]  }
  0x91   :  { %1253 = vmatmul.mubr.bf16.gmra.mrb[40].mxu1 %v2791_v16 }
  0x92   :  { %1485 = vmatmul.mubr.bf16.gmra.mrb[40].mxu0 %v2792_v17  ;;  %1260 = vmatprep.mubr.bf16.mxu1 %v2793_v18  ;;  %v2867_v17 = vld [vmem:[%s4057_s0 + $0x268] ss:$20 sps:$4 sm:$0xff]  }
  0x93   :  { %1492 = vmatprep.mubr.bf16.mxu0 %v2795_v19  ;;  %v2868_v19 = vld [vmem:[%s4057_s0 + $0x2b4] ss:$20 sps:$4 sm:$0xff]  }
  0x99   :  { %1261 = vmatmul.mubr.bf16.gmra.mrb[44].mxu1 %v2797_v20 }
  0x9a   :  { %1493 = vmatmul.mubr.bf16.gmra.mrb[44].mxu0 %v2798_v21  ;;  %1268 = vmatprep.mubr.bf16.mxu1 %v2799_v22  ;;  %v2870_v22 = vld [vmem:[%s4057_s0 + $0x2b0] ss:$20 sps:$4 sm:$0xff]  }
  0x9b   :  { %1500 = vmatprep.mubr.bf16.mxu0 %v2801_v23 }
  0xa1   :  { %1269 = vmatmul.mubr.bf16.gmra.mrb[48].mxu1 %v2803_v24  ;;  %v2871_v24 = vld [vmem:[%s4057_s0 + $0x290] ss:$20 sps:$4 sm:$0xff]  }
  0xa2   :  { %1501 = vmatmul.mubr.bf16.gmra.mrb[48].mxu0 %v2804_v25  ;;  %1276 = vmatprep.mubr.bf16.mxu1 %v2805_v26  ;;  %v2872_v26 = vld [vmem:[%s4057_s0 + $0x2dc] ss:$20 sps:$4 sm:$0xff]  }
  0xa3   :  { %2407 = vmatprep.mubr.msk.bf16.mxu0 %vm3098_vm0, %v3097_v40 }
  0xa9   :  { %1277 = vmatmul.mubr.bf16.gmra.mrb[52].mxu1 %v2807_v27 }
  0xaa   :  { %2408 = vmatmul.mubr.msk.bf16.vlgmr.msra.gmra.mrb[0].mxu0 %vm1064_vm1, %v2808_v28  ;;  %1284 = vmatprep.mubr.bf16.mxu1 %v2809_v29  ;;  %v2874_v29 = vld [vmem:[%s4057_s0 + $0x2d8] ss:$20 sps:$4 sm:$0xff]  }
  0xab   :  { %2411 = vmatprep.mubr.msk.bf16.mxu0 %vm3098_vm0, %v3097_v40 }
  0xb1   :  { %1285 = vmatmul.mubr.bf16.gmra.mrb[56].mxu1 %v2811_v30 }
  0xb2   :  { %2412 = vmatmul.mubr.msk.bf16.gmra.mrb[4].mxu0 %vm1064_vm1, %v2812_v31  ;;  %1292 = vmatprep.mubr.bf16.mxu1 %v2813_v32  ;;  %v2875_v31 = vld [vmem:[%s4057_s0 + $0x2b8] ss:$20 sps:$4 sm:$0xff]  }
  0xb3   :  { %2415 = vmatprep.mubr.msk.bf16.mxu0 %vm3098_vm0, %v3097_v40 }
  0xb9   :  { %1293 = vmatmul.mubr.bf16.gmra.mrb[60].mxu1 %v2815_v33  ;;  %v2876_v33 = vld [vmem:[%s4057_s0 + $0x304] ss:$20 sps:$4 sm:$0xff]  }
  0xba   :  { %2416 = vmatmul.mubr.msk.bf16.gmra.mrb[8].mxu0 %vm1064_vm1, %v2816_v34  ;;  %1300 = vmatprep.mubr.bf16.mxu1 %v2817_v35 }
  0xbb   :  { %2419 = vmatprep.mubr.msk.bf16.mxu0 %vm3098_vm0, %v3097_v40 }
  0xc1   :  { %1301 = vmatmul.mubr.bf16.gmra.mrb[64].mxu1 %v2819_v36  ;;  %v2878_v36 = vld [vmem:[%s4057_s0 + $0x300] ss:$20 sps:$4 sm:$0xff]  }
  0xc2   :  { %2420 = vmatmul.mubr.msk.bf16.gmra.mrb[12].mxu0 %vm1064_vm1, %v2820_v37  ;;  %1308 = vmatprep.mubr.bf16.mxu1 %v2821_v38  ;;  %v2879_v38 = vld [vmem:[%s4057_s0 + $0x2e0] ss:$20 sps:$4 sm:$0xff]  }
  0xc3   :  { %2423 = vmatprep.mubr.msk.bf16.mxu0 %vm3098_vm0, %v3097_v40 }
  0xc9   :  { %1309 = vmatmul.mubr.bf16.gmra.mrb[68].mxu1 %v2823_v39 }
  0xca   :  { %2424 = vmatmul.mubr.msk.bf16.gmra.mrb[16].mxu0 %vm1064_vm1, %v2824_v41  ;;  %1316 = vmatprep.mubr.bf16.mxu1 %v2825_v42  ;;  %v2880_v41 = vld [vmem:[%s4057_s0 + $0x32c] ss:$20 sps:$4 sm:$0xff]  }
  0xcb   :  { %2427 = vmatprep.mubr.msk.bf16.mxu0 %vm3098_vm0, %v3097_v40 }
  0xd1   :  { %1317 = vmatmul.mubr.bf16.gmra.mrb[72].mxu1 %v2827_v43 }
  0xd2   :  { %2428 = vmatmul.mubr.msk.bf16.gmra.mrb[20].mxu0 %vm1064_vm1, %v2828_v44  ;;  %1324 = vmatprep.mubr.bf16.mxu1 %v2829_v45  ;;  %v2882_v44 = vld [vmem:[%s4057_s0 + $0x328] ss:$20 sps:$4 sm:$0xff]  }
  0xd3   :  { %2431 = vmatprep.mubr.msk.bf16.mxu0 %vm3098_vm0, %v3097_v40 }
  0xd9   :  { %1325 = vmatmul.mubr.bf16.gmra.mrb[76].mxu1 %v2831_v46  ;;  %v2883_v46 = vld [vmem:[%s4057_s0 + $0x308] ss:$20 sps:$4 sm:$0xff]  }
  0xda   :  { %2432 = vmatmul.mubr.msk.bf16.gmra.mrb[24].mxu0 %vm1064_vm1, %v2832_v47  ;;  %1332 = vmatprep.mubr.bf16.mxu1 %v2833_v48  ;;  %v2884_v48 = vld [vmem:[%s4057_s0 + $0x354] ss:$20 sps:$4 sm:$0xff]  }
  0xdb   :  { %2435 = vmatprep.mubr.msk.bf16.mxu0 %vm3098_vm0, %v3097_v40 }
  0xe1   :  { %1333 = vmatmul.mubr.bf16.gmra.mrb[80].mxu1 %v2835_v49 }
  0xe2   :  { %2436 = vmatmul.mubr.msk.bf16.gmra.mrb[28].mxu0 %vm1064_vm1, %v2836_v50  ;;  %1340 = vmatprep.mubr.bf16.mxu1 %v2837_v51  ;;  %v2886_v51 = vld [vmem:[%s4057_s0 + $0x350] ss:$20 sps:$4 sm:$0xff]  }
  0xe3   :  { %2439 = vmatprep.mubr.msk.bf16.mxu0 %vm3098_vm0, %v3097_v40 }
  0xe9   :  { %1341 = vmatmul.mubr.bf16.gmra.mrb[84].mxu1 %v2839_v52 }
  0xea   :  { %2440 = vmatmul.mubr.msk.bf16.gmra.mrb[32].mxu0 %vm1064_vm1, %v2840_v53  ;;  %1348 = vmatprep.mubr.bf16.mxu1 %v2841_v54  ;;  %v2887_v53 = vld [vmem:[%s4057_s0 + $0x330] ss:$20 sps:$4 sm:$0xff]  }
  0xeb   :  { %2443 = vmatprep.mubr.msk.bf16.mxu0 %vm3098_vm0, %v3097_v40 }
  0xf1   :  { %1349 = vmatmul.mubr.bf16.gmra.mrb[88].mxu1 %v2843_v55  ;;  %v2888_v55 = vld [vmem:[%s4057_s0 + $0x37c] ss:$20 sps:$4 sm:$0xff]  }
  0xf2   :  { %2444 = vmatmul.mubr.msk.bf16.gmra.mrb[36].mxu0 %vm1064_vm1, %v2844_v56  ;;  %1356 = vmatprep.mubr.bf16.mxu1 %v2845_v57 }
  0xf3   :  { %2447 = vmatprep.mubr.msk.bf16.mxu0 %vm3098_vm0, %v3097_v40 }
  0xf9   :  { %1357 = vmatmul.mubr.bf16.gmra.mrb[92].mxu1 %v2847_v59 }
  0xfa   :  { %2448 = vmatmul.mubr.msk.bf16.gmra.mrb[40].mxu0 %vm1064_vm1, %v2848_v60  ;;  %1364 = vmatprep.mubr.bf16.mxu1 %v2305_v61  ;;  %v2891_v60 = vld [vmem:[%s4057_s0 + $0x358] ss:$20 sps:$4 sm:$0xff]  }
  0xfb   :  { %2451 = vmatprep.mubr.msk.bf16.mxu0 %vm3098_vm0, %v3097_v40 }
 0x101   :  { %1365 = vmatmul.mubr.bf16.gmra.mrb[96].mxu1 %v2304_v62  ;;  %v2892_v62 = vld [vmem:[%s4057_s0 + $0x3a4] ss:$20 sps:$4 sm:$0xff]  }
 0x102   :  { %2452 = vmatmul.mubr.msk.bf16.gmra.mrb[44].mxu0 %vm1064_vm1, %v2851_v63  ;;  %1508 = vmatprep.mubr.bf16.mxu1 %v2854_v1  ;;  %v157_v1 = vld [vmem:[%s4057_s0 + $0x3c8] sm:$0xff] }
 0x103   :  { %2455 = vmatprep.mubr.msk.bf16.mxu0 %vm3098_vm0, %v3097_v40 }
 0x109   :  { %1509 = vmatmul.mubr.bf16.vlgmr.msra.gmra.mrb[52].mxu1 %v2852_v2 }
 0x10a   :  { %2456 = vmatmul.mubr.msk.bf16.gmra.mrb[48].mxu0 %vm1064_vm1, %v2855_v3  ;;  %1516 = vmatprep.mubr.bf16.mxu1 %v2856_v4  ;;  %v2894_v3 = vld [vmem:[%s4057_s0 + $0x3a0] ss:$20 sps:$4 sm:$0xff]  }
 0x10b   :  { %2459 = vmatprep.mubr.msk.bf16.mxu0 %vm3098_vm0, %v3097_v40 }
 0x111   :  { %1517 = vmatmul.mubr.bf16.gmra.mrb[56].mxu1 %v2858_v5  ;;  %v2895_v5 = vld [vmem:[%s4057_s0 + $0x380] ss:$20 sps:$4 sm:$0xff]  }
 0x112   :  { %2460 = vmatmul.mubr.msk.bf16.gmra.mrb[52].mxu0 %vm1064_vm1, %v2859_v6  ;;  %1524 = vmatprep.mubr.bf16.mxu1 %v2860_v7  ;;  %v2307_v7 = vcombine.high %v157_v1, %v157_v1 }
 0x113   :  { %2463 = vmatprep.mubr.msk.bf16.mxu0 %vm3098_vm0, %v3097_v40 }
 0x114   :  { %v3664_v8 = vpop.f32.mrb[0].mxu1 }
 0x115   :  { %v1176_v10 = vpop.f32.mrb[1].mxu1 }
 0x116   :  { %v3672_v12 = vpop.f32.mrb[2].mxu1 }
 0x117   :  { %v1179_v13 = vpop.f32.mrb[3].mxu1 }
 0x118   :  { %v2898_v13 = vld [vmem:[%s4057_s0 + $0x3a8] ss:$20 sps:$4 sm:$0xff]  }
 0x119   :  { %1525 = vmatmul.mubr.bf16.gmra.mrb[60].mxu1 %v2862_v9 }
 0x11a   :  { %2464 = vmatmul.mubr.msk.bf16.gmra.mrb[56].mxu0 %vm1064_vm1, %v2863_v11  ;;  %1532 = vmatprep.mubr.bf16.mxu1 %v2864_v0  ;;  %v2306_v11 = vcombine.low %v157_v1, %v157_v1 }
 0x11b   :  { %2467 = vmatprep.mubr.msk.bf16.mxu0 %vm3098_vm0, %v3097_v40 }
 0x11c   :  { %v3680_v14 = vpop.f32.mrb[4].mxu1 }
 0x11d   :  { %v1184_v16 = vpop.f32.mrb[5].mxu1 }
 0x11e   :  { %v3688_v18 = vpop.f32.mrb[6].mxu1 }
 0x11f   :  { %v1187_v20 = vpop.f32.mrb[7].mxu1 }
 0x120   :  { %v2899_v20 = vld [vmem:[%s4057_s0 + $0x3d0] ss:$0 sps:$4 sm:$0xff]  }
 0x121   :  { %1533 = vmatmul.mubr.bf16.gmra.mrb[64].mxu1 %v2866_v15 }
 0x122   :  { %2468 = vmatmul.mubr.msk.bf16.gmra.mrb[60].mxu0 %vm1064_vm1, %v2867_v17  ;;  %1540 = vmatprep.mubr.bf16.mxu1 %v2868_v19 }
 0x123   :  { %2471 = vmatprep.mubr.msk.bf16.mxu0 %vm3098_vm0, %v3097_v40 }
 0x124   :  { %v3696_v21 = vpop.f32.mrb[8].mxu1 }
 0x125   :  { %v1192_v23 = vpop.f32.mrb[9].mxu1 }
 0x126   :  { %v3704_v25 = vpop.f32.mrb[10].mxu1 }
 0x127   :  { %v1195_v27 = vpop.f32.mrb[11].mxu1 }
 0x129   :  { %1541 = vmatmul.mubr.bf16.gmra.mrb[68].mxu1 %v2870_v22 }
 0x12a   :  { %2472 = vmatmul.mubr.msk.bf16.gmra.mrb[64].mxu0 %vm1064_vm1, %v2871_v24  ;;  %1548 = vmatprep.mubr.bf16.mxu1 %v2872_v26 }
 0x12b   :  { %2475 = vmatprep.mubr.msk.bf16.mxu0 %vm3098_vm0, %v3097_v40 }
 0x12c   :  { %v3712_v28 = vpop.f32.mrb[12].mxu1 }
 0x12d   :  { %v1200_v30 = vpop.f32.mrb[13].mxu1 }
 0x12e   :  { %v3720_v32 = vpop.f32.mrb[14].mxu1 }
 0x12f   :  { %v1203_v34 = vpop.f32.mrb[15].mxu1 }
 0x131   :  { %1549 = vmatmul.mubr.bf16.gmra.mrb[72].mxu1 %v2874_v29 }
 0x132   :  { %2476 = vmatmul.mubr.msk.bf16.gmra.mrb[68].mxu0 %vm1064_vm1, %v2875_v31  ;;  %1556 = vmatprep.mubr.bf16.mxu1 %v2876_v33 }
 0x133   :  { %2479 = vmatprep.mubr.msk.bf16.mxu0 %vm3098_vm0, %v3097_v40 }
 0x134   :  { %v3728_v35 = vpop.f32.mrb[16].mxu1 }
 0x135   :  { %v1208_v37 = vpop.f32.mrb[17].mxu1 }
 0x136   :  { %v3736_v39 = vpop.f32.mrb[18].mxu1 }
 0x137   :  { %v1211_v42 = vpop.f32.mrb[19].mxu1 }
 0x139   :  { %1557 = vmatmul.mubr.bf16.gmra.mrb[76].mxu1 %v2878_v36 }
 0x13a   :  { %2480 = vmatmul.mubr.msk.bf16.gmra.mrb[72].mxu0 %vm1064_vm1, %v2879_v38  ;;  %1564 = vmatprep.mubr.bf16.mxu1 %v2880_v41 }
 0x13b   :  { %2483 = vmatprep.mubr.msk.bf16.mxu0 %vm3098_vm0, %v3097_v40 }
 0x13c   :  { %v3744_v43 = vpop.f32.mrb[20].mxu1 }
 0x13d   :  { %v1216_v45 = vpop.f32.mrb[21].mxu1 }
 0x13e   :  { %v3752_v47 = vpop.f32.mrb[22].mxu1 }
 0x13f   :  { %v1219_v49 = vpop.f32.mrb[23].mxu1 }
 0x141   :  { %1565 = vmatmul.mubr.bf16.gmra.mrb[80].mxu1 %v2882_v44 }
 0x142   :  { %2484 = vmatmul.mubr.msk.bf16.gmra.mrb[76].mxu0 %vm1064_vm1, %v2883_v46  ;;  %1572 = vmatprep.mubr.bf16.mxu1 %v2884_v48 }
 0x143   :  { %2487 = vmatprep.mubr.msk.bf16.mxu0 %vm3098_vm0, %v3097_v40 }
 0x144   :  { %v3760_v50 = vpop.f32.mrb[24].mxu1 }
 0x145   :  { %v1224_v52 = vpop.f32.mrb[25].mxu1 }
 0x146   :  { %v3768_v54 = vpop.f32.mrb[26].mxu1 }
 0x147   :  { %v1227_v56 = vpop.f32.mrb[27].mxu1 }
 0x149   :  { %1573 = vmatmul.mubr.bf16.gmra.mrb[84].mxu1 %v2886_v51 }
 0x14a   :  { %2488 = vmatmul.mubr.msk.bf16.gmra.mrb[80].mxu0 %vm1064_vm1, %v2887_v53  ;;  %1580 = vmatprep.mubr.bf16.mxu1 %v2888_v55 }
 0x14b   :  { %2491 = vmatprep.mubr.msk.bf16.mxu0 %vm3098_vm0, %v3097_v40 }
 0x14c   :  { %v3776_v57 = vpop.f32.mrb[28].mxu1 }
 0x14d   :  { %v1232_v59 = vpop.f32.mrb[29].mxu1 }
 0x14e   :  { %v3784_v61 = vpop.f32.mrb[30].mxu1 }
 0x14f   :  { %v1235_v63 = vpop.f32.mrb[31].mxu1 }
 0x151   :  { %1581 = vmatmul.mubr.bf16.gmra.mrb[88].mxu1 %v2890_v58 }
 0x152   :  { %2492 = vmatmul.mubr.msk.bf16.gmra.mrb[84].mxu0 %vm1064_vm1, %v2891_v60  ;;  %1588 = vmatprep.mubr.bf16.mxu1 %v2892_v62 }
 0x153   :  { %2495 = vmatprep.mubr.msk.bf16.mxu0 %vm3098_vm0, %v3097_v40 }
 0x154   :  { %v3795_v2 = vpop.f32.mrb[32].mxu1 }
 0x155   :  { %v1240_v4 = vpop.f32.mrb[33].mxu1 }
 0x156   :  { %v3803_v6 = vpop.f32.mrb[34].mxu1 }
 0x157   :  { %v1243_v9 = vpop.f32.mrb[35].mxu1 }
 0x159   :  { %1589 = vmatmul.mubr.bf16.gmra.mrb[92].mxu1 %v2894_v3 }
 0x15a   :  { %2496 = vmatmul.mubr.msk.bf16.gmra.mrb[88].mxu0 %vm1064_vm1, %v2895_v5  ;;  %1596 = vmatprep.mubr.bf16.mxu1 %v2307_v7 }
 0x15b   :  { %2499 = vmatprep.mubr.msk.bf16.mxu0 %vm3098_vm0, %v3097_v40 }
 0x15c   :  { %v3808_v10 = vpop.f32.mrb[36].mxu1 }
 0x15d   :  { %v1248_v0 = vpop.f32.mrb[37].mxu1 }
 0x15e   :  { %v3813_v15 = vpop.f32.mrb[38].mxu1 }
 0x15f   :  { %v1251_v16 = vpop.f32.mrb[39].mxu1 }
 0x161   :  { %1597 = vmatmul.mubr.bf16.gmra.mrb[96].mxu1 %v2306_v11 }
 0x162   :  { %2500 = vmatmul.mubr.msk.bf16.gmra.mrb[92].mxu0 %vm1064_vm1, %v2898_v13 }
 0x163   :  { %2503 = vmatprep.mubr.msk.bf16.mxu0 %vm3098_vm0, %v3097_v40 }
 0x164   :  { %v3818_v17 = vpop.f32.mrb[40].mxu1 }
 0x165   :  { %v1256_v19 = vpop.f32.mrb[41].mxu1 }
 0x166   :  { %v3823_v22 = vpop.f32.mrb[42].mxu1 }
 0x167   :  { %v1259_v23 = vpop.f32.mrb[43].mxu1 }
 0x16a   :  { %2504 = vmatmul.mubr.msk.bf16.gmra.mrb[96].mxu0 %vm1064_vm1, %v2899_v20 }
 0x16c   :  { %v3826_v24 = vpop.f32.mrb[44].mxu1 }
 0x16d   :  { %v1264_v26 = vpop.f32.mrb[45].mxu1 }
 0x16e   :  { %v3828_v27 = vpop.f32.mrb[46].mxu1 }
 0x16f   :  { %v1267_v29 = vpop.f32.mrb[47].mxu1 }
 0x174   :  { %v3830_v30 = vpop.f32.mrb[48].mxu1 }
 0x175   :  { %v1272_v40 = vpop.f32.mrb[49].mxu1 }
 0x176   :  { %v3832_v31 = vpop.f32.mrb[50].mxu1 }
 0x177   :  { %v1275_v33 = vpop.f32.mrb[51].mxu1 }
 0x17d   :  { %v1638_v34 = vpop.f32.mrb[0].mxu0 }
 0x17e   :  { %v2539_v36 = vadd.f32 %v1638_v34, %v3664_v8  ;;  %v2409_v37 = vpop.f32.mrb[1].mxu0 }
 0x17f   :  { %v1641_v38 = vpop.f32.mrb[2].mxu0 }
 0x180   :  { %v1836_v41 = vsub.f32 0.0, %v2539_v36  ;;  %v2540_v42 = vadd.f32 %v1641_v38, %v3672_v12  ;;  %v2410_v44 = vpop.f32.mrb[3].mxu0 }
 0x182   :  { %v1885_v45 = vmul.f32 1.442695, %v1836_v41  ;;  %v1837_v46 = vsub.f32 0.0, %v2540_v42 }
 0x184   :  { %2900 = vpow2.f32 %v1885_v45  ;;  %v1887_v48 = vmul.f32 1.442695, %v1837_v46 }
 0x185   :  { %v1646_v49 = vpop.f32.mrb[4].mxu0 }
 0x186   :  { %2902 = vpow2.f32 %v1887_v48  ;;  %v2541_v51 = vadd.f32 %v1646_v49, %v3680_v14  ;;  %v2413_v52 = vpop.f32.mrb[5].mxu0 }
 0x187   :  { %v1649_v53 = vpop.f32.mrb[6].mxu0 }
 0x188   :  { %v1838_v55 = vsub.f32 0.0, %v2541_v51  ;;  %v2542_v56 = vadd.f32 %v1649_v53, %v3688_v18  ;;  %v2414_v8 = vpop.f32.mrb[7].mxu0 }
 0x18a   :  { %v1889_v58 = vmul.f32 1.442695, %v1838_v55  ;;  %v1839_v59 = vsub.f32 0.0, %v2542_v56 }
 0x18c   :  { %2904 = vpow2.f32 %v1889_v58  ;;  %v1891_v60 = vmul.f32 1.442695, %v1839_v59 }
 0x18d   :  { %v1654_v12 = vpop.f32.mrb[8].mxu0 }
 0x18e   :  { %v2901_v62 = vpop.eup %2900  ;;  %2906 = vpow2.f32 %v1891_v60  ;;  %v2543_v63 = vadd.f32 %v1654_v12, %v3696_v21  ;;  %v2417_v1 = vpop.f32.mrb[9].mxu0 }
 0x18f   :  { %v1983_v3 = vadd.f32 1.0, %v2901_v62  ;;  %v1657_v4 = vpop.f32.mrb[10].mxu0 }
 0x190   :  { %v2903_v5 = vpop.eup %2902  ;;  %v1840_v14 = vsub.f32 0.0, %v2543_v63  ;;  %v2544_v7 = vadd.f32 %v1657_v4, %v3704_v25  ;;  %v2418_v9 = vpop.f32.mrb[11].mxu0 }
 0x191   :  { %2908 = vrcp.f32 %v1983_v3  ;;  %v1984_v18 = vadd.f32 1.0, %v2903_v5 }
 0x192   :  { %v1893_v11 = vmul.f32 1.442695, %v1840_v14  ;;  %v1841_v0 = vsub.f32 0.0, %v2544_v7 }
 0x193   :  { %2910 = vrcp.f32 %v1984_v18 }
 0x194   :  { %2912 = vpow2.f32 %v1893_v11  ;;  %v1895_v13 = vmul.f32 1.442695, %v1841_v0 }
 0x195   :  { %v1662_v16 = vpop.f32.mrb[12].mxu0 }
 0x196   :  { %v2905_v19 = vpop.eup %2904  ;;  %2914 = vpow2.f32 %v1895_v13  ;;  %v2545_v21 = vadd.f32 %v1662_v16, %v3712_v28  ;;  %v2421_v20 = vpop.f32.mrb[13].mxu0 }
 0x197   :  { %v1985_v23 = vadd.f32 1.0, %v2905_v19  ;;  %v1665_v26 = vpop.f32.mrb[14].mxu0 }
 0x198   :  { %v2907_v29 = vpop.eup %2906  ;;  %v1842_v40 = vsub.f32 0.0, %v2545_v21  ;;  %v2546_v25 = vadd.f32 %v1665_v26, %v3720_v32  ;;  %v2422_v33 = vpop.f32.mrb[15].mxu0 }
 0x199   :  { %2916 = vrcp.f32 %v1985_v23  ;;  %v1986_v34 = vadd.f32 1.0, %v2907_v29 }
 0x19a   :  { %v1897_v36 = vmul.f32 1.442695, %v1842_v40  ;;  %v1843_v37 = vsub.f32 0.0, %v2546_v25 }
 0x19b   :  { %v2909_v38 = vpop.eup %2908  ;;  %2918 = vrcp.f32 %v1986_v34 }
 0x19c   :  { %2131 = vst.msk [vmem:[%s4058_s2] sm:$0xff] %vm2130_vm2, %v2909_v38  ;;  %2920 = vpow2.f32 %v1897_v36  ;;  %v1899_v28 = vmul.f32 1.442695, %v1843_v37 }
 0x19d   :  { %v2911_v41 = vpop.eup %2910  ;;  %v1670_v42 = vpop.f32.mrb[16].mxu0 }
 0x19e   :  { %v2913_v44 = vpop.eup %2912  ;;  %2132 = vst.msk [vmem:[%s4058_s2 + $0x8] sm:$0xff] %vm2130_vm2, %v2911_v41  ;;  %2922 = vpow2.f32 %v1899_v28  ;;  %v2547_v32 = vadd.f32 %v1670_v42, %v3728_v35  ;;  %v2425_v45 = vpop.f32.mrb[17].mxu0 }
 0x19f   :  { %v1987_v46 = vadd.f32 1.0, %v2913_v44  ;;  %v1673_v48 = vpop.f32.mrb[18].mxu0 }
 0x1a0   :  { %v2915_v49 = vpop.eup %2914  ;;  %v1844_v51 = vsub.f32 0.0, %v2547_v32  ;;  %v2548_v52 = vadd.f32 %v1673_v48, %v3736_v39  ;;  %v2426_v53 = vpop.f32.mrb[19].mxu0 }
 0x1a1   :  { %2924 = vrcp.f32 %v1987_v46  ;;  %v1988_v55 = vadd.f32 1.0, %v2915_v49 }
 0x1a2   :  { %v1901_v56 = vmul.f32 1.442695, %v1844_v51  ;;  %v1845_v8 = vsub.f32 0.0, %v2548_v52 }
 0x1a3   :  { %v2917_v58 = vpop.eup %2916  ;;  %2926 = vrcp.f32 %v1988_v55 }
 0x1a4   :  { %2133 = vst.msk [vmem:[%s4058_s2 + $0x10] sm:$0xff] %vm2130_vm2, %v2917_v58  ;;  %2928 = vpow2.f32 %v1901_v56  ;;  %v1903_v35 = vmul.f32 1.442695, %v1845_v8 }
 0x1a5   :  { %v2919_v59 = vpop.eup %2918  ;;  %v1678_v60 = vpop.f32.mrb[20].mxu0 }
 0x1a6   :  { %v2921_v12 = vpop.eup %2920  ;;  %2134 = vst.msk [vmem:[%s4058_s2 + $0x18] sm:$0xff] %vm2130_vm2, %v2919_v59  ;;  %2930 = vpow2.f32 %v1903_v35  ;;  %v2549_v39 = vadd.f32 %v1678_v60, %v3744_v43  ;;  %v2429_v62 = vpop.f32.mrb[21].mxu0 }
 0x1a7   :  { %v1989_v63 = vadd.f32 1.0, %v2921_v12  ;;  %v1681_v1 = vpop.f32.mrb[22].mxu0 }
 0x1a8   :  { %v2923_v3 = vpop.eup %2922  ;;  %v1846_v4 = vsub.f32 0.0, %v2549_v39  ;;  %v2550_v5 = vadd.f32 %v1681_v1, %v3752_v47  ;;  %v2430_v14 = vpop.f32.mrb[23].mxu0 }
 0x1a9   :  { %2932 = vrcp.f32 %v1989_v63  ;;  %v1990_v7 = vadd.f32 1.0, %v2923_v3 }
 0x1aa   :  { %v1905_v9 = vmul.f32 1.442695, %v1846_v4  ;;  %v1847_v18 = vsub.f32 0.0, %v2550_v5 }
 0x1ab   :  { %v2925_v11 = vpop.eup %2924  ;;  %2934 = vrcp.f32 %v1990_v7 }
 0x1ac   :  { %2135 = vst.msk [vmem:[%s4058_s2 + $0x20] sm:$0xff] %vm2130_vm2, %v2925_v11  ;;  %2936 = vpow2.f32 %v1905_v9  ;;  %v1907_v43 = vmul.f32 1.442695, %v1847_v18 }
 0x1ad   :  { %v2927_v0 = vpop.eup %2926  ;;  %v1686_v13 = vpop.f32.mrb[24].mxu0 }
 0x1ae   :  { %v2929_v16 = vpop.eup %2928  ;;  %2136 = vst.msk [vmem:[%s4058_s2 + $0x28] sm:$0xff] %vm2130_vm2, %v2927_v0  ;;  %2938 = vpow2.f32 %v1907_v43  ;;  %v2551_v47 = vadd.f32 %v1686_v13, %v3760_v50  ;;  %v2433_v19 = vpop.f32.mrb[25].mxu0 }
 0x1af   :  { %v1991_v21 = vadd.f32 1.0, %v2929_v16  ;;  %v1689_v20 = vpop.f32.mrb[26].mxu0 }
 0x1b0   :  { %v2931_v23 = vpop.eup %2930  ;;  %v1848_v26 = vsub.f32 0.0, %v2551_v47  ;;  %v2552_v29 = vadd.f32 %v1689_v20, %v3768_v54  ;;  %v2434_v40 = vpop.f32.mrb[27].mxu0 }
 0x1b1   :  { %2940 = vrcp.f32 %v1991_v21  ;;  %v1992_v25 = vadd.f32 1.0, %v2931_v23 }
 0x1b2   :  { %v1909_v33 = vmul.f32 1.442695, %v1848_v26  ;;  %v1849_v34 = vsub.f32 0.0, %v2552_v29 }
 0x1b3   :  { %v2933_v36 = vpop.eup %2932  ;;  %2942 = vrcp.f32 %v1992_v25 }
 0x1b4   :  { %2137 = vst.msk [vmem:[%s4058_s2 + $0x30] sm:$0xff] %vm2130_vm2, %v2933_v36  ;;  %2944 = vpow2.f32 %v1909_v33  ;;  %v1911_v50 = vmul.f32 1.442695, %v1849_v34 }
 0x1b5   :  { %v2935_v37 = vpop.eup %2934  ;;  %v1694_v38 = vpop.f32.mrb[28].mxu0 }
 0x1b6   :  { %v2937_v28 = vpop.eup %2936  ;;  %2138 = vst.msk [vmem:[%s4058_s2 + $0x38] sm:$0xff] %vm2130_vm2, %v2935_v37  ;;  %2946 = vpow2.f32 %v1911_v50  ;;  %v2553_v54 = vadd.f32 %v1694_v38, %v3776_v57  ;;  %v2437_v41 = vpop.f32.mrb[29].mxu0 }
 0x1b7   :  { %v1993_v42 = vadd.f32 1.0, %v2937_v28  ;;  %v1697_v44 = vpop.f32.mrb[30].mxu0 }
 0x1b8   :  { %v2939_v32 = vpop.eup %2938  ;;  %v1850_v45 = vsub.f32 0.0, %v2553_v54  ;;  %v2554_v46 = vadd.f32 %v1697_v44, %v3784_v61  ;;  %v2438_v48 = vpop.f32.mrb[31].mxu0 }
 0x1b9   :  { %2948 = vrcp.f32 %v1993_v42  ;;  %v1994_v49 = vadd.f32 1.0, %v2939_v32 }
 0x1ba   :  { %v1913_v51 = vmul.f32 1.442695, %v1850_v45  ;;  %v1851_v52 = vsub.f32 0.0, %v2554_v46 }
 0x1bb   :  { %v2941_v53 = vpop.eup %2940  ;;  %2950 = vrcp.f32 %v1994_v49 }
 0x1bc   :  { %2139 = vst.msk [vmem:[%s4058_s2 + $0x40] sm:$0xff] %vm2130_vm2, %v2941_v53  ;;  %2952 = vpow2.f32 %v1913_v51  ;;  %v1915_v57 = vmul.f32 1.442695, %v1851_v52 }
 0x1bd   :  { %v2943_v55 = vpop.eup %2942  ;;  %v1702_v56 = vpop.f32.mrb[32].mxu0 }
 0x1be   :  { %v2945_v8 = vpop.eup %2944  ;;  %2140 = vst.msk [vmem:[%s4058_s2 + $0x48] sm:$0xff] %vm2130_vm2, %v2943_v55  ;;  %2954 = vpow2.f32 %v1915_v57  ;;  %v2555_v61 = vadd.f32 %v1702_v56, %v3795_v2  ;;  %v2441_v58 = vpop.f32.mrb[33].mxu0 }
 0x1bf   :  { %v1995_v35 = vadd.f32 1.0, %v2945_v8  ;;  %v1705_v59 = vpop.f32.mrb[34].mxu0 }
 0x1c0   :  { %v2947_v60 = vpop.eup %2946  ;;  %v1852_v12 = vsub.f32 0.0, %v2555_v61  ;;  %v2556_v39 = vadd.f32 %v1705_v59, %v3803_v6  ;;  %v2442_v62 = vpop.f32.mrb[35].mxu0 }
 0x1c1   :  { %2956 = vrcp.f32 %v1995_v35  ;;  %v1996_v63 = vadd.f32 1.0, %v2947_v60 }
 0x1c2   :  { %v1917_v1 = vmul.f32 1.442695, %v1852_v12  ;;  %v1853_v3 = vsub.f32 0.0, %v2556_v39 }
 0x1c3   :  { %v2949_v4 = vpop.eup %2948  ;;  %2958 = vrcp.f32 %v1996_v63 }
 0x1c4   :  { %2141 = vst.msk [vmem:[%s4058_s2 + $0x50] sm:$0xff] %vm2130_vm2, %v2949_v4  ;;  %2960 = vpow2.f32 %v1917_v1  ;;  %v1919_v2 = vmul.f32 1.442695, %v1853_v3 }
 0x1c5   :  { %v2951_v5 = vpop.eup %2950  ;;  %v1710_v14 = vpop.f32.mrb[36].mxu0 }
 0x1c6   :  { %v2953_v7 = vpop.eup %2952  ;;  %2142 = vst.msk [vmem:[%s4058_s2 + $0x58] sm:$0xff] %vm2130_vm2, %v2951_v5  ;;  %2962 = vpow2.f32 %v1919_v2  ;;  %v2557_v6 = vadd.f32 %v1710_v14, %v3808_v10  ;;  %v2445_v9 = vpop.f32.mrb[37].mxu0 }
 0x1c7   :  { %v1997_v18 = vadd.f32 1.0, %v2953_v7  ;;  %v1713_v11 = vpop.f32.mrb[38].mxu0 }
 0x1c8   :  { %v2955_v43 = vpop.eup %2954  ;;  %v1854_v0 = vsub.f32 0.0, %v2557_v6  ;;  %v2558_v13 = vadd.f32 %v1713_v11, %v3813_v15  ;;  %v2446_v16 = vpop.f32.mrb[39].mxu0 }
 0x1c9   :  { %2964 = vrcp.f32 %v1997_v18  ;;  %v1998_v47 = vadd.f32 1.0, %v2955_v43 }
 0x1ca   :  { %v1921_v19 = vmul.f32 1.442695, %v1854_v0  ;;  %v1855_v21 = vsub.f32 0.0, %v2558_v13 }
 0x1cb   :  { %v2957_v20 = vpop.eup %2956  ;;  %2966 = vrcp.f32 %v1998_v47 }
 0x1cc   :  { %2143 = vst.msk [vmem:[%s4058_s2 + $0x60] sm:$0xff] %vm2130_vm2, %v2957_v20  ;;  %2968 = vpow2.f32 %v1921_v19  ;;  %v1923_v10 = vmul.f32 1.442695, %v1855_v21 }
 0x1cd   :  { %v2959_v23 = vpop.eup %2958  ;;  %v1718_v26 = vpop.f32.mrb[40].mxu0 }
 0x1ce   :  { %v2961_v29 = vpop.eup %2960  ;;  %2144 = vst.msk [vmem:[%s4058_s2 + $0x68] sm:$0xff] %vm2130_vm2, %v2959_v23  ;;  %2970 = vpow2.f32 %v1923_v10  ;;  %v2559_v15 = vadd.f32 %v1718_v26, %v3818_v17  ;;  %v2449_v40 = vpop.f32.mrb[41].mxu0 }
 0x1cf   :  { %v1999_v25 = vadd.f32 1.0, %v2961_v29  ;;  %v1721_v33 = vpop.f32.mrb[42].mxu0 }
 0x1d0   :  { %v2963_v34 = vpop.eup %2962  ;;  %v1856_v36 = vsub.f32 0.0, %v2559_v15  ;;  %v2560_v50 = vadd.f32 %v1721_v33, %v3823_v22  ;;  %v2450_v37 = vpop.f32.mrb[43].mxu0 }
 0x1d1   :  { %2972 = vrcp.f32 %v1999_v25  ;;  %v2000_v38 = vadd.f32 1.0, %v2963_v34 }
 0x1d2   :  { %v1925_v28 = vmul.f32 1.442695, %v1856_v36  ;;  %v1857_v54 = vsub.f32 0.0, %v2560_v50 }
 0x1d3   :  { %v2965_v41 = vpop.eup %2964  ;;  %2974 = vrcp.f32 %v2000_v38 }
 0x1d4   :  { %2145 = vst.msk [vmem:[%s4058_s2 + $0x70] sm:$0xff] %vm2130_vm2, %v2965_v41  ;;  %2976 = vpow2.f32 %v1925_v28  ;;  %v1927_v17 = vmul.f32 1.442695, %v1857_v54 }
 0x1d5   :  { %v2967_v42 = vpop.eup %2966  ;;  %v1726_v44 = vpop.f32.mrb[44].mxu0 }
 0x1d6   :  { %v2969_v32 = vpop.eup %2968  ;;  %2146 = vst.msk [vmem:[%s4058_s2 + $0x78] sm:$0xff] %vm2130_vm2, %v2967_v42  ;;  %2978 = vpow2.f32 %v1927_v17  ;;  %v2561_v22 = vadd.f32 %v1726_v44, %v3826_v24  ;;  %v2453_v45 = vpop.f32.mrb[45].mxu0 }
 0x1d7   :  { %v2001_v46 = vadd.f32 1.0, %v2969_v32  ;;  %v1729_v48 = vpop.f32.mrb[46].mxu0 }
 0x1d8   :  { %v2971_v49 = vpop.eup %2970  ;;  %v1858_v51 = vsub.f32 0.0, %v2561_v22  ;;  %v2562_v52 = vadd.f32 %v1729_v48, %v3828_v27  ;;  %v2454_v53 = vpop.f32.mrb[47].mxu0 }
 0x1d9   :  { %2980 = vrcp.f32 %v2001_v46  ;;  %v2002_v57 = vadd.f32 1.0, %v2971_v49 }
 0x1da   :  { %v1929_v55 = vmul.f32 1.442695, %v1858_v51  ;;  %v1859_v56 = vsub.f32 0.0, %v2562_v52 }
 0x1db   :  { %v2973_v8 = vpop.eup %2972  ;;  %2982 = vrcp.f32 %v2002_v57 }
 0x1dc   :  { %2147 = vst.msk [vmem:[%s4058_s2 + $0x80] sm:$0xff] %vm2130_vm2, %v2973_v8  ;;  %2984 = vpow2.f32 %v1929_v55  ;;  %v1931_v24 = vmul.f32 1.442695, %v1859_v56  ;;  %v1510_v61 = vpop.f32.mrb[52].mxu1 }
 0x1dd   :  { %v2975_v58 = vpop.eup %2974  ;;  %v1734_v35 = vpop.f32.mrb[48].mxu0 }
 0x1de   :  { %v1512_v59 = vpop.f32.mrb[53].mxu1  ;;  %v2977_v60 = vpop.eup %2976  ;;  %2148 = vst.msk [vmem:[%s4058_s2 + $0x88] sm:$0xff] %vm2130_vm2, %v2975_v58  ;;  %2986 = vpow2.f32 %v1931_v24  ;;  %v2563_v27 = vadd.f32 %v1734_v35, %v3830_v30 }
 0x1df   :  { %v2457_v12 = vpop.f32.mrb[49].mxu0  ;;  %v1513_v39 = vpop.f32.mrb[54].mxu1  ;;  %v2003_v62 = vadd.f32 1.0, %v2977_v60 }
 0x1e0   :  { %v1737_v63 = vpop.f32.mrb[50].mxu0  ;;  %v1515_v1 = vpop.f32.mrb[55].mxu1  ;;  %v1860_v4 = vsub.f32 0.0, %v2563_v27 }
 0x1e1   :  { %v2979_v3 = vpop.eup %2978  ;;  %v2564_v2 = vadd.f32 %v1737_v63, %v3832_v31  ;;  %v2458_v5 = vpop.f32.mrb[51].mxu0  ;;  %2988 = vrcp.f32 %v2003_v62 }
 0x1e2   :  { %v2004_v14 = vadd.f32 1.0, %v2979_v3  ;;  %v1933_v7 = vmul.f32 1.442695, %v1860_v4 }
 0x1e3   :  { %v1861_v6 = vsub.f32 0.0, %v2564_v2  ;;  %v2981_v9 = vpop.eup %2980 }
 0x1e4   :  { %2990 = vrcp.f32 %v2004_v14  ;;  %2149 = vst.msk [vmem:[%s4058_s2 + $0x90] sm:$0xff] %vm2130_vm2, %v2981_v9  ;;  %v1518_v18 = vpop.f32.mrb[56].mxu1 }
 0x1e5   :  { %2992 = vpow2.f32 %v1933_v7  ;;  %v1935_v30 = vmul.f32 1.442695, %v1861_v6  ;;  %v2983_v11 = vpop.eup %2982  ;;  %v1742_v43 = vpop.f32.mrb[52].mxu0 }
 0x1e6   :  { %v1520_v0 = vpop.f32.mrb[57].mxu1  ;;  %v2985_v13 = vpop.eup %2984  ;;  %2150 = vst.msk [vmem:[%s4058_s2 + $0x98] sm:$0xff] %vm2130_vm2, %v2983_v11  ;;  %v2565_v31 = vadd.f32 %v1742_v43, %v1510_v61 }
 0x1e7   :  { %2994 = vpow2.f32 %v1935_v30  ;;  %v2461_v16 = vpop.f32.mrb[53].mxu0  ;;  %v1521_v47 = vpop.f32.mrb[58].mxu1  ;;  %v2005_v19 = vadd.f32 1.0, %v2985_v13 }
 0x1e8   :  { %v1745_v21 = vpop.f32.mrb[54].mxu0  ;;  %v1523_v20 = vpop.f32.mrb[59].mxu1  ;;  %v1862_v23 = vsub.f32 0.0, %v2565_v31 }
 0x1e9   :  { %v2987_v10 = vpop.eup %2986  ;;  %v2566_v26 = vadd.f32 %v1745_v21, %v1513_v39  ;;  %v2462_v29 = vpop.f32.mrb[55].mxu0  ;;  %2996 = vrcp.f32 %v2005_v19 }
 0x1ea   :  { %v2006_v15 = vadd.f32 1.0, %v2987_v10  ;;  %v1937_v40 = vmul.f32 1.442695, %v1862_v23 }
 0x1eb   :  { %v1863_v25 = vsub.f32 0.0, %v2566_v26  ;;  %v2989_v33 = vpop.eup %2988 }
 0x1ec   :  { %2998 = vrcp.f32 %v2006_v15  ;;  %2151 = vst.msk [vmem:[%s4058_s2 + $0xa0] sm:$0xff] %vm2130_vm2, %v2989_v33  ;;  %v1526_v36 = vpop.f32.mrb[60].mxu1 }
 0x1ed   :  { %3000 = vpow2.f32 %v1937_v40  ;;  %v1939_v34 = vmul.f32 1.442695, %v1863_v25  ;;  %v1750_v37 = vpop.f32.mrb[56].mxu0  ;;  %v1528_v38 = vpop.f32.mrb[61].mxu1 }
 0x1ee   :  { %v2991_v50 = vpop.eup %2990  ;;  %v2567_v54 = vadd.f32 %v1750_v37, %v1518_v18  ;;  %v2465_v41 = vpop.f32.mrb[57].mxu0 }
 0x1ef   :  { %v2993_v28 = vpop.eup %2992  ;;  %2152 = vst.msk [vmem:[%s4058_s2 + $0xa8] sm:$0xff] %vm2130_vm2, %v2991_v50  ;;  %3002 = vpow2.f32 %v1939_v34  ;;  %v1529_v17 = vpop.f32.mrb[62].mxu1 }
 0x1f0   :  { %v2007_v42 = vadd.f32 1.0, %v2993_v28  ;;  %v1753_v44 = vpop.f32.mrb[58].mxu0  ;;  %v1531_v32 = vpop.f32.mrb[63].mxu1  ;;  %v1864_v45 = vsub.f32 0.0, %v2567_v54 }
 0x1f1   :  { %v2995_v22 = vpop.eup %2994  ;;  %v2568_v46 = vadd.f32 %v1753_v44, %v1521_v47  ;;  %v2466_v48 = vpop.f32.mrb[59].mxu0 }
 0x1f2   :  { %3004 = vrcp.f32 %v2007_v42  ;;  %v2008_v49 = vadd.f32 1.0, %v2995_v22  ;;  %v1941_v51 = vmul.f32 1.442695, %v1864_v45 }
 0x1f3   :  { %v1865_v52 = vsub.f32 0.0, %v2568_v46  ;;  %v2997_v53 = vpop.eup %2996 }
 0x1f4   :  { %3006 = vrcp.f32 %v2008_v49  ;;  %2153 = vst.msk [vmem:[%s4058_s2 + $0xb0] sm:$0xff] %vm2130_vm2, %v2997_v53  ;;  %v1534_v55 = vpop.f32.mrb[64].mxu1 }
 0x1f5   :  { %3008 = vpow2.f32 %v1941_v51  ;;  %v1943_v57 = vmul.f32 1.442695, %v1865_v52  ;;  %v1758_v8 = vpop.f32.mrb[60].mxu0  ;;  %v1536_v24 = vpop.f32.mrb[65].mxu1 }
 0x1f6   :  { %v2999_v56 = vpop.eup %2998  ;;  %v2569_v58 = vadd.f32 %v1758_v8, %v1526_v36  ;;  %v2469_v35 = vpop.f32.mrb[61].mxu0 }
 0x1f7   :  { %v3001_v61 = vpop.eup %3000  ;;  %2154 = vst.msk [vmem:[%s4058_s2 + $0xb8] sm:$0xff] %vm2130_vm2, %v2999_v56  ;;  %3010 = vpow2.f32 %v1943_v57  ;;  %v1537_v59 = vpop.f32.mrb[66].mxu1 }
 0x1f8   :  { %v2009_v60 = vadd.f32 1.0, %v3001_v61  ;;  %v1761_v27 = vpop.f32.mrb[62].mxu0  ;;  %v1539_v12 = vpop.f32.mrb[67].mxu1  ;;  %v1866_v62 = vsub.f32 0.0, %v2569_v58 }
 0x1f9   :  { %v3003_v39 = vpop.eup %3002  ;;  %v2570_v63 = vadd.f32 %v1761_v27, %v1529_v17  ;;  %v2470_v1 = vpop.f32.mrb[63].mxu0 }
 0x1fa   :  { %3012 = vrcp.f32 %v2009_v60  ;;  %v2010_v3 = vadd.f32 1.0, %v3003_v39  ;;  %v1945_v4 = vmul.f32 1.442695, %v1866_v62 }
 0x1fb   :  { %v1867_v2 = vsub.f32 0.0, %v2570_v63 }
 0x1fc   :  { %v3005_v5 = vpop.eup %3004  ;;  %3014 = vrcp.f32 %v2010_v3  ;;  %v1542_v7 = vpop.f32.mrb[68].mxu1 }
 0x1fd   :  { %2155 = vst.msk [vmem:[%s4058_s2 + $0xc0] sm:$0xff] %vm2130_vm2, %v3005_v5  ;;  %3016 = vpow2.f32 %v1945_v4  ;;  %v1947_v14 = vmul.f32 1.442695, %v1867_v2  ;;  %v1766_v9 = vpop.f32.mrb[64].mxu0  ;;  %v1544_v30 = vpop.f32.mrb[69].mxu1 }
 0x1fe   :  { %v3007_v6 = vpop.eup %3006  ;;  %v2571_v11 = vadd.f32 %v1766_v9, %v1534_v55  ;;  %v2473_v43 = vpop.f32.mrb[65].mxu0 }
 0x1ff   :  { %v3009_v18 = vpop.eup %3008  ;;  %2156 = vst.msk [vmem:[%s4058_s2 + $0xc8] sm:$0xff] %vm2130_vm2, %v3007_v6  ;;  %3018 = vpow2.f32 %v1947_v14  ;;  %v1545_v0 = vpop.f32.mrb[70].mxu1 }
 0x200   :  { %v2011_v13 = vadd.f32 1.0, %v3009_v18  ;;  %v1769_v31 = vpop.f32.mrb[66].mxu0  ;;  %v1547_v16 = vpop.f32.mrb[71].mxu1  ;;  %v1868_v19 = vsub.f32 0.0, %v2571_v11 }
 0x201   :  { %v3011_v47 = vpop.eup %3010  ;;  %v2572_v21 = vadd.f32 %v1769_v31, %v1537_v59  ;;  %v2474_v20 = vpop.f32.mrb[67].mxu0 }
 0x202   :  { %3020 = vrcp.f32 %v2011_v13  ;;  %v2012_v10 = vadd.f32 1.0, %v3011_v47  ;;  %v1949_v23 = vmul.f32 1.442695, %v1868_v19 }
 0x203   :  { %v1869_v26 = vsub.f32 0.0, %v2572_v21 }
 0x204   :  { %v3013_v29 = vpop.eup %3012  ;;  %3022 = vrcp.f32 %v2012_v10  ;;  %v1550_v40 = vpop.f32.mrb[72].mxu1 }
 0x205   :  { %2157 = vst.msk [vmem:[%s4058_s2 + $0xd0] sm:$0xff] %vm2130_vm2, %v3013_v29  ;;  %3024 = vpow2.f32 %v1949_v23  ;;  %v1951_v15 = vmul.f32 1.442695, %v1869_v26  ;;  %v1774_v33 = vpop.f32.mrb[68].mxu0  ;;  %v1552_v34 = vpop.f32.mrb[73].mxu1 }
 0x206   :  { %v3015_v25 = vpop.eup %3014  ;;  %v2573_v50 = vadd.f32 %v1774_v33, %v1542_v7  ;;  %v2477_v37 = vpop.f32.mrb[69].mxu0 }
 0x207   :  { %v3017_v36 = vpop.eup %3016  ;;  %2158 = vst.msk [vmem:[%s4058_s2 + $0xd8] sm:$0xff] %vm2130_vm2, %v3015_v25  ;;  %3026 = vpow2.f32 %v1951_v15  ;;  %v1553_v38 = vpop.f32.mrb[74].mxu1 }
 0x208   :  { %v2013_v28 = vadd.f32 1.0, %v3017_v36  ;;  %v1777_v54 = vpop.f32.mrb[70].mxu0  ;;  %v1555_v41 = vpop.f32.mrb[75].mxu1  ;;  %v1870_v42 = vsub.f32 0.0, %v2573_v50 }
 0x209   :  { %v3019_v17 = vpop.eup %3018  ;;  %v2574_v44 = vadd.f32 %v1777_v54, %v1545_v0  ;;  %v2478_v32 = vpop.f32.mrb[71].mxu0 }
 0x20a   :  { %3028 = vrcp.f32 %v2013_v28  ;;  %v2014_v22 = vadd.f32 1.0, %v3019_v17  ;;  %v1953_v45 = vmul.f32 1.442695, %v1870_v42 }
 0x20b   :  { %v1871_v46 = vsub.f32 0.0, %v2574_v44 }
 0x20c   :  { %v3021_v48 = vpop.eup %3020  ;;  %3030 = vrcp.f32 %v2014_v22  ;;  %v1558_v51 = vpop.f32.mrb[76].mxu1 }
 0x20d   :  { %2159 = vst.msk [vmem:[%s4058_s2 + $0xe0] sm:$0xff] %vm2130_vm2, %v3021_v48  ;;  %3032 = vpow2.f32 %v1953_v45  ;;  %v1955_v49 = vmul.f32 1.442695, %v1871_v46  ;;  %v1782_v53 = vpop.f32.mrb[72].mxu0  ;;  %v1560_v57 = vpop.f32.mrb[77].mxu1 }
 0x20e   :  { %v3023_v52 = vpop.eup %3022  ;;  %v2575_v56 = vadd.f32 %v1782_v53, %v1550_v40  ;;  %v2481_v8 = vpop.f32.mrb[73].mxu0 }
 0x20f   :  { %v3025_v55 = vpop.eup %3024  ;;  %2160 = vst.msk [vmem:[%s4058_s2 + $0xe8] sm:$0xff] %vm2130_vm2, %v3023_v52  ;;  %3034 = vpow2.f32 %v1955_v49  ;;  %v1561_v24 = vpop.f32.mrb[78].mxu1 }
 0x210   :  { %v2015_v61 = vadd.f32 1.0, %v3025_v55  ;;  %v1785_v58 = vpop.f32.mrb[74].mxu0  ;;  %v1563_v35 = vpop.f32.mrb[79].mxu1  ;;  %v1872_v60 = vsub.f32 0.0, %v2575_v56 }
 0x211   :  { %v3027_v59 = vpop.eup %3026  ;;  %v2576_v27 = vadd.f32 %v1785_v58, %v1553_v38  ;;  %v2482_v12 = vpop.f32.mrb[75].mxu0 }
 0x212   :  { %3036 = vrcp.f32 %v2015_v61  ;;  %v2016_v39 = vadd.f32 1.0, %v3027_v59  ;;  %v1957_v62 = vmul.f32 1.442695, %v1872_v60 }
 0x213   :  { %v1873_v63 = vsub.f32 0.0, %v2576_v27 }
 0x214   :  { %v3029_v1 = vpop.eup %3028  ;;  %3038 = vrcp.f32 %v2016_v39  ;;  %v1566_v4 = vpop.f32.mrb[80].mxu1 }
 0x215   :  { %2161 = vst.msk [vmem:[%s4058_s2 + $0xf0] sm:$0xff] %vm2130_vm2, %v3029_v1  ;;  %3040 = vpow2.f32 %v1957_v62  ;;  %v1959_v3 = vmul.f32 1.442695, %v1873_v63  ;;  %v1790_v5 = vpop.f32.mrb[76].mxu0  ;;  %v1568_v14 = vpop.f32.mrb[81].mxu1 }
 0x216   :  { %v3031_v2 = vpop.eup %3030  ;;  %v2577_v6 = vadd.f32 %v1790_v5, %v1558_v51  ;;  %v2485_v9 = vpop.f32.mrb[77].mxu0 }
 0x217   :  { %v3033_v7 = vpop.eup %3032  ;;  %2162 = vst.msk [vmem:[%s4058_s2 + $0xf8] sm:$0xff] %vm2130_vm2, %v3031_v2  ;;  %3042 = vpow2.f32 %v1959_v3  ;;  %v1569_v30 = vpop.f32.mrb[82].mxu1 }
 0x218   :  { %v2017_v18 = vadd.f32 1.0, %v3033_v7  ;;  %v1793_v11 = vpop.f32.mrb[78].mxu0  ;;  %v1571_v43 = vpop.f32.mrb[83].mxu1  ;;  %v1874_v13 = vsub.f32 0.0, %v2577_v6 }
 0x219   :  { %v3035_v0 = vpop.eup %3034  ;;  %v2578_v31 = vadd.f32 %v1793_v11, %v1561_v24  ;;  %v2486_v16 = vpop.f32.mrb[79].mxu0 }
 0x21a   :  { %3044 = vrcp.f32 %v2017_v18  ;;  %v2018_v47 = vadd.f32 1.0, %v3035_v0  ;;  %v1961_v19 = vmul.f32 1.442695, %v1874_v13 }
 0x21b   :  { %v1875_v21 = vsub.f32 0.0, %v2578_v31 }
 0x21c   :  { %v3037_v20 = vpop.eup %3036  ;;  %3046 = vrcp.f32 %v2018_v47  ;;  %v1574_v23 = vpop.f32.mrb[84].mxu1 }
 0x21d   :  { %2163 = vst.msk [vmem:[%s4058_s2 + $0x100] sm:$0xff] %vm2130_vm2, %v3037_v20  ;;  %3048 = vpow2.f32 %v1961_v19  ;;  %v1963_v10 = vmul.f32 1.442695, %v1875_v21  ;;  %v1798_v29 = vpop.f32.mrb[80].mxu0  ;;  %v1576_v15 = vpop.f32.mrb[85].mxu1 }
 0x21e   :  { %v3039_v26 = vpop.eup %3038  ;;  %v2579_v25 = vadd.f32 %v1798_v29, %v1566_v4  ;;  %v2489_v33 = vpop.f32.mrb[81].mxu0 }
 0x21f   :  { %v3041_v40 = vpop.eup %3040  ;;  %2164 = vst.msk [vmem:[%s4058_s2 + $0x108] sm:$0xff] %vm2130_vm2, %v3039_v26  ;;  %3050 = vpow2.f32 %v1963_v10  ;;  %v1577_v34 = vpop.f32.mrb[86].mxu1 }
 0x220   :  { %v2019_v36 = vadd.f32 1.0, %v3041_v40  ;;  %v1801_v50 = vpop.f32.mrb[82].mxu0  ;;  %v1579_v37 = vpop.f32.mrb[87].mxu1  ;;  %v1876_v28 = vsub.f32 0.0, %v2579_v25 }
 0x221   :  { %v3043_v38 = vpop.eup %3042  ;;  %v2580_v54 = vadd.f32 %v1801_v50, %v1569_v30  ;;  %v2490_v41 = vpop.f32.mrb[83].mxu0 }
 0x222   :  { %3052 = vrcp.f32 %v2019_v36  ;;  %v2020_v17 = vadd.f32 1.0, %v3043_v38  ;;  %v1965_v42 = vmul.f32 1.442695, %v1876_v28 }
 0x223   :  { %v1877_v44 = vsub.f32 0.0, %v2580_v54 }
 0x224   :  { %v3045_v32 = vpop.eup %3044  ;;  %3054 = vrcp.f32 %v2020_v17  ;;  %v1582_v45 = vpop.f32.mrb[88].mxu1 }
 0x225   :  { %2165 = vst.msk [vmem:[%s4058_s2 + $0x110] sm:$0xff] %vm2130_vm2, %v3045_v32  ;;  %3056 = vpow2.f32 %v1965_v42  ;;  %v1967_v22 = vmul.f32 1.442695, %v1877_v44  ;;  %v1806_v48 = vpop.f32.mrb[84].mxu0  ;;  %v1584_v49 = vpop.f32.mrb[89].mxu1 }
 0x226   :  { %v3047_v46 = vpop.eup %3046  ;;  %v2581_v52 = vadd.f32 %v1806_v48, %v1574_v23  ;;  %v2493_v53 = vpop.f32.mrb[85].mxu0 }
 0x227   :  { %v3049_v51 = vpop.eup %3048  ;;  %2166 = vst.msk [vmem:[%s4058_s2 + $0x118] sm:$0xff] %vm2130_vm2, %v3047_v46  ;;  %3058 = vpow2.f32 %v1967_v22  ;;  %v1585_v57 = vpop.f32.mrb[90].mxu1 }
 0x228   :  { %v2021_v55 = vadd.f32 1.0, %v3049_v51  ;;  %v1809_v56 = vpop.f32.mrb[86].mxu0  ;;  %v1587_v8 = vpop.f32.mrb[91].mxu1  ;;  %v1878_v61 = vsub.f32 0.0, %v2581_v52 }
 0x229   :  { %v3051_v24 = vpop.eup %3050  ;;  %v2582_v58 = vadd.f32 %v1809_v56, %v1577_v34  ;;  %v2494_v35 = vpop.f32.mrb[87].mxu0 }
 0x22a   :  { %3060 = vrcp.f32 %v2021_v55  ;;  %v2022_v59 = vadd.f32 1.0, %v3051_v24  ;;  %v1969_v60 = vmul.f32 1.442695, %v1878_v61 }
 0x22b   :  { %v1879_v27 = vsub.f32 0.0, %v2582_v58 }
 0x22c   :  { %v3053_v12 = vpop.eup %3052  ;;  %3062 = vrcp.f32 %v2022_v59  ;;  %v1590_v62 = vpop.f32.mrb[92].mxu1 }
 0x22d   :  { %2167 = vst.msk [vmem:[%s4058_s2 + $0x120] sm:$0xff] %vm2130_vm2, %v3053_v12  ;;  %3064 = vpow2.f32 %v1969_v60  ;;  %v1971_v39 = vmul.f32 1.442695, %v1879_v27  ;;  %v1814_v1 = vpop.f32.mrb[88].mxu0  ;;  %v1592_v3 = vpop.f32.mrb[93].mxu1 }
 0x22e   :  { %v3055_v63 = vpop.eup %3054  ;;  %v2583_v2 = vadd.f32 %v1814_v1, %v1582_v45  ;;  %v2497_v5 = vpop.f32.mrb[89].mxu0 }
 0x22f   :  { %v3057_v4 = vpop.eup %3056  ;;  %2168 = vst.msk [vmem:[%s4058_s2 + $0x128] sm:$0xff] %vm2130_vm2, %v3055_v63  ;;  %3066 = vpow2.f32 %v1971_v39  ;;  %v1593_v14 = vpop.f32.mrb[94].mxu1 }
 0x230   :  { %v2023_v7 = vadd.f32 1.0, %v3057_v4  ;;  %v1817_v6 = vpop.f32.mrb[90].mxu0  ;;  %v1595_v9 = vpop.f32.mrb[95].mxu1  ;;  %v1880_v18 = vsub.f32 0.0, %v2583_v2 }
 0x231   :  { %v3059_v30 = vpop.eup %3058  ;;  %v2584_v11 = vadd.f32 %v1817_v6, %v1585_v57  ;;  %v2498_v43 = vpop.f32.mrb[91].mxu0 }
 0x232   :  { %3068 = vrcp.f32 %v2023_v7  ;;  %v2024_v0 = vadd.f32 1.0, %v3059_v30  ;;  %v1973_v13 = vmul.f32 1.442695, %v1880_v18 }
 0x233   :  { %v1881_v31 = vsub.f32 0.0, %v2584_v11 }
 0x234   :  { %v3061_v16 = vpop.eup %3060  ;;  %3070 = vrcp.f32 %v2024_v0  ;;  %v1598_v19 = vpop.f32.mrb[96].mxu1 }
 0x235   :  { %2169 = vst.msk [vmem:[%s4058_s2 + $0x130] sm:$0xff] %vm2130_vm2, %v3061_v16  ;;  %3072 = vpow2.f32 %v1973_v13  ;;  %v1975_v47 = vmul.f32 1.442695, %v1881_v31  ;;  %v1822_v20 = vpop.f32.mrb[92].mxu0  ;;  %v1600_v10 = vpop.f32.mrb[97].mxu1 }
 0x236   :  { %v3063_v21 = vpop.eup %3062  ;;  %v2585_v26 = vadd.f32 %v1822_v20, %v1590_v62  ;;  %v2501_v29 = vpop.f32.mrb[93].mxu0 }
 0x237   :  { %v3065_v23 = vpop.eup %3064  ;;  %2170 = vst.msk [vmem:[%s4058_s2 + $0x138] sm:$0xff] %vm2130_vm2, %v3063_v21  ;;  %3074 = vpow2.f32 %v1975_v47  ;;  %v1601_v15 = vpop.f32.mrb[98].mxu1 }
 0x238   :  { %v2025_v40 = vadd.f32 1.0, %v3065_v23  ;;  %v1825_v25 = vpop.f32.mrb[94].mxu0  ;;  %v1602_v33 = vpop.f32.mrb[99].mxu1  ;;  %v1882_v36 = vsub.f32 0.0, %v2585_v26 }
 0x239   :  { %v3067_v34 = vpop.eup %3066  ;;  %v2586_v50 = vadd.f32 %v1825_v25, %v1593_v14  ;;  %v2502_v37 = vpop.f32.mrb[95].mxu0 }
 0x23a   :  { %3076 = vrcp.f32 %v2025_v40  ;;  %v2026_v38 = vadd.f32 1.0, %v3067_v34  ;;  %v1977_v28 = vmul.f32 1.442695, %v1882_v36 }
 0x23b   :  { %v1883_v54 = vsub.f32 0.0, %v2586_v50 }
 0x23c   :  { %v3069_v41 = vpop.eup %3068  ;;  %3078 = vrcp.f32 %v2026_v38 }
 0x23d   :  { %2171 = vst.msk [vmem:[%s4058_s2 + $0x140] sm:$0xff] %vm2130_vm2, %v3069_v41  ;;  %3080 = vpow2.f32 %v1977_v28  ;;  %v1979_v17 = vmul.f32 1.442695, %v1883_v54  ;;  %v1830_v44 = vpop.f32.mrb[96].mxu0 }
 0x23e   :  { %v3071_v42 = vpop.eup %3070  ;;  %v2587_v22 = vadd.f32 %v1830_v44, %v1598_v19  ;;  %v2505_v45 = vpop.f32.mrb[97].mxu0 }
 0x23f   :  { %v3073_v32 = vpop.eup %3072  ;;  %2172 = vst.msk [vmem:[%s4058_s2 + $0x148] sm:$0xff] %vm2130_vm2, %v3071_v42  ;;  %3082 = vpow2.f32 %v1979_v17  ;;  %v1833_v48 = vpop.f32.mrb[98].mxu0 }
 0x240   :  { %v2027_v46 = vadd.f32 1.0, %v3073_v32  ;;  %v1884_v51 = vsub.f32 0.0, %v2587_v22  ;;  %v2506_v52 = vpop.f32.mrb[99].mxu0 }
 0x241   :  { %v3075_v49 = vpop.eup %3074 }
 0x242   :  { %3084 = vrcp.f32 %v2027_v46  ;;  %v2028_v53 = vadd.f32 1.0, %v3075_v49  ;;  %v1981_v57 = vmul.f32 1.442695, %v1884_v51 }
 0x244   :  { %v3077_v55 = vpop.eup %3076  ;;  %3086 = vrcp.f32 %v2028_v53 }
 0x245   :  { %2173 = vst.msk [vmem:[%s4058_s2 + $0x150] sm:$0xff] %vm2130_vm2, %v3077_v55  ;;  %3088 = vpow2.f32 %v1981_v57 }
 0x246   :  { %v3079_v56 = vpop.eup %3078 }
 0x247   :  { %v3081_v8 = vpop.eup %3080  ;;  %2174 = vst.msk [vmem:[%s4058_s2 + $0x158] sm:$0xff] %vm2130_vm2, %v3079_v56 }
 0x248   :  { %v2029_v24 = vadd.f32 1.0, %v3081_v8 }
 0x249   :  { %v3083_v61 = vpop.eup %3082 }
 0x24a   :  { %3090 = vrcp.f32 %v2029_v24  ;;  %v2030_v58 = vadd.f32 1.0, %v3083_v61 }
 0x24c   :  { %v3085_v35 = vpop.eup %3084  ;;  %3092 = vrcp.f32 %v2030_v58 }
 0x24d   :  { %2175 = vst.msk [vmem:[%s4058_s2 + $0x160] sm:$0xff] %vm2130_vm2, %v3085_v35 }
 0x24e   :  { %v3087_v59 = vpop.eup %3086 }
 0x24f   :  { %v3089_v60 = vpop.eup %3088  ;;  %2176 = vst.msk [vmem:[%s4058_s2 + $0x168] sm:$0xff] %vm2130_vm2, %v3087_v59 }
 0x250   :  { %v2031_v27 = vadd.f32 1.0, %v3089_v60 }
 0x252   :  { %3094 = vrcp.f32 %v2031_v27 }
 0x254   :  { %v3091_v12 = vpop.eup %3090 }
 0x255   :  { %2177 = vst.msk [vmem:[%s4058_s2 + $0x170] sm:$0xff] %vm2130_vm2, %v3091_v12 }
 0x256   :  { %v3093_v39 = vpop.eup %3092 }
 0x257   :  { %2178 = vst.msk [vmem:[%s4058_s2 + $0x178] sm:$0xff] %vm2130_vm2, %v3093_v39 }
 0x25c   :  { %v3095_v62 = vpop.eup %3094 }
 0x25d   :  { %2179 = vst.msk [vmem:[%s4058_s2 + $0x180] sm:$0xff] %vm2130_vm2, %v3095_v62 }

</bundles_post_ra>
